<compile_context>
chip_gen: v7x
topology: tpu7x:2x2x1
jax: 0.10.0
libtpu: 0.0.40
codegen_flags: <defaults>
</compile_context>

<pallas_src>
import functools

import jax
import jax.numpy as jnp
from jax.experimental import pallas as pl
from jax.experimental.pallas import tpu as pltpu


# ----------------------------------------------------------------------------
# Kernel helpers (traced inside the single fused kernel)
# ----------------------------------------------------------------------------
def _attn_ln(x2, wqkv_ref, bqkv_ref, wo_ref, bo_ref, gamma_ref, beta_ref,
             *, num_heads, n, l):
    """(n*L, E) batch-major rows -> LayerNorm(x + MHA(x))."""
    e = wo_ref.shape[1]
    dh = e // num_heads

    # Fused QKV projection: one (n*L, E) @ (E, 3E) bf16 MXU matmul, f32 accum.
    # The softmax 1/sqrt(dh) scale is pre-folded into the Q columns at init.
    qkv = jnp.dot(x2.astype(jnp.bfloat16), wqkv_ref[...],
                  preferred_element_type=jnp.float32) + bqkv_ref[...]
    qkv_bf = qkv.astype(jnp.bfloat16)                   # single cast for q,k,v

    def fold_heads(mat):                                # (n*L, H*dh) -> (H*n, L, dh)
        return jnp.concatenate(
            [mat[:, h * dh:(h + 1) * dh].reshape(n, l, dh)
             for h in range(num_heads)], axis=0)

    qh = fold_heads(qkv_bf[:, :e])
    kh = fold_heads(qkv_bf[:, e:2 * e])
    vh = fold_heads(qkv_bf[:, 2 * e:])

    # One head-batched score/context einsum pair (batch dim = H*n).
    s = jnp.einsum('bqd,bkd->bqk', qh, kh, preferred_element_type=jnp.float32)
    s = s - jnp.max(s, axis=-1, keepdims=True)
    p = jnp.exp(s)
    p = p * pl.reciprocal(jnp.sum(p, axis=-1, keepdims=True), approx=True)
    ctx = jnp.einsum('bqk,bkd->bqd', p.astype(jnp.bfloat16), vh,
                     preferred_element_type=jnp.float32)

    # Unfold heads back onto the lane dim -> (n*L, E), then output projection.
    ctx2 = jnp.concatenate(
        [ctx[h * n:(h + 1) * n].reshape(n * l, dh) for h in range(num_heads)],
        axis=1)
    attn = jnp.dot(ctx2.astype(jnp.bfloat16), wo_ref[...],
                   preferred_element_type=jnp.float32) + bo_ref[...]

    # Residual + LayerNorm (eps=1e-5, biased variance, like nn.LayerNorm).
    y = x2 + attn
    mean = jnp.mean(y, axis=-1, keepdims=True)
    var = jnp.mean((y - mean) ** 2, axis=-1, keepdims=True)
    y = (y - mean) * jax.lax.rsqrt(var + 1e-5)
    return y * gamma_ref[...] + beta_ref[...]


def _ffn(x2, w_ref, b_ref):
    """relu(x @ W + b) on the flattened (n*L, E) rows."""
    y = jnp.dot(x2.astype(jnp.bfloat16), w_ref[...],
                preferred_element_type=jnp.float32) + b_ref[...]
    return jnp.maximum(y, 0.0)


def _encoder_kernel(x_ref,
                    wqkv1, bqkv1, wo1, bo1, g1, b1, wff1, bff1,
                    wqkv2, bqkv2, wo2, bo2, g2, b2, wff2, bff2,
                    wqkv3, bqkv3, wo3, bo3, g3, b3,
                    out_ref, *, heads, n_tile):
    l = x_ref.shape[0]
    h1, h2, h3 = heads

    # Fold the (L, n_tile, E) seq-major tile into batch-major rows (n*L + l)
    # using static slices + a leading-dim concat (no 3-D transpose in-kernel,
    # no wrapper-side HBM transpose pass).
    x_tile = x_ref[...]
    x2 = jnp.concatenate([x_tile[:, n, :] for n in range(n_tile)], axis=0)

    x2 = _attn_ln(x2, wqkv1, bqkv1, wo1, bo1, g1, b1,
                  num_heads=h1, n=n_tile, l=l)
    x2 = _ffn(x2, wff1, bff1)                           # E   -> E/2 (+ReLU)
    x2 = _attn_ln(x2, wqkv2, bqkv2, wo2, bo2, g2, b2,
                  num_heads=h2, n=n_tile, l=l)
    x2 = _ffn(x2, wff2, bff2)                           # E/2 -> E/4 (+ReLU)
    x2 = _attn_ln(x2, wqkv3, bqkv3, wo3, bo3, g3, b3,
                  num_heads=h3, n=n_tile, l=l)

    # Lane-dense store: batch-major (n*L, E/4) rows -> (L, n_tile*E/4) slab.
    out_ref[...] = jnp.concatenate(
        [x2[n * l:(n + 1) * l, :] for n in range(n_tile)], axis=1)


# ----------------------------------------------------------------------------
# Wrapper
# ----------------------------------------------------------------------------
def _pick_n_tile(n, e4):
    """Batch tile: full batch for tiny N; otherwise a multiple of 8 that keeps
    the (L, n_tile*E4) output store lane-dense (multiple of 128 lanes).
    On v7x (64 MiB VMEM) halve this if the per-step footprint grows large."""
    if n <= 8:
        return n
    for m in (8, 16, 32, 64):
        if n % m == 0 and (m * e4) % 128 == 0:
            return m
    assert n % 8 == 0, "batch must be a multiple of 8 (or <= 8)"
    return 8


def encoder(x_lne, params):
    """Forward pass matching Encoder.forward (eval mode).

    x_lne: (L, N, E)  ->  returns (L, N, E // 4)
    """
    x = x_lne.astype(jnp.float32)
    L, N, E = x.shape
    E4 = E // 4
    heads = params["num_heads"]
    n_tile = _pick_n_tile(N, E4)
    grid = (N // n_tile,)

    def resident(arr):          # weights: constant block index -> DMA'd once
        ndim = arr.ndim
        return pl.BlockSpec(arr.shape, lambda i: (0,) * ndim)

    args = [x]
    in_specs = [pl.BlockSpec((L, n_tile, E), lambda i: (0, i, 0))]
    for i in (1, 2, 3):
        p = params[f"stage{i}"]
        names = ["wqkv_t", "bqkv", "wo_t", "bo", "gamma", "beta"]
        if i < 3:
            names += ["w_ff_t", "b_ff"]
        for name in names:
            args.append(p[name])
            in_specs.append(resident(p[name]))

    # Explicit scoped-VMEM budget: resident weights + double-buffered
    # activation tiles + live per-step intermediates (+ margin).
    def nbytes(a):
        return a.size * a.dtype.itemsize

    weight_bytes = sum(nbytes(a) for a in args[1:])
    act_tile_bytes = L * n_tile * (E + E4) * 4
    interm_bytes = (n_tile * L * 3 * E * 6             # qkv f32 + bf16 copy
                    + heads[0] * n_tile * L * L * 8    # scores / probs (f32)
                    + n_tile * L * E * 16)             # ctx / residual / LN tmp
    vmem_limit = int(min(max(weight_bytes + 2 * act_tile_bytes + interm_bytes
                             + (4 << 20), 16 << 20), 64 << 20))

    out = pl.pallas_call(
        functools.partial(_encoder_kernel, heads=heads, n_tile=n_tile),
        grid=grid,
        out_shape=jax.ShapeDtypeStruct((L, N * E4), jnp.float32),
        in_specs=in_specs,
        out_specs=pl.BlockSpec((L, n_tile * E4), lambda i: (0, i)),
        compiler_params=pltpu.CompilerParams(
            dimension_semantics=("parallel",),   # shard batch across TCs (v7x)
            vmem_limit_bytes=vmem_limit),
    )(*args)
    # Contiguous reshape only -- no wrapper transpose / extra HBM pass.
    return out.reshape(L, N, E4)


# ----------------------------------------------------------------------------
# Deterministic synthetic parameters
# ----------------------------------------------------------------------------
def init_params(key, embed_dim, num_heads):
    dims = (embed_dim, embed_dim // 2, embed_dim // 4)
    heads = (num_heads, num_heads // 2, num_heads // 4)
    for d, h in zip(dims, heads):
        assert h >= 1 and d % h == 0, "need num_heads >= 4 and dims % heads == 0"

    keys = iter(jax.random.split(key, 24))

    def dense(shape, scale=0.1):
        return scale * jax.random.normal(next(keys), shape, jnp.float32)

    params = {"num_heads": heads}
    for i, (d, h) in enumerate(zip(dims, heads)):
        dh = d // h
        inv_sqrt_dh = 1.0 / float(dh) ** 0.5
        wqkv = dense((d, 3 * d))
        bqkv = dense((1, 3 * d), 0.02)
        # Fold the softmax 1/sqrt(dh) scale into the Q projection (exact,
        # done offline on static weights -> no runtime multiply in the kernel).
        wqkv = wqkv.at[:, :d].multiply(inv_sqrt_dh)
        bqkv = bqkv.at[:, :d].multiply(inv_sqrt_dh)
        p = {
            # Weights pre-transposed (x @ W), bf16 for the MXU; QKV fused.
            "wqkv_t": wqkv.astype(jnp.bfloat16),
            "bqkv": bqkv,
            "wo_t": dense((d, d)).astype(jnp.bfloat16),
            "bo": dense((1, d), 0.02),
            "gamma": jnp.ones((1, d), jnp.float32),     # nn.LayerNorm init
            "beta": jnp.zeros((1, d), jnp.float32),
        }
        if i < 2:  # stages 1 & 2 have a feedforward d -> d/2 (+ReLU)
            p["w_ff_t"] = dense((d, d // 2)).astype(jnp.bfloat16)
            p["b_ff"] = dense((1, d // 2), 0.02)
        params[f"stage{i + 1}"] = p
    return params


# ----------------------------------------------------------------------------
if __name__ == "__main__":
    # seq, batch, embed_dim, num_heads — batch=16 exercises a 2-step grid with
    # weight-resident BlockSpecs and double-buffered activation tiles.
    L, N, E, H = 8, 16, 64, 4
    k_params, k_x = jax.random.split(jax.random.PRNGKey(0))
    params = init_params(k_params, E, H)
    x = jax.random.normal(k_x, (L, N, E), jnp.float32)

    y = encoder(x, params)
    jax.block_until_ready(y)

    assert y.shape == (L, N, E // 4), y.shape
    assert bool(jnp.all(jnp.isfinite(y)))
    print("KERNEL_OK")
</pallas_src>

<mosaic_0001>
module attributes {stable_mosaic.version = 11 : i64} {
  func.func @_encoder_kernel(%arg0: i32, %arg1: memref<8x8x64xf32, #tpu.memory_space<vmem>>, %arg2: memref<64x192xbf16, #tpu.memory_space<vmem>>, %arg3: memref<1x192xf32, #tpu.memory_space<vmem>>, %arg4: memref<64x64xbf16, #tpu.memory_space<vmem>>, %arg5: memref<1x64xf32, #tpu.memory_space<vmem>>, %arg6: memref<1x64xf32, #tpu.memory_space<vmem>>, %arg7: memref<1x64xf32, #tpu.memory_space<vmem>>, %arg8: memref<64x32xbf16, #tpu.memory_space<vmem>>, %arg9: memref<1x32xf32, #tpu.memory_space<vmem>>, %arg10: memref<32x96xbf16, #tpu.memory_space<vmem>>, %arg11: memref<1x96xf32, #tpu.memory_space<vmem>>, %arg12: memref<32x32xbf16, #tpu.memory_space<vmem>>, %arg13: memref<1x32xf32, #tpu.memory_space<vmem>>, %arg14: memref<1x32xf32, #tpu.memory_space<vmem>>, %arg15: memref<1x32xf32, #tpu.memory_space<vmem>>, %arg16: memref<32x16xbf16, #tpu.memory_space<vmem>>, %arg17: memref<1x16xf32, #tpu.memory_space<vmem>>, %arg18: memref<16x48xbf16, #tpu.memory_space<vmem>>, %arg19: memref<1x48xf32, #tpu.memory_space<vmem>>, %arg20: memref<16x16xbf16, #tpu.memory_space<vmem>>, %arg21: memref<1x16xf32, #tpu.memory_space<vmem>>, %arg22: memref<1x16xf32, #tpu.memory_space<vmem>>, %arg23: memref<1x16xf32, #tpu.memory_space<vmem>>, %arg24: memref<8x128xf32, #tpu.memory_space<vmem>>) attributes {dimension_semantics = [#tpu.dimension_semantics<parallel>], iteration_bounds = array<i64: 2>, scalar_prefetch = 0 : i64, scratch_operands = 0 : i64, tpu.core_type = #tpu.core_type<tc>, window_params = [{transform_indices = @transform_0, window_bounds = array<i64: 8, 8, 64>}, {pipeline_mode = #tpu.pipeline_mode<synchronous>, transform_indices = @transform_1, window_bounds = array<i64: 64, 192>}, {pipeline_mode = #tpu.pipeline_mode<synchronous>, transform_indices = @transform_2, window_bounds = array<i64: 1, 192>}, {pipeline_mode = #tpu.pipeline_mode<synchronous>, transform_indices = @transform_3, window_bounds = array<i64: 64, 64>}, {pipeline_mode = #tpu.pipeline_mode<synchronous>, transform_indices = @transform_4, window_bounds = array<i64: 1, 64>}, {pipeline_mode = #tpu.pipeline_mode<synchronous>, transform_indices = @transform_5, window_bounds = array<i64: 1, 64>}, {pipeline_mode = #tpu.pipeline_mode<synchronous>, transform_indices = @transform_6, window_bounds = array<i64: 1, 64>}, {pipeline_mode = #tpu.pipeline_mode<synchronous>, transform_indices = @transform_7, window_bounds = array<i64: 64, 32>}, {pipeline_mode = #tpu.pipeline_mode<synchronous>, transform_indices = @transform_8, window_bounds = array<i64: 1, 32>}, {pipeline_mode = #tpu.pipeline_mode<synchronous>, transform_indices = @transform_9, window_bounds = array<i64: 32, 96>}, {pipeline_mode = #tpu.pipeline_mode<synchronous>, transform_indices = @transform_10, window_bounds = array<i64: 1, 96>}, {pipeline_mode = #tpu.pipeline_mode<synchronous>, transform_indices = @transform_11, window_bounds = array<i64: 32, 32>}, {pipeline_mode = #tpu.pipeline_mode<synchronous>, transform_indices = @transform_12, window_bounds = array<i64: 1, 32>}, {pipeline_mode = #tpu.pipeline_mode<synchronous>, transform_indices = @transform_13, window_bounds = array<i64: 1, 32>}, {pipeline_mode = #tpu.pipeline_mode<synchronous>, transform_indices = @transform_14, window_bounds = array<i64: 1, 32>}, {pipeline_mode = #tpu.pipeline_mode<synchronous>, transform_indices = @transform_15, window_bounds = array<i64: 32, 16>}, {pipeline_mode = #tpu.pipeline_mode<synchronous>, transform_indices = @transform_16, window_bounds = array<i64: 1, 16>}, {pipeline_mode = #tpu.pipeline_mode<synchronous>, transform_indices = @transform_17, window_bounds = array<i64: 16, 48>}, {pipeline_mode = #tpu.pipeline_mode<synchronous>, transform_indices = @transform_18, window_bounds = array<i64: 1, 48>}, {pipeline_mode = #tpu.pipeline_mode<synchronous>, transform_indices = @transform_19, window_bounds = array<i64: 16, 16>}, {pipeline_mode = #tpu.pipeline_mode<synchronous>, transform_indices = @transform_20, window_bounds = array<i64: 1, 16>}, {pipeline_mode = #tpu.pipeline_mode<synchronous>, transform_indices = @transform_21, window_bounds = array<i64: 1, 16>}, {pipeline_mode = #tpu.pipeline_mode<synchronous>, transform_indices = @transform_22, window_bounds = array<i64: 1, 16>}, {transform_indices = @transform_23, window_bounds = array<i64: 8, 128>}]} {
    %c0 = arith.constant 0 : index
    %c0_0 = arith.constant 0 : index
    %c0_1 = arith.constant 0 : index
    %0 = vector.load %arg1[%c0, %c0_0, %c0_1] : memref<8x8x64xf32, #tpu.memory_space<vmem>>, vector<8x8x64xf32>
    %1 = vector.extract_strided_slice %0 {offsets = [0, 0, 0], sizes = [8, 1, 64], strides = [1, 1, 1]} : vector<8x8x64xf32> to vector<8x1x64xf32>
    %2 = vector.shape_cast %1 : vector<8x1x64xf32> to vector<8x64xf32>
    %3 = vector.extract_strided_slice %0 {offsets = [0, 1, 0], sizes = [8, 1, 64], strides = [1, 1, 1]} : vector<8x8x64xf32> to vector<8x1x64xf32>
    %4 = vector.shape_cast %3 : vector<8x1x64xf32> to vector<8x64xf32>
    %5 = vector.extract_strided_slice %0 {offsets = [0, 2, 0], sizes = [8, 1, 64], strides = [1, 1, 1]} : vector<8x8x64xf32> to vector<8x1x64xf32>
    %6 = vector.shape_cast %5 : vector<8x1x64xf32> to vector<8x64xf32>
    %7 = vector.extract_strided_slice %0 {offsets = [0, 3, 0], sizes = [8, 1, 64], strides = [1, 1, 1]} : vector<8x8x64xf32> to vector<8x1x64xf32>
    %8 = vector.shape_cast %7 : vector<8x1x64xf32> to vector<8x64xf32>
    %9 = vector.extract_strided_slice %0 {offsets = [0, 4, 0], sizes = [8, 1, 64], strides = [1, 1, 1]} : vector<8x8x64xf32> to vector<8x1x64xf32>
    %10 = vector.shape_cast %9 : vector<8x1x64xf32> to vector<8x64xf32>
    %11 = vector.extract_strided_slice %0 {offsets = [0, 5, 0], sizes = [8, 1, 64], strides = [1, 1, 1]} : vector<8x8x64xf32> to vector<8x1x64xf32>
    %12 = vector.shape_cast %11 : vector<8x1x64xf32> to vector<8x64xf32>
    %13 = vector.extract_strided_slice %0 {offsets = [0, 6, 0], sizes = [8, 1, 64], strides = [1, 1, 1]} : vector<8x8x64xf32> to vector<8x1x64xf32>
    %14 = vector.shape_cast %13 : vector<8x1x64xf32> to vector<8x64xf32>
    %15 = vector.extract_strided_slice %0 {offsets = [0, 7, 0], sizes = [8, 1, 64], strides = [1, 1, 1]} : vector<8x8x64xf32> to vector<8x1x64xf32>
    %16 = vector.shape_cast %15 : vector<8x1x64xf32> to vector<8x64xf32>
    %17 = tpu.concatenate %2, %4, %6, %8, %10, %12, %14, %16 in 0 : vector<8x64xf32>, vector<8x64xf32>, vector<8x64xf32>, vector<8x64xf32>, vector<8x64xf32>, vector<8x64xf32>, vector<8x64xf32>, vector<8x64xf32> -> vector<64x64xf32>
    %18 = arith.truncf %17 : vector<64x64xf32> to vector<64x64xbf16>
    %c0_2 = arith.constant 0 : index
    %c0_3 = arith.constant 0 : index
    %19 = vector.load %arg2[%c0_2, %c0_3] : memref<64x192xbf16, #tpu.memory_space<vmem>>, vector<64x192xbf16>
    %cst = arith.constant dense<0.000000e+00> : vector<64x192xf32>
    %20 = tpu.matmul %18, %19, %cst {dimension_numbers = #tpu.dot_dimension_numbers<[1], [0], [0], [1], [0, 0, 1, 1], [], []>} : vector<64x64xbf16>, vector<64x192xbf16>, vector<64x192xf32> -> vector<64x192xf32>
    %c0_4 = arith.constant 0 : index
    %c0_5 = arith.constant 0 : index
    %21 = vector.load %arg3[%c0_4, %c0_5] : memref<1x192xf32, #tpu.memory_space<vmem>>, vector<1x192xf32>
    %22 = vector.broadcast %21 : vector<1x192xf32> to vector<64x192xf32>
    %23 = arith.addf %20, %22 : vector<64x192xf32>
    %24 = arith.truncf %23 : vector<64x192xf32> to vector<64x192xbf16>
    %25 = vector.extract_strided_slice %24 {offsets = [0, 0], sizes = [64, 64], strides = [1, 1]} : vector<64x192xbf16> to vector<64x64xbf16>
    %26 = vector.extract_strided_slice %25 {offsets = [0, 0], sizes = [64, 16], strides = [1, 1]} : vector<64x64xbf16> to vector<64x16xbf16>
    %27 = vector.shape_cast %26 : vector<64x16xbf16> to vector<8x8x16xbf16>
    %28 = vector.extract_strided_slice %25 {offsets = [0, 16], sizes = [64, 16], strides = [1, 1]} : vector<64x64xbf16> to vector<64x16xbf16>
    %29 = vector.shape_cast %28 : vector<64x16xbf16> to vector<8x8x16xbf16>
    %30 = vector.extract_strided_slice %25 {offsets = [0, 32], sizes = [64, 16], strides = [1, 1]} : vector<64x64xbf16> to vector<64x16xbf16>
    %31 = vector.shape_cast %30 : vector<64x16xbf16> to vector<8x8x16xbf16>
    %32 = vector.extract_strided_slice %25 {offsets = [0, 48], sizes = [64, 16], strides = [1, 1]} : vector<64x64xbf16> to vector<64x16xbf16>
    %33 = vector.shape_cast %32 : vector<64x16xbf16> to vector<8x8x16xbf16>
    %34 = tpu.concatenate %27, %29, %31, %33 in 0 : vector<8x8x16xbf16>, vector<8x8x16xbf16>, vector<8x8x16xbf16>, vector<8x8x16xbf16> -> vector<32x8x16xbf16>
    %35 = vector.extract_strided_slice %24 {offsets = [0, 64], sizes = [64, 64], strides = [1, 1]} : vector<64x192xbf16> to vector<64x64xbf16>
    %36 = vector.extract_strided_slice %35 {offsets = [0, 0], sizes = [64, 16], strides = [1, 1]} : vector<64x64xbf16> to vector<64x16xbf16>
    %37 = vector.shape_cast %36 : vector<64x16xbf16> to vector<8x8x16xbf16>
    %38 = vector.extract_strided_slice %35 {offsets = [0, 16], sizes = [64, 16], strides = [1, 1]} : vector<64x64xbf16> to vector<64x16xbf16>
    %39 = vector.shape_cast %38 : vector<64x16xbf16> to vector<8x8x16xbf16>
    %40 = vector.extract_strided_slice %35 {offsets = [0, 32], sizes = [64, 16], strides = [1, 1]} : vector<64x64xbf16> to vector<64x16xbf16>
    %41 = vector.shape_cast %40 : vector<64x16xbf16> to vector<8x8x16xbf16>
    %42 = vector.extract_strided_slice %35 {offsets = [0, 48], sizes = [64, 16], strides = [1, 1]} : vector<64x64xbf16> to vector<64x16xbf16>
    %43 = vector.shape_cast %42 : vector<64x16xbf16> to vector<8x8x16xbf16>
    %44 = tpu.concatenate %37, %39, %41, %43 in 0 : vector<8x8x16xbf16>, vector<8x8x16xbf16>, vector<8x8x16xbf16>, vector<8x8x16xbf16> -> vector<32x8x16xbf16>
    %45 = vector.extract_strided_slice %24 {offsets = [0, 128], sizes = [64, 64], strides = [1, 1]} : vector<64x192xbf16> to vector<64x64xbf16>
    %46 = vector.extract_strided_slice %45 {offsets = [0, 0], sizes = [64, 16], strides = [1, 1]} : vector<64x64xbf16> to vector<64x16xbf16>
    %47 = vector.shape_cast %46 : vector<64x16xbf16> to vector<8x8x16xbf16>
    %48 = vector.extract_strided_slice %45 {offsets = [0, 16], sizes = [64, 16], strides = [1, 1]} : vector<64x64xbf16> to vector<64x16xbf16>
    %49 = vector.shape_cast %48 : vector<64x16xbf16> to vector<8x8x16xbf16>
    %50 = vector.extract_strided_slice %45 {offsets = [0, 32], sizes = [64, 16], strides = [1, 1]} : vector<64x64xbf16> to vector<64x16xbf16>
    %51 = vector.shape_cast %50 : vector<64x16xbf16> to vector<8x8x16xbf16>
    %52 = vector.extract_strided_slice %45 {offsets = [0, 48], sizes = [64, 16], strides = [1, 1]} : vector<64x64xbf16> to vector<64x16xbf16>
    %53 = vector.shape_cast %52 : vector<64x16xbf16> to vector<8x8x16xbf16>
    %54 = tpu.concatenate %47, %49, %51, %53 in 0 : vector<8x8x16xbf16>, vector<8x8x16xbf16>, vector<8x8x16xbf16>, vector<8x8x16xbf16> -> vector<32x8x16xbf16>
    "tpu.trace_start"() <{level = 10 : i32, message = "bqd,bkd->bqk"}> : () -> ()
    %cst_6 = arith.constant dense<0.000000e+00> : vector<32x8x8xf32>
    %55 = tpu.matmul %34, %44, %cst_6 {dimension_numbers = #tpu.dot_dimension_numbers<[2], [2], [1], [1], [0, 0, 0, 1, 1, 1], [0], [0]>} : vector<32x8x16xbf16>, vector<32x8x16xbf16>, vector<32x8x8xf32> -> vector<32x8x8xf32>
    "tpu.trace_stop"() : () -> ()
    %cst_7 = arith.constant dense<0xFF800000> : vector<32x8xf32>
    %56 = vector.multi_reduction <maximumf>, %55, %cst_7 [2] : vector<32x8x8xf32> to vector<32x8xf32>
    %57 = vector.shape_cast %56 : vector<32x8xf32> to vector<32x8x1xf32>
    %58 = vector.broadcast %57 : vector<32x8x1xf32> to vector<32x8x8xf32>
    %59 = arith.subf %55, %58 : vector<32x8x8xf32>
    %60 = math.exp %59 : vector<32x8x8xf32>
    %cst_8 = arith.constant dense<0.000000e+00> : vector<32x8xf32>
    %61 = vector.multi_reduction <add>, %60, %cst_8 [2] : vector<32x8x8xf32> to vector<32x8xf32>
    %62 = vector.shape_cast %61 : vector<32x8xf32> to vector<32x8x1xf32>
    %63 = tpu.reciprocal %62 {approx = true} : vector<32x8x1xf32> -> vector<32x8x1xf32>
    %64 = vector.broadcast %63 : vector<32x8x1xf32> to vector<32x8x8xf32>
    %65 = arith.mulf %60, %64 : vector<32x8x8xf32>
    %66 = arith.truncf %65 : vector<32x8x8xf32> to vector<32x8x8xbf16>
    "tpu.trace_start"() <{level = 10 : i32, message = "bqk,bkd->bqd"}> : () -> ()
    %cst_9 = arith.constant dense<0.000000e+00> : vector<32x8x16xf32>
    %67 = tpu.matmul %66, %54, %cst_9 {dimension_numbers = #tpu.dot_dimension_numbers<[2], [1], [1], [2], [0, 0, 0, 1, 1, 2], [0], [0]>} : vector<32x8x8xbf16>, vector<32x8x16xbf16>, vector<32x8x16xf32> -> vector<32x8x16xf32>
    "tpu.trace_stop"() : () -> ()
    %68 = vector.extract_strided_slice %67 {offsets = [0, 0, 0], sizes = [8, 8, 16], strides = [1, 1, 1]} : vector<32x8x16xf32> to vector<8x8x16xf32>
    %69 = vector.shape_cast %68 : vector<8x8x16xf32> to vector<64x16xf32>
    %70 = vector.extract_strided_slice %67 {offsets = [8, 0, 0], sizes = [8, 8, 16], strides = [1, 1, 1]} : vector<32x8x16xf32> to vector<8x8x16xf32>
    %71 = vector.shape_cast %70 : vector<8x8x16xf32> to vector<64x16xf32>
    %72 = vector.extract_strided_slice %67 {offsets = [16, 0, 0], sizes = [8, 8, 16], strides = [1, 1, 1]} : vector<32x8x16xf32> to vector<8x8x16xf32>
    %73 = vector.shape_cast %72 : vector<8x8x16xf32> to vector<64x16xf32>
    %74 = vector.extract_strided_slice %67 {offsets = [24, 0, 0], sizes = [8, 8, 16], strides = [1, 1, 1]} : vector<32x8x16xf32> to vector<8x8x16xf32>
    %75 = vector.shape_cast %74 : vector<8x8x16xf32> to vector<64x16xf32>
    %76 = tpu.concatenate %69, %71, %73, %75 in 1 : vector<64x16xf32>, vector<64x16xf32>, vector<64x16xf32>, vector<64x16xf32> -> vector<64x64xf32>
    %77 = arith.truncf %76 : vector<64x64xf32> to vector<64x64xbf16>
    %c0_10 = arith.constant 0 : index
    %c0_11 = arith.constant 0 : index
    %78 = vector.load %arg4[%c0_10, %c0_11] : memref<64x64xbf16, #tpu.memory_space<vmem>>, vector<64x64xbf16>
    %cst_12 = arith.constant dense<0.000000e+00> : vector<64x64xf32>
    %79 = tpu.matmul %77, %78, %cst_12 {dimension_numbers = #tpu.dot_dimension_numbers<[1], [0], [0], [1], [0, 0, 1, 1], [], []>} : vector<64x64xbf16>, vector<64x64xbf16>, vector<64x64xf32> -> vector<64x64xf32>
    %c0_13 = arith.constant 0 : index
    %c0_14 = arith.constant 0 : index
    %80 = vector.load %arg5[%c0_13, %c0_14] : memref<1x64xf32, #tpu.memory_space<vmem>>, vector<1x64xf32>
    %81 = vector.broadcast %80 : vector<1x64xf32> to vector<64x64xf32>
    %82 = arith.addf %79, %81 : vector<64x64xf32>
    %83 = arith.addf %17, %82 : vector<64x64xf32>
    %cst_15 = arith.constant dense<0.000000e+00> : vector<64xf32>
    %84 = vector.multi_reduction <add>, %83, %cst_15 [1] : vector<64x64xf32> to vector<64xf32>
    %85 = vector.shape_cast %84 : vector<64xf32> to vector<64x1xf32>
    %cst_16 = arith.constant 6.400000e+01 : f32
    %86 = vector.broadcast %cst_16 : f32 to vector<64x1xf32>
    %87 = arith.divf %85, %86 : vector<64x1xf32>
    %88 = vector.broadcast %87 : vector<64x1xf32> to vector<64x64xf32>
    %89 = arith.subf %83, %88 : vector<64x64xf32>
    %90 = arith.mulf %89, %89 : vector<64x64xf32>
    %cst_17 = arith.constant dense<0.000000e+00> : vector<64xf32>
    %91 = vector.multi_reduction <add>, %90, %cst_17 [1] : vector<64x64xf32> to vector<64xf32>
    %92 = vector.shape_cast %91 : vector<64xf32> to vector<64x1xf32>
    %cst_18 = arith.constant 6.400000e+01 : f32
    %93 = vector.broadcast %cst_18 : f32 to vector<64x1xf32>
    %94 = arith.divf %92, %93 : vector<64x1xf32>
    %95 = vector.broadcast %87 : vector<64x1xf32> to vector<64x64xf32>
    %96 = arith.subf %83, %95 : vector<64x64xf32>
    %cst_19 = arith.constant 9.99999974E-6 : f32
    %97 = vector.broadcast %cst_19 : f32 to vector<64x1xf32>
    %98 = arith.addf %94, %97 : vector<64x1xf32>
    %99 = math.rsqrt %98 : vector<64x1xf32>
    %100 = vector.broadcast %99 : vector<64x1xf32> to vector<64x64xf32>
    %101 = arith.mulf %96, %100 : vector<64x64xf32>
    %c0_20 = arith.constant 0 : index
    %c0_21 = arith.constant 0 : index
    %102 = vector.load %arg6[%c0_20, %c0_21] : memref<1x64xf32, #tpu.memory_space<vmem>>, vector<1x64xf32>
    %103 = vector.broadcast %102 : vector<1x64xf32> to vector<64x64xf32>
    %104 = arith.mulf %101, %103 : vector<64x64xf32>
    %c0_22 = arith.constant 0 : index
    %c0_23 = arith.constant 0 : index
    %105 = vector.load %arg7[%c0_22, %c0_23] : memref<1x64xf32, #tpu.memory_space<vmem>>, vector<1x64xf32>
    %106 = vector.broadcast %105 : vector<1x64xf32> to vector<64x64xf32>
    %107 = arith.addf %104, %106 : vector<64x64xf32>
    %108 = arith.truncf %107 : vector<64x64xf32> to vector<64x64xbf16>
    %c0_24 = arith.constant 0 : index
    %c0_25 = arith.constant 0 : index
    %109 = vector.load %arg8[%c0_24, %c0_25] : memref<64x32xbf16, #tpu.memory_space<vmem>>, vector<64x32xbf16>
    %cst_26 = arith.constant dense<0.000000e+00> : vector<64x32xf32>
    %110 = tpu.matmul %108, %109, %cst_26 {dimension_numbers = #tpu.dot_dimension_numbers<[1], [0], [0], [1], [0, 0, 1, 1], [], []>} : vector<64x64xbf16>, vector<64x32xbf16>, vector<64x32xf32> -> vector<64x32xf32>
    %c0_27 = arith.constant 0 : index
    %c0_28 = arith.constant 0 : index
    %111 = vector.load %arg9[%c0_27, %c0_28] : memref<1x32xf32, #tpu.memory_space<vmem>>, vector<1x32xf32>
    %112 = vector.broadcast %111 : vector<1x32xf32> to vector<64x32xf32>
    %113 = arith.addf %110, %112 : vector<64x32xf32>
    %cst_29 = arith.constant 0.000000e+00 : f32
    %114 = vector.broadcast %cst_29 : f32 to vector<64x32xf32>
    %115 = arith.maximumf %113, %114 : vector<64x32xf32>
    %116 = arith.truncf %115 : vector<64x32xf32> to vector<64x32xbf16>
    %c0_30 = arith.constant 0 : index
    %c0_31 = arith.constant 0 : index
    %117 = vector.load %arg10[%c0_30, %c0_31] : memref<32x96xbf16, #tpu.memory_space<vmem>>, vector<32x96xbf16>
    %cst_32 = arith.constant dense<0.000000e+00> : vector<64x96xf32>
    %118 = tpu.matmul %116, %117, %cst_32 {dimension_numbers = #tpu.dot_dimension_numbers<[1], [0], [0], [1], [0, 0, 1, 1], [], []>} : vector<64x32xbf16>, vector<32x96xbf16>, vector<64x96xf32> -> vector<64x96xf32>
    %c0_33 = arith.constant 0 : index
    %c0_34 = arith.constant 0 : index
    %119 = vector.load %arg11[%c0_33, %c0_34] : memref<1x96xf32, #tpu.memory_space<vmem>>, vector<1x96xf32>
    %120 = vector.broadcast %119 : vector<1x96xf32> to vector<64x96xf32>
    %121 = arith.addf %118, %120 : vector<64x96xf32>
    %122 = arith.truncf %121 : vector<64x96xf32> to vector<64x96xbf16>
    %123 = vector.extract_strided_slice %122 {offsets = [0, 0], sizes = [64, 32], strides = [1, 1]} : vector<64x96xbf16> to vector<64x32xbf16>
    %124 = vector.extract_strided_slice %123 {offsets = [0, 0], sizes = [64, 16], strides = [1, 1]} : vector<64x32xbf16> to vector<64x16xbf16>
    %125 = vector.shape_cast %124 : vector<64x16xbf16> to vector<8x8x16xbf16>
    %126 = vector.extract_strided_slice %123 {offsets = [0, 16], sizes = [64, 16], strides = [1, 1]} : vector<64x32xbf16> to vector<64x16xbf16>
    %127 = vector.shape_cast %126 : vector<64x16xbf16> to vector<8x8x16xbf16>
    %128 = tpu.concatenate %125, %127 in 0 : vector<8x8x16xbf16>, vector<8x8x16xbf16> -> vector<16x8x16xbf16>
    %129 = vector.extract_strided_slice %122 {offsets = [0, 32], sizes = [64, 32], strides = [1, 1]} : vector<64x96xbf16> to vector<64x32xbf16>
    %130 = vector.extract_strided_slice %129 {offsets = [0, 0], sizes = [64, 16], strides = [1, 1]} : vector<64x32xbf16> to vector<64x16xbf16>
    %131 = vector.shape_cast %130 : vector<64x16xbf16> to vector<8x8x16xbf16>
    %132 = vector.extract_strided_slice %129 {offsets = [0, 16], sizes = [64, 16], strides = [1, 1]} : vector<64x32xbf16> to vector<64x16xbf16>
    %133 = vector.shape_cast %132 : vector<64x16xbf16> to vector<8x8x16xbf16>
    %134 = tpu.concatenate %131, %133 in 0 : vector<8x8x16xbf16>, vector<8x8x16xbf16> -> vector<16x8x16xbf16>
    %135 = vector.extract_strided_slice %122 {offsets = [0, 64], sizes = [64, 32], strides = [1, 1]} : vector<64x96xbf16> to vector<64x32xbf16>
    %136 = vector.extract_strided_slice %135 {offsets = [0, 0], sizes = [64, 16], strides = [1, 1]} : vector<64x32xbf16> to vector<64x16xbf16>
    %137 = vector.shape_cast %136 : vector<64x16xbf16> to vector<8x8x16xbf16>
    %138 = vector.extract_strided_slice %135 {offsets = [0, 16], sizes = [64, 16], strides = [1, 1]} : vector<64x32xbf16> to vector<64x16xbf16>
    %139 = vector.shape_cast %138 : vector<64x16xbf16> to vector<8x8x16xbf16>
    %140 = tpu.concatenate %137, %139 in 0 : vector<8x8x16xbf16>, vector<8x8x16xbf16> -> vector<16x8x16xbf16>
    "tpu.trace_start"() <{level = 10 : i32, message = "bqd,bkd->bqk"}> : () -> ()
    %cst_35 = arith.constant dense<0.000000e+00> : vector<16x8x8xf32>
    %141 = tpu.matmul %128, %134, %cst_35 {dimension_numbers = #tpu.dot_dimension_numbers<[2], [2], [1], [1], [0, 0, 0, 1, 1, 1], [0], [0]>} : vector<16x8x16xbf16>, vector<16x8x16xbf16>, vector<16x8x8xf32> -> vector<16x8x8xf32>
    "tpu.trace_stop"() : () -> ()
    %cst_36 = arith.constant dense<0xFF800000> : vector<16x8xf32>
    %142 = vector.multi_reduction <maximumf>, %141, %cst_36 [2] : vector<16x8x8xf32> to vector<16x8xf32>
    %143 = vector.shape_cast %142 : vector<16x8xf32> to vector<16x8x1xf32>
    %144 = vector.broadcast %143 : vector<16x8x1xf32> to vector<16x8x8xf32>
    %145 = arith.subf %141, %144 : vector<16x8x8xf32>
    %146 = math.exp %145 : vector<16x8x8xf32>
    %cst_37 = arith.constant dense<0.000000e+00> : vector<16x8xf32>
    %147 = vector.multi_reduction <add>, %146, %cst_37 [2] : vector<16x8x8xf32> to vector<16x8xf32>
    %148 = vector.shape_cast %147 : vector<16x8xf32> to vector<16x8x1xf32>
    %149 = tpu.reciprocal %148 {approx = true} : vector<16x8x1xf32> -> vector<16x8x1xf32>
    %150 = vector.broadcast %149 : vector<16x8x1xf32> to vector<16x8x8xf32>
    %151 = arith.mulf %146, %150 : vector<16x8x8xf32>
    %152 = arith.truncf %151 : vector<16x8x8xf32> to vector<16x8x8xbf16>
    "tpu.trace_start"() <{level = 10 : i32, message = "bqk,bkd->bqd"}> : () -> ()
    %cst_38 = arith.constant dense<0.000000e+00> : vector<16x8x16xf32>
    %153 = tpu.matmul %152, %140, %cst_38 {dimension_numbers = #tpu.dot_dimension_numbers<[2], [1], [1], [2], [0, 0, 0, 1, 1, 2], [0], [0]>} : vector<16x8x8xbf16>, vector<16x8x16xbf16>, vector<16x8x16xf32> -> vector<16x8x16xf32>
    "tpu.trace_stop"() : () -> ()
    %154 = vector.extract_strided_slice %153 {offsets = [0, 0, 0], sizes = [8, 8, 16], strides = [1, 1, 1]} : vector<16x8x16xf32> to vector<8x8x16xf32>
    %155 = vector.shape_cast %154 : vector<8x8x16xf32> to vector<64x16xf32>
    %156 = vector.extract_strided_slice %153 {offsets = [8, 0, 0], sizes = [8, 8, 16], strides = [1, 1, 1]} : vector<16x8x16xf32> to vector<8x8x16xf32>
    %157 = vector.shape_cast %156 : vector<8x8x16xf32> to vector<64x16xf32>
    %158 = tpu.concatenate %155, %157 in 1 : vector<64x16xf32>, vector<64x16xf32> -> vector<64x32xf32>
    %159 = arith.truncf %158 : vector<64x32xf32> to vector<64x32xbf16>
    %c0_39 = arith.constant 0 : index
    %c0_40 = arith.constant 0 : index
    %160 = vector.load %arg12[%c0_39, %c0_40] : memref<32x32xbf16, #tpu.memory_space<vmem>>, vector<32x32xbf16>
    %cst_41 = arith.constant dense<0.000000e+00> : vector<64x32xf32>
    %161 = tpu.matmul %159, %160, %cst_41 {dimension_numbers = #tpu.dot_dimension_numbers<[1], [0], [0], [1], [0, 0, 1, 1], [], []>} : vector<64x32xbf16>, vector<32x32xbf16>, vector<64x32xf32> -> vector<64x32xf32>
    %c0_42 = arith.constant 0 : index
    %c0_43 = arith.constant 0 : index
    %162 = vector.load %arg13[%c0_42, %c0_43] : memref<1x32xf32, #tpu.memory_space<vmem>>, vector<1x32xf32>
    %163 = vector.broadcast %162 : vector<1x32xf32> to vector<64x32xf32>
    %164 = arith.addf %161, %163 : vector<64x32xf32>
    %165 = arith.addf %115, %164 : vector<64x32xf32>
    %cst_44 = arith.constant dense<0.000000e+00> : vector<64xf32>
    %166 = vector.multi_reduction <add>, %165, %cst_44 [1] : vector<64x32xf32> to vector<64xf32>
    %167 = vector.shape_cast %166 : vector<64xf32> to vector<64x1xf32>
    %cst_45 = arith.constant 3.200000e+01 : f32
    %168 = vector.broadcast %cst_45 : f32 to vector<64x1xf32>
    %169 = arith.divf %167, %168 : vector<64x1xf32>
    %170 = vector.broadcast %169 : vector<64x1xf32> to vector<64x32xf32>
    %171 = arith.subf %165, %170 : vector<64x32xf32>
    %172 = arith.mulf %171, %171 : vector<64x32xf32>
    %cst_46 = arith.constant dense<0.000000e+00> : vector<64xf32>
    %173 = vector.multi_reduction <add>, %172, %cst_46 [1] : vector<64x32xf32> to vector<64xf32>
    %174 = vector.shape_cast %173 : vector<64xf32> to vector<64x1xf32>
    %cst_47 = arith.constant 3.200000e+01 : f32
    %175 = vector.broadcast %cst_47 : f32 to vector<64x1xf32>
    %176 = arith.divf %174, %175 : vector<64x1xf32>
    %177 = vector.broadcast %169 : vector<64x1xf32> to vector<64x32xf32>
    %178 = arith.subf %165, %177 : vector<64x32xf32>
    %cst_48 = arith.constant 9.99999974E-6 : f32
    %179 = vector.broadcast %cst_48 : f32 to vector<64x1xf32>
    %180 = arith.addf %176, %179 : vector<64x1xf32>
    %181 = math.rsqrt %180 : vector<64x1xf32>
    %182 = vector.broadcast %181 : vector<64x1xf32> to vector<64x32xf32>
    %183 = arith.mulf %178, %182 : vector<64x32xf32>
    %c0_49 = arith.constant 0 : index
    %c0_50 = arith.constant 0 : index
    %184 = vector.load %arg14[%c0_49, %c0_50] : memref<1x32xf32, #tpu.memory_space<vmem>>, vector<1x32xf32>
    %185 = vector.broadcast %184 : vector<1x32xf32> to vector<64x32xf32>
    %186 = arith.mulf %183, %185 : vector<64x32xf32>
    %c0_51 = arith.constant 0 : index
    %c0_52 = arith.constant 0 : index
    %187 = vector.load %arg15[%c0_51, %c0_52] : memref<1x32xf32, #tpu.memory_space<vmem>>, vector<1x32xf32>
    %188 = vector.broadcast %187 : vector<1x32xf32> to vector<64x32xf32>
    %189 = arith.addf %186, %188 : vector<64x32xf32>
    %190 = arith.truncf %189 : vector<64x32xf32> to vector<64x32xbf16>
    %c0_53 = arith.constant 0 : index
    %c0_54 = arith.constant 0 : index
    %191 = vector.load %arg16[%c0_53, %c0_54] : memref<32x16xbf16, #tpu.memory_space<vmem>>, vector<32x16xbf16>
    %cst_55 = arith.constant dense<0.000000e+00> : vector<64x16xf32>
    %192 = tpu.matmul %190, %191, %cst_55 {dimension_numbers = #tpu.dot_dimension_numbers<[1], [0], [0], [1], [0, 0, 1, 1], [], []>} : vector<64x32xbf16>, vector<32x16xbf16>, vector<64x16xf32> -> vector<64x16xf32>
    %c0_56 = arith.constant 0 : index
    %c0_57 = arith.constant 0 : index
    %193 = vector.load %arg17[%c0_56, %c0_57] : memref<1x16xf32, #tpu.memory_space<vmem>>, vector<1x16xf32>
    %194 = vector.broadcast %193 : vector<1x16xf32> to vector<64x16xf32>
    %195 = arith.addf %192, %194 : vector<64x16xf32>
    %cst_58 = arith.constant 0.000000e+00 : f32
    %196 = vector.broadcast %cst_58 : f32 to vector<64x16xf32>
    %197 = arith.maximumf %195, %196 : vector<64x16xf32>
    %198 = arith.truncf %197 : vector<64x16xf32> to vector<64x16xbf16>
    %c0_59 = arith.constant 0 : index
    %c0_60 = arith.constant 0 : index
    %199 = vector.load %arg18[%c0_59, %c0_60] : memref<16x48xbf16, #tpu.memory_space<vmem>>, vector<16x48xbf16>
    %cst_61 = arith.constant dense<0.000000e+00> : vector<64x48xf32>
    %200 = tpu.matmul %198, %199, %cst_61 {dimension_numbers = #tpu.dot_dimension_numbers<[1], [0], [0], [1], [0, 0, 1, 1], [], []>} : vector<64x16xbf16>, vector<16x48xbf16>, vector<64x48xf32> -> vector<64x48xf32>
    %c0_62 = arith.constant 0 : index
    %c0_63 = arith.constant 0 : index
    %201 = vector.load %arg19[%c0_62, %c0_63] : memref<1x48xf32, #tpu.memory_space<vmem>>, vector<1x48xf32>
    %202 = vector.broadcast %201 : vector<1x48xf32> to vector<64x48xf32>
    %203 = arith.addf %200, %202 : vector<64x48xf32>
    %204 = arith.truncf %203 : vector<64x48xf32> to vector<64x48xbf16>
    %205 = vector.extract_strided_slice %204 {offsets = [0, 0], sizes = [64, 16], strides = [1, 1]} : vector<64x48xbf16> to vector<64x16xbf16>
    %206 = vector.shape_cast %205 : vector<64x16xbf16> to vector<8x8x16xbf16>
    %207 = vector.extract_strided_slice %204 {offsets = [0, 16], sizes = [64, 16], strides = [1, 1]} : vector<64x48xbf16> to vector<64x16xbf16>
    %208 = vector.shape_cast %207 : vector<64x16xbf16> to vector<8x8x16xbf16>
    %209 = vector.extract_strided_slice %204 {offsets = [0, 32], sizes = [64, 16], strides = [1, 1]} : vector<64x48xbf16> to vector<64x16xbf16>
    %210 = vector.shape_cast %209 : vector<64x16xbf16> to vector<8x8x16xbf16>
    "tpu.trace_start"() <{level = 10 : i32, message = "bqd,bkd->bqk"}> : () -> ()
    %cst_64 = arith.constant dense<0.000000e+00> : vector<8x8x8xf32>
    %211 = tpu.matmul %206, %208, %cst_64 {dimension_numbers = #tpu.dot_dimension_numbers<[2], [2], [1], [1], [0, 0, 0, 1, 1, 1], [0], [0]>} : vector<8x8x16xbf16>, vector<8x8x16xbf16>, vector<8x8x8xf32> -> vector<8x8x8xf32>
    "tpu.trace_stop"() : () -> ()
    %cst_65 = arith.constant dense<0xFF800000> : vector<8x8xf32>
    %212 = vector.multi_reduction <maximumf>, %211, %cst_65 [2] : vector<8x8x8xf32> to vector<8x8xf32>
    %213 = vector.shape_cast %212 : vector<8x8xf32> to vector<8x8x1xf32>
    %214 = vector.broadcast %213 : vector<8x8x1xf32> to vector<8x8x8xf32>
    %215 = arith.subf %211, %214 : vector<8x8x8xf32>
    %216 = math.exp %215 : vector<8x8x8xf32>
    %cst_66 = arith.constant dense<0.000000e+00> : vector<8x8xf32>
    %217 = vector.multi_reduction <add>, %216, %cst_66 [2] : vector<8x8x8xf32> to vector<8x8xf32>
    %218 = vector.shape_cast %217 : vector<8x8xf32> to vector<8x8x1xf32>
    %219 = tpu.reciprocal %218 {approx = true} : vector<8x8x1xf32> -> vector<8x8x1xf32>
    %220 = vector.broadcast %219 : vector<8x8x1xf32> to vector<8x8x8xf32>
    %221 = arith.mulf %216, %220 : vector<8x8x8xf32>
    %222 = arith.truncf %221 : vector<8x8x8xf32> to vector<8x8x8xbf16>
    "tpu.trace_start"() <{level = 10 : i32, message = "bqk,bkd->bqd"}> : () -> ()
    %cst_67 = arith.constant dense<0.000000e+00> : vector<8x8x16xf32>
    %223 = tpu.matmul %222, %210, %cst_67 {dimension_numbers = #tpu.dot_dimension_numbers<[2], [1], [1], [2], [0, 0, 0, 1, 1, 2], [0], [0]>} : vector<8x8x8xbf16>, vector<8x8x16xbf16>, vector<8x8x16xf32> -> vector<8x8x16xf32>
    "tpu.trace_stop"() : () -> ()
    %224 = vector.shape_cast %223 : vector<8x8x16xf32> to vector<64x16xf32>
    %225 = arith.truncf %224 : vector<64x16xf32> to vector<64x16xbf16>
    %c0_68 = arith.constant 0 : index
    %c0_69 = arith.constant 0 : index
    %226 = vector.load %arg20[%c0_68, %c0_69] : memref<16x16xbf16, #tpu.memory_space<vmem>>, vector<16x16xbf16>
    %cst_70 = arith.constant dense<0.000000e+00> : vector<64x16xf32>
    %227 = tpu.matmul %225, %226, %cst_70 {dimension_numbers = #tpu.dot_dimension_numbers<[1], [0], [0], [1], [0, 0, 1, 1], [], []>} : vector<64x16xbf16>, vector<16x16xbf16>, vector<64x16xf32> -> vector<64x16xf32>
    %c0_71 = arith.constant 0 : index
    %c0_72 = arith.constant 0 : index
    %228 = vector.load %arg21[%c0_71, %c0_72] : memref<1x16xf32, #tpu.memory_space<vmem>>, vector<1x16xf32>
    %229 = vector.broadcast %228 : vector<1x16xf32> to vector<64x16xf32>
    %230 = arith.addf %227, %229 : vector<64x16xf32>
    %231 = arith.addf %197, %230 : vector<64x16xf32>
    %cst_73 = arith.constant dense<0.000000e+00> : vector<64xf32>
    %232 = vector.multi_reduction <add>, %231, %cst_73 [1] : vector<64x16xf32> to vector<64xf32>
    %233 = vector.shape_cast %232 : vector<64xf32> to vector<64x1xf32>
    %cst_74 = arith.constant 1.600000e+01 : f32
    %234 = vector.broadcast %cst_74 : f32 to vector<64x1xf32>
    %235 = arith.divf %233, %234 : vector<64x1xf32>
    %236 = vector.broadcast %235 : vector<64x1xf32> to vector<64x16xf32>
    %237 = arith.subf %231, %236 : vector<64x16xf32>
    %238 = arith.mulf %237, %237 : vector<64x16xf32>
    %cst_75 = arith.constant dense<0.000000e+00> : vector<64xf32>
    %239 = vector.multi_reduction <add>, %238, %cst_75 [1] : vector<64x16xf32> to vector<64xf32>
    %240 = vector.shape_cast %239 : vector<64xf32> to vector<64x1xf32>
    %cst_76 = arith.constant 1.600000e+01 : f32
    %241 = vector.broadcast %cst_76 : f32 to vector<64x1xf32>
    %242 = arith.divf %240, %241 : vector<64x1xf32>
    %243 = vector.broadcast %235 : vector<64x1xf32> to vector<64x16xf32>
    %244 = arith.subf %231, %243 : vector<64x16xf32>
    %cst_77 = arith.constant 9.99999974E-6 : f32
    %245 = vector.broadcast %cst_77 : f32 to vector<64x1xf32>
    %246 = arith.addf %242, %245 : vector<64x1xf32>
    %247 = math.rsqrt %246 : vector<64x1xf32>
    %248 = vector.broadcast %247 : vector<64x1xf32> to vector<64x16xf32>
    %249 = arith.mulf %244, %248 : vector<64x16xf32>
    %c0_78 = arith.constant 0 : index
    %c0_79 = arith.constant 0 : index
    %250 = vector.load %arg22[%c0_78, %c0_79] : memref<1x16xf32, #tpu.memory_space<vmem>>, vector<1x16xf32>
    %251 = vector.broadcast %250 : vector<1x16xf32> to vector<64x16xf32>
    %252 = arith.mulf %249, %251 : vector<64x16xf32>
    %c0_80 = arith.constant 0 : index
    %c0_81 = arith.constant 0 : index
    %253 = vector.load %arg23[%c0_80, %c0_81] : memref<1x16xf32, #tpu.memory_space<vmem>>, vector<1x16xf32>
    %254 = vector.broadcast %253 : vector<1x16xf32> to vector<64x16xf32>
    %255 = arith.addf %252, %254 : vector<64x16xf32>
    %256 = vector.extract_strided_slice %255 {offsets = [0, 0], sizes = [8, 16], strides = [1, 1]} : vector<64x16xf32> to vector<8x16xf32>
    %257 = vector.extract_strided_slice %255 {offsets = [8, 0], sizes = [8, 16], strides = [1, 1]} : vector<64x16xf32> to vector<8x16xf32>
    %258 = vector.extract_strided_slice %255 {offsets = [16, 0], sizes = [8, 16], strides = [1, 1]} : vector<64x16xf32> to vector<8x16xf32>
    %259 = vector.extract_strided_slice %255 {offsets = [24, 0], sizes = [8, 16], strides = [1, 1]} : vector<64x16xf32> to vector<8x16xf32>
    %260 = vector.extract_strided_slice %255 {offsets = [32, 0], sizes = [8, 16], strides = [1, 1]} : vector<64x16xf32> to vector<8x16xf32>
    %261 = vector.extract_strided_slice %255 {offsets = [40, 0], sizes = [8, 16], strides = [1, 1]} : vector<64x16xf32> to vector<8x16xf32>
    %262 = vector.extract_strided_slice %255 {offsets = [48, 0], sizes = [8, 16], strides = [1, 1]} : vector<64x16xf32> to vector<8x16xf32>
    %263 = vector.extract_strided_slice %255 {offsets = [56, 0], sizes = [8, 16], strides = [1, 1]} : vector<64x16xf32> to vector<8x16xf32>
    %264 = tpu.concatenate %256, %257, %258, %259, %260, %261, %262, %263 in 1 : vector<8x16xf32>, vector<8x16xf32>, vector<8x16xf32>, vector<8x16xf32>, vector<8x16xf32>, vector<8x16xf32>, vector<8x16xf32>, vector<8x16xf32> -> vector<8x128xf32>
    %c0_82 = arith.constant 0 : index
    %c0_83 = arith.constant 0 : index
    %265 = vector.load %arg24[%c0_82, %c0_83] : memref<8x128xf32, #tpu.memory_space<vmem>>, vector<8x128xf32>
    tpu.vector_store %arg24[%c0_82, %c0_83], %264 {strides = array<i32>} : memref<8x128xf32, #tpu.memory_space<vmem>>, vector<8x128xf32>,
    return
  }
  func.func @transform_0(%arg0: i32) -> (i32, i32, i32) {
    %c0_i32 = arith.constant 0 : i32
    %c0_i32_0 = arith.constant 0 : i32
    %c0_i32_1 = arith.constant 0 : i32
    return %c0_i32, %arg0, %c0_i32_0 : i32, i32, i32
  }
  func.func @transform_1(%arg0: i32) -> (i32, i32) {
    %c0_i32 = arith.constant 0 : i32
    %c0_i32_0 = arith.constant 0 : i32
    %c0_i32_1 = arith.constant 0 : i32
    return %c0_i32, %c0_i32_0 : i32, i32
  }
  func.func @transform_2(%arg0: i32) -> (i32, i32) {
    %c0_i32 = arith.constant 0 : i32
    %c0_i32_0 = arith.constant 0 : i32
    %c0_i32_1 = arith.constant 0 : i32
    return %c0_i32, %c0_i32_0 : i32, i32
  }
  func.func @transform_3(%arg0: i32) -> (i32, i32) {
    %c0_i32 = arith.constant 0 : i32
    %c0_i32_0 = arith.constant 0 : i32
    %c0_i32_1 = arith.constant 0 : i32
    return %c0_i32, %c0_i32_0 : i32, i32
  }
  func.func @transform_4(%arg0: i32) -> (i32, i32) {
    %c0_i32 = arith.constant 0 : i32
    %c0_i32_0 = arith.constant 0 : i32
    %c0_i32_1 = arith.constant 0 : i32
    return %c0_i32, %c0_i32_0 : i32, i32
  }
  func.func @transform_5(%arg0: i32) -> (i32, i32) {
    %c0_i32 = arith.constant 0 : i32
    %c0_i32_0 = arith.constant 0 : i32
    %c0_i32_1 = arith.constant 0 : i32
    return %c0_i32, %c0_i32_0 : i32, i32
  }
  func.func @transform_6(%arg0: i32) -> (i32, i32) {
    %c0_i32 = arith.constant 0 : i32
    %c0_i32_0 = arith.constant 0 : i32
    %c0_i32_1 = arith.constant 0 : i32
    return %c0_i32, %c0_i32_0 : i32, i32
  }
  func.func @transform_7(%arg0: i32) -> (i32, i32) {
    %c0_i32 = arith.constant 0 : i32
    %c0_i32_0 = arith.constant 0 : i32
    %c0_i32_1 = arith.constant 0 : i32
    return %c0_i32, %c0_i32_0 : i32, i32
  }
  func.func @transform_8(%arg0: i32) -> (i32, i32) {
    %c0_i32 = arith.constant 0 : i32
    %c0_i32_0 = arith.constant 0 : i32
    %c0_i32_1 = arith.constant 0 : i32
    return %c0_i32, %c0_i32_0 : i32, i32
  }
  func.func @transform_9(%arg0: i32) -> (i32, i32) {
    %c0_i32 = arith.constant 0 : i32
    %c0_i32_0 = arith.constant 0 : i32
    %c0_i32_1 = arith.constant 0 : i32
    return %c0_i32, %c0_i32_0 : i32, i32
  }
  func.func @transform_10(%arg0: i32) -> (i32, i32) {
    %c0_i32 = arith.constant 0 : i32
    %c0_i32_0 = arith.constant 0 : i32
    %c0_i32_1 = arith.constant 0 : i32
    return %c0_i32, %c0_i32_0 : i32, i32
  }
  func.func @transform_11(%arg0: i32) -> (i32, i32) {
    %c0_i32 = arith.constant 0 : i32
    %c0_i32_0 = arith.constant 0 : i32
    %c0_i32_1 = arith.constant 0 : i32
    return %c0_i32, %c0_i32_0 : i32, i32
  }
  func.func @transform_12(%arg0: i32) -> (i32, i32) {
    %c0_i32 = arith.constant 0 : i32
    %c0_i32_0 = arith.constant 0 : i32
    %c0_i32_1 = arith.constant 0 : i32
    return %c0_i32, %c0_i32_0 : i32, i32
  }
  func.func @transform_13(%arg0: i32) -> (i32, i32) {
    %c0_i32 = arith.constant 0 : i32
    %c0_i32_0 = arith.constant 0 : i32
    %c0_i32_1 = arith.constant 0 : i32
    return %c0_i32, %c0_i32_0 : i32, i32
  }
  func.func @transform_14(%arg0: i32) -> (i32, i32) {
    %c0_i32 = arith.constant 0 : i32
    %c0_i32_0 = arith.constant 0 : i32
    %c0_i32_1 = arith.constant 0 : i32
    return %c0_i32, %c0_i32_0 : i32, i32
  }
  func.func @transform_15(%arg0: i32) -> (i32, i32) {
    %c0_i32 = arith.constant 0 : i32
    %c0_i32_0 = arith.constant 0 : i32
    %c0_i32_1 = arith.constant 0 : i32
    return %c0_i32, %c0_i32_0 : i32, i32
  }
  func.func @transform_16(%arg0: i32) -> (i32, i32) {
    %c0_i32 = arith.constant 0 : i32
    %c0_i32_0 = arith.constant 0 : i32
    %c0_i32_1 = arith.constant 0 : i32
    return %c0_i32, %c0_i32_0 : i32, i32
  }
  func.func @transform_17(%arg0: i32) -> (i32, i32) {
    %c0_i32 = arith.constant 0 : i32
    %c0_i32_0 = arith.constant 0 : i32
    %c0_i32_1 = arith.constant 0 : i32
    return %c0_i32, %c0_i32_0 : i32, i32
  }
  func.func @transform_18(%arg0: i32) -> (i32, i32) {
    %c0_i32 = arith.constant 0 : i32
    %c0_i32_0 = arith.constant 0 : i32
    %c0_i32_1 = arith.constant 0 : i32
    return %c0_i32, %c0_i32_0 : i32, i32
  }
  func.func @transform_19(%arg0: i32) -> (i32, i32) {
    %c0_i32 = arith.constant 0 : i32
    %c0_i32_0 = arith.constant 0 : i32
    %c0_i32_1 = arith.constant 0 : i32
    return %c0_i32, %c0_i32_0 : i32, i32
  }
  func.func @transform_20(%arg0: i32) -> (i32, i32) {
    %c0_i32 = arith.constant 0 : i32
    %c0_i32_0 = arith.constant 0 : i32
    %c0_i32_1 = arith.constant 0 : i32
    return %c0_i32, %c0_i32_0 : i32, i32
  }
  func.func @transform_21(%arg0: i32) -> (i32, i32) {
    %c0_i32 = arith.constant 0 : i32
    %c0_i32_0 = arith.constant 0 : i32
    %c0_i32_1 = arith.constant 0 : i32
    return %c0_i32, %c0_i32_0 : i32, i32
  }
  func.func @transform_22(%arg0: i32) -> (i32, i32) {
    %c0_i32 = arith.constant 0 : i32
    %c0_i32_0 = arith.constant 0 : i32
    %c0_i32_1 = arith.constant 0 : i32
    return %c0_i32, %c0_i32_0 : i32, i32
  }
  func.func @transform_23(%arg0: i32) -> (i32, i32) {
    %c0_i32 = arith.constant 0 : i32
    %c0_i32_0 = arith.constant 0 : i32
    return %c0_i32, %arg0 : i32, i32
  }
}

</mosaic_0001>

<bundles_post_ra>
// kernel: tpu_custom_call.1
= control target key start
LH: loop header
LB: loop body
LE: loop exit
PB: predicated region body
PF: predicated region fallthrough
CT: control target
= control target key end

     0   :  { %s14305_s0 = inlined_call_operand.hbm [shape: f32[8,16,64], index: 0, kind: input, shape index: {}]   ;;  %s14306_s1 = inlined_call_operand.vmem [shape: bf16[64,192], index: 1, kind: input, shape index: {}]   ;;  %s14307_s2 = inlined_call_operand.hbm [shape: f32[1,192], index: 2, kind: input, shape index: {}]   ;;  %s14308_s3 = inlined_call_operand.hbm [shape: bf16[64,64], index: 3, kind: input, shape index: {}]   ;;  %s14309_s4 = inlined_call_operand.hbm [shape: f32[1,64], index: 4, kind: input, shape index: {}]   ;;  %s14310_s5 = inlined_call_operand.hbm [shape: f32[1,64], index: 5, kind: input, shape index: {}]   ;;  %s14311_s6 = inlined_call_operand.hbm [shape: f32[1,64], index: 6, kind: input, shape index: {}]   ;;  %s14312_s7 = inlined_call_operand.vmem [shape: bf16[64,32], index: 7, kind: input, shape index: {}]   ;;  %s14313_s8 = inlined_call_operand.hbm [shape: f32[1,32], index: 8, kind: input, shape index: {}]   ;;  %s14314_s9 = inlined_call_operand.vmem [shape: bf16[32,96], index: 9, kind: input, shape index: {}]   ;;  %s14315_s10 = inlined_call_operand.hbm [shape: f32[1,96], index: 10, kind: input, shape index: {}]   ;;  %s14316_s11 = inlined_call_operand.vmem [shape: bf16[32,32], index: 11, kind: input, shape index: {}]   ;;  %s14317_s12 = inlined_call_operand.hbm [shape: f32[1,32], index: 12, kind: input, shape index: {}]   ;;  %s14318_s13 = inlined_call_operand.hbm [shape: f32[1,32], index: 13, kind: input, shape index: {}]   ;;  %s14319_s14 = inlined_call_operand.hbm [shape: f32[1,32], index: 14, kind: input, shape index: {}]   ;;  %s14320_s15 = inlined_call_operand.vmem [shape: bf16[32,16], index: 15, kind: input, shape index: {}]   ;;  %s14321_s16 = inlined_call_operand.hbm [shape: f32[1,16], index: 16, kind: input, shape index: {}]   ;;  %s14322_s17 = inlined_call_operand.vmem [shape: bf16[16,48], index: 17, kind: input, shape index: {}]   ;;  %s14323_s18 = inlined_call_operand.vmem [shape: f32[1,48], index: 18, kind: input, shape index: {}]   ;;  %s14324_s19 = inlined_call_operand.vmem [shape: bf16[16,16], index: 19, kind: input, shape index: {}]   ;;  %s14325_s20 = inlined_call_operand.vmem [shape: f32[1,16], index: 20, kind: input, shape index: {}]   ;;  %s14326_s21 = inlined_call_operand.vmem [shape: f32[1,16], index: 21, kind: input, shape index: {}]   ;;  %s14327_s22 = inlined_call_operand.vmem [shape: f32[1,16], index: 22, kind: input, shape index: {}]   ;;  %s14328_s23 = inlined_call_operand.hbm [shape: f32[8,256], index: 23, kind: output, shape index: {}]  }
   0x1   :  { %14366 = sst [smem:[#allocation46_spill]] %s14305_s0 }
   0x2   :  { %14367 = sst [smem:[#allocation47_spill]] %s14306_s1 }
   0x3   :  { %14368 = sst [smem:[#allocation48_spill]] %s14307_s2 }
   0x4   :  { %14369 = sst [smem:[#allocation49_spill]] %s14308_s3 }
   0x5   :  { %14370 = sst [smem:[#allocation50_spill]] %s14309_s4 }
   0x6   :  { %14371 = sst [smem:[#allocation51_spill]] %s14310_s5 }
   0x7   :  { %14372 = sst [smem:[#allocation52_spill]] %s14311_s6 }
   0x8   :  { %14373 = sst [smem:[#allocation53_spill]] %s14312_s7 }
   0x9   :  { %14374 = sst [smem:[#allocation54_spill]] %s14315_s10 }
   0xa   :  { %14375 = sst [smem:[#allocation55_spill]] %s14318_s13 }
   0xb   :  { %14376 = sst [smem:[#allocation56_spill]] %s14320_s15 }
   0xc   :  { %14377 = sst [smem:[#allocation57_spill]] %s14322_s17 }
   0xd   :  { %14378 = sst [smem:[#allocation58_spill]] %s14323_s18 }
   0xe   :  { %14379 = sst [smem:[#allocation59_spill]] %s14324_s19 }
   0xf   :  { %14380 = sst [smem:[#allocation60_spill]] %s14325_s20 }
  0x10   :  { %14381 = sst [smem:[#allocation61_spill]] %s14326_s21 }
  0x11   :  { %14382 = sst [smem:[#allocation62_spill]] %s14327_s22 }
  0x12   :  { %14383 = sst [smem:[#allocation63_spill]] %s14328_s23 }
  0x13   :  { %28 = vsyncpa [#allocation3], 0 }
  0x14   :  { %30 = vsyncpa [#allocation3 + $0x1], 0 }
  0x15   :  { %31 = vsyncpa [#allocation6], 0 }
  0x16   :  { %32 = vsyncpa [#allocation9], 0 }
  0x17   :  { %33 = vsyncpa [#allocation12], 0 }
  0x18   :  { %34 = vsyncpa [#allocation15], 0 }
  0x19   :  { %35 = vsyncpa [#allocation18], 0 }
  0x1a   :  { %36 = vsyncpa [#allocation21], 0 }
  0x1b   :  { %37 = vsyncpa [#allocation4], 0 }
  0x1c   :  { %39 = vsyncpa [#allocation4 + $0x1], 0  ;;  %s11469_s4 = smov 0   ;;  %s11471_s30 = smov 0  }
  0x1d   :  { %s11473_s24 = smov 0   ;;  %s11475_s25 = smov 0  }
  0x1e LB: > { %s11321_s5 = smov [#allocation5]   ;;  %s11490_s26 = sadd.s32 4294967295, %s11319_s25   ;;  %s11319_s25 = sphi %s11475_s25, %s14467_s25   ;;  %s11315_s24 = sphi %s11473_s24, %s14466_s24   ;;  %s11311_s30 = sphi %s11471_s30, %s14465_s30   ;;  %s11307_s4 = sphi %s11469_s4, %s14464_s4  }
  0x1f   : > { %s580_s1 = sshll.u32 %s11321_s5, 4  ;;  %p9001_p0 = scmp.ge.s32.totalorder %s11319_s25, 1  ;;  %s11495_s1 = int_to_ptr.vmem [resolvable:$true] %s580_s1 }
  0x20   : > { %p14340_p1 = scmp.eq.s32.totalorder %s11490_s26, 0  ;;  %p564_p2 = scmp.lt.s32.totalorder %s11319_s25, 3 }
  0x21   : > { %s11322_s6 = smov [#allocation8]   ;;  %s11323_s7 = smov [#allocation11]  }
  0x22   : > { %p11497_p3 = pnand %p9001_p0, %p564_p2  ;;  %s604_s27 = sshll.u32 %s11322_s6, 4  ;;  %s11504_s27 = int_to_ptr.vmem [resolvable:$true] %s604_s27 }
  0x23   : > { %s626_s28 = sshll.u32 %s11323_s7, 4  ;;  %s11324_s3 = smov [#allocation14]   ;;  %s11512_s28 = int_to_ptr.vmem [resolvable:$true] %s626_s28 }
  0x24   : > { %s14384_s2 = scalar_select %p11497_p3, 1, 0 }
  0x25   : > { %p10387_p5 = pneg %p11497_p3  ;;  %s11514_s0 = sshll.u32 %s11324_s3, 4  ;;  %s655_s0 = int_to_ptr.vmem [resolvable:$true] %s11514_s0 }
  0x26   : > { %s14386_s22 = sld [smem:[#allocation48_spill]] }
  0x27   : > { %p11508_p6 = pnand %p10387_p5, %p14340_p1 }
  0x29   : > { %p11524_p8 = pneg %p11508_p6 }
  0x2c   : > { %s10891_s21 = scalar_lea.hbm %s14386_s22, 32 }
  0x2d   : > { %p10892_p7 = scmp.ne.s32.totalorder %s14386_s22, %s10891_s21  ;;  %p10898_p11 = scmp.lt.u32.totalorder %s10891_s21, %s14386_s22 }
  0x2f   : > { %p10894_p9 = pnand %p11524_p8, %p10892_p7 }
  0x31   : > { %p10895_p10 = pneg %p10894_p9 }
  0x33   : > { %p10900_p12 = pnand %p10898_p11, %p10895_p10 }
  0x35   : > { %10903 = shalt.err (!%p10900_p12)
}
  0x36   : > { %s10904_s20 = scalar_lea.vmem %s11495_s1, 32  ;;  %p10912_p5 = scmp.lt.s32.totalorder %s11495_s1, %s11495_s1 }
  0x37   : > { %p10905_p13 = scmp.ne.s32.totalorder %s11495_s1, %s10904_s20  ;;  %p10913_p4 = scmp.lt.s32.totalorder %s10904_s20, %s10904_s20 }
  0x39   : > { %p10907_p0 = pnand %p10905_p13, %p11524_p8  ;;  %p10914_p7 = por %p10913_p4, %p10912_p5 }
  0x3b   : > { %p10908_p2 = pneg %p10907_p0 }
  0x3d   : > { %p10915_p9 = pnand %p10914_p7, %p10908_p2 }
  0x3f   : > { %10918 = shalt.err (!%p10915_p9)
}
  0x40   : > { %10390 = dma.hbm_to_vmem [thread:$0]  (!%p11508_p6), %s14386_s22, 32, %s11495_s1, [#allocation6]  }
  0x41   : > { %s14388_s6 = sld [smem:[#allocation50_spill]] }
  0x47   : > { %s10919_s3 = scalar_lea.hbm %s14388_s6, 16 }
  0x48   : > { %p10920_p10 = scmp.ne.s32.totalorder %s14388_s6, %s10919_s3  ;;  %p10926_p12 = scmp.lt.u32.totalorder %s10919_s3, %s14388_s6 }
  0x4a   : > { %p10922_p4 = pnand %p10920_p10, %p11524_p8 }
  0x4c   : > { %p10923_p11 = pneg %p10922_p4 }
  0x4e   : > { %p10928_p13 = pnand %p10926_p12, %p10923_p11 }
  0x50   : > { %10931 = shalt.err (!%p10928_p13)
}
  0x51   : > { %s10932_s1 = scalar_lea.vmem %s11504_s27, 16  ;;  %s10939_s17 = scalar_lea.vmem %s11504_s27, 32 }
  0x52   : > { %p10933_p0 = scmp.ne.s32.totalorder %s11504_s27, %s10932_s1  ;;  %p10940_p7 = scmp.lt.s32.totalorder %s11504_s27, %s11504_s27 }
  0x53   : > { %p10941_p9 = scmp.lt.s32.totalorder %s10939_s17, %s10932_s1 }
  0x54   : > { %p10935_p2 = pnand %p10933_p0, %p11524_p8 }
  0x55   : > { %p10942_p10 = por %p10941_p9, %p10940_p7 }
  0x56   : > { %p10936_p5 = pneg %p10935_p2 }
  0x58   : > { %p10943_p4 = pnand %p10942_p10, %p10936_p5 }
  0x5a   : > { %10946 = shalt.err (!%p10943_p4)
}
  0x5b   : > { %10396 = dma.hbm_to_vmem [thread:$0]  (!%p11508_p6), %s14388_s6, 16, %s11504_s27, [#allocation9]  }
  0x5c   : > { %s14389_s23 = sld [smem:[#allocation52_spill]] }
  0x62   : > { %s10947_s5 = scalar_lea.hbm %s14389_s23, 16 }
  0x63   : > { %p10948_p11 = scmp.ne.s32.totalorder %s14389_s23, %s10947_s5  ;;  %p10954_p0 = scmp.lt.u32.totalorder %s10947_s5, %s14389_s23 }
  0x65   : > { %p10950_p12 = pnand %p10948_p11, %p11524_p8 }
  0x67   : > { %p10951_p13 = pneg %p10950_p12 }
  0x69   : > { %p10956_p2 = pnand %p10954_p0, %p10951_p13 }
  0x6b   : > { %10959 = shalt.err (!%p10956_p2)
}
  0x6c   : > { %s10960_s27 = scalar_lea.vmem %s11512_s28, 16  ;;  %s10967_s15 = scalar_lea.vmem %s11512_s28, 32 }
  0x6d   : > { %p10961_p5 = scmp.ne.s32.totalorder %s11512_s28, %s10960_s27  ;;  %p10968_p10 = scmp.lt.s32.totalorder %s11512_s28, %s11512_s28 }
  0x6e   : > { %p10969_p4 = scmp.lt.s32.totalorder %s10967_s15, %s10960_s27 }
  0x6f   : > { %p10963_p7 = pnand %p10961_p5, %p11524_p8 }
  0x70   : > { %p10970_p11 = por %p10969_p4, %p10968_p10 }
  0x71   : > { %p10964_p9 = pneg %p10963_p7 }
  0x73   : > { %p10971_p12 = pnand %p10970_p11, %p10964_p9 }
  0x75   : > { %10974 = shalt.err (!%p10971_p12)
}
  0x76   : > { %10402 = dma.hbm_to_vmem [thread:$0]  (!%p11508_p6), %s14389_s23, 16, %s11512_s28, [#allocation12]  }
  0x77   : > { %s11325_s21 = smov [#allocation17]   ;;  %s14390_s10 = sld [smem:[#allocation54_spill]] }
  0x78   : > { %s679_s5 = sshll.u32 %s11325_s21, 4  ;;  %s680_s5 = int_to_ptr.vmem [resolvable:$true] %s679_s5 }
  0x7d   : > { %s10975_s1 = scalar_lea.hbm %s14390_s10, 16 }
  0x7e   : > { %p10976_p13 = scmp.ne.s32.totalorder %s14390_s10, %s10975_s1  ;;  %p10982_p5 = scmp.lt.u32.totalorder %s10975_s1, %s14390_s10 }
  0x80   : > { %p10978_p0 = pnand %p10976_p13, %p11524_p8 }
  0x82   : > { %p10979_p2 = pneg %p10978_p0 }
  0x84   : > { %p10984_p7 = pnand %p10982_p5, %p10979_p2 }
  0x86   : > { %10987 = shalt.err (!%p10984_p7)
}
  0x87   : > { %s10988_s28 = scalar_lea.vmem %s655_s0, 16  ;;  %s10995_s18 = scalar_lea.vmem %s655_s0, 32 }
  0x88   : > { %p10989_p9 = scmp.ne.s32.totalorder %s655_s0, %s10988_s28  ;;  %p10996_p11 = scmp.lt.s32.totalorder %s655_s0, %s655_s0 }
  0x89   : > { %p10997_p12 = scmp.lt.s32.totalorder %s10995_s18, %s10988_s28 }
  0x8a   : > { %p10991_p10 = pnand %p10989_p9, %p11524_p8 }
  0x8b   : > { %p10998_p1 = por %p10997_p12, %p10996_p11 }
  0x8c   : > { %p10992_p4 = pneg %p10991_p10 }
  0x8e   : > { %p10999_p3 = pnand %p10998_p1, %p10992_p4 }
  0x90   : > { %11002 = shalt.err (!%p10999_p3)
}
  0x91   : > { %10408 = dma.hbm_to_vmem [thread:$0]  (!%p11508_p6), %s14390_s10, 16, %s655_s0, [#allocation15]  }
  0x92   : > { %s14391_s13 = sld [smem:[#allocation55_spill]] }
  0x98   : > { %s11003_s20 = scalar_lea.hbm %s14391_s13, 16 }
  0x99   : > { %p11004_p13 = scmp.ne.s32.totalorder %s14391_s13, %s11003_s20  ;;  %p11010_p3 = scmp.lt.u32.totalorder %s11003_s20, %s14391_s13 }
  0x9b   : > { %p11006_p0 = pnand %p11004_p13, %p11524_p8 }
  0x9d   : > { %p11007_p1 = pneg %p11006_p0 }
  0x9f   : > { %p11012_p2 = pnand %p11010_p3, %p11007_p1 }
  0xa1   : > { %11015 = shalt.err (!%p11012_p2)
}
  0xa2   : > { %s11016_s28 = scalar_lea.vmem %s680_s5, 16  ;;  %s11023_s0 = scalar_lea.vmem %s680_s5, 32 }
  0xa3   : > { %p11017_p5 = scmp.ne.s32.totalorder %s680_s5, %s11016_s28  ;;  %p11024_p10 = scmp.lt.s32.totalorder %s680_s5, %s680_s5 }
  0xa4   : > { %p11025_p4 = scmp.lt.s32.totalorder %s11023_s0, %s11016_s28 }
  0xa5   : > { %p11019_p7 = pnand %p11017_p5, %p11524_p8 }
  0xa6   : > { %p11026_p11 = por %p11025_p4, %p11024_p10 }
  0xa7   : > { %p11020_p9 = pneg %p11019_p7 }
  0xa9   : > { %p11027_p12 = pnand %p11026_p11, %p11020_p9 }
  0xab   : > { %11030 = shalt.err (!%p11027_p12)
}
  0xac   : > { %10414 = dma.hbm_to_vmem [thread:$0]  (!%p11508_p6), %s14391_s13, 16, %s680_s5, [#allocation18]  }
  0xad   : > { %s11326_s21 = smov [#allocation7]   ;;  %s14392_s1 = sld [smem:[#allocation49_spill]] }
  0xae   : > { %s590_s6 = sshll.u32 %s11326_s21, 4  ;;  %s591_s6 = int_to_ptr.vmem [resolvable:$true] %s590_s6 }
  0xb3   : > { %s11031_s17 = scalar_lea.hbm %s14392_s1, 512 }
  0xb4   : > { %p11032_p13 = scmp.ne.s32.totalorder %s14392_s1, %s11031_s17  ;;  %p11038_p3 = scmp.lt.u32.totalorder %s11031_s17, %s14392_s1 }
  0xb6   : > { %p11034_p0 = pnand %p11032_p13, %p11524_p8 }
  0xb8   : > { %p11035_p1 = pneg %p11034_p0 }
  0xba   : > { %p11040_p2 = pnand %p11038_p3, %p11035_p1 }
  0xbc   : > { %11043 = shalt.err (!%p11040_p2)
}
  0xbd   : > { %s11044_s5 = scalar_lea.vmem %s591_s6, 512  ;;  %p11052_p10 = scmp.lt.s32.totalorder %s591_s6, %s591_s6 }
  0xbe   : > { %p11045_p5 = scmp.ne.s32.totalorder %s591_s6, %s11044_s5  ;;  %p11053_p4 = scmp.lt.s32.totalorder %s11044_s5, %s11044_s5 }
  0xc0   : > { %p11047_p7 = pnand %p11045_p5, %p11524_p8  ;;  %p11054_p11 = por %p11053_p4, %p11052_p10 }
  0xc2   : > { %p11048_p9 = pneg %p11047_p7 }
  0xc4   : > { %p11055_p12 = pnand %p11054_p11, %p11048_p9 }
  0xc6   : > { %11058 = shalt.err (!%p11055_p12)
}
  0xc7   : > { %s11327_s18 = smov 64   ;;  %s11328_s19 = smov 4  }
  0xc8   : > { %10393 = dma.hbm_to_vmem [thread:$0]  (!%p11508_p6), %s14392_s1, 512, %s591_s6, [#allocation6], %s11327_s18, %s11327_s18, %s11328_s19  }
  0xc9   : > { %s11329_s20 = smov [#allocation10]   ;;  %s11330_s27 = smov [#allocation13]  }
  0xca   : > { %s615_s17 = sshll.u32 %s11329_s20, 4  ;;  %s640_s15 = sshll.u32 %s11330_s27, 4  ;;  %s616_s17 = int_to_ptr.vmem [resolvable:$true] %s615_s17  ;;  %s11648_s15 = int_to_ptr.vmem [resolvable:$true] %s640_s15 }
  0xcb   : > { %s14393_s5 = sld [smem:[#allocation51_spill]] }
  0xd1   : > { %s11059_s10 = scalar_lea.hbm %s14393_s5, 16 }
  0xd2   : > { %p11060_p13 = scmp.ne.s32.totalorder %s14393_s5, %s11059_s10  ;;  %p11066_p3 = scmp.lt.u32.totalorder %s11059_s10, %s14393_s5 }
  0xd4   : > { %p11062_p0 = pnand %p11060_p13, %p11524_p8 }
  0xd6   : > { %p11063_p1 = pneg %p11062_p0 }
  0xd8   : > { %p11068_p2 = pnand %p11066_p3, %p11063_p1 }
  0xda   : > { %11071 = shalt.err (!%p11068_p2)
}
  0xdb   : > { %s11072_s18 = scalar_lea.vmem %s616_s17, 16  ;;  %s11079_s19 = scalar_lea.vmem %s616_s17, 32 }
  0xdc   : > { %p11073_p5 = scmp.ne.s32.totalorder %s616_s17, %s11072_s18  ;;  %p11080_p10 = scmp.lt.s32.totalorder %s616_s17, %s616_s17 }
  0xdd   : > { %p11081_p4 = scmp.lt.s32.totalorder %s11079_s19, %s11072_s18 }
  0xde   : > { %p11075_p7 = pnand %p11073_p5, %p11524_p8 }
  0xdf   : > { %p11082_p11 = por %p11081_p4, %p11080_p10 }
  0xe0   : > { %p11076_p9 = pneg %p11075_p7 }
  0xe2   : > { %p11083_p12 = pnand %p11082_p11, %p11076_p9 }
  0xe4   : > { %11086 = shalt.err (!%p11083_p12)
}
  0xe5   : > { %10399 = dma.hbm_to_vmem [thread:$0]  (!%p11508_p6), %s14393_s5, 16, %s616_s17, [#allocation9]  }
  0xe6   : > { %s11087_s20 = scalar_lea.hbm %s14313_s8, 16 }
  0xe7   : > { %p11088_p13 = scmp.ne.s32.totalorder %s14313_s8, %s11087_s20  ;;  %p11094_p3 = scmp.lt.u32.totalorder %s11087_s20, %s14313_s8 }
  0xe9   : > { %p11090_p0 = pnand %p11088_p13, %p11524_p8 }
  0xeb   : > { %p11091_p1 = pneg %p11090_p0 }
  0xed   : > { %p11096_p2 = pnand %p11094_p3, %p11091_p1 }
  0xef   : > { %11099 = shalt.err (!%p11096_p2)
}
  0xf0   : > { %s11100_s17 = scalar_lea.vmem %s11648_s15, 16  ;;  %s11107_s6 = scalar_lea.vmem %s11648_s15, 32 }
  0xf1   : > { %p11101_p5 = scmp.ne.s32.totalorder %s11648_s15, %s11100_s17  ;;  %p11108_p10 = scmp.lt.s32.totalorder %s11648_s15, %s11648_s15 }
  0xf2   : > { %p11109_p4 = scmp.lt.s32.totalorder %s11107_s6, %s11100_s17 }
  0xf3   : > { %p11103_p7 = pnand %p11101_p5, %p11524_p8 }
  0xf4   : > { %p11110_p11 = por %p11109_p4, %p11108_p10 }
  0xf5   : > { %p11104_p9 = pneg %p11103_p7 }
  0xf7   : > { %p11111_p12 = pnand %p11110_p11, %p11104_p9 }
  0xf9   : > { %11114 = shalt.err (!%p11111_p12)
}
  0xfa   : > { %10405 = dma.hbm_to_vmem [thread:$0]  (!%p11508_p6), %s14313_s8, 16, %s11648_s15, [#allocation12]  }
  0xfb   : > { %s11331_s13 = smov [#allocation16]   ;;  %s11332_s10 = smov [#allocation19]  }
  0xfc   : > { %s668_s22 = sshll.u32 %s11331_s13, 4  ;;  %s690_s3 = sshll.u32 %s11332_s10, 4  ;;  %s669_s22 = int_to_ptr.vmem [resolvable:$true] %s668_s22  ;;  %s11692_s3 = int_to_ptr.vmem [resolvable:$true] %s690_s3 }
  0xfd   : > { %s11115_s28 = scalar_lea.hbm %s14317_s12, 16 }
  0xfe   : > { %p11116_p13 = scmp.ne.s32.totalorder %s14317_s12, %s11115_s28  ;;  %p11122_p3 = scmp.lt.u32.totalorder %s11115_s28, %s14317_s12 }
 0x100   : > { %p11118_p0 = pnand %p11116_p13, %p11524_p8 }
 0x102   : > { %p11119_p1 = pneg %p11118_p0 }
 0x104   : > { %p11124_p2 = pnand %p11122_p3, %p11119_p1 }
 0x106   : > { %11127 = shalt.err (!%p11124_p2)
}
 0x107   : > { %s11128_s6 = scalar_lea.vmem %s669_s22, 16  ;;  %s11135_s18 = scalar_lea.vmem %s669_s22, 32 }
 0x108   : > { %p11129_p5 = scmp.ne.s32.totalorder %s669_s22, %s11128_s6  ;;  %p11136_p10 = scmp.lt.s32.totalorder %s669_s22, %s669_s22 }
 0x109   : > { %p11137_p4 = scmp.lt.s32.totalorder %s11135_s18, %s11128_s6 }
 0x10a   : > { %p11131_p7 = pnand %p11129_p5, %p11524_p8 }
 0x10b   : > { %p11138_p11 = por %p11137_p4, %p11136_p10 }
 0x10c   : > { %p11132_p9 = pneg %p11131_p7 }
 0x10e   : > { %p11139_p12 = pnand %p11138_p11, %p11132_p9 }
 0x110   : > { %11142 = shalt.err (!%p11139_p12)
}
 0x111   : > { %10411 = dma.hbm_to_vmem [thread:$0]  (!%p11508_p6), %s14317_s12, 16, %s669_s22, [#allocation15]  }
 0x112   : > { %s11143_s27 = scalar_lea.hbm %s14319_s14, 16 }
 0x113   : > { %p11144_p13 = scmp.ne.s32.totalorder %s14319_s14, %s11143_s27  ;;  %p11150_p3 = scmp.lt.u32.totalorder %s11143_s27, %s14319_s14 }
 0x115   : > { %p11146_p0 = pnand %p11144_p13, %p11524_p8 }
 0x117   : > { %p11147_p1 = pneg %p11146_p0 }
 0x119   : > { %p11152_p2 = pnand %p11150_p3, %p11147_p1 }
 0x11b   : > { %11155 = shalt.err (!%p11152_p2)
}
 0x11c   : > { %s11156_s22 = scalar_lea.vmem %s11692_s3, 16  ;;  %s11163_s15 = scalar_lea.vmem %s11692_s3, 32 }
 0x11d   : > { %p11157_p5 = scmp.ne.s32.totalorder %s11692_s3, %s11156_s22  ;;  %p11164_p10 = scmp.lt.s32.totalorder %s11692_s3, %s11692_s3 }
 0x11e   : > { %p11165_p4 = scmp.lt.s32.totalorder %s11163_s15, %s11156_s22 }
 0x11f   : > { %p11159_p7 = pnand %p11157_p5, %p11524_p8 }
 0x120   : > { %p11166_p11 = por %p11165_p4, %p11164_p10 }
 0x121   : > { %p11160_p9 = pneg %p11159_p7 }
 0x123   : > { %p11167_p12 = pnand %p11166_p11, %p11160_p9 }
 0x125   : > { %11170 = shalt.err (!%p11167_p12)
}
 0x126   : > { %10417 = dma.hbm_to_vmem [thread:$0]  (!%p11508_p6), %s14319_s14, 16, %s11692_s3, [#allocation18]  }
 0x127   : > { %s11333_s19 = smov [#allocation20]   ;;  %s11171_s27 = scalar_lea.hbm %s14321_s16, 16 }
 0x128   : > { %s704_s13 = sshll.u32 %s11333_s19, 4  ;;  %p11172_p13 = scmp.ne.s32.totalorder %s14321_s16, %s11171_s27  ;;  %s705_s13 = int_to_ptr.vmem [resolvable:$true] %s704_s13 }
 0x129   : > { %p11178_p3 = scmp.lt.u32.totalorder %s11171_s27, %s14321_s16 }
 0x12a   : > { %p11174_p0 = pnand %p11172_p13, %p11524_p8 }
 0x12c   : > { %p11175_p1 = pneg %p11174_p0 }
 0x12e   : > { %p11180_p2 = pnand %p11178_p3, %p11175_p1 }
 0x130   : > { %11183 = shalt.err (!%p11180_p2)
}
 0x131   : > { %s11184_s3 = scalar_lea.vmem %s705_s13, 16  ;;  %s11191_s22 = scalar_lea.vmem %s705_s13, 32 }
 0x132   : > { %p11185_p5 = scmp.ne.s32.totalorder %s705_s13, %s11184_s3  ;;  %p11192_p10 = scmp.lt.s32.totalorder %s705_s13, %s705_s13 }
 0x133   : > { %p11193_p4 = scmp.lt.s32.totalorder %s11191_s22, %s11184_s3 }
 0x134   : > { %p11187_p7 = pnand %p11185_p5, %p11524_p8 }
 0x135   : > { %p11194_p11 = por %p11193_p4, %p11192_p10 }
 0x136   : > { %p11188_p9 = pneg %p11187_p7 }
 0x138   : > { %p11195_p12 = pnand %p11194_p11, %p11188_p9 }
 0x13a   : > { %11198 = shalt.err (!%p11195_p12)
}
 0x13b   : > { %10420 = dma.hbm_to_vmem [thread:$0]  (!%p11508_p6), %s14321_s16, 16, %s705_s13, [#allocation21]  }
 0x13c   : > { %s9000_s7 = sadd.s32 4294967294, %s11319_s25   ;;  %s11756_s29 = sadd.s32 1, %s11319_s25  }
 0x13d   : > { %s52_s18 = sadd.s32 1, %s11315_s24  ;;  %s49_s19 = ssub.s32 %s11319_s25, %s11756_s29 }
 0x13e   : > { %p59_p8 = scmp.ne.s32.totalorder %s11315_s24, %s11311_s30  ;;  %p50_p13 = scmp.eq.s32.totalorder %s49_s19, 0 }
 0x13f   : > { %p60_p0 = scmp.eq.s32.totalorder %s11319_s25, 0  ;;  %p65_p1 = scmp.ne.s32.totalorder %s11311_s30, %s11307_s4 }
 0x140   : > { %p551_p3 = scmp.eq.s32.totalorder %s11490_s26, 1  ;;  %p14394_p5 = scmp.eq.s32.totalorder %s11490_s26, 0 }
 0x141   : > { %s11768_s10 = scalar_select %p50_p13, %s11315_s24, %s52_s18  }
 0x142   : > { %p61_p2 = por %p60_p0, %p59_p8  ;;  %p11772_p7 = por %p14394_p5, %p65_p1 }
 0x143   : > { %p11776_p6 = por %p551_p3, %p59_p8  ;;  %p557_p9 = scmp.eq.s32.totalorder %s9000_s7, 1 }
 0x144   : > { %p10440_p10 = scmp.lt.s32.totalorder %s11319_s25, 2  ;;  %s733_s27 = sand.u32 1, %s11315_s24  }
 0x145   : > { %s14396_s13 = scalar_select %p11776_p6, 1, 0 }
 0x146   : > { %p11782_p4 = por %p557_p9, %p65_p1  ;;  %s9014_s0 = sshll.u32 %s733_s27, 6 }
 0x147   : > { %s9015_s21 = sshll.u32 %s11319_s25, 7  ;;  %s14398_s22 = sld [smem:[#allocation46_spill]] }
 0x148   : > { %s14397_s28 = scalar_select %p11782_p4, 1, 0 }
 0x149   : > { %s737_s6 = scalar_lea.vmem [#allocation2], %s9014_s0  ;;  %p11792_p11 = pnand %p10440_p10, %p61_p2 }
 0x14a   : > { %s743_s18 = sshll.u32 %s737_s6, 4  ;;  %s11798_s19 = scalar_lea.sflag [#allocation3], %s733_s27  ;;  %s11796_s18 = int_to_ptr.vmem [resolvable:$true] %s743_s18 }
 0x14b   : > { %p11201_p8 = pneg %p11792_p11 }
 0x14d   : > { %s11790_s15 = scalar_lea.hbm %s14398_s22, %s9015_s21  ;;  %s11204_s17 = scalar_lea.hbm %s14398_s22, 2048 }
 0x14e   : > { %s11199_s1 = scalar_lea.hbm %s11790_s15, 1024  ;;  %p11205_p1 = scmp.lt.u32.totalorder %s11790_s15, %s14398_s22 }
 0x14f   : > { %p11200_p12 = scmp.ne.s32.totalorder %s11790_s15, %s11199_s1  ;;  %p11206_p3 = scmp.lt.u32.totalorder %s11204_s17, %s11199_s1 }
 0x150   : > { %p11208_p5 = scmp.lt.u32.totalorder %s11199_s1, %s11790_s15 }
 0x151   : > { %p11202_p13 = pnand %p11201_p8, %p11200_p12  ;;  %p11207_p2 = por %p11206_p3, %p11205_p1 }
 0x153   : > { %p11203_p0 = pneg %p11202_p13  ;;  %p11209_p9 = por %p11208_p5, %p11207_p2 }
 0x155   : > { %p11210_p10 = pnand %p11209_p9, %p11203_p0 }
 0x157   : > { %11213 = shalt.err (!%p11210_p10)
}
 0x158   : > { %s11214_s27 = scalar_lea.vmem %s11796_s18, 1024  ;;  %s11334_s0 = smov [#allocation2]  }
 0x159   : > { %p11215_p12 = scmp.ne.s32.totalorder %s11796_s18, %s11214_s27  ;;  %s11219_s21 = sshll.u32 %s11334_s0, 4  ;;  %s11220_s21 = int_to_ptr.vmem [resolvable:$false] %s11219_s21 }
 0x15a   : > { %s11221_s3 = scalar_lea.vmem %s11220_s21, 2048  ;;  %p11222_p6 = scmp.lt.s32.totalorder %s11796_s18, %s11220_s21 }
 0x15b   : > { %p11217_p13 = pnand %p11215_p12, %p11201_p8  ;;  %p11223_p1 = scmp.lt.s32.totalorder %s11221_s3, %s11214_s27 }
 0x15d   : > { %p11218_p4 = pneg %p11217_p13  ;;  %p11224_p3 = por %p11223_p1, %p11222_p6 }
 0x15f   : > { %p11225_p2 = pnand %p11224_p3, %p11218_p4 }
 0x161   : > { %11228 = shalt.err (!%p11225_p2)
}
 0x162   : > { %s11335_s1 = smov 256   ;;  %s11336_s17 = smov 128  }
 0x163   : > { %s11337_s6 = smov 8   ;;  %p14400_p8 = scmp.ne.s32.totalorder %s14384_s2, 0 }
 0x164   : > { %10424 = dma.hbm_to_vmem [thread:$0]  (!%p11792_p11), %s11790_s15, 1024, %s11796_s18, %s11798_s19, %s11335_s1, %s11336_s17, %s11337_s6  }
 0x165   : > { %755 = sbr.rel (%p14400_p8) target bundleno = 6539 (0x198b), region = 112 }
 0x16c   : > { %s11829_s0 = sand.u32 1, %s11311_s30  }
 0x16d   : > { %s9017_s27 = sshll.u32 %s11829_s0, 6  ;;  %s758_s21 = scalar_lea.sflag [#allocation3], %s11829_s0 }
 0x16e   : > { %s11833_s3 = scalar_lea.vmem [#allocation2], %s9017_s27 }
 0x16f   : > { %11274 = dma.done.wait (%p11772_p7), %s758_s21, 1024  }
 0x170   : > { %11276 = vsyncadd (%p11772_p7), %s758_s21, 4294966272  ;;  %p14401_p6 = scmp.eq.s32.totalorder %s11490_s26, 0 }
 0x172   : > { %11278 = dma.done.wait (%p14401_p6), [#allocation6], 544   ;;  %p14402_p4 = pmov %p14401_p6 }
 0x174   : > { %11280 = vsyncadd (%p14402_p4), [#allocation6], 4294966752  ;;  %p14403_p11 = pmov %p14402_p4 }
 0x175   : > { %p14404_p0 = pmov %p14402_p4 }
 0x176   : > { %11282 = dma.done.wait (%p14403_p11), [#allocation9], 32  }
 0x177   : > { %11284 = vsyncadd (%p14404_p0), [#allocation9], 4294967264  ;;  %p14405_p5 = pmov %p14404_p0 }
 0x178   : > { %p14406_p9 = pmov %p14404_p0 }
 0x179   : > { %11286 = dma.done.wait (%p14405_p5), [#allocation12], 32  }
 0x17a   : > { %11288 = vsyncadd (%p14406_p9), [#allocation12], 4294967264  ;;  %p14407_p7 = pmov %p14404_p0 }
 0x17b   : > { %p14408_p10 = pmov %p14404_p0 }
 0x17c   : > { %11290 = dma.done.wait (%p14407_p7), [#allocation15], 32  }
 0x17d   : > { %11292 = vsyncadd (%p14408_p10), [#allocation15], 4294967264  ;;  %p14409_p12 = pmov %p14404_p0 }
 0x17e   : > { %p14410_p13 = pmov %p14404_p0 }
 0x17f   : > { %11294 = dma.done.wait (%p14409_p12), [#allocation18], 32  }
 0x180   : > { %11296 = vsyncadd (%p14410_p13), [#allocation18], 4294967264  ;;  %p14411_p1 = pmov %p14404_p0 }
 0x181   : > { %p14412_p3 = pmov %p14404_p0 }
 0x182   : > { %11298 = dma.done.wait (%p14411_p1), [#allocation21], 16  }
 0x183   : > { %11300 = vsyncadd (%p14412_p3), [#allocation21], 4294967280  ;;  %v11338_v0 = vmov 0   ;;  %s14413_s15 = sld [smem:[#allocation47_spill]]  ;;  %vm886_vm0 = vcmask 1041409   ;;  %vm889_vm1 = vcmask 1042434  }
 0x184   : > { %1121 = vmatprep.mubr.bf16.mxu0 %v11338_v0  ;;  %vm892_vm2 = vcmask 1043459   ;;  %vm895_vm3 = vcmask 1044484   ;;  %vm898_vm4 = vcmask 1045509   ;;  %v11883_v7 = vld [vmem:[%s11833_s3] sm:$0xff]  ;;  %v11886_v8 = vld [vmem:[%s11833_s3 + $0x8] sm:$0xff]  ;;  %vm901_vm5 = vcmask 1046534  }
 0x185   : > { %vm904_vm6 = vcmask 1047559   ;;  %v11889_v9 = vld [vmem:[%s11833_s3 + $0x10] sm:$0xff]  ;;  %v11892_v10 = vld [vmem:[%s11833_s3 + $0x18] sm:$0xff]  ;;  %v11895_v11 = vld [vmem:[%s11833_s3 + $0x20] sm:$0xff]  ;;  %v885_v12 = vrot.slane %v11886_v8, 7  ;;  %v907_v13 = vrot.slane %v11883_v7, 1 }
 0x186   : > { %v922_v14 = vrot.slane %v11883_v7, 2  ;;  %v11901_v15 = vld [vmem:[%s11833_s3 + $0x28] sm:$0xff]  ;;  %v11904_v16 = vld [vmem:[%s11833_s3 + $0x30] sm:$0xff]  ;;  %v11907_v17 = vld [vmem:[%s11833_s3 + $0x38] sm:$0xff]  ;;  %v888_v18 = vrot.slane %v11889_v9, 6  ;;  %v891_v19 = vrot.slane %v11892_v10, 5 }
 0x187   : > { %v894_v20 = vrot.slane %v11895_v11, 4  ;;  %v887_v22 = vsel %vm886_vm0, %v885_v12, %v11883_v7  ;;  %v897_v23 = vrot.slane %v11901_v15, 3  ;;  %v900_v24 = vrot.slane %v11904_v16, 2  ;;  %s14362_s1 = smov 112   ;;  %s14360_s17 = smov 64  }
 0x188   : > { %v903_v25 = vrot.slane %v11907_v17, 1  ;;  %vm1076_vm7 = vcmask 523264   ;;  %v890_v27 = vsel %vm889_vm1, %v888_v18, %v887_v22  ;;  %v908_v28 = vsel %vm886_vm0, %v11886_v8, %v907_v13  ;;  %s14363_s6 = smov 96   ;;  %s14355_s27 = smov 80  }
 0x189   : > { %v10591_v1 = vld [vmem:[%s14413_s15 + $0x4] ss:$8 sps:$4 sm:$0xff]   ;;  %v10593_v2 = vld [vmem:[%s14413_s15] ss:$8 sps:$4 sm:$0xff]   ;;  %v10594_v3 = vld [vmem:[%s14413_s15 + $0x14] ss:$8 sps:$4 sm:$0xff]   ;;  %v893_v31 = vsel %vm892_vm2, %v891_v19, %v890_v27 }
 0x18a   : > { %1089 = vmatprep.subr.bf16.mxu0 %v10591_v1  ;;  %v10596_v4 = vld [vmem:[%s14413_s15 + $0x10] ss:$8 sps:$4 sm:$0xff]   ;;  %v10597_v5 = vld [vmem:[%s14413_s15 + $0x24] ss:$8 sps:$4 sm:$0xff]   ;;  %v10599_v6 = vld [vmem:[%s14413_s15 + $0x20] ss:$8 sps:$4 sm:$0xff]   ;;  %v896_v35 = vsel %vm895_vm3, %v894_v20, %v893_v31 }
 0x18b   : > { %1090 = vmatpush1.bf16.msra.mxu0 %v10593_v2  ;;  %v10600_v21 = vld [vmem:[%s14413_s15 + $0x34] ss:$8 sps:$4 sm:$0xff]   ;;  %v10602_v26 = vld [vmem:[%s14413_s15 + $0x30] ss:$8 sps:$4 sm:$0xff]   ;;  %v909_v29 = vrot.slane %v11889_v9, 7  ;;  %v911_v30 = vrot.slane %v11892_v10, 6  ;;  %v899_v39 = vsel %vm898_vm4, %v897_v23, %v896_v35 }
 0x18c   : > { %1091 = vmatprep.subr.bf16.mxu0 %v10594_v3  ;;  %v913_v32 = vrot.slane %v11895_v11, 5  ;;  %v915_v33 = vrot.slane %v11901_v15, 4  ;;  %v917_v34 = vrot.slane %v11904_v16, 3  ;;  %v919_v37 = vrot.slane %v11907_v17, 2  ;;  %s14358_s21 = smov 16   ;;  %s14357_s2 = smov 32  }
 0x18d   : > { %v910_v36 = vsel %vm889_vm1, %v909_v29, %v908_v28  ;;  %v923_v38 = vrot.slane %v11886_v8, 1  ;;  %v926_v41 = vrot.slane %v11892_v10, 7  ;;  %v928_v42 = vrot.slane %v11895_v11, 6  ;;  %s14356_s20 = smov 48   ;;  %s14445_s3 = sld [smem:[#allocation53_spill]] }
 0x18e   : > { %v912_v40 = vsel %vm892_vm2, %v911_v30, %v910_v36  ;;  %v902_v43 = vsel %vm901_vm5, %v900_v24, %v899_v39  ;;  %v930_v46 = vrot.slane %v11901_v15, 5  ;;  %v932_v50 = vrot.slane %v11904_v16, 4  ;;  %s14448_s18 = sld [smem:[#allocation56_spill]]  ;;  %s14451_s7 = sld [smem:[#allocation59_spill]] }
 0x18f   : > { %1092 = vmatpush1.bf16.msra.mxu0 %v10596_v4  ;;  %v914_v44 = vsel %vm895_vm3, %v913_v32, %v912_v40  ;;  %v924_v45 = vsel %vm886_vm0, %v923_v38, %v922_v14  ;;  %v11945_v47 = vsel %vm904_vm6, %v903_v25, %v902_v43  ;;  %v934_v53 = vrot.slane %v11907_v17, 3  ;;  %s14453_s19 = sld [smem:[#allocation61_spill]]  ;;  %p14461_p8 = scmp.ne.s32.totalorder %s14396_s13, 0 }
 0x190   : > { %1093 = vmatprep.subr.bf16.mxu0 %v10597_v5  ;;  %14414 = vst [vmem:[#allocation31_spill] sm:$0xff] %v11945_v47  ;;  %v916_v48 = vsel %vm898_vm4, %v915_v33, %v914_v44  ;;  %v925_v49 = vsel %vm889_vm1, %v11889_v9, %v924_v45  ;;  %v937_v54 = vrot.slane %v11883_v7, 3  ;;  %v938_v57 = vrot.slane %v11886_v8, 2 }
 0x191   : > { %v918_v51 = vsel %vm901_vm5, %v917_v34, %v916_v48  ;;  %v927_v52 = vsel %vm892_vm2, %v926_v41, %v925_v49  ;;  %v940_v58 = vrot.slane %v11889_v9, 1  ;;  %v943_v61 = vrot.slane %v11895_v11, 7 }
 0x192   : > { %v11956_v55 = vsel %vm904_vm6, %v919_v37, %v918_v51  ;;  %v929_v56 = vsel %vm895_vm3, %v928_v42, %v927_v52  ;;  %v945_v62 = vrot.slane %v11901_v15, 6  ;;  %v939_v1 = vsel %vm886_vm0, %v938_v57, %v937_v54 }
 0x193   : > { %1094 = vmatpush1.bf16.msra.mxu0 %v10599_v6  ;;  %14415 = vst [vmem:[#allocation32_spill] sm:$0xff] %v11956_v55  ;;  %v1012_v59 = vpack.c.bf16 %v11956_v55, %v11945_v47  ;;  %v931_v60 = vsel %vm898_vm4, %v930_v46, %v929_v56  ;;  %v947_v2 = vrot.slane %v11904_v16, 5  ;;  %v949_v3 = vrot.slane %v11907_v17, 4 }
 0x194   : > { %1095 = vmatprep.subr.bf16.mxu0 %v10600_v21  ;;  %v933_v63 = vsel %vm901_vm5, %v932_v50, %v931_v60  ;;  %v941_v5 = vsel %vm889_vm1, %v940_v58, %v939_v1  ;;  %v952_v6 = vrot.slane %v11883_v7, 4  ;;  %v953_v12 = vrot.slane %v11886_v8, 3 }
 0x195   : > { %v11972_v4 = vsel %vm904_vm6, %v934_v53, %v933_v63  ;;  %v942_v13 = vsel %vm892_vm2, %v11892_v10, %v941_v5  ;;  %v955_v14 = vrot.slane %v11889_v9, 2  ;;  %v957_v18 = vrot.slane %v11892_v10, 1 }
 0x196   : > { %14416 = vst [vmem:[#allocation33_spill] sm:$0xff] %v11972_v4  ;;  %v960_v19 = vrot.slane %v11901_v15, 7  ;;  %v944_v20 = vsel %vm895_vm3, %v943_v61, %v942_v13  ;;  %v954_v21 = vsel %vm886_vm0, %v953_v12, %v952_v6  ;;  %v962_v22 = vrot.slane %v11904_v16, 6 }
 0x197   : > { %1096 = vmatpush1.bf16.msra.mxu0 %v10602_v26  ;;  %v964_v23 = vrot.slane %v11907_v17, 5  ;;  %v946_v24 = vsel %vm898_vm4, %v945_v62, %v944_v20  ;;  %v956_v25 = vsel %vm889_vm1, %v955_v14, %v954_v21  ;;  %v967_v26 = vrot.slane %v11883_v7, 5  ;;  %v12066_v21 = vld [vmem:[#allocation5] sm:$0x3] }
 0x198   : > { %v968_v27 = vrot.slane %v11886_v8, 4  ;;  %v948_v28 = vsel %vm901_vm5, %v947_v2, %v946_v24  ;;  %v958_v29 = vsel %vm892_vm2, %v957_v18, %v956_v25  ;;  %v970_v30 = vrot.slane %v11889_v9, 3 }
 0x199   : > { %v972_v31 = vrot.slane %v11892_v10, 2  ;;  %v11996_v32 = vsel %vm904_vm6, %v949_v3, %v948_v28  ;;  %v959_v33 = vsel %vm895_vm3, %v11895_v11, %v958_v29  ;;  %v974_v35 = vrot.slane %v11895_v11, 1 }
 0x19a   : > { %9038 = vmatmul.mubr.msk.bf16.vlgmr.msra.gmra.mrb[0].mxu0 %vm1076_vm7, %v1012_v59  ;;  %14417 = vst [vmem:[#allocation34_spill] sm:$0xff] %v11996_v32  ;;  %v969_v34 = vsel %vm886_vm0, %v968_v27, %v967_v26  ;;  %v1013_v36 = vpack.c.bf16 %v11996_v32, %v11972_v4  ;;  %v961_v37 = vsel %vm898_vm4, %v960_v19, %v959_v33  ;;  %v977_v39 = vrot.slane %v11904_v16, 7 }
 0x19b   : > { %1131 = vmatprep.mubr.bf16.mxu0 %v11338_v0  ;;  %v971_v38 = vsel %vm889_vm1, %v970_v30, %v969_v34  ;;  %v963_v40 = vsel %vm901_vm5, %v962_v22, %v961_v37  ;;  %v979_v42 = vrot.slane %v11907_v17, 6  ;;  %v982_v43 = vrot.slane %v11883_v7, 6 }
 0x19c   : > { %v973_v41 = vsel %vm892_vm2, %v972_v31, %v971_v38  ;;  %v983_v45 = vrot.slane %v11886_v8, 5  ;;  %v985_v46 = vrot.slane %v11889_v9, 4  ;;  %v12017_v48 = vsel %vm904_vm6, %v964_v23, %v963_v40 }
 0x19d   : > { %v975_v44 = vsel %vm895_vm3, %v974_v35, %v973_v41  ;;  %14418 = vst [vmem:[#allocation35_spill] sm:$0xff] %v12017_v48  ;;  %v987_v50 = vrot.slane %v11892_v10, 3  ;;  %v989_v51 = vrot.slane %v11895_v11, 2  ;;  %v991_v54 = vrot.slane %v11901_v15, 1 }
 0x19e   : > { %v976_v49 = vsel %vm898_vm4, %v11901_v15, %v975_v44  ;;  %v984_v53 = vsel %vm886_vm0, %v983_v45, %v982_v43  ;;  %v997_v56 = vrot.slane %v11883_v7, 7  ;;  %v998_v59 = vrot.slane %v11886_v8, 6 }
 0x19f   : > { %v978_v52 = vsel %vm901_vm5, %v977_v39, %v976_v49  ;;  %v986_v58 = vsel %vm889_vm1, %v985_v46, %v984_v53  ;;  %v1000_v60 = vrot.slane %v11889_v9, 5  ;;  %v1002_v63 = vrot.slane %v11892_v10, 4 }
 0x1a0   : > { %v12028_v57 = vsel %vm904_vm6, %v979_v42, %v978_v52  ;;  %v988_v62 = vsel %vm892_vm2, %v987_v50, %v986_v58  ;;  %v1004_v1 = vrot.slane %v11895_v11, 3  ;;  %v994_v2 = vrot.slane %v11907_v17, 7 }
 0x1a1   : > { %14419 = vst [vmem:[#allocation36_spill] sm:$0xff] %v12028_v57  ;;  %v1014_v61 = vpack.c.bf16 %v12028_v57, %v12017_v48  ;;  %v990_v7 = vsel %vm895_vm3, %v989_v51, %v988_v62  ;;  %v999_v3 = vsel %vm886_vm0, %v998_v59, %v997_v56  ;;  %v1006_v5 = vrot.slane %v11901_v15, 2 }
 0x1a2   : > { %9039 = vmatmul.mubr.msk.bf16.gmra.mrb[4].mxu0 %vm1076_vm7, %v1013_v36  ;;  %v992_v8 = vsel %vm898_vm4, %v991_v54, %v990_v7  ;;  %v1001_v9 = vsel %vm889_vm1, %v1000_v60, %v999_v3  ;;  %v1008_v6 = vrot.slane %v11904_v16, 1  ;;  %v1026_v19 = vlaneseq }
 0x1a3   : > { %1141 = vmatprep.mubr.bf16.mxu0 %v11338_v0  ;;  %v993_v12 = vsel %vm901_vm5, %v11904_v16, %v992_v8  ;;  %v1003_v10 = vsel %vm892_vm2, %v1002_v63, %v1001_v9  ;;  %v14345_v24 = vmov 0.0   ;;  %vm11341_vm8 = vmmov 0  }
 0x1a4   : > { %v1005_v11 = vsel %vm895_vm3, %v1004_v1, %v1003_v10  ;;  %v12052_v13 = vsel %vm904_vm6, %v994_v2, %v993_v12  ;;  %v12063_v20 = vshrl.u32 %v1026_v19, 7  ;;  %9579 = vmatprep.subr.bf16.mxu1 %v14345_v24  ;;  %9609 = vmatprep.subr.bf16.mxu0 %v14345_v24  ;;  %vm1308_vm9 = vcmask 130048  }
 0x1a5   : > { %14420 = vst [vmem:[#allocation37_spill] sm:$0xff] %v12052_v13  ;;  %v1007_v15 = vsel %vm898_vm4, %v1006_v5, %v1005_v11  ;;  %9581 = vmatprep.mubr.msk.bf16.mxu1 %vm11341_vm8, %v14345_v24  ;;  %vm2891_vm10 = vcmask 64512   ;;  %vm3279_vm11 = vcmask 1043456   ;;  %vm4853_vm12 = vcmask 261120  }
 0x1a6   : > { %v1009_v14 = vsel %vm901_vm5, %v1008_v6, %v1007_v15  ;;  %vm4862_vm13 = vcmask 392192   ;;  %vm8804_vm14 = vcmask 654336   ;;  %vm8806_vm15 = vcmask 785408  }
 0x1a7   : > { %v12058_v18 = vsel %vm904_vm6, %v11907_v17, %v1009_v14  ;;  %vm8808_vm0 = vcmask 916480  }
 0x1a8   : > { %14421 = vst [vmem:[#allocation38_spill] sm:$0xff] %v12058_v18  ;;  %v1015_v16 = vpack.c.bf16 %v12058_v18, %v12052_v13 }
 0x1aa   : > { %9040 = vmatmul.mubr.msk.bf16.gmra.mrb[8].mxu0 %vm1076_vm7, %v1014_v61 }
 0x1ab   : > { %1151 = vmatprep.mubr.bf16.mxu0 %v11338_v0  ;;  %v1028_v0 = vsub.s32 0, %v12063_v20 }
 0x1ad   : > { %v1029_v22 = vrot.slane %v12066_v21, %v1028_v0 }
 0x1b2   : > { %9041 = vmatmul.mubr.msk.bf16.gmra.mrb[12].mxu0 %vm1076_vm7, %v1015_v16 }
 0x1b3   : > { %9611 = vmatprep.mubr.msk.bf16.mxu0 %vm11341_vm8, %v14345_v24 }
 0x26d   : > { %v1123_v23 = vpop.f32.mrb[0].mxu0 }
 0x26e   : > { %v1124_v17 = vadd.f32 %v1123_v23, %v1029_v22  ;;  %v12071_v25 = vpop.f32.mrb[1].mxu0 }
 0x26f   : > { %v1127_v26 = vpop.f32.mrb[2].mxu0 }
 0x270   : > { %v12073_v27 = vpack.c.bf16 %v1124_v17, %v1124_v17  ;;  %v1128_v28 = vadd.f32 %v1127_v26, %v1029_v22  ;;  %v12075_v29 = vpop.f32.mrb[3].mxu0 }
 0x272   : > { %1190 = vrot.lane.b32.xlu0 %v12073_v27, %s14362_s1  ;;  %v12079_v30 = vpack.c.bf16 %v1128_v28, %v1128_v28 }
 0x275   : > { %v1133_v31 = vpop.f32.mrb[4].mxu0 }
 0x276   : > { %v1134_v33 = vadd.f32 %v1133_v31, %v1029_v22  ;;  %v12085_v34 = vpop.f32.mrb[5].mxu0  ;;  %1192 = vrot.lane.b32.xlu0 %v12079_v30, %s14362_s1 }
 0x277   : > { %v1137_v35 = vpop.f32.mrb[6].mxu0 }
 0x278   : > { %v12089_v36 = vpack.c.bf16 %v1134_v33, %v1134_v33  ;;  %v1138_v37 = vadd.f32 %v1137_v35, %v1029_v22  ;;  %v12091_v38 = vpop.f32.mrb[7].mxu0 }
 0x27a   : > { %1194 = vrot.lane.b32.xlu1 %v12089_v36, %s14362_s1  ;;  %1306 = vrot.lane.b32.xlu0 %v12073_v27, %s14360_s17  ;;  %v12097_v39 = vpack.c.bf16 %v1138_v37, %v1138_v37 }
 0x27d   : > { %v1143_v40 = vpop.f32.mrb[8].mxu0 }
 0x27e   : > { %v1144_v41 = vadd.f32 %v1143_v40, %v1029_v22  ;;  %1196 = vrot.lane.b32.xlu1 %v12097_v39, %s14362_s1  ;;  %v12101_v42 = vpop.f32.mrb[9].mxu0 }
 0x27f   : > { %v1147_v43 = vpop.f32.mrb[10].mxu0 }
 0x280   : > { %v12103_v44 = vpack.c.bf16 %v1144_v41, %v1144_v41  ;;  %v1148_v45 = vadd.f32 %v1147_v43, %v1029_v22  ;;  %v12105_v46 = vpop.f32.mrb[11].mxu0 }
 0x282   : > { %v12107_v49 = vpack.c.bf16 %v1148_v45, %v1148_v45  ;;  %1198 = vrot.lane.b32.xlu1 %v12103_v44, %s14362_s1 }
 0x284   : > { %1200 = vrot.lane.b32.xlu0 %v12107_v49, %s14362_s1 }
 0x285   : > { %v1153_v50 = vpop.f32.mrb[12].mxu0 }
 0x286   : > { %v1154_v51 = vadd.f32 %v1153_v50, %v1029_v22  ;;  %v12113_v52 = vpop.f32.mrb[13].mxu0  ;;  %1355 = vrot.lane.b32.xlu1 %v12079_v30, %s14360_s17 }
 0x287   : > { %v1157_v53 = vpop.f32.mrb[14].mxu0 }
 0x288   : > { %v12117_v54 = vpack.c.bf16 %v1154_v51, %v1154_v51  ;;  %v1158_v56 = vadd.f32 %v1157_v53, %v1029_v22  ;;  %v12119_v58 = vpop.f32.mrb[15].mxu0 }
 0x28a   : > { %v12121_v59 = vpack.c.bf16 %v1158_v56, %v1158_v56  ;;  %1202 = vrot.lane.b32.xlu0 %v12117_v54, %s14362_s1 }
 0x28c   : > { %1204 = vrot.lane.b32.xlu1 %v12121_v59, %s14362_s1 }
 0x28e   : > { %1403 = vrot.lane.b32.xlu0 %v12089_v36, %s14360_s17 }
 0x290   : > { %1206 = vrot.lane.b32.xlu1 %v12073_v27, %s14363_s6 }
 0x292   : > { %1208 = vrot.lane.b32.xlu0 %v12079_v30, %s14363_s6 }
 0x294   : > { %1451 = vrot.lane.b32.xlu1 %v12097_v39, %s14360_s17 }
 0x296   : > { %1210 = vrot.lane.b32.xlu0 %v12089_v36, %s14363_s6 }
 0x298   : > { %1212 = vrot.lane.b32.xlu1 %v12097_v39, %s14363_s6 }
 0x29a   : > { %1499 = vrot.lane.b32.xlu0 %v12103_v44, %s14360_s17 }
 0x29c   : > { %1547 = vrot.lane.b32.xlu1 %v12107_v49, %s14360_s17 }
 0x29e   : > { %1214 = vrot.lane.b32.xlu0 %v12103_v44, %s14363_s6 }
 0x2a0   : > { %1216 = vrot.lane.b32.xlu1 %v12107_v49, %s14363_s6 }
 0x2a2   : > { %1595 = vrot.lane.b32.xlu0 %v12117_v54, %s14360_s17 }
 0x2a4   : > { %1643 = vrot.lane.b32.xlu1 %v12121_v59, %s14360_s17 }
 0x2a6   : > { %1218 = vrot.lane.b32.xlu0 %v12117_v54, %s14363_s6 }
 0x2a8   : > { %1220 = vrot.lane.b32.xlu1 %v12121_v59, %s14363_s6 }
 0x2e4   : > { %v12155_v60 = vpop.permute.xlu0 %1190 }
 0x2e5   : > { %v9066_v61 = vcombine.low %v12155_v60, %v12155_v60 }
 0x2e7   : > { %1693 = vrot.lane.b32.xlu0 %v9066_v61, %s14360_s17 }
 0x2e8   : > { %v12160_v62 = vpop.permute.xlu0 %1192 }
 0x2e9   : > { %v9068_v63 = vcombine.low %v12160_v62, %v12160_v62 }
 0x2eb   : > { %1222 = vrot.lane.b32.xlu0 %v12073_v27, %s14355_s27  ;;  %1743 = vrot.lane.b32.xlu1 %v9068_v63, %s14360_s17 }
 0x2ec   : > { %v12167_v1 = vpop.permute.xlu1 %1194  ;;  %v1307_v7 = vpop.permute.xlu0 %1306 }
 0x2ed   : > { %v9070_v2 = vcombine.low %v12167_v1, %v12167_v1  ;;  %v1313_v3 = vsel %vm1308_vm9, %v1307_v7, 0 }
 0x2ee   : > { %9580 = vmatpush3.bf16.xpose.msra.mxu1 %v1313_v3 }
 0x2ef   : > { %1793 = vrot.lane.b32.xlu0 %v9070_v2, %s14360_s17  ;;  %1224 = vrot.lane.b32.xlu1 %v12079_v30, %s14355_s27 }
 0x2f0   : > { %v12175_v5 = vpop.permute.xlu1 %1196  ;;  %9585 = vmatprep.subr.bf16.mxu1 %v14345_v24 }
 0x2f1   : > { %v9072_v8 = vcombine.low %v12175_v5, %v12175_v5 }
 0x2f3   : > { %1226 = vrot.lane.b32.xlu0 %v12089_v36, %s14355_s27  ;;  %1843 = vrot.lane.b32.xlu1 %v9072_v8, %s14360_s17 }
 0x2f4   : > { %v12183_v9 = vpop.permute.xlu1 %1198 }
 0x2f5   : > { %v9074_v6 = vcombine.low %v12183_v9, %v12183_v9  ;;  %9582 = vmatmul.mubr.msk.bf16.vlgmr.msra.gmra.mrb[0].mxu1 %vm1308_vm9, %v12073_v27 }
 0x2f6   : > { %v12189_v12 = vpop.permute.xlu0 %1200  ;;  %9587 = vmatprep.mubr.msk.bf16.mxu1 %vm11341_vm8, %v14345_v24 }
 0x2f7   : > { %1893 = vrot.lane.b32.xlu0 %v9074_v6, %s14360_s17  ;;  %1228 = vrot.lane.b32.xlu1 %v12097_v39, %s14355_s27  ;;  %v9076_v10 = vcombine.low %v12189_v12, %v12189_v12 }
 0x2f8   : > { %v1356_v11 = vpop.permute.xlu1 %1355 }
 0x2f9   : > { %v1361_v15 = vsel %vm1308_vm9, %v1356_v11, 0 }
 0x2fa   : > { %9586 = vmatpush3.bf16.xpose.msra.mxu1 %v1361_v15 }
 0x2fb   : > { %1943 = vrot.lane.b32.xlu1 %v9076_v10, %s14360_s17  ;;  %9591 = vmatprep.subr.bf16.mxu1 %v14345_v24 }
 0x2fc   : > { %v12201_v14 = vpop.permute.xlu0 %1202 }
 0x2fd   : > { %v9078_v16 = vcombine.low %v12201_v14, %v12201_v14 }
 0x2fe   : > { %v12205_v19 = vpop.permute.xlu1 %1204 }
 0x2ff   : > { %v9080_v0 = vcombine.low %v12205_v19, %v12205_v19  ;;  %1993 = vrot.lane.b32.xlu0 %v9078_v16, %s14360_s17 }
 0x300   : > { %v1404_v22 = vpop.permute.xlu0 %1403 }
 0x301   : > { %v1409_v23 = vsel %vm1308_vm9, %v1404_v22, 0  ;;  %9588 = vmatmul.mubr.msk.bf16.vlgmr.msra.gmra.mrb[4].mxu1 %vm1308_vm9, %v12079_v30  ;;  %2043 = vrot.lane.b32.xlu1 %v9080_v0, %s14360_s17 }
 0x302   : > { %v12214_v17 = vpop.permute.xlu1 %1206  ;;  %9592 = vmatpush3.bf16.xpose.msra.mxu1 %v1409_v23  ;;  %9593 = vmatprep.mubr.msk.bf16.mxu1 %vm11341_vm8, %v14345_v24 }
 0x303   : > { %1230 = vrot.lane.b32.xlu0 %v12103_v44, %s14355_s27  ;;  %9597 = vmatprep.subr.bf16.mxu1 %v14345_v24  ;;  %v9082_v27 = vcombine.low %v12214_v17, %v12214_v17 }
 0x304   : > { %v12221_v26 = vpop.permute.xlu0 %1208 }
 0x305   : > { %1232 = vrot.lane.b32.xlu1 %v12107_v49, %s14355_s27  ;;  %v9084_v30 = vcombine.low %v12221_v26, %v12221_v26 }
 0x306   : > { %v1452_v28 = vpop.permute.xlu1 %1451 }
 0x307   : > { %2093 = vrot.lane.b32.xlu0 %v9082_v27, %s14360_s17  ;;  %v1457_v33 = vsel %vm1308_vm9, %v1452_v28, 0 }
 0x308   : > { %v12230_v31 = vpop.permute.xlu0 %1210 }
 0x309   : > { %9594 = vmatmul.mubr.msk.bf16.vlgmr.msra.gmra.mrb[8].mxu1 %vm1308_vm9, %v12089_v36  ;;  %2143 = vrot.lane.b32.xlu1 %v9084_v30, %s14360_s17  ;;  %v9086_v40 = vcombine.low %v12230_v31, %v12230_v31 }
 0x30a   : > { %v12236_v35 = vpop.permute.xlu1 %1212  ;;  %9598 = vmatpush3.bf16.xpose.msra.mxu1 %v1457_v33  ;;  %9599 = vmatprep.mubr.msk.bf16.mxu1 %vm11341_vm8, %v14345_v24 }
 0x30b   : > { %1234 = vrot.lane.b32.xlu0 %v12117_v54, %s14355_s27  ;;  %9603 = vmatprep.subr.bf16.mxu1 %v14345_v24  ;;  %v9088_v41 = vcombine.low %v12236_v35, %v12236_v35 }
 0x30c   : > { %v1500_v37 = vpop.permute.xlu0 %1499 }
 0x30d   : > { %1236 = vrot.lane.b32.xlu1 %v12121_v59, %s14355_s27  ;;  %v1505_v50 = vsel %vm1308_vm9, %v1500_v37, 0 }
 0x30e   : > { %v1548_v36 = vpop.permute.xlu1 %1547 }
 0x30f   : > { %v1553_v43 = vsel %vm1308_vm9, %v1548_v36, 0  ;;  %2193 = vrot.lane.b32.xlu0 %v9086_v40, %s14360_s17 }
 0x310   : > { %9610 = vmatpush3.bf16.xpose.msra.mxu0 %v1553_v43  ;;  %v12251_v45 = vpop.permute.xlu0 %1214 }
 0x311   : > { %v9090_v51 = vcombine.low %v12251_v45, %v12251_v45  ;;  %9600 = vmatmul.mubr.msk.bf16.vlgmr.msra.gmra.mrb[12].mxu1 %vm1308_vm9, %v12097_v39  ;;  %2243 = vrot.lane.b32.xlu1 %v9088_v41, %s14360_s17 }
 0x312   : > { %v12259_v53 = vpop.permute.xlu1 %1216  ;;  %9604 = vmatpush3.bf16.xpose.msra.mxu1 %v1505_v50  ;;  %9621 = vmatprep.subr.bf16.mxu0 %v14345_v24 }
 0x313   : > { %v9092_v56 = vcombine.low %v12259_v53, %v12259_v53  ;;  %2293 = vrot.lane.b32.xlu0 %v9090_v51, %s14360_s17  ;;  %9605 = vmatprep.mubr.msk.bf16.mxu1 %vm11341_vm8, %v14345_v24 }
 0x314   : > { %v1596_v61 = vpop.permute.xlu0 %1595  ;;  %9615 = vmatprep.subr.bf16.mxu1 %v14345_v24 }
 0x315   : > { %2343 = vrot.lane.b32.xlu1 %v9092_v56, %s14360_s17  ;;  %v1601_v2 = vsel %vm1308_vm9, %v1596_v61, 0 }
 0x316   : > { %v1644_v39 = vpop.permute.xlu1 %1643 }
 0x317   : > { %v1649_v63 = vsel %vm1308_vm9, %v1644_v39, 0  ;;  %9612 = vmatmul.mubr.msk.bf16.vlgmr.msra.gmra.mrb[16].mxu0 %vm1308_vm9, %v12107_v49 }
 0x318   : > { %9622 = vmatpush3.bf16.xpose.msra.mxu0 %v1649_v63  ;;  %v12272_v7 = vpop.permute.xlu0 %1218  ;;  %9623 = vmatprep.mubr.msk.bf16.mxu0 %vm11341_vm8, %v14345_v24 }
 0x319   : > { %v9094_v3 = vcombine.low %v12272_v7, %v12272_v7  ;;  %9606 = vmatmul.mubr.msk.bf16.vlgmr.msra.gmra.mrb[16].mxu1 %vm1308_vm9, %v12103_v44  ;;  %9633 = vmatprep.subr.bf16.mxu0 %v14345_v24 }
 0x31a   : > { %v12282_v8 = vpop.permute.xlu1 %1220  ;;  %9616 = vmatpush3.bf16.xpose.msra.mxu1 %v1601_v2  ;;  %9617 = vmatprep.mubr.msk.bf16.mxu1 %vm11341_vm8, %v14345_v24 }
 0x31b   : > { %v9096_v49 = vcombine.low %v12282_v8, %v12282_v8  ;;  %2393 = vrot.lane.b32.xlu0 %v9094_v3, %s14360_s17  ;;  %9627 = vmatprep.subr.bf16.mxu1 %v14345_v24 }
 0x31d   : > { %2443 = vrot.lane.b32.xlu1 %v9096_v49, %s14360_s17 }
 0x31f   : > { %9624 = vmatmul.mubr.msk.bf16.vlgmr.msra.gmra.mrb[20].mxu0 %vm1308_vm9, %v12121_v59 }
 0x320   : > { %9635 = vmatprep.mubr.msk.bf16.mxu0 %vm11341_vm8, %v14345_v24 }
 0x321   : > { %9618 = vmatmul.mubr.msk.bf16.vlgmr.msra.gmra.mrb[20].mxu1 %vm1308_vm9, %v12117_v54 }
 0x322   : > { %9629 = vmatprep.mubr.msk.bf16.mxu1 %vm11341_vm8, %v14345_v24 }
 0x359   : > { %v1694_v44 = vpop.permute.xlu0 %1693 }
 0x35a   : > { %v1699_v6 = vsel %vm1308_vm9, %v1694_v44, 0 }
 0x35b   : > { %9628 = vmatpush3.bf16.xpose.msra.mxu1 %v1699_v6 }
 0x35c   : > { %9639 = vmatprep.subr.bf16.mxu1 %v14345_v24 }
 0x35d   : > { %v1744_v10 = vpop.permute.xlu1 %1743  ;;  %v12301_v11 = vpop.permute.xlu0 %1222 }
 0x35e   : > { %v1749_v59 = vsel %vm1308_vm9, %v1744_v10, 0  ;;  %v9098_v15 = vcombine.low %v12301_v11, %v12301_v11 }
 0x35f   : > { %9634 = vmatpush3.bf16.xpose.msra.mxu0 %v1749_v59 }
 0x360   : > { %2493 = vrot.lane.b32.xlu0 %v9098_v15, %s14360_s17  ;;  %9645 = vmatprep.subr.bf16.mxu0 %v14345_v24 }
 0x361   : > { %v12308_v54 = vpop.permute.xlu1 %1224  ;;  %v1794_v16 = vpop.permute.xlu0 %1793 }
 0x362   : > { %v9100_v0 = vcombine.low %v12308_v54, %v12308_v54  ;;  %v1799_v22 = vsel %vm1308_vm9, %v1794_v16, 0  ;;  %9630 = vmatmul.mubr.msk.bf16.vlgmr.msra.gmra.mrb[24].mxu1 %vm1308_vm9, %v12155_v60 }
 0x363   : > { %9640 = vmatpush3.bf16.xpose.msra.mxu1 %v1799_v22  ;;  %9641 = vmatprep.mubr.msk.bf16.mxu1 %vm11341_vm8, %v14345_v24 }
 0x364   : > { %2543 = vrot.lane.b32.xlu1 %v9100_v0, %s14360_s17  ;;  %9651 = vmatprep.subr.bf16.mxu1 %v14345_v24 }
 0x365   : > { %v1844_v23 = vpop.permute.xlu1 %1843  ;;  %v12319_v27 = vpop.permute.xlu0 %1226 }
 0x366   : > { %v1849_v28 = vsel %vm1308_vm9, %v1844_v23, 0  ;;  %v9102_v30 = vcombine.low %v12319_v27, %v12319_v27  ;;  %9636 = vmatmul.mubr.msk.bf16.vlgmr.msra.gmra.mrb[24].mxu0 %vm1308_vm9, %v12160_v62 }
 0x367   : > { %9646 = vmatpush3.bf16.xpose.msra.mxu0 %v1849_v28  ;;  %9647 = vmatprep.mubr.msk.bf16.mxu0 %vm11341_vm8, %v14345_v24 }
 0x368   : > { %2593 = vrot.lane.b32.xlu0 %v9102_v30, %s14360_s17  ;;  %9657 = vmatprep.subr.bf16.mxu0 %v14345_v24 }
 0x369   : > { %v12330_v60 = vpop.permute.xlu1 %1228  ;;  %v1894_v33 = vpop.permute.xlu0 %1893 }
 0x36a   : > { %v9104_v37 = vcombine.low %v12330_v60, %v12330_v60  ;;  %v1899_v40 = vsel %vm1308_vm9, %v1894_v33, 0  ;;  %9642 = vmatmul.mubr.msk.bf16.vlgmr.msra.gmra.mrb[28].mxu1 %vm1308_vm9, %v12167_v1 }
 0x36b   : > { %9652 = vmatpush3.bf16.xpose.msra.mxu1 %v1899_v40  ;;  %9653 = vmatprep.mubr.msk.bf16.mxu1 %vm11341_vm8, %v14345_v24 }
 0x36c   : > { %2643 = vrot.lane.b32.xlu1 %v9104_v37, %s14360_s17  ;;  %9663 = vmatprep.subr.bf16.mxu1 %v14345_v24 }
 0x36d   : > { %v1944_v62 = vpop.permute.xlu1 %1943 }
 0x36e   : > { %v1949_v36 = vsel %vm1308_vm9, %v1944_v62, 0  ;;  %9648 = vmatmul.mubr.msk.bf16.vlgmr.msra.gmra.mrb[28].mxu0 %vm1308_vm9, %v12175_v5 }
 0x36f   : > { %9658 = vmatpush3.bf16.xpose.msra.mxu0 %v1949_v36  ;;  %9659 = vmatprep.mubr.msk.bf16.mxu0 %vm11341_vm8, %v14345_v24 }
 0x370   : > { %9669 = vmatprep.subr.bf16.mxu0 %v14345_v24 }
 0x371   : > { %v1994_v1 = vpop.permute.xlu0 %1993 }
 0x372   : > { %v1999_v41 = vsel %vm1308_vm9, %v1994_v1, 0  ;;  %9654 = vmatmul.mubr.msk.bf16.vlgmr.msra.gmra.mrb[32].mxu1 %vm1308_vm9, %v12183_v9  ;;  %v1032_v9 = vsub.s32 1, %v12063_v20 }
 0x373   : > { %v2044_v43 = vpop.permute.xlu1 %2043  ;;  %9664 = vmatpush3.bf16.xpose.msra.mxu1 %v1999_v41  ;;  %9665 = vmatprep.mubr.msk.bf16.mxu1 %vm11341_vm8, %v14345_v24 }
 0x374   : > { %v2049_v50 = vsel %vm1308_vm9, %v2044_v43, 0  ;;  %9675 = vmatprep.subr.bf16.mxu1 %v14345_v24  ;;  %v1033_v20 = vrot.slane %v12066_v21, %v1032_v9 }
 0x375   : > { %v12354_v5 = vpop.permute.xlu0 %1230 }
 0x376   : > { %v9106_v51 = vcombine.low %v12354_v5, %v12354_v5  ;;  %9660 = vmatmul.mubr.msk.bf16.vlgmr.msra.gmra.mrb[32].mxu0 %vm1308_vm9, %v12189_v12  ;;  %v1130_v3 = vadd.f32 %v12075_v29, %v1033_v20  ;;  %v1126_v21 = vadd.f32 %v12071_v25, %v1033_v20  ;;  %v1136_v16 = vadd.f32 %v12085_v34, %v1033_v20 }
 0x377   : > { %9670 = vmatpush3.bf16.xpose.msra.mxu0 %v2049_v50  ;;  %v12360_v56 = vpop.permute.xlu1 %1232  ;;  %9671 = vmatprep.mubr.msk.bf16.mxu0 %vm11341_vm8, %v14345_v24  ;;  %v1150_v0 = vadd.f32 %v12105_v46, %v1033_v20  ;;  %v1146_v23 = vadd.f32 %v12101_v42, %v1033_v20  ;;  %v1156_v33 = vadd.f32 %v12113_v52, %v1033_v20 }
 0x378   : > { %v9108_v61 = vcombine.low %v12360_v56, %v12360_v56  ;;  %2693 = vrot.lane.b32.xlu0 %v9106_v51, %s14360_s17  ;;  %9681 = vmatprep.subr.bf16.mxu0 %v14345_v24  ;;  %v12394_v10 = vpack.c.bf16 %v1130_v3, %v1130_v3  ;;  %v12403_v15 = vpack.c.bf16 %v1126_v21, %v1126_v21 }
 0x379   : > { %v2094_v39 = vpop.permute.xlu0 %2093  ;;  %v12419_v34 = vpack.c.bf16 %v1136_v16, %v1136_v16  ;;  %v12425_v46 = vpack.c.bf16 %v1150_v0, %v1150_v0  ;;  %v12435_v42 = vpack.c.bf16 %v1146_v23, %v1146_v23  ;;  %v12450_v52 = vpack.c.bf16 %v1156_v33, %v1156_v33 }
 0x37a   : > { %v2099_v63 = vsel %vm1308_vm9, %v2094_v39, 0  ;;  %2743 = vrot.lane.b32.xlu1 %v9108_v61, %s14360_s17  ;;  %9666 = vmatmul.mubr.msk.bf16.vlgmr.msra.gmra.mrb[36].mxu1 %vm1308_vm9, %v12201_v14 }
 0x37b   : > { %v2144_v12 = vpop.permute.xlu1 %2143  ;;  %9676 = vmatpush3.bf16.xpose.msra.mxu1 %v2099_v63  ;;  %9677 = vmatprep.mubr.msk.bf16.mxu1 %vm11341_vm8, %v14345_v24 }
 0x37c   : > { %9687 = vmatprep.subr.bf16.mxu1 %v14345_v24  ;;  %v2149_v49 = vsel %vm1308_vm9, %v2144_v12, 0 }
 0x37d   : > { %v12377_v2 = vpop.permute.xlu0 %1234 }
 0x37e   : > { %v9110_v44 = vcombine.low %v12377_v2, %v12377_v2  ;;  %9672 = vmatmul.mubr.msk.bf16.vlgmr.msra.gmra.mrb[36].mxu0 %vm1308_vm9, %v12205_v19  ;;  %v1140_v19 = vadd.f32 %v12091_v38, %v1033_v20 }
 0x37f   : > { %9682 = vmatpush3.bf16.xpose.msra.mxu0 %v2149_v49  ;;  %v12385_v14 = vpop.permute.xlu1 %1236  ;;  %9683 = vmatprep.mubr.msk.bf16.mxu0 %vm11341_vm8, %v14345_v24 }
 0x380   : > { %v9112_v6 = vcombine.low %v12385_v14, %v12385_v14  ;;  %2793 = vrot.lane.b32.xlu0 %v9110_v44, %s14360_s17  ;;  %9693 = vmatprep.subr.bf16.mxu0 %v14345_v24  ;;  %v12409_v38 = vpack.c.bf16 %v1140_v19, %v1140_v19 }
 0x381   : > { %v2194_v29 = vpop.permute.xlu0 %2193 }
 0x382   : > { %v2199_v59 = vsel %vm1308_vm9, %v2194_v29, 0  ;;  %2843 = vrot.lane.b32.xlu1 %v9112_v6, %s14360_s17  ;;  %9678 = vmatmul.mubr.msk.bf16.vlgmr.msra.gmra.mrb[40].mxu1 %vm1308_vm9, %v12214_v17  ;;  %s14450_s17 = sld [smem:[#allocation58_spill]] }
 0x383   : > { %v2244_v25 = vpop.permute.xlu1 %2243  ;;  %9688 = vmatpush3.bf16.xpose.msra.mxu1 %v2199_v59  ;;  %9689 = vmatprep.mubr.msk.bf16.mxu1 %vm11341_vm8, %v14345_v24 }
 0x384   : > { %1260 = vrot.lane.b32.xlu0 %v12394_v10, %s14362_s1  ;;  %9699 = vmatprep.subr.bf16.mxu1 %v14345_v24  ;;  %v2249_v17 = vsel %vm1308_vm9, %v2244_v25, 0 }
 0x385   : > { %v2294_v22 = vpop.permute.xlu0 %2293 }
 0x386   : > { %9684 = vmatmul.mubr.msk.bf16.vlgmr.msra.gmra.mrb[40].mxu0 %vm1308_vm9, %v12221_v26  ;;  %1258 = vrot.lane.b32.xlu1 %v12403_v15, %s14362_s1  ;;  %v1160_v26 = vadd.f32 %v12119_v58, %v1033_v20  ;;  %v2299_v28 = vsel %vm1308_vm9, %v2294_v22, 0 }
 0x387   : > { %9694 = vmatpush3.bf16.xpose.msra.mxu0 %v2249_v17  ;;  %9695 = vmatprep.mubr.msk.bf16.mxu0 %vm11341_vm8, %v14345_v24  ;;  %v2344_v30 = vpop.permute.xlu1 %2343 }
 0x388   : > { %1264 = vrot.lane.b32.xlu0 %v12409_v38, %s14362_s1  ;;  %9705 = vmatprep.subr.bf16.mxu0 %v14345_v24  ;;  %v12441_v58 = vpack.c.bf16 %v1160_v26, %v1160_v26  ;;  %v2349_v37 = vsel %vm1308_vm9, %v2344_v30, 0 }
 0x38a   : > { %1262 = vrot.lane.b32.xlu1 %v12419_v34, %s14362_s1  ;;  %9690 = vmatmul.mubr.msk.bf16.vlgmr.msra.gmra.mrb[44].mxu1 %vm1308_vm9, %v12230_v31 }
 0x38b   : > { %9700 = vmatpush3.bf16.xpose.msra.mxu1 %v2299_v28  ;;  %9701 = vmatprep.mubr.msk.bf16.mxu1 %vm11341_vm8, %v14345_v24 }
 0x38c   : > { %1268 = vrot.lane.b32.xlu0 %v12425_v46, %s14362_s1  ;;  %9711 = vmatprep.subr.bf16.mxu1 %v14345_v24 }
 0x38d   : > { %v2394_v31 = vpop.permute.xlu0 %2393 }
 0x38e   : > { %1266 = vrot.lane.b32.xlu1 %v12435_v42, %s14362_s1  ;;  %9696 = vmatmul.mubr.msk.bf16.vlgmr.msra.gmra.mrb[44].mxu0 %vm1308_vm9, %v12236_v35  ;;  %v2399_v40 = vsel %vm1308_vm9, %v2394_v31, 0 }
 0x38f   : > { %9706 = vmatpush3.bf16.xpose.msra.mxu0 %v2349_v37  ;;  %9707 = vmatprep.mubr.msk.bf16.mxu0 %vm11341_vm8, %v14345_v24  ;;  %v2444_v35 = vpop.permute.xlu1 %2443 }
 0x390   : > { %1272 = vrot.lane.b32.xlu0 %v12441_v58, %s14362_s1  ;;  %9717 = vmatprep.subr.bf16.mxu0 %v14345_v24  ;;  %v2449_v62 = vsel %vm1308_vm9, %v2444_v35, 0 }
 0x392   : > { %1270 = vrot.lane.b32.xlu1 %v12450_v52, %s14362_s1  ;;  %9702 = vmatmul.mubr.msk.bf16.vlgmr.msra.gmra.mrb[48].mxu1 %vm1308_vm9, %v12251_v45 }
 0x393   : > { %9712 = vmatpush3.bf16.xpose.msra.mxu1 %v2399_v40  ;;  %9713 = vmatprep.mubr.msk.bf16.mxu1 %vm11341_vm8, %v14345_v24 }
 0x394   : > { %1276 = vrot.lane.b32.xlu0 %v12394_v10, %s14363_s6  ;;  %9723 = vmatprep.subr.bf16.mxu1 %v14345_v24 }
 0x396   : > { %1274 = vrot.lane.b32.xlu1 %v12403_v15, %s14363_s6  ;;  %9708 = vmatmul.mubr.msk.bf16.vlgmr.msra.gmra.mrb[48].mxu0 %vm1308_vm9, %v12259_v53 }
 0x397   : > { %9718 = vmatpush3.bf16.xpose.msra.mxu0 %v2449_v62  ;;  %9719 = vmatprep.mubr.msk.bf16.mxu0 %vm11341_vm8, %v14345_v24 }
 0x398   : > { %1280 = vrot.lane.b32.xlu0 %v12409_v38, %s14363_s6  ;;  %9729 = vmatprep.subr.bf16.mxu0 %v14345_v24 }
 0x39a   : > { %1278 = vrot.lane.b32.xlu1 %v12419_v34, %s14363_s6  ;;  %9714 = vmatmul.mubr.msk.bf16.vlgmr.msra.gmra.mrb[52].mxu1 %vm1308_vm9, %v12272_v7 }
 0x39b   : > { %9725 = vmatprep.mubr.msk.bf16.mxu1 %vm11341_vm8, %v14345_v24 }
 0x39c   : > { %1284 = vrot.lane.b32.xlu0 %v12425_v46, %s14363_s6 }
 0x39e   : > { %1282 = vrot.lane.b32.xlu1 %v12435_v42, %s14363_s6  ;;  %9720 = vmatmul.mubr.msk.bf16.vlgmr.msra.gmra.mrb[52].mxu0 %vm1308_vm9, %v12282_v8 }
 0x39f   : > { %9731 = vmatprep.mubr.msk.bf16.mxu0 %vm11341_vm8, %v14345_v24 }
 0x3a0   : > { %1290 = vrot.lane.b32.xlu0 %v12403_v15, %s14355_s27 }
 0x3a2   : > { %1286 = vrot.lane.b32.xlu1 %v12450_v52, %s14363_s6 }
 0x3a6   : > { %1288 = vrot.lane.b32.xlu1 %v12441_v58, %s14363_s6 }
 0x3aa   : > { %1292 = vrot.lane.b32.xlu1 %v12394_v10, %s14355_s27 }
 0x3c8   : > { %v12497_v45 = vpop.f32.mrb[0].mxu1 }
 0x3c9   : > { %v9583_v53 = vpop.f32.mrb[1].mxu1  ;;  %v2892_v7 = vsel %vm2891_vm10, %v12497_v45, -inf }
 0x3ca   : > { %v1352_v8 = vpop.f32.mrb[2].mxu1  ;;  %2893 = vmax.xlane.f32.xlu0 %v2892_v7 }
 0x3cb   : > { %v9584_v36 = vpop.f32.mrb[3].mxu1 }
 0x3d2   : > { %v2494_v1 = vpop.permute.xlu0 %2493 }
 0x3d3   : > { %v2499_v41 = vsel %vm1308_vm9, %v2494_v1, 0 }
 0x3d4   : > { %v12502_v43 = vpop.f32.mrb[4].mxu1  ;;  %9724 = vmatpush3.bf16.xpose.msra.mxu1 %v2499_v41 }
 0x3d5   : > { %v9589_v50 = vpop.f32.mrb[5].mxu1  ;;  %v2895_v51 = vsel %vm2891_vm10, %v12502_v43, -inf  ;;  %9735 = vmatprep.subr.bf16.mxu1 %v14345_v24 }
 0x3d6   : > { %v1400_v9 = vpop.f32.mrb[6].mxu1  ;;  %2896 = vmax.xlane.f32.xlu1 %v2895_v51  ;;  %v2544_v61 = vpop.permute.xlu1 %2543 }
 0x3d7   : > { %v2549_v39 = vsel %vm1308_vm9, %v2544_v61, 0  ;;  %v9590_v63 = vpop.f32.mrb[7].mxu1 }
 0x3d8   : > { %9730 = vmatpush3.bf16.xpose.msra.mxu0 %v2549_v39 }
 0x3d9   : > { %9741 = vmatprep.subr.bf16.mxu0 %v14345_v24 }
 0x3da   : > { %v2594_v12 = vpop.permute.xlu0 %2593 }
 0x3db   : > { %v2599_v20 = vsel %vm1308_vm9, %v2594_v12, 0  ;;  %9726 = vmatmul.mubr.msk.bf16.vlgmr.msra.gmra.mrb[56].mxu1 %vm1308_vm9, %v12301_v11  ;;  %v3327_v12 = vsel %vm3279_vm11, %v12394_v10, 0 }
 0x3dc   : > { %v12512_v3 = vpop.f32.mrb[8].mxu1  ;;  %9736 = vmatpush3.bf16.xpose.msra.mxu1 %v2599_v20  ;;  %9737 = vmatprep.mubr.msk.bf16.mxu1 %vm11341_vm8, %v14345_v24 }
 0x3dd   : > { %v9595_v49 = vpop.f32.mrb[9].mxu1  ;;  %v2898_v44 = vsel %vm2891_vm10, %v12512_v3, -inf  ;;  %9747 = vmatprep.subr.bf16.mxu1 %v14345_v24 }
 0x3de   : > { %v1448_v21 = vpop.f32.mrb[10].mxu1  ;;  %v2644_v6 = vpop.permute.xlu1 %2643  ;;  %2899 = vmax.xlane.f32.xlu0 %v2898_v44 }
 0x3df   : > { %v2649_v29 = vsel %vm1308_vm9, %v2644_v6, 0  ;;  %v9596_v19 = vpop.f32.mrb[11].mxu1  ;;  %9732 = vmatmul.mubr.msk.bf16.vlgmr.msra.gmra.mrb[56].mxu0 %vm1308_vm9, %v12308_v54 }
 0x3e0   : > { %9742 = vmatpush3.bf16.xpose.msra.mxu0 %v2649_v29  ;;  %9743 = vmatprep.mubr.msk.bf16.mxu0 %vm11341_vm8, %v14345_v24 }
 0x3e1   : > { %9753 = vmatprep.subr.bf16.mxu0 %v14345_v24 }
 0x3e3   : > { %9738 = vmatmul.mubr.msk.bf16.vlgmr.msra.gmra.mrb[60].mxu1 %vm1308_vm9, %v12319_v27 }
 0x3e4   : > { %v12527_v11 = vpop.f32.mrb[12].mxu1  ;;  %9749 = vmatprep.mubr.msk.bf16.mxu1 %vm11341_vm8, %v14345_v24 }
 0x3e5   : > { %v9601_v59 = vpop.f32.mrb[13].mxu1  ;;  %v2901_v40 = vsel %vm2891_vm10, %v12527_v11, -inf }
 0x3e6   : > { %v1496_v25 = vpop.f32.mrb[14].mxu1 }
 0x3e7   : > { %v9602_v16 = vpop.f32.mrb[15].mxu1  ;;  %9744 = vmatmul.mubr.msk.bf16.vlgmr.msra.gmra.mrb[60].mxu0 %vm1308_vm9, %v12330_v60 }
 0x3e8   : > { %9755 = vmatprep.mubr.msk.bf16.mxu0 %vm11341_vm8, %v14345_v24 }
 0x3ea   : > { %v12535_v54 = vpop.f32.mrb[16].mxu0  ;;  %v2694_v0 = vpop.permute.xlu0 %2693 }
 0x3eb   : > { %v2699_v17 = vsel %vm1308_vm9, %v2694_v0, 0  ;;  %v9613_v27 = vpop.f32.mrb[17].mxu0  ;;  %v2907_v22 = vsel %vm2891_vm10, %v12535_v54, -inf }
 0x3ec   : > { %v1592_v23 = vpop.f32.mrb[18].mxu0  ;;  %v2744_v26 = vpop.permute.xlu1 %2743  ;;  %2908 = vmax.xlane.f32.xlu0 %v2907_v22  ;;  %9748 = vmatpush3.bf16.xpose.msra.mxu1 %v2699_v17 }
 0x3ed   : > { %v2749_v28 = vsel %vm1308_vm9, %v2744_v26, 0  ;;  %v12541_v30 = vpop.f32.mrb[16].mxu1  ;;  %v9614_v60 = vpop.f32.mrb[19].mxu0  ;;  %9759 = vmatprep.subr.bf16.mxu1 %v14345_v24 }
 0x3ee   : > { %v9607_v33 = vpop.f32.mrb[17].mxu1  ;;  %9754 = vmatpush3.bf16.xpose.msra.mxu0 %v2749_v28  ;;  %v2904_v37 = vsel %vm2891_vm10, %v12541_v30, -inf }
 0x3ef   : > { %2905 = vmax.xlane.f32.xlu1 %v2904_v37  ;;  %v1544_v31 = vpop.f32.mrb[18].mxu1  ;;  %9765 = vmatprep.subr.bf16.mxu0 %v14345_v24 }
 0x3f0   : > { %v9608_v35 = vpop.f32.mrb[19].mxu1  ;;  %2902 = vmax.xlane.f32.xlu0 %v2901_v40 }
 0x3f2   : > { %v12549_v62 = vpop.f32.mrb[20].mxu0  ;;  %v2794_v53 = vpop.permute.xlu0 %2793 }
 0x3f3   : > { %v2799_v7 = vsel %vm1308_vm9, %v2794_v53, 0  ;;  %v9625_v8 = vpop.f32.mrb[21].mxu0  ;;  %9750 = vmatmul.mubr.msk.bf16.vlgmr.msra.gmra.mrb[64].mxu1 %vm1308_vm9, %v12354_v5  ;;  %v2913_v36 = vsel %vm2891_vm10, %v12549_v62, -inf }
 0x3f4   : > { %v1688_v1 = vpop.f32.mrb[22].mxu0  ;;  %v2844_v41 = vpop.permute.xlu1 %2843  ;;  %2914 = vmax.xlane.f32.xlu0 %v2913_v36  ;;  %9760 = vmatpush3.bf16.xpose.msra.mxu1 %v2799_v7 }
 0x3f5   : > { %v2849_v50 = vsel %vm1308_vm9, %v2844_v41, 0  ;;  %v12557_v51 = vpop.f32.mrb[20].mxu1  ;;  %v9626_v9 = vpop.f32.mrb[23].mxu0  ;;  %9756 = vmatmul.mubr.msk.bf16.vlgmr.msra.gmra.mrb[64].mxu0 %vm1308_vm9, %v12360_v56  ;;  %9761 = vmatprep.mubr.msk.bf16.mxu1 %vm11341_vm8, %v14345_v24  ;;  %v3281_v56 = vsel %vm3279_vm11, %v12403_v15, 0 }
 0x3f6   : > { %v9619_v61 = vpop.f32.mrb[21].mxu1  ;;  %9766 = vmatpush3.bf16.xpose.msra.mxu0 %v2849_v50  ;;  %v2910_v5 = vsel %vm2891_vm10, %v12557_v51, -inf  ;;  %9771 = vmatprep.subr.bf16.mxu1 %v14345_v24  ;;  %v12607_v53 = vpop.permute.xlu0 %1260 }
 0x3f7   : > { %2911 = vmax.xlane.f32.xlu1 %v2910_v5  ;;  %v1640_v39 = vpop.f32.mrb[22].mxu1  ;;  %9767 = vmatprep.mubr.msk.bf16.mxu0 %vm11341_vm8, %v14345_v24 }
 0x3f8   : > { %v9620_v63 = vpop.f32.mrb[23].mxu1  ;;  %9777 = vmatprep.subr.bf16.mxu0 %v14345_v24  ;;  %v12595_v17 = vpop.permute.xlu1 %1258 }
 0x3fa   : > { %v12619_v39 = vpop.permute.xlu0 %1264 }
 0x3fb   : > { %9762 = vmatmul.mubr.msk.bf16.vlgmr.msra.gmra.mrb[68].mxu1 %vm1308_vm9, %v12377_v2 }
 0x3fc   : > { %9772 = vmatpush3.bf16.msra.mxu1 %v3281_v56  ;;  %9773 = vmatprep.mubr.msk.bf16.mxu1 %vm11341_vm8, %v14345_v24  ;;  %v12605_v31 = vpop.permute.xlu1 %1262 }
 0x3fd   : > { %9768 = vmatmul.mubr.msk.bf16.vlgmr.msra.gmra.mrb[68].mxu0 %vm1308_vm9, %v12385_v14  ;;  %9783 = vmatprep.subr.bf16.mxu1 %v14345_v24 }
 0x3fe   : > { %9778 = vmatpush3.bf16.msra.mxu0 %v3327_v12  ;;  %9779 = vmatprep.mubr.msk.bf16.mxu0 %vm11341_vm8, %v14345_v24 }
 0x3ff   : > { %9789 = vmatprep.subr.bf16.mxu0 %v14345_v24 }
 0x400   : > { %v12613_v50 = vpop.permute.xlu1 %1266 }
 0x435   : > { %v12583_v2 = vpop.f32.mrb[24].mxu1 }
 0x436   : > { %v9631_v15 = vpop.f32.mrb[25].mxu1  ;;  %v2916_v20 = vsel %vm2891_vm10, %v12583_v2, -inf }
 0x437   : > { %2917 = vmax.xlane.f32.xlu1 %v2916_v20  ;;  %v1738_v49 = vpop.f32.mrb[26].mxu1 }
 0x438   : > { %v9632_v14 = vpop.f32.mrb[27].mxu1  ;;  %v12625_v49 = vpop.permute.xlu1 %1270 }
 0x439   : > { %v12587_v44 = vpop.f32.mrb[24].mxu0 }
 0x43a   : > { %v9637_v10 = vpop.f32.mrb[25].mxu0  ;;  %v2919_v21 = vsel %vm2891_vm10, %v12587_v44, -inf }
 0x43b   : > { %v1788_v6 = vpop.f32.mrb[26].mxu0  ;;  %2920 = vmax.xlane.f32.xlu0 %v2919_v21  ;;  %v12627_v21 = vpop.permute.xlu0 %1268 }
 0x43c   : > { %v9638_v29 = vpop.f32.mrb[27].mxu0 }
 0x43d   : > { %v12591_v19 = vpop.f32.mrb[28].mxu1 }
 0x43e   : > { %v9643_v59 = vpop.f32.mrb[29].mxu1  ;;  %v2922_v25 = vsel %vm2891_vm10, %v12591_v19, -inf }
 0x43f   : > { %2923 = vmax.xlane.f32.xlu1 %v2922_v25  ;;  %v1838_v16 = vpop.f32.mrb[30].mxu1 }
 0x440   : > { %v9644_v0 = vpop.f32.mrb[31].mxu1 }
 0x441   : > { %v12597_v27 = vpop.f32.mrb[28].mxu0  ;;  %v12633_v0 = vpop.permute.xlu1 %1274 }
 0x442   : > { %v9649_v22 = vpop.f32.mrb[29].mxu0  ;;  %v2925_v23 = vsel %vm2891_vm10, %v12597_v27, -inf }
 0x443   : > { %v1888_v26 = vpop.f32.mrb[30].mxu0  ;;  %2926 = vmax.xlane.f32.xlu0 %v2925_v23 }
 0x444   : > { %v9650_v28 = vpop.f32.mrb[31].mxu0 }
 0x445   : > { %v12601_v60 = vpop.f32.mrb[32].mxu1  ;;  %v12639_v28 = vpop.permute.xlu0 %1272 }
 0x446   : > { %v9655_v33 = vpop.f32.mrb[33].mxu1  ;;  %v2928_v37 = vsel %vm2891_vm10, %v12601_v60, -inf }
 0x447   : > { %2929 = vmax.xlane.f32.xlu1 %v2928_v37  ;;  %v1938_v40 = vpop.f32.mrb[34].mxu1 }
 0x448   : > { %v9656_v35 = vpop.f32.mrb[35].mxu1 }
 0x449   : > { %v12609_v7 = vpop.f32.mrb[32].mxu0 }
 0x44a   : > { %v9661_v8 = vpop.f32.mrb[33].mxu0  ;;  %v2931_v36 = vsel %vm2891_vm10, %v12609_v7, -inf }
 0x44b   : > { %v1988_v1 = vpop.f32.mrb[34].mxu0  ;;  %2932 = vmax.xlane.f32.xlu0 %v2931_v36  ;;  %v12643_v8 = vpop.permute.xlu1 %1278 }
 0x44c   : > { %v9662_v41 = vpop.f32.mrb[35].mxu0 }
 0x44d   : > { %v12615_v9 = vpop.f32.mrb[36].mxu1  ;;  %v12645_v41 = vpop.permute.xlu0 %1276 }
 0x44e   : > { %v9667_v61 = vpop.f32.mrb[37].mxu1  ;;  %v2934_v5 = vsel %vm2891_vm10, %v12615_v9, -inf }
 0x44f   : > { %2935 = vmax.xlane.f32.xlu1 %v2934_v5  ;;  %v2038_v63 = vpop.f32.mrb[38].mxu1 }
 0x450   : > { %v9668_v56 = vpop.f32.mrb[39].mxu1 }
 0x451   : > { %v12621_v12 = vpop.f32.mrb[36].mxu0 }
 0x452   : > { %v9673_v15 = vpop.f32.mrb[37].mxu0  ;;  %v2937_v20 = vsel %vm2891_vm10, %v12621_v12, -inf }
 0x453   : > { %v2088_v14 = vpop.f32.mrb[38].mxu0  ;;  %2938 = vmax.xlane.f32.xlu0 %v2937_v20  ;;  %v12649_v15 = vpop.permute.xlu1 %1282 }
 0x454   : > { %v9674_v10 = vpop.f32.mrb[39].mxu0 }
 0x455   : > { %v12629_v6 = vpop.f32.mrb[40].mxu1  ;;  %v12653_v10 = vpop.permute.xlu0 %1280 }
 0x456   : > { %v9679_v29 = vpop.f32.mrb[41].mxu1  ;;  %v2940_v59 = vsel %vm2891_vm10, %v12629_v6, -inf }
 0x457   : > { %2941 = vmax.xlane.f32.xlu1 %v2940_v59  ;;  %v2138_v25 = vpop.f32.mrb[42].mxu1 }
 0x458   : > { %v9680_v16 = vpop.f32.mrb[43].mxu1 }
 0x459   : > { %v12635_v22 = vpop.f32.mrb[40].mxu0 }
 0x45a   : > { %v9685_v23 = vpop.f32.mrb[41].mxu0  ;;  %v2943_v26 = vsel %vm2891_vm10, %v12635_v22, -inf }
 0x45b   : > { %v2188_v33 = vpop.f32.mrb[42].mxu0  ;;  %2944 = vmax.xlane.f32.xlu0 %v2943_v26  ;;  %v12659_v23 = vpop.permute.xlu1 %1286 }
 0x45c   : > { %v9686_v37 = vpop.f32.mrb[43].mxu0  ;;  %14422 = vst [vmem:[#allocation39_spill] sm:$0xff] %v12659_v23 }
 0x45d   : > { %v12641_v40 = vpop.f32.mrb[44].mxu1  ;;  %v12661_v37 = vpop.permute.xlu0 %1284 }
 0x45e   : > { %v9691_v35 = vpop.f32.mrb[45].mxu1  ;;  %14423 = vst [vmem:[#allocation40_spill] sm:$0xff] %v12661_v37  ;;  %v2946_v32 = vsel %vm2891_vm10, %v12641_v40, -inf }
 0x45f   : > { %v2238_v36 = vpop.f32.mrb[46].mxu1 }
 0x460   : > { %v9692_v1 = vpop.f32.mrb[47].mxu1 }
 0x461   : > { %v12647_v61 = vpop.f32.mrb[44].mxu0 }
 0x462   : > { %v9697_v5 = vpop.f32.mrb[45].mxu0 }
 0x463   : > { %v2288_v63 = vpop.f32.mrb[46].mxu0 }
 0x464   : > { %v9698_v56 = vpop.f32.mrb[47].mxu0  ;;  %v12665_v63 = vpop.permute.xlu1 %1288 }
 0x465   : > { %v12651_v20 = vpop.f32.mrb[48].mxu1  ;;  %14424 = vst [vmem:[#allocation41_spill] sm:$0xff] %v12665_v63 }
 0x466   : > { %v9703_v14 = vpop.f32.mrb[49].mxu1 }
 0x467   : > { %v2338_v29 = vpop.f32.mrb[50].mxu1 }
 0x468   : > { %1296 = vrot.lane.b32.xlu1 %v12409_v38, %s14355_s27  ;;  %v9704_v59 = vpop.f32.mrb[51].mxu1  ;;  %v12671_v29 = vpop.permute.xlu0 %1290 }
 0x469   : > { %v12657_v25 = vpop.f32.mrb[48].mxu0  ;;  %14425 = vst [vmem:[#allocation42_spill] sm:$0xff] %v12671_v29 }
 0x46a   : > { %v9709_v16 = vpop.f32.mrb[49].mxu0 }
 0x46b   : > { %v2388_v26 = vpop.f32.mrb[50].mxu0 }
 0x46c   : > { %v9710_v33 = vpop.f32.mrb[51].mxu0  ;;  %v12673_v26 = vpop.permute.xlu1 %1292 }
 0x46d   : > { %v12663_v35 = vpop.f32.mrb[52].mxu1  ;;  %14426 = vst [vmem:[#allocation43_spill] sm:$0xff] %v12673_v26  ;;  %v2894_v33 = vpop.xlane.xlu0 %2893 }
 0x46e   : > { %v9715_v36 = vpop.f32.mrb[53].mxu1  ;;  %v2988_v24 = vsub.f32 %v12497_v45, %v2894_v33 }
 0x46f   : > { %v2438_v1 = vpop.f32.mrb[54].mxu1 }
 0x470   : > { %v9716_v5 = vpop.f32.mrb[55].mxu1  ;;  %v2897_v36 = vpop.xlane.xlu1 %2896  ;;  %v3020_v1 = vmul.f32 1.442695, %v2988_v24 }
 0x471   : > { %v12667_v56 = vpop.f32.mrb[52].mxu0  ;;  %1294 = vrot.lane.b32.xlu0 %v12419_v34, %s14355_s27  ;;  %v2989_v5 = vsub.f32 %v12502_v43, %v2897_v36  ;;  %v2900_v18 = vpop.xlane.xlu0 %2899  ;;  %v2949_v43 = vsel %vm2891_vm10, %v12647_v61, -inf }
 0x472   : > { %v9721_v14 = vpop.f32.mrb[53].mxu0  ;;  %10619 = vpow2.f32 %v3020_v1  ;;  %v2961_v33 = vsel %vm2891_vm10, %v12667_v56, -inf }
 0x473   : > { %v2488_v59 = vpop.f32.mrb[54].mxu0  ;;  %v3022_v57 = vmul.f32 1.442695, %v2989_v5  ;;  %v2990_v14 = vsub.f32 %v12512_v3, %v2900_v18 }
 0x474   : > { %v9722_v16 = vpop.f32.mrb[55].mxu0 }
 0x475   : > { %10621 = vpow2.f32 %v3022_v57  ;;  %v3024_v48 = vmul.f32 1.442695, %v2990_v14 }
 0x477   : > { %10623 = vpow2.f32 %v3024_v48  ;;  %v2955_v48 = vsel %vm2891_vm10, %v12657_v25, -inf }
 0x479   : > { %v2909_v13 = vpop.xlane.xlu0 %2908 }
 0x47a   : > { %v2993_v59 = vsub.f32 %v12535_v54, %v2909_v13 }
 0x47c   : > { %v12681_v55 = vpop.eup %10619  ;;  %v3030_v24 = vmul.f32 1.442695, %v2993_v59 }
 0x47d   : > { %v2903_v16 = vpop.xlane.xlu0 %2902  ;;  %v3084_v57 = vsel %vm2891_vm10, %v12681_v55, 0.0 }
 0x47e   : > { %v2991_v45 = vsub.f32 %v12527_v11, %v2903_v16  ;;  %10625 = vpow2.f32 %v3030_v24  ;;  %v2958_v11 = vsel %vm2891_vm10, %v12663_v35, -inf  ;;  %v2906_v24 = vpop.xlane.xlu1 %2905 }
 0x47f   : > { %v12688_v18 = vpop.eup %10621 }
 0x480   : > { %v3026_v13 = vmul.f32 1.442695, %v2991_v45  ;;  %v3087_v3 = vsel %vm2891_vm10, %v12688_v18, 0.0 }
 0x481   : > { %v12698_v54 = vpop.eup %10623  ;;  %v2915_v5 = vpop.xlane.xlu0 %2914 }
 0x482   : > { %10627 = vpow2.f32 %v3026_v13  ;;  %v3090_v36 = vsel %vm2891_vm10, %v12698_v54, 0.0  ;;  %v2995_v16 = vsub.f32 %v12549_v62, %v2915_v5 }
 0x488   : > { %v12704_v1 = vpop.eup %10625 }
 0x489   : > { %v3099_v14 = vsel %vm2891_vm10, %v12704_v1, 0.0 }
 0x48c   : > { %2947 = vmax.xlane.f32.xlu1 %v2946_v32  ;;  %v2952_v32 = vsel %vm2891_vm10, %v12651_v20, -inf  ;;  %v12708_v59 = vpop.eup %10627 }
 0x48d   : > { %v3093_v45 = vsel %vm2891_vm10, %v12708_v59, 0.0 }
 0x490   : > { %2950 = vmax.xlane.f32.xlu0 %v2949_v43  ;;  %3085 = vadd.xlane.f32.xlu1 %v3084_v57  ;;  %v2992_v43 = vsub.f32 %v12541_v30, %v2906_v24  ;;  %v3034_v57 = vmul.f32 1.442695, %v2995_v16 }
 0x492   : > { %v3028_v13 = vmul.f32 1.442695, %v2992_v43  ;;  %10629 = vpow2.f32 %v3034_v57 }
 0x494   : > { %3088 = vadd.xlane.f32.xlu0 %v3087_v3  ;;  %2953 = vmax.xlane.f32.xlu1 %v2952_v32  ;;  %10631 = vpow2.f32 %v3028_v13 }
 0x498   : > { %2956 = vmax.xlane.f32.xlu0 %v2955_v48  ;;  %2959 = vmax.xlane.f32.xlu1 %v2958_v11 }
 0x49c   : > { %2962 = vmax.xlane.f32.xlu0 %v2961_v33  ;;  %3091 = vadd.xlane.f32.xlu1 %v3090_v36  ;;  %v2912_v36 = vpop.xlane.xlu1 %2911 }
 0x4a0   : > { %3100 = vadd.xlane.f32.xlu0 %v3099_v14  ;;  %v12722_v14 = vpop.eup %10629 }
 0x4a4   : > { %3094 = vadd.xlane.f32.xlu0 %v3093_v45  ;;  %v2994_v45 = vsub.f32 %v12557_v51, %v2912_v36 }
 0x4ae   : > { %v12714_v3 = vpop.f32.mrb[56].mxu1 }
 0x4af   : > { %v9727_v32 = vpop.f32.mrb[57].mxu1  ;;  %v2964_v48 = vsel %vm2891_vm10, %v12714_v3, -inf }
 0x4b0   : > { %v2538_v11 = vpop.f32.mrb[58].mxu1  ;;  %2965 = vmax.xlane.f32.xlu1 %v2964_v48  ;;  %v3105_v32 = vsel %vm2891_vm10, %v12722_v14, 0.0  ;;  %v12731_v48 = vpop.eup %10631 }
 0x4b1   : > { %v9728_v62 = vpop.f32.mrb[59].mxu1  ;;  %v3096_v51 = vsel %vm2891_vm10, %v12731_v48, 0.0 }
 0x4b2   : > { %v12718_v33 = vpop.f32.mrb[56].mxu0 }
 0x4b3   : > { %v9733_v5 = vpop.f32.mrb[57].mxu0  ;;  %v2967_v30 = vsel %vm2891_vm10, %v12718_v33, -inf }
 0x4b4   : > { %v2588_v16 = vpop.f32.mrb[58].mxu0  ;;  %2968 = vmax.xlane.f32.xlu0 %v2967_v30  ;;  %v3032_v5 = vmul.f32 1.442695, %v2994_v45 }
 0x4b5   : > { %v9734_v24 = vpop.f32.mrb[59].mxu0 }
 0x4b6   : > { %v12725_v43 = vpop.f32.mrb[60].mxu1  ;;  %10633 = vpow2.f32 %v3032_v5 }
 0x4b7   : > { %v9739_v57 = vpop.f32.mrb[61].mxu1  ;;  %v2970_v13 = vsel %vm2891_vm10, %v12725_v43, -inf }
 0x4b8   : > { %v2638_v11 = vpop.f32.mrb[62].mxu1  ;;  %2971 = vmax.xlane.f32.xlu1 %v2970_v13  ;;  %3106 = vadd.xlane.f32.xlu0 %v3105_v32 }
 0x4b9   : > { %v9740_v62 = vpop.f32.mrb[63].mxu1 }
 0x4ba   : > { %v12733_v30 = vpop.f32.mrb[60].mxu0 }
 0x4bb   : > { %v9745_v16 = vpop.f32.mrb[61].mxu0  ;;  %v2973_v36 = vsel %vm2891_vm10, %v12733_v30, -inf }
 0x4bc   : > { %v2688_v24 = vpop.f32.mrb[62].mxu0  ;;  %3097 = vadd.xlane.f32.xlu1 %v3096_v51  ;;  %2974 = vmax.xlane.f32.xlu0 %v2973_v36 }
 0x4bd   : > { %v9746_v57 = vpop.f32.mrb[63].mxu0 }
 0x4c0   : > { %v12744_v16 = vpop.eup %10633 }
 0x4c1   : > { %v3102_v57 = vsel %vm2891_vm10, %v12744_v16, 0.0 }
 0x4c4   : > { %v2918_v4 = vpop.xlane.xlu1 %2917 }
 0x4c5   : > { %v2996_v13 = vsub.f32 %v12583_v2, %v2918_v4 }
 0x4c6   : > { %v12740_v32 = vpop.f32.mrb[64].mxu1 }
 0x4c7   : > { %v3036_v45 = vmul.f32 1.442695, %v2996_v13  ;;  %v9751_v11 = vpop.f32.mrb[65].mxu1  ;;  %v2976_v62 = vsel %vm2891_vm10, %v12740_v32, -inf }
 0x4c8   : > { %v2738_v47 = vpop.f32.mrb[66].mxu1  ;;  %v12746_v26 = vpop.f32.mrb[64].mxu0  ;;  %2977 = vmax.xlane.f32.xlu1 %v2976_v62 }
 0x4c9   : > { %10635 = vpow2.f32 %v3036_v45  ;;  %v2921_v51 = vpop.xlane.xlu0 %2920  ;;  %v9752_v36 = vpop.f32.mrb[67].mxu1  ;;  %v2979_v5 = vsel %vm2891_vm10, %v12746_v26, -inf }
 0x4ca   : > { %v2997_v4 = vsub.f32 %v12587_v44, %v2921_v51  ;;  %v9757_v2 = vpop.f32.mrb[65].mxu0  ;;  %2980 = vmax.xlane.f32.xlu0 %v2979_v5 }
 0x4cb   : > { %v2788_v24 = vpop.f32.mrb[66].mxu0 }
 0x4cc   : > { %v3038_v13 = vmul.f32 1.442695, %v2997_v4  ;;  %v9758_v11 = vpop.f32.mrb[67].mxu0  ;;  %v2924_v47 = vpop.xlane.xlu1 %2923  ;;  %3103 = vadd.xlane.f32.xlu1 %v3102_v57 }
 0x4cd   : > { %v2998_v62 = vsub.f32 %v12591_v19, %v2924_v47 }
 0x4ce   : > { %10637 = vpow2.f32 %v3038_v13  ;;  %v12754_v45 = vpop.f32.mrb[68].mxu1 }
 0x4cf   : > { %v3040_v36 = vmul.f32 1.442695, %v2998_v62  ;;  %v9763_v29 = vpop.f32.mrb[69].mxu1  ;;  %v2982_v44 = vsel %vm2891_vm10, %v12754_v45, -inf }
 0x4d0   : > { %v2838_v51 = vpop.f32.mrb[70].mxu1  ;;  %v12758_v5 = vpop.f32.mrb[68].mxu0  ;;  %2983 = vmax.xlane.f32.xlu1 %v2982_v44 }
 0x4d1   : > { %10639 = vpow2.f32 %v3040_v36  ;;  %v2927_v2 = vpop.xlane.xlu0 %2926  ;;  %v9764_v4 = vpop.f32.mrb[71].mxu1  ;;  %v2985_v24 = vsel %vm2891_vm10, %v12758_v5, -inf }
 0x4d2   : > { %v2999_v19 = vsub.f32 %v12597_v27, %v2927_v2  ;;  %v9769_v57 = vpop.f32.mrb[69].mxu0  ;;  %2986 = vmax.xlane.f32.xlu0 %v2985_v24 }
 0x4d3   : > { %v12763_v13 = vpop.eup %10635  ;;  %v2888_v29 = vpop.f32.mrb[70].mxu0 }
 0x4d4   : > { %v3042_v11 = vmul.f32 1.442695, %v2999_v19  ;;  %v9770_v47 = vpop.f32.mrb[71].mxu0  ;;  %v2930_v62 = vpop.xlane.xlu1 %2929  ;;  %v3108_v51 = vsel %vm2891_vm10, %v12763_v13, 0.0 }
 0x4d5   : > { %v3000_v36 = vsub.f32 %v12601_v60, %v2930_v62  ;;  %3109 = vadd.xlane.f32.xlu1 %v3108_v51 }
 0x4d6   : > { %10641 = vpow2.f32 %v3042_v11 }
 0x4d7   : > { %v3044_v44 = vmul.f32 1.442695, %v3000_v36 }
 0x4d8   : > { %v12768_v4 = vpop.eup %10637  ;;  %v2933_v63 = vpop.xlane.xlu0 %2932 }
 0x4d9   : > { %10643 = vpow2.f32 %v3044_v44  ;;  %v3001_v27 = vsub.f32 %v12609_v7, %v2933_v63  ;;  %v3111_v2 = vsel %vm2891_vm10, %v12768_v4, 0.0 }
 0x4da   : > { %3112 = vadd.xlane.f32.xlu0 %v3111_v2 }
 0x4db   : > { %v12773_v24 = vpop.eup %10639  ;;  %v3046_v19 = vmul.f32 1.442695, %v3001_v27 }
 0x4dc   : > { %v2936_v57 = vpop.xlane.xlu1 %2935  ;;  %v3114_v60 = vsel %vm2891_vm10, %v12773_v24, 0.0 }
 0x4dd   : > { %10645 = vpow2.f32 %v3046_v19  ;;  %v3002_v29 = vsub.f32 %v12615_v9, %v2936_v57  ;;  %3115 = vadd.xlane.f32.xlu1 %v3114_v60 }
 0x4df   : > { %v3048_v11 = vmul.f32 1.442695, %v3002_v29 }
 0x4e0   : > { %v12778_v47 = vpop.eup %10641  ;;  %v2939_v62 = vpop.xlane.xlu0 %2938 }
 0x4e1   : > { %10647 = vpow2.f32 %v3048_v11  ;;  %v3003_v7 = vsub.f32 %v12621_v12, %v2939_v62  ;;  %v3117_v63 = vsel %vm2891_vm10, %v12778_v47, 0.0 }
 0x4e2   : > { %3118 = vadd.xlane.f32.xlu0 %v3117_v63 }
 0x4e3   : > { %v12783_v51 = vpop.eup %10643  ;;  %v3050_v36 = vmul.f32 1.442695, %v3003_v7 }
 0x4e4   : > { %v2942_v44 = vpop.xlane.xlu1 %2941  ;;  %v3120_v27 = vsel %vm2891_vm10, %v12783_v51, 0.0 }
 0x4e5   : > { %10649 = vpow2.f32 %v3050_v36  ;;  %v3004_v9 = vsub.f32 %v12629_v6, %v2942_v44  ;;  %3121 = vadd.xlane.f32.xlu1 %v3120_v27 }
 0x4e7   : > { %v12788_v2 = vpop.eup %10645  ;;  %v3052_v19 = vmul.f32 1.442695, %v3004_v9 }
 0x4e8   : > { %v2945_v57 = vpop.xlane.xlu0 %2944  ;;  %v3123_v12 = vsel %vm2891_vm10, %v12788_v2, 0.0  ;;  %v12809_v27 = vpop.permute.xlu1 %1296 }
 0x4e9   : > { %10651 = vpow2.f32 %v3052_v19  ;;  %v3005_v60 = vsub.f32 %v12635_v22, %v2945_v57  ;;  %3124 = vadd.xlane.f32.xlu0 %v3123_v12  ;;  %14427 = vst [vmem:[#allocation44_spill] sm:$0xff] %v12809_v27 }
 0x4eb   : > { %v12793_v29 = vpop.eup %10647  ;;  %v3054_v11 = vmul.f32 1.442695, %v3005_v60 }
 0x4ec   : > { %v3126_v62 = vsel %vm2891_vm10, %v12793_v29, 0.0  ;;  %v12811_v9 = vpop.permute.xlu0 %1294 }
 0x4ed   : > { %10653 = vpow2.f32 %v3054_v11  ;;  %3127 = vadd.xlane.f32.xlu1 %v3126_v62  ;;  %14428 = vst [vmem:[#allocation45_spill] sm:$0xff] %v12811_v9 }
 0x4ef   : > { %v12797_v6 = vpop.eup %10649 }
 0x4f0   : > { %v3129_v7 = vsel %vm2891_vm10, %v12797_v6, 0.0 }
 0x4f1   : > { %3130 = vadd.xlane.f32.xlu0 %v3129_v7 }
 0x4f3   : > { %v12801_v63 = vpop.eup %10651 }
 0x4f4   : > { %v3132_v22 = vsel %vm2891_vm10, %v12801_v63, 0.0 }
 0x4f5   : > { %3133 = vadd.xlane.f32.xlu1 %v3132_v22 }
 0x4f7   : > { %v12805_v36 = vpop.eup %10653 }
 0x4f8   : > { %v3135_v44 = vsel %vm2891_vm10, %v12805_v36, 0.0 }
 0x4f9   : > { %3136 = vadd.xlane.f32.xlu0 %v3135_v44 }
 0x519   : > { %v2948_v19 = vpop.xlane.xlu1 %2947 }
 0x51a   : > { %v3006_v57 = vsub.f32 %v12641_v40, %v2948_v19 }
 0x51c   : > { %v3056_v12 = vmul.f32 1.442695, %v3006_v57 }
 0x51d   : > { %v3086_v60 = vpop.xlane.xlu1 %3085  ;;  %v2951_v11 = vpop.xlane.xlu0 %2950 }
 0x51e   : > { %10655 = vpow2.f32 %v3056_v12  ;;  %v3007_v62 = vsub.f32 %v12647_v61, %v2951_v11 }
 0x51f   : > { %10657 = vrcp.f32 %v3086_v60 }
 0x520   : > { %v3058_v7 = vmul.f32 1.442695, %v3007_v62 }
 0x521   : > { %v2954_v22 = vpop.xlane.xlu1 %2953  ;;  %v3089_v23 = vpop.xlane.xlu0 %3088 }
 0x522   : > { %10659 = vpow2.f32 %v3058_v7  ;;  %v3008_v44 = vsub.f32 %v12651_v20, %v2954_v22 }
 0x523   : > { %10661 = vrcp.f32 %v3089_v23 }
 0x524   : > { %v3060_v27 = vmul.f32 1.442695, %v3008_v44  ;;  %v14429_v44 = vmov 0.0  }
 0x525   : > { %v2960_v37 = vpop.xlane.xlu1 %2959  ;;  %v2957_v9 = vpop.xlane.xlu0 %2956 }
 0x526   : > { %10663 = vpow2.f32 %v3060_v27  ;;  %v3010_v40 = vsub.f32 %v12663_v35, %v2960_v37  ;;  %v3009_v19 = vsub.f32 %v12657_v25, %v2957_v9 }
 0x528   : > { %v12818_v57 = vpop.eup %10655  ;;  %v3064_v12 = vmul.f32 1.442695, %v3010_v40  ;;  %v3062_v61 = vmul.f32 1.442695, %v3009_v19 }
 0x529   : > { %v10658_v60 = vpop.eup %10657  ;;  %v3092_v11 = vpop.xlane.xlu1 %3091  ;;  %v3138_v7 = vsel %vm2891_vm10, %v12818_v57, 0.0 }
 0x52a   : > { %v2963_v62 = vpop.xlane.xlu0 %2962  ;;  %10665 = vpow2.f32 %v3064_v12  ;;  %3139 = vadd.xlane.f32.xlu1 %v3138_v7  ;;  %v3212_v23 = vmul.f32 %v10658_v60, %v12681_v55 }
 0x52b   : > { %v3011_v20 = vsub.f32 %v12667_v56, %v2963_v62  ;;  %10667 = vpow2.f32 %v3062_v61  ;;  %v3373_v56 = vsel %vm3279_vm11, %v12419_v34, 0  ;;  %v3419_v34 = vsel %vm3279_vm11, %v12409_v38, 0 }
 0x52c   : > { %v12824_v37 = vpop.eup %10659  ;;  %10669 = vrcp.f32 %v3092_v11  ;;  %v3244_v35 = vpack.c.bf16 %v3212_v23, %v3212_v23 }
 0x52d   : > { %v3066_v25 = vmul.f32 1.442695, %v3011_v20  ;;  %v10662_v27 = vpop.eup %10661  ;;  %v3141_v22 = vsel %vm2891_vm10, %v12824_v37, 0.0 }
 0x52e   : > { %v3101_v9 = vpop.xlane.xlu0 %3100  ;;  %9774 = vmatmul.mubr.msk.bf16.vlgmr.msra.gmra.mrb[72].mxu1 %vm2891_vm10, %v3244_v35  ;;  %3142 = vadd.xlane.f32.xlu0 %v3141_v22  ;;  %v3213_v55 = vmul.f32 %v10662_v27, %v12688_v18  ;;  %v3465_v35 = vsel %vm3279_vm11, %v12435_v42, 0 }
 0x52f   : > { %10671 = vpow2.f32 %v3066_v25  ;;  %9784 = vmatpush3.bf16.msra.mxu1 %v3373_v56  ;;  %9785 = vmatprep.mubr.msk.bf16.mxu1 %vm11341_vm8, %v14429_v44 }
 0x530   : > { %v12834_v40 = vpop.eup %10663  ;;  %v3245_v19 = vpack.c.bf16 %v3213_v55, %v3213_v55  ;;  %9795 = vmatprep.subr.bf16.mxu1 %v14429_v44 }
 0x531   : > { %v3144_v61 = vsel %vm2891_vm10, %v12834_v40, 0.0 }
 0x532   : > { %v3095_v12 = vpop.xlane.xlu0 %3094  ;;  %9780 = vmatmul.mubr.msk.bf16.vlgmr.msra.gmra.mrb[72].mxu0 %vm2891_vm10, %v3245_v19  ;;  %3145 = vadd.xlane.f32.xlu1 %v3144_v61 }
 0x533   : > { %10673 = vrcp.f32 %v3095_v12  ;;  %9790 = vmatpush3.bf16.msra.mxu0 %v3419_v34  ;;  %9791 = vmatprep.mubr.msk.bf16.mxu0 %vm11341_vm8, %v14429_v44  ;;  %v3511_v12 = vsel %vm3279_vm11, %v12425_v46, 0 }
 0x534   : > { %v12844_v18 = vpop.eup %10665  ;;  %9801 = vmatprep.subr.bf16.mxu0 %v14429_v44  ;;  %10675 = vrcp.f32 %v3101_v9 }
 0x535   : > { %v12847_v60 = vpop.eup %10667  ;;  %v3150_v11 = vsel %vm2891_vm10, %v12844_v18, 0.0 }
 0x536   : > { %v10670_v62 = vpop.eup %10669  ;;  %3151 = vadd.xlane.f32.xlu1 %v3150_v11  ;;  %v3147_v38 = vsel %vm2891_vm10, %v12847_v60, 0.0 }
 0x537   : > { %3148 = vadd.xlane.f32.xlu0 %v3147_v38  ;;  %v3214_v7 = vmul.f32 %v10670_v62, %v12698_v54 }
 0x539   : > { %v12854_v20 = vpop.eup %10671  ;;  %v3246_v23 = vpack.c.bf16 %v3214_v7, %v3214_v7 }
 0x53a   : > { %v3153_v25 = vsel %vm2891_vm10, %v12854_v20, 0.0 }
 0x53b   : > { %9786 = vmatmul.mubr.msk.bf16.vlgmr.msra.gmra.mrb[76].mxu1 %vm2891_vm10, %v3246_v23  ;;  %3154 = vadd.xlane.f32.xlu0 %v3153_v25 }
 0x53c   : > { %9796 = vmatpush3.bf16.msra.mxu1 %v3465_v35  ;;  %9797 = vmatprep.mubr.msk.bf16.mxu1 %vm11341_vm8, %v14429_v44 }
 0x53d   : > { %v10674_v27 = vpop.eup %10673  ;;  %v2966_v9 = vpop.xlane.xlu1 %2965  ;;  %9807 = vmatprep.subr.bf16.mxu1 %v14429_v44 }
 0x53e   : > { %v3215_v54 = vmul.f32 %v10674_v27, %v12708_v59  ;;  %v3012_v22 = vsub.f32 %v12714_v3, %v2966_v9  ;;  %v10676_v55 = vpop.eup %10675 }
 0x53f   : > { %v3217_v59 = vmul.f32 %v10676_v55, %v12704_v1 }
 0x540   : > { %v3247_v56 = vpack.c.bf16 %v3215_v54, %v3215_v54  ;;  %v3068_v19 = vmul.f32 1.442695, %v3012_v22 }
 0x541   : > { %v2969_v61 = vpop.xlane.xlu0 %2968  ;;  %v3249_v7 = vpack.c.bf16 %v3217_v59, %v3217_v59  ;;  %v3695_v59 = vsel %vm3279_vm11, %v12607_v53, 0  ;;  %v3557_v53 = vsel %vm3279_vm11, %v12450_v52, 0 }
 0x542   : > { %9792 = vmatmul.mubr.msk.bf16.vlgmr.msra.gmra.mrb[76].mxu0 %vm2891_vm10, %v3247_v56  ;;  %10677 = vpow2.f32 %v3068_v19  ;;  %v3013_v34 = vsub.f32 %v12718_v33, %v2969_v61  ;;  %v3603_v33 = vsel %vm3279_vm11, %v12441_v58, 0 }
 0x543   : > { %9802 = vmatpush3.bf16.msra.mxu0 %v3511_v12  ;;  %9803 = vmatprep.mubr.msk.bf16.mxu0 %vm11341_vm8, %v14429_v44 }
 0x544   : > { %9813 = vmatprep.subr.bf16.mxu0 %v14429_v44  ;;  %v3070_v3 = vmul.f32 1.442695, %v3013_v34 }
 0x545   : > { %v2972_v11 = vpop.xlane.xlu1 %2971  ;;  %v3107_v62 = vpop.xlane.xlu0 %3106 }
 0x546   : > { %10679 = vpow2.f32 %v3070_v3  ;;  %v3014_v38 = vsub.f32 %v12725_v43, %v2972_v11 }
 0x547   : > { %10681 = vrcp.f32 %v3107_v62 }
 0x548   : > { %v3072_v23 = vmul.f32 1.442695, %v3014_v38 }
 0x549   : > { %v3098_v25 = vpop.xlane.xlu1 %3097  ;;  %v2975_v35 = vpop.xlane.xlu0 %2974 }
 0x54a   : > { %9804 = vmatmul.mubr.msk.bf16.vlgmr.msra.gmra.mrb[80].mxu0 %vm2891_vm10, %v3249_v7  ;;  %10683 = vpow2.f32 %v3072_v23  ;;  %v3015_v1 = vsub.f32 %v12733_v30, %v2975_v35 }
 0x54b   : > { %9814 = vmatpush3.bf16.msra.mxu0 %v3603_v33  ;;  %9815 = vmatprep.mubr.msk.bf16.mxu0 %vm11341_vm8, %v14429_v44  ;;  %10685 = vrcp.f32 %v3098_v25 }
 0x54c   : > { %9825 = vmatprep.subr.bf16.mxu0 %v14429_v44  ;;  %v12882_v43 = vpop.eup %10677  ;;  %v3074_v27 = vmul.f32 1.442695, %v3015_v1 }
 0x54d   : > { %v3156_v9 = vsel %vm2891_vm10, %v12882_v43, 0.0 }
 0x54e   : > { %10687 = vpow2.f32 %v3074_v27  ;;  %3157 = vadd.xlane.f32.xlu1 %v3156_v9  ;;  %v3649_v9 = vsel %vm3279_vm11, %v12595_v17, 0 }
 0x550   : > { %v12886_v54 = vpop.eup %10679 }
 0x551   : > { %v10682_v22 = vpop.eup %10681  ;;  %v3159_v30 = vsel %vm2891_vm10, %v12886_v54, 0.0 }
 0x552   : > { %3160 = vadd.xlane.f32.xlu0 %v3159_v30  ;;  %v3219_v56 = vmul.f32 %v10682_v22, %v12722_v14 }
 0x554   : > { %v12891_v55 = vpop.eup %10683  ;;  %v3251_v19 = vpack.c.bf16 %v3219_v56, %v3219_v56 }
 0x555   : > { %v10686_v12 = vpop.eup %10685  ;;  %v12893_v61 = vpop.xlane.xlu1 %2977  ;;  %v3162_v34 = vsel %vm2891_vm10, %v12891_v55, 0.0 }
 0x556   : > { %9816 = vmatmul.mubr.msk.bf16.vlgmr.msra.gmra.mrb[84].mxu0 %vm2891_vm10, %v3251_v19  ;;  %3163 = vadd.xlane.f32.xlu1 %v3162_v34  ;;  %v3216_v3 = vmul.f32 %v10686_v12, %v12731_v48  ;;  %v3741_v19 = vsel %vm3279_vm11, %v12605_v31, 0  ;;  %v3787_v31 = vsel %vm3279_vm11, %v12619_v39, 0 }
 0x557   : > { %9826 = vmatpush3.bf16.msra.mxu0 %v3695_v59  ;;  %9827 = vmatprep.mubr.msk.bf16.mxu0 %vm11341_vm8, %v14429_v44  ;;  %v2981_v7 = vpop.xlane.xlu0 %2980 }
 0x558   : > { %v12903_v14 = vpop.eup %10687  ;;  %v3248_v11 = vpack.c.bf16 %v3216_v3, %v3216_v3  ;;  %9837 = vmatprep.subr.bf16.mxu0 %v14429_v44 }
 0x559   : > { %v3104_v62 = vpop.xlane.xlu1 %3103  ;;  %v3165_v38 = vsel %vm2891_vm10, %v12903_v14, 0.0 }
 0x55a   : > { %9798 = vmatmul.mubr.msk.bf16.vlgmr.msra.gmra.mrb[80].mxu1 %vm2891_vm10, %v3248_v11  ;;  %3166 = vadd.xlane.f32.xlu0 %v3165_v38  ;;  %10689 = vrcp.f32 %v3104_v62  ;;  %v3016_v62 = vsub.f32 %v12740_v32, %v12893_v61 }
 0x55b   : > { %9808 = vmatpush3.bf16.msra.mxu1 %v3557_v53  ;;  %9809 = vmatprep.mubr.msk.bf16.mxu1 %vm11341_vm8, %v14429_v44 }
 0x55c   : > { %9819 = vmatprep.subr.bf16.mxu1 %v14429_v44  ;;  %v3076_v61 = vmul.f32 1.442695, %v3016_v62  ;;  %v4155_v62 = vsel %vm3279_vm11, %v12653_v10, 0 }
 0x55d   : > { %v12914_v48 = vpop.xlane.xlu1 %2983 }
 0x55f   : > { %v2987_v25 = vpop.xlane.xlu0 %2986 }
 0x560   : > { %v3019_v39 = vsub.f32 %v12758_v5, %v2987_v25 }
 0x562   : > { %v3110_v23 = vpop.xlane.xlu1 %3109  ;;  %v3082_v5 = vmul.f32 1.442695, %v3019_v39 }
 0x563   : > { %10691 = vrcp.f32 %v3110_v23 }
 0x564   : > { %v10690_v33 = vpop.eup %10689 }
 0x565   : > { %v3218_v35 = vmul.f32 %v10690_v33, %v12744_v16 }
 0x567   : > { %v3113_v1 = vpop.xlane.xlu0 %3112  ;;  %1300 = vrot.lane.b32.xlu1 %v12425_v46, %s14355_s27  ;;  %v3250_v27 = vpack.c.bf16 %v3218_v35, %v3218_v35  ;;  %v3879_v35 = vsel %vm3279_vm11, %v12627_v21, 0 }
 0x568   : > { %10693 = vrcp.f32 %v3113_v1 }
 0x569   : > { %9810 = vmatmul.mubr.msk.bf16.vlgmr.msra.gmra.mrb[84].mxu1 %vm2891_vm10, %v3250_v27 }
 0x56a   : > { %v3116_v22 = vpop.xlane.xlu1 %3115  ;;  %9820 = vmatpush3.bf16.msra.mxu1 %v3649_v9  ;;  %9821 = vmatprep.mubr.msk.bf16.mxu1 %vm11341_vm8, %v14429_v44 }
 0x56b   : > { %10695 = vrcp.f32 %v3116_v22  ;;  %9831 = vmatprep.subr.bf16.mxu1 %v14429_v44 }
 0x56d   : > { %v10692_v16 = vpop.eup %10691 }
 0x56e   : > { %v3220_v30 = vmul.f32 %v10692_v16, %v12763_v13 }
 0x56f   : > { %v3119_v56 = vpop.xlane.xlu0 %3118 }
 0x570   : > { %10697 = vrcp.f32 %v3119_v56  ;;  %1298 = vrot.lane.b32.xlu0 %v12435_v42, %s14355_s27  ;;  %v3252_v46 = vpack.c.bf16 %v3220_v30, %v3220_v30  ;;  %v3017_v42 = vsub.f32 %v12746_v26, %v2981_v7  ;;  %v3971_v30 = vsel %vm3279_vm11, %v12639_v28, 0 }
 0x572   : > { %v10694_v17 = vpop.eup %10693  ;;  %9822 = vmatmul.mubr.msk.bf16.vlgmr.msra.gmra.mrb[88].mxu1 %vm2891_vm10, %v3252_v46  ;;  %v3122_v12 = vpop.xlane.xlu1 %3121  ;;  %v3078_v38 = vmul.f32 1.442695, %v3017_v42  ;;  %v4017_v46 = vsel %vm3279_vm11, %v12633_v0, 0 }
 0x573   : > { %9832 = vmatpush3.bf16.msra.mxu1 %v3741_v19  ;;  %10699 = vrcp.f32 %v3122_v12  ;;  %v3221_v34 = vmul.f32 %v10694_v17, %v12768_v4  ;;  %9833 = vmatprep.mubr.msk.bf16.mxu1 %vm11341_vm8, %v14429_v44 }
 0x574   : > { %9843 = vmatprep.subr.bf16.mxu1 %v14429_v44 }
 0x575   : > { %v10696_v13 = vpop.eup %10695  ;;  %v3253_v59 = vpack.c.bf16 %v3221_v34, %v3221_v34 }
 0x576   : > { %v3125_v3 = vpop.xlane.xlu0 %3124  ;;  %v3222_v11 = vmul.f32 %v10696_v13, %v12773_v24  ;;  %v3833_v24 = vsel %vm3279_vm11, %v12613_v50, 0  ;;  %v3018_v50 = vsub.f32 %v12754_v45, %v12914_v48  ;;  %v3925_v45 = vsel %vm3279_vm11, %v12625_v49, 0 }
 0x577   : > { %9828 = vmatmul.mubr.msk.bf16.vlgmr.msra.gmra.mrb[88].mxu0 %vm2891_vm10, %v3253_v59  ;;  %10701 = vrcp.f32 %v3125_v3 }
 0x578   : > { %9838 = vmatpush3.bf16.msra.mxu0 %v3787_v31  ;;  %v3254_v4 = vpack.c.bf16 %v3222_v11, %v3222_v11  ;;  %9839 = vmatprep.mubr.msk.bf16.mxu0 %vm11341_vm8, %v14429_v44  ;;  %v3080_v27 = vmul.f32 1.442695, %v3018_v50  ;;  %v14430_v50 = vld [vmem:[#allocation40_spill] sm:$0xff] }
 0x579   : > { %9849 = vmatprep.subr.bf16.mxu0 %v14429_v44 }
 0x57a   : > { %v10698_v26 = vpop.eup %10697  ;;  %9834 = vmatmul.mubr.msk.bf16.vlgmr.msra.gmra.mrb[92].mxu1 %vm2891_vm10, %v3254_v4  ;;  %v3128_v53 = vpop.xlane.xlu1 %3127 }
 0x57b   : > { %9844 = vmatpush3.bf16.msra.mxu1 %v3833_v24  ;;  %10703 = vrcp.f32 %v3128_v53  ;;  %v3223_v7 = vmul.f32 %v10698_v26, %v12778_v47  ;;  %9845 = vmatprep.mubr.msk.bf16.mxu1 %vm11341_vm8, %v14429_v44 }
 0x57c   : > { %9855 = vmatprep.subr.bf16.mxu1 %v14429_v44  ;;  %10705 = vpow2.f32 %v3078_v38 }
 0x57d   : > { %v10700_v32 = vpop.eup %10699  ;;  %v3255_v23 = vpack.c.bf16 %v3223_v7, %v3223_v7 }
 0x57e   : > { %v3131_v25 = vpop.xlane.xlu0 %3130  ;;  %v3224_v33 = vmul.f32 %v10700_v32, %v12783_v51 }
 0x57f   : > { %9840 = vmatmul.mubr.msk.bf16.vlgmr.msra.gmra.mrb[92].mxu0 %vm2891_vm10, %v3255_v23  ;;  %10707 = vrcp.f32 %v3131_v25  ;;  %v4247_v23 = vsel %vm3279_vm11, %v14430_v50, 0 }
 0x580   : > { %9850 = vmatpush3.bf16.msra.mxu0 %v3879_v35  ;;  %v3256_v47 = vpack.c.bf16 %v3224_v33, %v3224_v33  ;;  %9851 = vmatprep.mubr.msk.bf16.mxu0 %vm11341_vm8, %v14429_v44  ;;  %10709 = vpow2.f32 %v3076_v61  ;;  %v14431_v33 = vld [vmem:[#allocation39_spill] sm:$0xff] }
 0x581   : > { %v10702_v1 = vpop.eup %10701  ;;  %9861 = vmatprep.subr.bf16.mxu0 %v14429_v44  ;;  %10711 = vpow2.f32 %v3082_v5  ;;  %v4293_v35 = vsel %vm3279_vm11, %v14431_v33, 0 }
 0x582   : > { %9846 = vmatmul.mubr.msk.bf16.vlgmr.msra.gmra.mrb[96].mxu1 %vm2891_vm10, %v3256_v47  ;;  %v3134_v21 = vpop.xlane.xlu1 %3133  ;;  %v3225_v51 = vmul.f32 %v10702_v1, %v12788_v2 }
 0x583   : > { %9856 = vmatpush3.bf16.msra.mxu1 %v3925_v45  ;;  %10713 = vrcp.f32 %v3134_v21  ;;  %9857 = vmatprep.mubr.msk.bf16.mxu1 %vm11341_vm8, %v14429_v44  ;;  %v14432_v45 = vld [vmem:[#allocation41_spill] sm:$0xff] }
 0x584   : > { %v3257_v48 = vpack.c.bf16 %v3225_v51, %v3225_v51  ;;  %9867 = vmatprep.subr.bf16.mxu1 %v14429_v44  ;;  %10715 = vpow2.f32 %v3080_v27  ;;  %v4339_v21 = vsel %vm3279_vm11, %v14432_v45, 0 }
 0x585   : > { %v10704_v9 = vpop.eup %10703 }
 0x586   : > { %v3137_v22 = vpop.xlane.xlu0 %3136  ;;  %v3226_v16 = vmul.f32 %v10704_v9, %v12793_v29  ;;  %v12970_v49 = vpop.eup %10705 }
 0x587   : > { %9852 = vmatmul.mubr.msk.bf16.vlgmr.msra.gmra.mrb[96].mxu0 %vm2891_vm10, %v3257_v48  ;;  %10717 = vrcp.f32 %v3137_v22  ;;  %v3171_v29 = vsel %vm2891_vm10, %v12970_v49, 0.0  ;;  %v14433_v48 = vld [vmem:[#allocation42_spill] sm:$0xff] }
 0x588   : > { %9862 = vmatpush3.bf16.msra.mxu0 %v3971_v30  ;;  %v3258_v2 = vpack.c.bf16 %v3226_v16, %v3226_v16  ;;  %9863 = vmatprep.mubr.msk.bf16.mxu0 %vm11341_vm8, %v14429_v44  ;;  %v4385_v9 = vsel %vm3279_vm11, %v14433_v48, 0  ;;  %v14434_v16 = vld [vmem:[#allocation43_spill] sm:$0xff] }
 0x589   : > { %v10708_v56 = vpop.eup %10707  ;;  %9873 = vmatprep.subr.bf16.mxu0 %v14429_v44  ;;  %v4431_v30 = vsel %vm3279_vm11, %v14434_v16, 0 }
 0x58a   : > { %9858 = vmatmul.mubr.msk.bf16.vlgmr.msra.gmra.mrb[100].mxu1 %vm2891_vm10, %v3258_v2  ;;  %v3227_v28 = vmul.f32 %v10708_v56, %v12797_v6  ;;  %v12984_v17 = vpop.eup %10709  ;;  %v4063_v6 = vsel %vm3279_vm11, %v12645_v41, 0 }
 0x58b   : > { %9868 = vmatpush3.bf16.msra.mxu1 %v4017_v46  ;;  %3172 = vadd.xlane.f32.xlu1 %v3171_v29  ;;  %v12986_v19 = vpop.eup %10711  ;;  %v3168_v34 = vsel %vm2891_vm10, %v12984_v17, 0.0 }
 0x58c   : > { %v3259_v12 = vpack.c.bf16 %v3227_v28, %v3227_v28  ;;  %9869 = vmatprep.mubr.msk.bf16.mxu1 %vm11341_vm8, %v14429_v44  ;;  %9879 = vmatprep.subr.bf16.mxu1 %v14429_v44  ;;  %v3177_v59 = vsel %vm2891_vm10, %v12986_v19, 0.0 }
 0x58d   : > { %v10714_v0 = vpop.eup %10713 }
 0x58e   : > { %v3228_v13 = vmul.f32 %v10714_v0, %v12801_v63  ;;  %v12994_v42 = vpop.eup %10715  ;;  %v4109_v63 = vsel %vm3279_vm11, %v12643_v8, 0  ;;  %v14435_v0 = vld [vmem:[#allocation45_spill] sm:$0xff] }
 0x58f   : > { %9864 = vmatmul.mubr.msk.bf16.vlgmr.msra.gmra.mrb[100].mxu0 %vm2891_vm10, %v3259_v12  ;;  %3169 = vadd.xlane.f32.xlu0 %v3168_v34  ;;  %v3174_v41 = vsel %vm2891_vm10, %v12994_v42, 0.0  ;;  %v4477_v34 = vsel %vm3279_vm11, %v14435_v0, 0 }
 0x590   : > { %9874 = vmatpush3.bf16.msra.mxu0 %v4063_v6  ;;  %3178 = vadd.xlane.f32.xlu1 %v3177_v59  ;;  %v3260_v3 = vpack.c.bf16 %v3228_v13, %v3228_v13 }
 0x591   : > { %v10718_v11 = vpop.eup %10717  ;;  %9875 = vmatprep.mubr.msk.bf16.mxu0 %vm11341_vm8, %v14429_v44  ;;  %9885 = vmatprep.subr.bf16.mxu0 %v14429_v44 }
 0x592   : > { %9870 = vmatmul.mubr.msk.bf16.vlgmr.msra.gmra.mrb[104].mxu1 %vm2891_vm10, %v3260_v3  ;;  %v3229_v31 = vmul.f32 %v10718_v11, %v12805_v36  ;;  %v14436_v3 = vld [vmem:[#allocation44_spill] sm:$0xff] }
 0x593   : > { %9880 = vmatpush3.bf16.msra.mxu1 %v4109_v63  ;;  %3175 = vadd.xlane.f32.xlu0 %v3174_v41 }
 0x594   : > { %v3261_v4 = vpack.c.bf16 %v3229_v31, %v3229_v31  ;;  %9881 = vmatprep.mubr.msk.bf16.mxu1 %vm11341_vm8, %v14429_v44  ;;  %9891 = vmatprep.subr.bf16.mxu1 %v14429_v44 }
 0x597   : > { %9876 = vmatmul.mubr.msk.bf16.vlgmr.msra.gmra.mrb[104].mxu0 %vm2891_vm10, %v3261_v4 }
 0x598   : > { %9886 = vmatpush3.bf16.msra.mxu0 %v4155_v62  ;;  %9887 = vmatprep.mubr.msk.bf16.mxu0 %vm11341_vm8, %v14429_v44 }
 0x599   : > { %9897 = vmatprep.subr.bf16.mxu0 %v14429_v44 }
 0x5a1   : > { %1304 = vrot.lane.b32.xlu1 %v12441_v58, %s14355_s27  ;;  %v4201_v58 = vsel %vm3279_vm11, %v12649_v15, 0 }
 0x5a9   : > { %1302 = vrot.lane.b32.xlu0 %v12450_v52, %s14355_s27  ;;  %s14447_s27 = smov 16  }
 0x5b7   : > { %v3140_v8 = vpop.xlane.xlu1 %3139 }
 0x5b8   : > { %10719 = vrcp.f32 %v3140_v8 }
 0x5bb   : > { %v3143_v36 = vpop.xlane.xlu0 %3142 }
 0x5bc   : > { %10721 = vrcp.f32 %v3143_v36 }
 0x5bf   : > { %v3146_v38 = vpop.xlane.xlu1 %3145 }
 0x5c0   : > { %10723 = vrcp.f32 %v3146_v38 }
 0x5c2   : > { %v10720_v10 = vpop.eup %10719 }
 0x5c3   : > { %v3152_v26 = vpop.xlane.xlu1 %3151  ;;  %v3230_v24 = vmul.f32 %v10720_v10, %v12818_v57 }
 0x5c4   : > { %10725 = vrcp.f32 %v3152_v26  ;;  %v3149_v39 = vpop.xlane.xlu0 %3148 }
 0x5c5   : > { %10727 = vrcp.f32 %v3149_v39  ;;  %v3262_v53 = vpack.c.bf16 %v3230_v24, %v3230_v24 }
 0x5c6   : > { %v10722_v7 = vpop.eup %10721 }
 0x5c7   : > { %9882 = vmatmul.mubr.msk.bf16.vlgmr.msra.gmra.mrb[108].mxu1 %vm2891_vm10, %v3262_v53  ;;  %v3231_v52 = vmul.f32 %v10722_v7, %v12824_v37 }
 0x5c8   : > { %9892 = vmatpush3.bf16.msra.mxu1 %v4201_v58  ;;  %v3155_v32 = vpop.xlane.xlu0 %3154  ;;  %9893 = vmatprep.mubr.msk.bf16.mxu1 %vm11341_vm8, %v14429_v44 }
 0x5c9   : > { %10729 = vrcp.f32 %v3155_v32  ;;  %v3263_v61 = vpack.c.bf16 %v3231_v52, %v3231_v52  ;;  %9903 = vmatprep.subr.bf16.mxu1 %v14429_v44 }
 0x5ca   : > { %v10724_v57 = vpop.eup %10723 }
 0x5cb   : > { %9888 = vmatmul.mubr.msk.bf16.vlgmr.msra.gmra.mrb[108].mxu0 %vm2891_vm10, %v3263_v61  ;;  %v3232_v15 = vmul.f32 %v10724_v57, %v12834_v40 }
 0x5cc   : > { %9898 = vmatpush3.bf16.msra.mxu0 %v4247_v23  ;;  %9899 = vmatprep.mubr.msk.bf16.mxu0 %vm11341_vm8, %v14429_v44 }
 0x5cd   : > { %v3264_v37 = vpack.c.bf16 %v3232_v15, %v3232_v15  ;;  %9909 = vmatprep.subr.bf16.mxu0 %v14429_v44 }
 0x5ce   : > { %v10726_v5 = vpop.eup %10725 }
 0x5cf   : > { %v10728_v25 = vpop.eup %10727  ;;  %9894 = vmatmul.mubr.msk.bf16.vlgmr.msra.gmra.mrb[112].mxu1 %vm2891_vm10, %v3264_v37  ;;  %v3234_v40 = vmul.f32 %v10726_v5, %v12844_v18 }
 0x5d0   : > { %9904 = vmatpush3.bf16.msra.mxu1 %v4293_v35  ;;  %v3233_v47 = vmul.f32 %v10728_v25, %v12847_v60  ;;  %9905 = vmatprep.mubr.msk.bf16.mxu1 %vm11341_vm8, %v14429_v44 }
 0x5d1   : > { %9915 = vmatprep.subr.bf16.mxu1 %v14429_v44  ;;  %v3266_v51 = vpack.c.bf16 %v3234_v40, %v3234_v40 }
 0x5d2   : > { %v3265_v1 = vpack.c.bf16 %v3233_v47, %v3233_v47 }
 0x5d3   : > { %v10730_v27 = vpop.eup %10729 }
 0x5d4   : > { %9900 = vmatmul.mubr.msk.bf16.vlgmr.msra.gmra.mrb[112].mxu0 %vm2891_vm10, %v3265_v1  ;;  %v3235_v60 = vmul.f32 %v10730_v27, %v12854_v20 }
 0x5d5   : > { %9910 = vmatpush3.bf16.msra.mxu0 %v4339_v21  ;;  %9911 = vmatprep.mubr.msk.bf16.mxu0 %vm11341_vm8, %v14429_v44 }
 0x5d6   : > { %9921 = vmatprep.subr.bf16.mxu0 %v14429_v44  ;;  %v3267_v18 = vpack.c.bf16 %v3235_v60, %v3235_v60 }
 0x5d7   : > { %9906 = vmatmul.mubr.msk.bf16.vlgmr.msra.gmra.mrb[116].mxu1 %vm2891_vm10, %v3266_v51 }
 0x5d8   : > { %9916 = vmatpush3.bf16.msra.mxu1 %v4385_v9  ;;  %9917 = vmatprep.mubr.msk.bf16.mxu1 %vm11341_vm8, %v14429_v44 }
 0x5d9   : > { %9927 = vmatprep.subr.bf16.mxu1 %v14429_v44 }
 0x5db   : > { %v3158_v22 = vpop.xlane.xlu1 %3157 }
 0x5dc   : > { %10731 = vrcp.f32 %v3158_v22  ;;  %9912 = vmatmul.mubr.msk.bf16.vlgmr.msra.gmra.mrb[116].mxu0 %vm2891_vm10, %v3267_v18 }
 0x5dd   : > { %9922 = vmatpush3.bf16.msra.mxu0 %v4431_v30  ;;  %9923 = vmatprep.mubr.msk.bf16.mxu0 %vm11341_vm8, %v14429_v44 }
 0x5de   : > { %9933 = vmatprep.subr.bf16.mxu0 %v14429_v44 }
 0x5df   : > { %v3161_v20 = vpop.xlane.xlu0 %3160 }
 0x5e0   : > { %10733 = vrcp.f32 %v3161_v20 }
 0x5e3   : > { %v3164_v2 = vpop.xlane.xlu1 %3163 }
 0x5e4   : > { %10735 = vrcp.f32 %v3164_v2 }
 0x5e6   : > { %v10732_v56 = vpop.eup %10731 }
 0x5e7   : > { %v3167_v46 = vpop.xlane.xlu0 %3166  ;;  %v3236_v29 = vmul.f32 %v10732_v56, %v12882_v43  ;;  %v4523_v43 = vsel %vm3279_vm11, %v14436_v3, 0  ;;  %v1301_v62 = vpop.permute.xlu1 %1300 }
 0x5e8   : > { %10737 = vrcp.f32 %v3167_v46  ;;  %v4615_v8 = vsel %vm3279_vm11, %v1301_v62, 0 }
 0x5e9   : > { %v3268_v28 = vpack.c.bf16 %v3236_v29, %v3236_v29 }
 0x5ea   : > { %v10734_v12 = vpop.eup %10733 }
 0x5eb   : > { %9918 = vmatmul.mubr.msk.bf16.vlgmr.msra.gmra.mrb[120].mxu1 %vm2891_vm10, %v3268_v28  ;;  %v3237_v13 = vmul.f32 %v10734_v12, %v12886_v54  ;;  %v1299_v63 = vpop.permute.xlu0 %1298 }
 0x5ec   : > { %9928 = vmatpush3.bf16.msra.mxu1 %v4477_v34  ;;  %9929 = vmatprep.mubr.msk.bf16.mxu1 %vm11341_vm8, %v14429_v44  ;;  %v4569_v31 = vsel %vm3279_vm11, %v1299_v63, 0 }
 0x5ed   : > { %v3269_v6 = vpack.c.bf16 %v3237_v13, %v3237_v13  ;;  %9939 = vmatprep.subr.bf16.mxu1 %v14429_v44 }
 0x5ee   : > { %v10736_v59 = vpop.eup %10735 }
 0x5ef   : > { %9924 = vmatmul.mubr.msk.bf16.vlgmr.msra.gmra.mrb[120].mxu0 %vm2891_vm10, %v3269_v6  ;;  %v3238_v11 = vmul.f32 %v10736_v59, %v12891_v55 }
 0x5f0   : > { %9934 = vmatpush3.bf16.msra.mxu0 %v4523_v43  ;;  %9935 = vmatprep.mubr.msk.bf16.mxu0 %vm11341_vm8, %v14429_v44 }
 0x5f1   : > { %v3270_v54 = vpack.c.bf16 %v3238_v11, %v3238_v11  ;;  %9945 = vmatprep.subr.bf16.mxu0 %v14429_v44 }
 0x5f2   : > { %v10738_v41 = vpop.eup %10737 }
 0x5f3   : > { %9930 = vmatmul.mubr.msk.bf16.vlgmr.msra.gmra.mrb[124].mxu1 %vm2891_vm10, %v3270_v54  ;;  %v3239_v4 = vmul.f32 %v10738_v41, %v12903_v14 }
 0x5f4   : > { %9940 = vmatpush3.bf16.msra.mxu1 %v4569_v31  ;;  %9941 = vmatprep.mubr.msk.bf16.mxu1 %vm11341_vm8, %v14429_v44 }
 0x5f5   : > { %v3271_v55 = vpack.c.bf16 %v3239_v4, %v3239_v4  ;;  %9951 = vmatprep.subr.bf16.mxu1 %v14429_v44 }
 0x5f7   : > { %9936 = vmatmul.mubr.msk.bf16.vlgmr.msra.gmra.mrb[124].mxu0 %vm2891_vm10, %v3271_v55 }
 0x5f8   : > { %9946 = vmatpush3.bf16.msra.mxu0 %v4615_v8  ;;  %9947 = vmatprep.mubr.msk.bf16.mxu0 %vm11341_vm8, %v14429_v44 }
 0x5f9   : > { %9957 = vmatprep.subr.bf16.mxu0 %v14429_v44 }
 0x601   : > { %v13091_v36 = vpop.f32.mrb[72].mxu1 }
 0x602   : > { %v9775_v14 = vpop.f32.mrb[73].mxu1 }
 0x603   : > { %v3320_v38 = vpop.f32.mrb[74].mxu1 }
 0x604   : > { %v9776_v10 = vpop.f32.mrb[75].mxu1 }
 0x605   : > { %v13093_v26 = vpop.f32.mrb[72].mxu0 }
 0x606   : > { %v9781_v24 = vpop.f32.mrb[73].mxu0 }
 0x607   : > { %v3366_v39 = vpop.f32.mrb[74].mxu0 }
 0x608   : > { %v9782_v53 = vpop.f32.mrb[75].mxu0 }
 0x60e   : > { %v13095_v7 = vpop.f32.mrb[76].mxu1 }
 0x60f   : > { %v9787_v58 = vpop.f32.mrb[77].mxu1 }
 0x610   : > { %v3412_v52 = vpop.f32.mrb[78].mxu1 }
 0x611   : > { %v9788_v32 = vpop.f32.mrb[79].mxu1 }
 0x615   : > { %v13097_v61 = vpop.f32.mrb[76].mxu0 }
 0x616   : > { %v9793_v57 = vpop.f32.mrb[77].mxu0 }
 0x617   : > { %v3458_v50 = vpop.f32.mrb[78].mxu0 }
 0x618   : > { %v9794_v23 = vpop.f32.mrb[79].mxu0  ;;  %v3173_v15 = vpop.xlane.xlu1 %3172 }
 0x619   : > { %10739 = vrcp.f32 %v3173_v15 }
 0x61c   : > { %v3170_v5 = vpop.xlane.xlu0 %3169 }
 0x61d   : > { %v13099_v37 = vpop.f32.mrb[80].mxu0  ;;  %v3179_v25 = vpop.xlane.xlu1 %3178  ;;  %10741 = vrcp.f32 %v3170_v5 }
 0x61e   : > { %v9805_v33 = vpop.f32.mrb[81].mxu0  ;;  %10743 = vrcp.f32 %v3179_v25 }
 0x61f   : > { %v3550_v35 = vpop.f32.mrb[82].mxu0 }
 0x620   : > { %v9806_v47 = vpop.f32.mrb[83].mxu0  ;;  %v3176_v40 = vpop.xlane.xlu0 %3175 }
 0x621   : > { %10745 = vrcp.f32 %v3176_v40  ;;  %v1305_v45 = vpop.permute.xlu1 %1304 }
 0x622   : > { %v4707_v48 = vsel %vm3279_vm11, %v1305_v45, 0 }
 0x623   : > { %v10740_v1 = vpop.eup %10739 }
 0x624   : > { %v3241_v27 = vmul.f32 %v10740_v1, %v12970_v49  ;;  %v1303_v18 = vpop.permute.xlu0 %1302 }
 0x625   : > { %v4661_v56 = vsel %vm3279_vm11, %v1303_v18, 0 }
 0x626   : > { %v3273_v21 = vpack.c.bf16 %v3241_v27, %v3241_v27 }
 0x627   : > { %v10742_v51 = vpop.eup %10741 }
 0x628   : > { %v10744_v60 = vpop.eup %10743  ;;  %9948 = vmatmul.mubr.msk.bf16.vlgmr.msra.gmra.mrb[128].mxu0 %vm2891_vm10, %v3273_v21  ;;  %v3240_v9 = vmul.f32 %v10742_v51, %v12984_v17 }
 0x629   : > { %v13105_v22 = vpop.f32.mrb[84].mxu0  ;;  %9958 = vmatpush3.bf16.msra.mxu0 %v4707_v48  ;;  %9959 = vmatprep.mubr.msk.bf16.mxu0 %vm11341_vm8, %v14429_v44  ;;  %v3243_v49 = vmul.f32 %v10744_v60, %v12986_v19 }
 0x62a   : > { %v9817_v16 = vpop.f32.mrb[85].mxu0  ;;  %v3272_v30 = vpack.c.bf16 %v3240_v9, %v3240_v9 }
 0x62b   : > { %v10746_v20 = vpop.eup %10745  ;;  %v3642_v2 = vpop.f32.mrb[86].mxu0  ;;  %v3275_v28 = vpack.c.bf16 %v3243_v49, %v3243_v49 }
 0x62c   : > { %v9818_v46 = vpop.f32.mrb[87].mxu0  ;;  %9942 = vmatmul.mubr.msk.bf16.vlgmr.msra.gmra.mrb[128].mxu1 %vm2891_vm10, %v3272_v30  ;;  %v3242_v12 = vmul.f32 %v10746_v20, %v12994_v42 }
 0x62d   : > { %v13112_v29 = vpop.f32.mrb[80].mxu1  ;;  %9952 = vmatpush3.bf16.msra.mxu1 %v4661_v56  ;;  %9953 = vmatprep.mubr.msk.bf16.mxu1 %vm11341_vm8, %v14429_v44  ;;  %v10603_v46 = vld [vmem:[#allocation7] sm:$0xff]  }
 0x62e   : > { %v9799_v17 = vpop.f32.mrb[81].mxu1  ;;  %v3274_v19 = vpack.c.bf16 %v3242_v12, %v3242_v12  ;;  %9963 = vmatprep.subr.bf16.mxu1 %v10603_v46 }
 0x62f   : > { %v3504_v0 = vpop.f32.mrb[82].mxu1 }
 0x630   : > { %v9800_v34 = vpop.f32.mrb[83].mxu1  ;;  %9960 = vmatmul.mubr.msk.bf16.vlgmr.msra.gmra.mrb[132].mxu0 %vm2891_vm10, %v3275_v28 }
 0x634   : > { %9954 = vmatmul.mubr.msk.bf16.vlgmr.msra.gmra.mrb[132].mxu1 %vm2891_vm10, %v3274_v19 }
 0x635   : > { %9964 = vmatpush3.bf16.msra.mxu1 %v10603_v46 }
 0x63c   : > { %v13119_v13 = vpop.f32.mrb[84].mxu1 }
 0x63d   : > { %v9811_v6 = vpop.f32.mrb[85].mxu1 }
 0x63e   : > { %v3596_v59 = vpop.f32.mrb[86].mxu1 }
 0x63f   : > { %v9812_v3 = vpop.f32.mrb[87].mxu1 }
 0x645   : > { %v3685_v43 = vpop.f32.mrb[88].mxu1 }
 0x646   : > { %v9823_v11 = vpop.f32.mrb[89].mxu1 }
 0x647   : > { %v3688_v63 = vpop.f32.mrb[90].mxu1 }
 0x648   : > { %v9824_v54 = vpop.f32.mrb[91].mxu1 }
 0x64a   : > { %v3731_v41 = vpop.f32.mrb[88].mxu0 }
 0x64b   : > { %v10511_v31 = vpack.i.bf16 %v3731_v41, %v3685_v43  ;;  %v9829_v4 = vpop.f32.mrb[89].mxu0 }
 0x64c   : > { %v3734_v42 = vpop.f32.mrb[90].mxu0 }
 0x64d   : > { %10512 = vrot.lane.b32.xlu0 %v10511_v31, %s14358_s21  ;;  %v9830_v62 = vpop.f32.mrb[91].mxu0  ;;  %v3777_v55 = vpop.f32.mrb[92].mxu1 }
 0x64e   : > { %v9835_v8 = vpop.f32.mrb[93].mxu1 }
 0x64f   : > { %v3780_v14 = vpop.f32.mrb[94].mxu1 }
 0x650   : > { %v9836_v38 = vpop.f32.mrb[95].mxu1 }
 0x652   : > { %v3823_v10 = vpop.f32.mrb[92].mxu0 }
 0x653   : > { %v10516_v24 = vpack.i.bf16 %v3823_v10, %v3777_v55  ;;  %v9841_v39 = vpop.f32.mrb[93].mxu0 }
 0x654   : > { %v3826_v53 = vpop.f32.mrb[94].mxu0 }
 0x655   : > { %10517 = vrot.lane.b32.xlu1 %v10516_v24, %s14358_s21  ;;  %v9842_v58 = vpop.f32.mrb[95].mxu0  ;;  %v13123_v52 = vpop.f32.mrb[96].mxu1 }
 0x656   : > { %v9847_v32 = vpop.f32.mrb[97].mxu1 }
 0x657   : > { %v3872_v57 = vpop.f32.mrb[98].mxu1  ;;  %v10604_v32 = vld [vmem:[#allocation7 + $0x8] sm:$0xff]  }
 0x658   : > { %v9848_v50 = vpop.f32.mrb[99].mxu1  ;;  %9965 = vmatprep.subr.bf16.mxu1 %v10604_v32 }
 0x659   : > { %9966 = vmatpush3.bf16.msra.mxu1 %v10604_v32  ;;  %v10605_v50 = vld [vmem:[#allocation7 + $0x10] sm:$0xff]  }
 0x65a   : > { %v13125_v23 = vpop.f32.mrb[96].mxu0  ;;  %9967 = vmatprep.subr.bf16.mxu1 %v10605_v50 }
 0x65b   : > { %v10541_v15 = vpack.i.bf16 %v13125_v23, %v13123_v52  ;;  %v9853_v5 = vpop.f32.mrb[97].mxu0 }
 0x65c   : > { %v3918_v25 = vpop.f32.mrb[98].mxu0 }
 0x65d   : > { %v9854_v33 = vpop.f32.mrb[99].mxu0  ;;  %v13129_v35 = vpop.f32.mrb[100].mxu1  ;;  %9968 = vmatpush3.bf16.msra.mxu1 %v10605_v50 }
 0x65e   : > { %v9859_v47 = vpop.f32.mrb[101].mxu1 }
 0x65f   : > { %v3964_v40 = vpop.f32.mrb[102].mxu1 }
 0x660   : > { %v9860_v1 = vpop.f32.mrb[103].mxu1  ;;  %v10606_v40 = vld [vmem:[#allocation7 + $0x18] sm:$0xff]  }
 0x661   : > { %9969 = vmatprep.subr.bf16.mxu1 %v10606_v40 }
 0x662   : > { %v13131_v27 = vpop.f32.mrb[100].mxu0  ;;  %9970 = vmatpush3.bf16.msra.mxu1 %v10606_v40 }
 0x663   : > { %v10546_v45 = vpack.i.bf16 %v13131_v27, %v13129_v35  ;;  %v9865_v21 = vpop.f32.mrb[101].mxu0 }
 0x664   : > { %v4010_v51 = vpop.f32.mrb[102].mxu0 }
 0x665   : > { %v9866_v60 = vpop.f32.mrb[103].mxu0  ;;  %v4053_v48 = vpop.f32.mrb[104].mxu1 }
 0x666   : > { %v9871_v9 = vpop.f32.mrb[105].mxu1 }
 0x667   : > { %v4056_v18 = vpop.f32.mrb[106].mxu1 }
 0x668   : > { %v9872_v16 = vpop.f32.mrb[107].mxu1 }
 0x66a   : > { %v4099_v30 = vpop.f32.mrb[104].mxu0 }
 0x66b   : > { %v10521_v49 = vpack.i.bf16 %v4099_v30, %v4053_v48  ;;  %v9877_v20 = vpop.f32.mrb[105].mxu0 }
 0x66c   : > { %v4102_v2 = vpop.f32.mrb[106].mxu0 }
 0x66d   : > { %10522 = vrot.lane.b32.xlu0 %v10521_v49, %s14357_s2  ;;  %v9878_v56 = vpop.f32.mrb[107].mxu0 }
 0x69a   : > { %v4145_v17 = vpop.f32.mrb[108].mxu1 }
 0x69b   : > { %v9883_v28 = vpop.f32.mrb[109].mxu1 }
 0x69c   : > { %v4148_v12 = vpop.f32.mrb[110].mxu1 }
 0x69d   : > { %v9884_v0 = vpop.f32.mrb[111].mxu1 }
 0x69e   : > { %v4191_v34 = vpop.f32.mrb[108].mxu0 }
 0x69f   : > { %v10526_v19 = vpack.i.bf16 %v4191_v34, %v4145_v17  ;;  %v9889_v6 = vpop.f32.mrb[109].mxu0 }
 0x6a0   : > { %v4194_v59 = vpop.f32.mrb[110].mxu0 }
 0x6a1   : > { %10527 = vrot.lane.b32.xlu1 %v10526_v19, %s14357_s2  ;;  %v9890_v3 = vpop.f32.mrb[111].mxu0 }
 0x6a2   : > { %v4237_v43 = vpop.f32.mrb[112].mxu1 }
 0x6a3   : > { %v9895_v11 = vpop.f32.mrb[113].mxu1 }
 0x6a4   : > { %v4240_v63 = vpop.f32.mrb[114].mxu1 }
 0x6a5   : > { %v9896_v54 = vpop.f32.mrb[115].mxu1 }
 0x6a7   : > { %v4283_v41 = vpop.f32.mrb[112].mxu0 }
 0x6a8   : > { %v10551_v31 = vpack.i.bf16 %v4283_v41, %v4237_v43  ;;  %v9901_v4 = vpop.f32.mrb[113].mxu0 }
 0x6a9   : > { %v4286_v42 = vpop.f32.mrb[114].mxu0 }
 0x6aa   : > { %v9902_v62 = vpop.f32.mrb[115].mxu0  ;;  %v4329_v55 = vpop.f32.mrb[116].mxu1 }
 0x6ab   : > { %v9907_v8 = vpop.f32.mrb[117].mxu1 }
 0x6ac   : > { %v4332_v14 = vpop.f32.mrb[118].mxu1 }
 0x6ad   : > { %v9908_v38 = vpop.f32.mrb[119].mxu1 }
 0x6af   : > { %v4375_v10 = vpop.f32.mrb[116].mxu0 }
 0x6b0   : > { %v10556_v24 = vpack.i.bf16 %v4375_v10, %v4329_v55  ;;  %v9913_v39 = vpop.f32.mrb[117].mxu0 }
 0x6b1   : > { %v4378_v53 = vpop.f32.mrb[118].mxu0 }
 0x6b2   : > { %v9914_v58 = vpop.f32.mrb[119].mxu0 }
 0x6be   : > { %v4421_v57 = vpop.f32.mrb[120].mxu1 }
 0x6bf   : > { %v9919_v5 = vpop.f32.mrb[121].mxu1  ;;  %v10513_v63 = vpop.permute.xlu0 %10512 }
 0x6c0   : > { %v4424_v25 = vpop.f32.mrb[122].mxu1  ;;  %v10515_v41 = vunpack.i.h.bf16 %v10513_v63 }
 0x6c1   : > { %v9920_v33 = vpop.f32.mrb[123].mxu1 }
 0x6c2   : > { %v4467_v47 = vpop.f32.mrb[120].mxu0  ;;  %v4846_v8 = vsel %vm1308_vm9, %v13093_v26, %v10515_v41 }
 0x6c3   : > { %v10531_v1 = vpack.i.bf16 %v4467_v47, %v4421_v57  ;;  %v9925_v21 = vpop.f32.mrb[121].mxu0 }
 0x6c4   : > { %v4470_v51 = vpop.f32.mrb[122].mxu0 }
 0x6c5   : > { %10532 = vrot.lane.b32.xlu0 %v10531_v1, %s14356_s20  ;;  %v9926_v60 = vpop.f32.mrb[123].mxu0 }
 0x6c6   : > { %v4513_v48 = vpop.f32.mrb[124].mxu1 }
 0x6c7   : > { %v9931_v9 = vpop.f32.mrb[125].mxu1  ;;  %v10518_v62 = vpop.permute.xlu1 %10517 }
 0x6c8   : > { %v4516_v18 = vpop.f32.mrb[126].mxu1  ;;  %v10520_v50 = vunpack.i.h.bf16 %v10518_v62  ;;  %v10519_v5 = vunpack.i.l.bf16 %v10518_v62 }
 0x6c9   : > { %v9932_v16 = vpop.f32.mrb[127].mxu1  ;;  %10542 = vrot.lane.b32.xlu0 %v10541_v15, %s14358_s21 }
 0x6ca   : > { %v4559_v30 = vpop.f32.mrb[124].mxu0  ;;  %v4847_v47 = vsel %vm1308_vm9, %v13095_v7, %v10519_v5 }
 0x6cb   : > { %v10536_v49 = vpack.i.bf16 %v4559_v30, %v4513_v48  ;;  %v9937_v20 = vpop.f32.mrb[125].mxu0 }
 0x6cc   : > { %v4562_v2 = vpop.f32.mrb[126].mxu0 }
 0x6cd   : > { %10552 = vrot.lane.b32.xlu0 %v10551_v31, %s14357_s2  ;;  %10537 = vrot.lane.b32.xlu1 %v10536_v49, %s14356_s20  ;;  %v9938_v56 = vpop.f32.mrb[127].mxu0  ;;  %v10514_v31 = vunpack.i.l.bf16 %v10513_v63 }
 0x6cf   : > { %v4845_v14 = vsel %vm1308_vm9, %v13091_v36, %v10514_v31  ;;  %v4848_v36 = vsel %vm1308_vm9, %v13097_v61, %v10520_v50  ;;  %v9146_v31 = vld [vmem:[#allocation8] ss:$0 sm:$0xff] }
 0x6d0   : > { %v14440_v50 = vld [vmem:[#allocation34_spill] sm:$0xff] }
 0x6d1   : > { %10547 = vrot.lane.b32.xlu1 %v10546_v45, %s14358_s21  ;;  %s14452_s21 = sld [smem:[#allocation60_spill]] }
 0x6d5   : > { %10557 = vrot.lane.b32.xlu1 %v10556_v24, %s14357_s2  ;;  %s14449_s2 = sld [smem:[#allocation57_spill]] }
 0x6df   : > { %v10523_v54 = vpop.permute.xlu0 %10522 }
 0x6e0   : > { %v10525_v4 = vunpack.i.h.bf16 %v10523_v54  ;;  %v10524_v42 = vunpack.i.l.bf16 %v10523_v54 }
 0x6e2   : > { %v4854_v24 = vsel %vm4853_vm12, %v4845_v14, %v10524_v42  ;;  %v4855_v39 = vsel %vm4853_vm12, %v4846_v8, %v10525_v4  ;;  %v14437_v8 = vld [vmem:[#allocation31_spill] sm:$0xff] }
 0x6fb   : > { %v4651_v46 = vpop.f32.mrb[128].mxu0 }
 0x6fc   : > { %v9949_v17 = vpop.f32.mrb[129].mxu0 }
 0x6fd   : > { %v4654_v52 = vpop.f32.mrb[130].mxu0 }
 0x6fe   : > { %v9950_v23 = vpop.f32.mrb[131].mxu0 }
 0x6ff   : > { %v4605_v15 = vpop.f32.mrb[128].mxu1 }
 0x700   : > { %v10561_v28 = vpack.i.bf16 %v4651_v46, %v4605_v15  ;;  %v9943_v12 = vpop.f32.mrb[129].mxu1 }
 0x701   : > { %v4608_v0 = vpop.f32.mrb[130].mxu1 }
 0x702   : > { %10562 = vrot.lane.b32.xlu0 %v10561_v28, %s14356_s20  ;;  %v9944_v34 = vpop.f32.mrb[131].mxu1 }
 0x703   : > { %v4743_v19 = vpop.f32.mrb[132].mxu0 }
 0x704   : > { %v9961_v6 = vpop.f32.mrb[133].mxu0 }
 0x705   : > { %v4746_v59 = vpop.f32.mrb[134].mxu0 }
 0x706   : > { %v9962_v3 = vpop.f32.mrb[135].mxu0 }
 0x707   : > { %v4697_v43 = vpop.f32.mrb[132].mxu1 }
 0x708   : > { %v10566_v35 = vpack.i.bf16 %v4743_v19, %v4697_v43  ;;  %v9955_v27 = vpop.f32.mrb[133].mxu1 }
 0x709   : > { %v4700_v45 = vpop.f32.mrb[134].mxu1 }
 0x70a   : > { %10567 = vrot.lane.b32.xlu1 %v10566_v35, %s14356_s20  ;;  %v9956_v11 = vpop.f32.mrb[135].mxu1  ;;  %s14446_s20 = smov 64  }
 0x713   : > { %v10528_v53 = vpop.permute.xlu1 %10527 }
 0x714   : > { %v10530_v25 = vunpack.i.h.bf16 %v10528_v53  ;;  %v10529_v33 = vunpack.i.l.bf16 %v10528_v53  ;;  %v14439_v53 = vld [vmem:[#allocation32_spill] sm:$0xff] }
 0x716   : > { %v4857_v21 = vsel %vm4853_vm12, %v4848_v36, %v10530_v25  ;;  %v4856_v51 = vsel %vm4853_vm12, %v4847_v47, %v10529_v33 }
 0x737   : > { %v10533_v55 = vpop.permute.xlu0 %10532 }
 0x738   : > { %v10535_v38 = vunpack.i.h.bf16 %v10533_v55  ;;  %v10534_v10 = vunpack.i.l.bf16 %v10533_v55 }
 0x73a   : > { %v4863_v58 = vsel %vm4862_vm13, %v4854_v24, %v10534_v10  ;;  %v4864_v32 = vsel %vm4862_vm13, %v4855_v39, %v10535_v38  ;;  %v14438_v10 = vld [vmem:[#allocation33_spill] sm:$0xff] }
 0x73b   : > { %v4871_v57 = vpack.c.bf16 %v4864_v32, %v4863_v58  ;;  %v10543_v18 = vpop.permute.xlu0 %10542 }
 0x73c   : > { %v10545_v30 = vunpack.i.h.bf16 %v10543_v18  ;;  %v10544_v61 = vunpack.i.l.bf16 %v10543_v18  ;;  %v14442_v18 = vld [vmem:[#allocation37_spill] sm:$0xff] }
 0x73d   : > { %9971 = vmatprep.mubr.msk.bf16.mxu1 %vm1076_vm7, %v4871_v57 }
 0x73e   : > { %v4850_v56 = vsel %vm1308_vm9, %v13099_v37, %v10545_v30  ;;  %v4849_v46 = vsel %vm1308_vm9, %v13112_v29, %v10544_v61  ;;  %v14443_v30 = vld [vmem:[#allocation36_spill] sm:$0xff] }
 0x73f   : > { %v10538_v26 = vpop.permute.xlu1 %10537  ;;  %v10553_v16 = vpop.permute.xlu0 %10552 }
 0x740   : > { %v10540_v40 = vunpack.i.h.bf16 %v10538_v26  ;;  %v10539_v1 = vunpack.i.l.bf16 %v10538_v26  ;;  %v10555_v20 = vunpack.i.h.bf16 %v10553_v16  ;;  %v10554_v7 = vunpack.i.l.bf16 %v10553_v16 }
 0x742   : > { %v4866_v60 = vsel %vm4862_vm13, %v4857_v21, %v10540_v40  ;;  %v4865_v48 = vsel %vm4862_vm13, %v4856_v51, %v10539_v1  ;;  %v4858_v23 = vsel %vm4853_vm12, %v4849_v46, %v10554_v7  ;;  %v4859_v15 = vsel %vm4853_vm12, %v4850_v56, %v10555_v20  ;;  %v14444_v20 = vld [vmem:[#allocation38_spill] sm:$0xff] }
 0x743   : > { %v4872_v9 = vpack.c.bf16 %v4866_v60, %v4865_v48  ;;  %v10548_v49 = vpop.permute.xlu1 %10547  ;;  %v14441_v60 = vld [vmem:[#allocation35_spill] sm:$0xff] }
 0x744   : > { %v10550_v19 = vunpack.i.h.bf16 %v10548_v49  ;;  %v10549_v6 = vunpack.i.l.bf16 %v10548_v49 }
 0x745   : > { %9972 = vmatmul.mubr.msk.bf16.vlgmr.msra.gmra.mrb[136].mxu1 %vm1076_vm7, %v4872_v9 }
 0x746   : > { %v4852_v29 = vsel %vm1308_vm9, %v13105_v22, %v10550_v19  ;;  %v4851_v43 = vsel %vm1308_vm9, %v13119_v13, %v10549_v6 }
 0x747   : > { %v10558_v28 = vpop.permute.xlu1 %10557 }
 0x748   : > { %v10560_v59 = vunpack.i.h.bf16 %v10558_v28  ;;  %v10559_v3 = vunpack.i.l.bf16 %v10558_v28 }
 0x74a   : > { %v4860_v45 = vsel %vm4853_vm12, %v4851_v43, %v10559_v3  ;;  %v4861_v11 = vsel %vm4853_vm12, %v4852_v29, %v10560_v59 }
 0x774   : > { %v10563_v2 = vpop.permute.xlu0 %10562 }
 0x775   : > { %v10565_v17 = vunpack.i.h.bf16 %v10563_v2  ;;  %v10564_v52 = vunpack.i.l.bf16 %v10563_v2 }
 0x777   : > { %v4867_v12 = vsel %vm4862_vm13, %v4858_v23, %v10564_v52  ;;  %v4868_v0 = vsel %vm4862_vm13, %v4859_v15, %v10565_v17 }
 0x778   : > { %v4873_v34 = vpack.c.bf16 %v4868_v0, %v4867_v12 }
 0x77a   : > { %9975 = vmatprep.mubr.msk.bf16.mxu1 %vm1076_vm7, %v4873_v34 }
 0x77c   : > { %v10568_v37 = vpop.permute.xlu1 %10567 }
 0x77d   : > { %v10570_v35 = vunpack.i.h.bf16 %v10568_v37  ;;  %v10569_v27 = vunpack.i.l.bf16 %v10568_v37 }
 0x77f   : > { %v4870_v63 = vsel %vm4862_vm13, %v4861_v11, %v10570_v35  ;;  %v4869_v54 = vsel %vm4862_vm13, %v4860_v45, %v10569_v27 }
 0x780   : > { %v4874_v41 = vpack.c.bf16 %v4870_v63, %v4869_v54  ;;  %v10607_v54 = vld [vmem:[%s14445_s3] sm:$0xff]  }
 0x781   : > { %9979 = vmatprep.subr.bf16.mxu0 %v10607_v54 }
 0x782   : > { %9976 = vmatmul.mubr.msk.bf16.gmra.mrb[140].mxu1 %vm1076_vm7, %v4874_v41  ;;  %9980 = vmatpush3.bf16.msra.mxu0 %v10607_v54  ;;  %v10608_v41 = vld [vmem:[%s14445_s3 + $0x8] sm:$0xff]  }
 0x783   : > { %9981 = vmatprep.subr.bf16.mxu0 %v10608_v41 }
 0x786   : > { %9982 = vmatpush3.bf16.msra.mxu0 %v10608_v41 }
 0x818   : > { %v9973_v4 = vpop.f32.mrb[136].mxu1 }
 0x819   : > { %v4960_v42 = vpop.f32.mrb[137].mxu1  ;;  %v4969_v22 = vadd.f32 %v9973_v4, %v9146_v31  ;;  %v10610_v4 = vld [vmem:[%s14445_s3 + $0x18] sm:$0xff]  }
 0x81a   : > { %v4961_v62 = vadd.f32 %v9146_v31, %v4960_v42  ;;  %v9974_v55 = vpop.f32.mrb[138].mxu1 }
 0x81b   : > { %v4963_v13 = vpop.f32.mrb[139].mxu1  ;;  %v4993_v24 = vadd.f32 %v4969_v22, %v14438_v10  ;;  %v4972_v39 = vadd.f32 %v9974_v55, %v9146_v31 }
 0x81c   : > { %v4991_v14 = vadd.f32 %v4961_v62, %v14437_v8  ;;  %v4964_v38 = vadd.f32 %v9146_v31, %v4963_v13 }
 0x81d   : > { %v4994_v5 = vadd.f32 %v4972_v39, %v14440_v50  ;;  %v5005_v25 = vsel %vm1076_vm7, %v4993_v24, 0.0 }
 0x81e   : > { %v4992_v58 = vadd.f32 %v4964_v38, %v14439_v53  ;;  %v4999_v32 = vsel %vm1076_vm7, %v4991_v14, 0.0 }
 0x81f   : > { %5000 = vadd.xlane.f32.xlu0 %v4999_v32  ;;  %v5008_v33 = vsel %vm1076_vm7, %v4994_v5, 0.0 }
 0x820   : > { %v5002_v57 = vsel %vm1076_vm7, %v4992_v58, 0.0 }
 0x821   : > { %5003 = vadd.xlane.f32.xlu1 %v5002_v57 }
 0x823   : > { %5006 = vadd.xlane.f32.xlu0 %v5005_v25 }
 0x827   : > { %5009 = vadd.xlane.f32.xlu0 %v5008_v33 }
 0x855   : > { %v9977_v26 = vpop.f32.mrb[140].mxu1 }
 0x856   : > { %v4985_v36 = vadd.f32 %v9977_v26, %v9146_v31  ;;  %v4976_v47 = vpop.f32.mrb[141].mxu1 }
 0x857   : > { %v4977_v40 = vadd.f32 %v9146_v31, %v4976_v47  ;;  %v9978_v1 = vpop.f32.mrb[142].mxu1 }
 0x858   : > { %v4988_v21 = vadd.f32 %v9978_v1, %v9146_v31  ;;  %v4979_v51 = vpop.f32.mrb[143].mxu1  ;;  %v4997_v16 = vadd.f32 %v4985_v36, %v14442_v18 }
 0x859   : > { %v4995_v48 = vadd.f32 %v4977_v40, %v14441_v60  ;;  %v4980_v9 = vadd.f32 %v9146_v31, %v4979_v51  ;;  %v10609_v31 = vld [vmem:[%s14445_s3 + $0x10] sm:$0xff]   ;;  %s14456_s3 = smov 48  }
 0x85a   : > { %v4998_v7 = vadd.f32 %v4988_v21, %v14444_v20  ;;  %v5017_v56 = vsel %vm1076_vm7, %v4997_v16, 0.0  ;;  %9983 = vmatprep.subr.bf16.mxu0 %v10609_v31 }
 0x85b   : > { %v4996_v61 = vadd.f32 %v4980_v9, %v14443_v30  ;;  %v5011_v49 = vsel %vm1076_vm7, %v4995_v48, 0.0  ;;  %9984 = vmatpush3.bf16.msra.mxu0 %v10609_v31 }
 0x85c   : > { %5012 = vadd.xlane.f32.xlu1 %v5011_v49  ;;  %v5020_v46 = vsel %vm1076_vm7, %v4998_v7, 0.0  ;;  %9985 = vmatprep.subr.bf16.mxu0 %v10610_v4  ;;  %v9155_v49 = vld [vmem:[#allocation10] ss:$0 sm:$0xff] }
 0x85d   : > { %v5014_v2 = vsel %vm1076_vm7, %v4996_v61, 0.0 }
 0x85e   : > { %5015 = vadd.xlane.f32.xlu0 %v5014_v2 }
 0x85f   : > { %9986 = vmatpush3.bf16.msra.mxu0 %v10610_v4 }
 0x860   : > { %5018 = vadd.xlane.f32.xlu1 %v5017_v56  ;;  %10007 = vmatprep.subr.bf16.mxu0 %v14429_v44 }
 0x862   : > { %5021 = vadd.xlane.f32.xlu0 %v5020_v46 }
 0x8ac   : > { %v5001_v17 = vpop.xlane.xlu0 %5000 }
 0x8ad   : > { %v5024_v52 = vmul.f32 0.015625, %v5001_v17  ;;  %v9156_v17 = vld [vmem:[#allocation11] ss:$0 sm:$0xff] }
 0x8ae   : > { %v5004_v23 = vpop.xlane.xlu1 %5003 }
 0x8af   : > { %v13203_v15 = vsub.f32 %v4991_v14, %v5024_v52  ;;  %v5025_v28 = vmul.f32 0.015625, %v5004_v23 }
 0x8b0   : > { %v5007_v12 = vpop.xlane.xlu0 %5006 }
 0x8b1   : > { %v13205_v0 = vsub.f32 %v4992_v58, %v5025_v28  ;;  %v5026_v34 = vmul.f32 0.015625, %v5007_v12  ;;  %v5040_v19 = vmul.f32 %v13203_v15, %v13203_v15 }
 0x8b3   : > { %v13209_v6 = vsub.f32 %v4993_v24, %v5026_v34  ;;  %v5048_v59 = vsel %vm1076_vm7, %v5040_v19, 0.0  ;;  %v5041_v3 = vmul.f32 %v13205_v0, %v13205_v0 }
 0x8b4   : > { %5049 = vadd.xlane.f32.xlu1 %v5048_v59  ;;  %v5010_v37 = vpop.xlane.xlu0 %5009 }
 0x8b5   : > { %v5027_v29 = vmul.f32 0.015625, %v5010_v37  ;;  %v5051_v43 = vsel %vm1076_vm7, %v5041_v3, 0.0  ;;  %v5042_v35 = vmul.f32 %v13209_v6, %v13209_v6 }
 0x8b6   : > { %5052 = vadd.xlane.f32.xlu0 %v5051_v43 }
 0x8b7   : > { %v13217_v27 = vsub.f32 %v4994_v5, %v5027_v29  ;;  %v5054_v45 = vsel %vm1076_vm7, %v5042_v35, 0.0 }
 0x8b8   : > { %5055 = vadd.xlane.f32.xlu1 %v5054_v45 }
 0x8b9   : > { %v5043_v11 = vmul.f32 %v13217_v27, %v13217_v27 }
 0x8bb   : > { %v5057_v63 = vsel %vm1076_vm7, %v5043_v11, 0.0 }
 0x8bc   : > { %5058 = vadd.xlane.f32.xlu0 %v5057_v63 }
 0x8e9   : > { %v5013_v42 = vpop.xlane.xlu1 %5012 }
 0x8ea   : > { %v5028_v22 = vmul.f32 0.015625, %v5013_v42 }
 0x8eb   : > { %v5016_v62 = vpop.xlane.xlu0 %5015 }
 0x8ec   : > { %v13236_v55 = vsub.f32 %v4995_v48, %v5028_v22  ;;  %v5029_v13 = vmul.f32 0.015625, %v5016_v62 }
 0x8ed   : > { %v5019_v8 = vpop.xlane.xlu1 %5018 }
 0x8ee   : > { %v13238_v14 = vsub.f32 %v4996_v61, %v5029_v13  ;;  %v5030_v38 = vmul.f32 0.015625, %v5019_v8  ;;  %v5044_v10 = vmul.f32 %v13236_v55, %v13236_v55 }
 0x8ef   : > { %v5022_v24 = vpop.xlane.xlu0 %5021 }
 0x8f0   : > { %v13242_v39 = vsub.f32 %v4997_v16, %v5030_v38  ;;  %v5031_v53 = vmul.f32 0.015625, %v5022_v24  ;;  %v5060_v58 = vsel %vm1076_vm7, %v5044_v10, 0.0  ;;  %v5045_v32 = vmul.f32 %v13238_v14, %v13238_v14 }
 0x8f1   : > { %5061 = vadd.xlane.f32.xlu1 %v5060_v58 }
 0x8f2   : > { %v13247_v57 = vsub.f32 %v4998_v7, %v5031_v53  ;;  %v5063_v50 = vsel %vm1076_vm7, %v5045_v32, 0.0  ;;  %v5046_v5 = vmul.f32 %v13242_v39, %v13242_v39 }
 0x8f3   : > { %5064 = vadd.xlane.f32.xlu0 %v5063_v50 }
 0x8f4   : > { %v5066_v25 = vsel %vm1076_vm7, %v5046_v5, 0.0  ;;  %v5047_v33 = vmul.f32 %v13247_v57, %v13247_v57 }
 0x8f5   : > { %5067 = vadd.xlane.f32.xlu1 %v5066_v25 }
 0x8f6   : > { %v5069_v26 = vsel %vm1076_vm7, %v5047_v33, 0.0 }
 0x8f7   : > { %5070 = vadd.xlane.f32.xlu0 %v5069_v26 }
 0x941   : > { %v5050_v36 = vpop.xlane.xlu1 %5049 }
 0x942   : > { %v5072_v47 = vmul.f32 0.015625, %v5050_v36 }
 0x943   : > { %v5053_v40 = vpop.xlane.xlu0 %5052 }
 0x944   : > { %v5080_v1 = vadd.f32 1e-05, %v5072_v47  ;;  %v5073_v21 = vmul.f32 0.015625, %v5053_v40 }
 0x945   : > { %v5056_v51 = vpop.xlane.xlu1 %5055 }
 0x946   : > { %10747 = vrsqrt.f32 %v5080_v1  ;;  %v5081_v60 = vadd.f32 1e-05, %v5073_v21  ;;  %v5074_v48 = vmul.f32 0.015625, %v5056_v51 }
 0x948   : > { %10749 = vrsqrt.f32 %v5081_v60  ;;  %v5082_v9 = vadd.f32 1e-05, %v5074_v48 }
 0x949   : > { %v5059_v18 = vpop.xlane.xlu0 %5058 }
 0x94a   : > { %10751 = vrsqrt.f32 %v5082_v9  ;;  %v5075_v16 = vmul.f32 0.015625, %v5059_v18 }
 0x94c   : > { %v5083_v30 = vadd.f32 1e-05, %v5075_v16 }
 0x94e   : > { %10753 = vrsqrt.f32 %v5083_v30 }
 0x950   : > { %v10748_v61 = vpop.eup %10747 }
 0x951   : > { %v5096_v20 = vmul.f32 %v10748_v61, %v13203_v15 }
 0x952   : > { %v10750_v7 = vpop.eup %10749 }
 0x953   : > { %v5097_v2 = vmul.f32 %v10750_v7, %v13205_v0  ;;  %v5111_v56 = vmul.f32 %v9155_v49, %v5096_v20 }
 0x954   : > { %v10752_v46 = vpop.eup %10751 }
 0x955   : > { %v5098_v52 = vmul.f32 %v10752_v46, %v13209_v6  ;;  %v5112_v23 = vmul.f32 %v9155_v49, %v5097_v2  ;;  %v5126_v28 = vadd.f32 %v9156_v17, %v5111_v56 }
 0x957   : > { %v5127_v12 = vadd.f32 %v9156_v17, %v5112_v23  ;;  %v5113_v19 = vmul.f32 %v9155_v49, %v5098_v52 }
 0x958   : > { %v10754_v34 = vpop.eup %10753 }
 0x959   : > { %v5099_v59 = vmul.f32 %v10754_v34, %v13217_v27  ;;  %v5134_v3 = vpack.c.bf16 %v5127_v12, %v5126_v28  ;;  %v5128_v15 = vadd.f32 %v9156_v17, %v5113_v19 }
 0x95b   : > { %v5114_v37 = vmul.f32 %v9155_v49, %v5099_v59  ;;  %9987 = vmatprep.mubr.msk.bf16.mxu0 %vm1076_vm7, %v5134_v3 }
 0x95d   : > { %v5129_v29 = vadd.f32 %v9156_v17, %v5114_v37 }
 0x95f   : > { %v5135_v43 = vpack.c.bf16 %v5129_v29, %v5128_v15  ;;  %v9166_v29 = vld [vmem:[#allocation14] ss:$0 sm:$0xff] }
 0x961   : > { %9988 = vmatmul.mubr.msk.bf16.vlgmr.msra.gmra.mrb[136].mxu0 %vm1076_vm7, %v5135_v43 }
 0x97e   : > { %v5062_v0 = vpop.xlane.xlu1 %5061 }
 0x97f   : > { %v5076_v35 = vmul.f32 0.015625, %v5062_v0 }
 0x980   : > { %v5065_v45 = vpop.xlane.xlu0 %5064 }
 0x981   : > { %v5084_v6 = vadd.f32 1e-05, %v5076_v35  ;;  %v5077_v11 = vmul.f32 0.015625, %v5065_v45 }
 0x982   : > { %v5068_v63 = vpop.xlane.xlu1 %5067 }
 0x983   : > { %10755 = vrsqrt.f32 %v5084_v6  ;;  %v5085_v54 = vadd.f32 1e-05, %v5077_v11  ;;  %v5078_v41 = vmul.f32 0.015625, %v5068_v63 }
 0x984   : > { %v5071_v31 = vpop.xlane.xlu0 %5070 }
 0x985   : > { %10757 = vrsqrt.f32 %v5085_v54  ;;  %v5086_v27 = vadd.f32 1e-05, %v5078_v41  ;;  %v5079_v4 = vmul.f32 0.015625, %v5071_v31 }
 0x987   : > { %10759 = vrsqrt.f32 %v5086_v27  ;;  %v5087_v42 = vadd.f32 1e-05, %v5079_v4 }
 0x989   : > { %10761 = vrsqrt.f32 %v5087_v42 }
 0x98d   : > { %v10756_v22 = vpop.eup %10755 }
 0x98e   : > { %v5100_v62 = vmul.f32 %v10756_v22, %v13236_v55 }
 0x98f   : > { %v10758_v13 = vpop.eup %10757 }
 0x990   : > { %v5101_v8 = vmul.f32 %v10758_v13, %v13238_v14  ;;  %v5115_v38 = vmul.f32 %v9155_v49, %v5100_v62  ;;  %v10611_v14 = vld [vmem:[%s14314_s9] sm:$0xff]  }
 0x991   : > { %v10760_v10 = vpop.eup %10759  ;;  %9995 = vmatprep.subr.bf16.mxu1 %v10611_v14 }
 0x992   : > { %v5116_v24 = vmul.f32 %v9155_v49, %v5101_v8  ;;  %v5102_v53 = vmul.f32 %v10760_v10, %v13242_v39  ;;  %v5130_v32 = vadd.f32 %v9156_v17, %v5115_v38  ;;  %9996 = vmatpush3.bf16.msra.mxu1 %v10611_v14  ;;  %v10612_v39 = vld [vmem:[%s14314_s9 + $0x8] sm:$0xff]  }
 0x993   : > { %v10762_v58 = vpop.eup %10761  ;;  %9997 = vmatprep.subr.bf16.mxu1 %v10612_v39 }
 0x994   : > { %v5131_v50 = vadd.f32 %v9156_v17, %v5116_v24  ;;  %v5103_v5 = vmul.f32 %v10762_v58, %v13247_v57  ;;  %v5117_v25 = vmul.f32 %v9155_v49, %v5102_v53  ;;  %v9157_v57 = vld [vmem:[#allocation13] ss:$0 sm:$0xff] }
 0x996   : > { %v5136_v33 = vpack.c.bf16 %v5131_v50, %v5130_v32  ;;  %v5118_v26 = vmul.f32 %v9155_v49, %v5103_v5  ;;  %v5132_v36 = vadd.f32 %v9156_v17, %v5117_v25  ;;  %9998 = vmatpush3.bf16.msra.mxu1 %v10612_v39 }
 0x997   : > { %10019 = vmatprep.subr.bf16.mxu1 %v14429_v44 }
 0x998   : > { %9991 = vmatprep.mubr.msk.bf16.mxu0 %vm1076_vm7, %v5136_v33  ;;  %v5133_v55 = vadd.f32 %v9156_v17, %v5118_v26 }
 0x99a   : > { %v5137_v47 = vpack.c.bf16 %v5133_v55, %v5132_v36 }
 0x99c   : > { %9992 = vmatmul.mubr.msk.bf16.gmra.mrb[140].mxu0 %vm1076_vm7, %v5137_v47 }
 0x99d   : > { %10009 = vmatprep.mubr.msk.bf16.mxu0 %vm11341_vm8, %v14429_v44 }
 0xa34   : > { %v9989_v40 = vpop.f32.mrb[136].mxu0 }
 0xa35   : > { %v5223_v1 = vpop.f32.mrb[137].mxu0  ;;  %v13279_v60 = vadd.f32 %v9989_v40, %v9157_v57 }
 0xa36   : > { %v13277_v21 = vadd.f32 %v9157_v57, %v5223_v1  ;;  %v9990_v51 = vpop.f32.mrb[138].mxu0 }
 0xa37   : > { %v13281_v48 = vadd.f32 %v9990_v51, %v9157_v57  ;;  %v5226_v9 = vpop.f32.mrb[139].mxu0  ;;  %v5256_v49 = vmax.f32 %v13279_v60, 0.0 }
 0xa38   : > { %v13283_v18 = vadd.f32 %v9157_v57, %v5226_v9  ;;  %v5254_v30 = vmax.f32 %v13277_v21, 0.0 }
 0xa39   : > { %v5257_v16 = vmax.f32 %v13281_v48, 0.0 }
 0xa3a   : > { %v5255_v61 = vmax.f32 %v13283_v18, 0.0 }
 0xa3b   : > { %v5263_v7 = vpack.c.bf16 %v5257_v16, %v5256_v49 }
 0xa3c   : > { %v5262_v20 = vpack.c.bf16 %v5255_v61, %v5254_v30 }
 0xa3e   : > { %9999 = vmatprep.mubr.msk.bf16.mxu1 %vm4853_vm12, %v5262_v20 }
 0xa3f   : > { %10000 = vmatmul.mubr.msk.bf16.vlgmr.msra.gmra.mrb[144].mxu1 %vm4853_vm12, %v5263_v7 }
 0xa6f   : > { %v9993_v2 = vpop.f32.mrb[140].mxu0 }
 0xa70   : > { %v5239_v56 = vpop.f32.mrb[141].mxu0  ;;  %v13301_v52 = vadd.f32 %v9993_v2, %v9157_v57 }
 0xa71   : > { %v13299_v46 = vadd.f32 %v9157_v57, %v5239_v56  ;;  %v9994_v17 = vpop.f32.mrb[142].mxu0 }
 0xa72   : > { %v13303_v23 = vadd.f32 %v9994_v17, %v9157_v57  ;;  %v5242_v28 = vpop.f32.mrb[143].mxu0  ;;  %v5260_v3 = vmax.f32 %v13301_v52, 0.0 }
 0xa73   : > { %v13305_v12 = vadd.f32 %v9157_v57, %v5242_v28  ;;  %v5258_v19 = vmax.f32 %v13299_v46, 0.0 }
 0xa74   : > { %v5261_v34 = vmax.f32 %v13303_v23, 0.0 }
 0xa75   : > { %v5259_v59 = vmax.f32 %v13305_v12, 0.0 }
 0xa76   : > { %v5265_v15 = vpack.c.bf16 %v5261_v34, %v5260_v3 }
 0xa77   : > { %v5264_v37 = vpack.c.bf16 %v5259_v59, %v5258_v19 }
 0xa79   : > { %10003 = vmatprep.mubr.msk.bf16.mxu1 %vm4853_vm12, %v5264_v37 }
 0xa7a   : > { %10004 = vmatmul.mubr.msk.bf16.gmra.mrb[148].mxu1 %vm4853_vm12, %v5265_v15 }
 0xa7b   : > { %10021 = vmatprep.mubr.msk.bf16.mxu1 %vm11341_vm8, %v14429_v44 }
 0xb12   : > { %v10001_v43 = vpop.f32.mrb[144].mxu1 }
 0xb13   : > { %v5335_v0 = vpop.f32.mrb[145].mxu1  ;;  %v5344_v11 = vadd.f32 %v10001_v43, %v9166_v29 }
 0xb14   : > { %v5336_v35 = vadd.f32 %v9166_v29, %v5335_v0  ;;  %v10002_v45 = vpop.f32.mrb[146].mxu1 }
 0xb15   : > { %v5338_v6 = vpop.f32.mrb[147].mxu1  ;;  %v13329_v31 = vpack.c.bf16 %v5344_v11, %v5344_v11  ;;  %v5347_v27 = vadd.f32 %v10002_v45, %v9166_v29 }
 0xb16   : > { %v13323_v63 = vpack.c.bf16 %v5336_v35, %v5336_v35  ;;  %v5339_v54 = vadd.f32 %v9166_v29, %v5338_v6 }
 0xb17   : > { %v13335_v4 = vpack.c.bf16 %v5347_v27, %v5347_v27 }
 0xb18   : > { %v13325_v41 = vpack.c.bf16 %v5339_v54, %v5339_v54  ;;  %5390 = vrot.lane.b32.xlu1 %v13323_v63, %s14362_s1 }
 0xb1a   : > { %5392 = vrot.lane.b32.xlu0 %v13325_v41, %s14362_s1 }
 0xb1c   : > { %5394 = vrot.lane.b32.xlu1 %v13329_v31, %s14362_s1 }
 0xb1e   : > { %5406 = vrot.lane.b32.xlu0 %v13323_v63, %s14363_s6 }
 0xb20   : > { %5396 = vrot.lane.b32.xlu1 %v13335_v4, %s14362_s1 }
 0xb4d   : > { %v10005_v42 = vpop.f32.mrb[148].mxu1 }
 0xb4e   : > { %v5360_v22 = vadd.f32 %v10005_v42, %v9166_v29  ;;  %v5351_v62 = vpop.f32.mrb[149].mxu1 }
 0xb4f   : > { %v5352_v13 = vadd.f32 %v9166_v29, %v5351_v62  ;;  %v10006_v8 = vpop.f32.mrb[150].mxu1 }
 0xb50   : > { %v5363_v38 = vadd.f32 %v10006_v8, %v9166_v29  ;;  %v5354_v10 = vpop.f32.mrb[151].mxu1  ;;  %v13349_v32 = vpack.c.bf16 %v5360_v22, %v5360_v22 }
 0xb51   : > { %v13341_v24 = vpack.c.bf16 %v5352_v13, %v5352_v13  ;;  %v5355_v53 = vadd.f32 %v9166_v29, %v5354_v10 }
 0xb52   : > { %v13353_v50 = vpack.c.bf16 %v5363_v38, %v5363_v38 }
 0xb53   : > { %v13343_v58 = vpack.c.bf16 %v5355_v53, %v5355_v53  ;;  %5398 = vrot.lane.b32.xlu1 %v13341_v24, %s14362_s1 }
 0xb55   : > { %5400 = vrot.lane.b32.xlu0 %v13343_v58, %s14362_s1 }
 0xb57   : > { %5454 = vrot.lane.b32.xlu1 %v13325_v41, %s14363_s6 }
 0xb59   : > { %5402 = vrot.lane.b32.xlu0 %v13349_v32, %s14362_s1 }
 0xb5b   : > { %5404 = vrot.lane.b32.xlu1 %v13353_v50, %s14362_s1 }
 0xb5d   : > { %5502 = vrot.lane.b32.xlu0 %v13329_v31, %s14363_s6 }
 0xb5f   : > { %5550 = vrot.lane.b32.xlu1 %v13335_v4, %s14363_s6 }
 0xb61   : > { %5598 = vrot.lane.b32.xlu0 %v13341_v24, %s14363_s6 }
 0xb63   : > { %5646 = vrot.lane.b32.xlu1 %v13343_v58, %s14363_s6 }
 0xb65   : > { %5694 = vrot.lane.b32.xlu0 %v13349_v32, %s14363_s6 }
 0xb67   : > { %5742 = vrot.lane.b32.xlu1 %v13353_v50, %s14363_s6 }
 0xb8a   : > { %v13371_v5 = vpop.permute.xlu1 %5390 }
 0xb8b   : > { %v9189_v25 = vcombine.low %v13371_v5, %v13371_v5 }
 0xb8c   : > { %v13375_v33 = vpop.permute.xlu0 %5392 }
 0xb8d   : > { %v13379_v26 = vcombine.low %v13375_v33, %v13375_v33  ;;  %5792 = vrot.lane.b32.xlu0 %v9189_v25, %s14363_s6 }
 0xb8e   : > { %v13382_v36 = vpop.permute.xlu1 %5394 }
 0xb8f   : > { %v13386_v55 = vcombine.low %v13382_v36, %v13382_v36  ;;  %5842 = vrot.lane.b32.xlu1 %v13379_v26, %s14363_s6 }
 0xb90   : > { %v5407_v47 = vpop.permute.xlu0 %5406 }
 0xb91   : > { %v5412_v14 = vsel %vm1308_vm9, %v5407_v47, 0  ;;  %5892 = vrot.lane.b32.xlu0 %v13386_v55, %s14363_s6 }
 0xb92   : > { %v13393_v39 = vpop.permute.xlu1 %5396  ;;  %10008 = vmatpush3.bf16.xpose.msra.mxu0 %v5412_v14 }
 0xb93   : > { %v13397_v57 = vcombine.low %v13393_v39, %v13393_v39  ;;  %10013 = vmatprep.subr.bf16.mxu0 %v14429_v44 }
 0xb95   : > { %5942 = vrot.lane.b32.xlu1 %v13397_v57, %s14363_s6 }
 0xb99   : > { %10010 = vmatmul.mubr.msk.bf16.vlgmr.msra.gmra.mrb[144].mxu0 %vm1308_vm9, %v13323_v63 }
 0xb9a   : > { %10015 = vmatprep.mubr.msk.bf16.mxu0 %vm11341_vm8, %v14429_v44 }
 0xbc5   : > { %v13406_v40 = vpop.permute.xlu1 %5398 }
 0xbc6   : > { %v13410_v1 = vcombine.low %v13406_v40, %v13406_v40 }
 0xbc7   : > { %v13412_v51 = vpop.permute.xlu0 %5400 }
 0xbc8   : > { %v13416_v9 = vcombine.low %v13412_v51, %v13412_v51  ;;  %5992 = vrot.lane.b32.xlu0 %v13410_v1, %s14363_s6 }
 0xbc9   : > { %v5455_v20 = vpop.permute.xlu1 %5454 }
 0xbca   : > { %v5460_v7 = vsel %vm1308_vm9, %v5455_v20, 0  ;;  %6042 = vrot.lane.b32.xlu1 %v13416_v9, %s14363_s6 }
 0xbcb   : > { %10014 = vmatpush3.bf16.xpose.msra.mxu0 %v5460_v7  ;;  %v13423_v2 = vpop.permute.xlu0 %5402 }
 0xbcc   : > { %v13427_v56 = vcombine.low %v13423_v2, %v13423_v2  ;;  %10025 = vmatprep.subr.bf16.mxu0 %v14429_v44 }
 0xbcd   : > { %v13430_v17 = vpop.permute.xlu1 %5404 }
 0xbce   : > { %v13434_v28 = vcombine.low %v13430_v17, %v13430_v17  ;;  %6092 = vrot.lane.b32.xlu0 %v13427_v56, %s14363_s6 }
 0xbcf   : > { %v5503_v37 = vpop.permute.xlu0 %5502 }
 0xbd0   : > { %v5508_v15 = vsel %vm1308_vm9, %v5503_v37, 0  ;;  %6142 = vrot.lane.b32.xlu1 %v13434_v28, %s14363_s6 }
 0xbd1   : > { %v5551_v29 = vpop.permute.xlu1 %5550  ;;  %10020 = vmatpush3.bf16.xpose.msra.mxu1 %v5508_v15 }
 0xbd2   : > { %v5556_v43 = vsel %vm1308_vm9, %v5551_v29, 0  ;;  %10016 = vmatmul.mubr.msk.bf16.vlgmr.msra.gmra.mrb[148].mxu0 %vm1308_vm9, %v13325_v41  ;;  %6430 = vrot.lane.b32.xlu0 %v13325_v41, %s14446_s20 }
 0xbd3   : > { %10026 = vmatpush3.bf16.xpose.msra.mxu0 %v5556_v43  ;;  %10031 = vmatprep.subr.bf16.mxu1 %v14429_v44  ;;  %v5599_v0 = vpop.permute.xlu0 %5598 }
 0xbd4   : > { %6382 = vrot.lane.b32.xlu1 %v13323_v63, %s14446_s20  ;;  %10027 = vmatprep.mubr.msk.bf16.mxu0 %vm11341_vm8, %v14429_v44  ;;  %v5604_v45 = vsel %vm1308_vm9, %v5599_v0, 0 }
 0xbd5   : > { %10037 = vmatprep.subr.bf16.mxu0 %v14429_v44  ;;  %v5647_v35 = vpop.permute.xlu1 %5646 }
 0xbd6   : > { %6526 = vrot.lane.b32.xlu0 %v13335_v4, %s14446_s20  ;;  %v5652_v6 = vsel %vm1308_vm9, %v5647_v35, 0 }
 0xbd7   : > { %v5695_v11 = vpop.permute.xlu0 %5694 }
 0xbd8   : > { %6478 = vrot.lane.b32.xlu1 %v13329_v31, %s14446_s20  ;;  %10022 = vmatmul.mubr.msk.bf16.vlgmr.msra.gmra.mrb[152].mxu1 %vm1308_vm9, %v13329_v31  ;;  %v5700_v54 = vsel %vm1308_vm9, %v5695_v11, 0 }
 0xbd9   : > { %10032 = vmatpush3.bf16.xpose.msra.mxu1 %v5604_v45  ;;  %10033 = vmatprep.mubr.msk.bf16.mxu1 %vm11341_vm8, %v14429_v44  ;;  %v5743_v63 = vpop.permute.xlu1 %5742 }
 0xbda   : > { %10028 = vmatmul.mubr.msk.bf16.vlgmr.msra.gmra.mrb[152].mxu0 %vm1308_vm9, %v13335_v4  ;;  %6622 = vrot.lane.b32.xlu0 %v13343_v58, %s14446_s20  ;;  %v5748_v41 = vsel %vm1308_vm9, %v5743_v63, 0 }
 0xbdb   : > { %10038 = vmatpush3.bf16.xpose.msra.mxu0 %v5652_v6  ;;  %10043 = vmatprep.subr.bf16.mxu1 %v14429_v44 }
 0xbdc   : > { %6574 = vrot.lane.b32.xlu1 %v13341_v24, %s14446_s20  ;;  %10039 = vmatprep.mubr.msk.bf16.mxu0 %vm11341_vm8, %v14429_v44 }
 0xbdd   : > { %10049 = vmatprep.subr.bf16.mxu0 %v14429_v44 }
 0xbde   : > { %6766 = vrot.lane.b32.xlu0 %v9189_v25, %s14446_s20 }
 0xbe0   : > { %6670 = vrot.lane.b32.xlu1 %v13349_v32, %s14446_s20  ;;  %10034 = vmatmul.mubr.msk.bf16.vlgmr.msra.gmra.mrb[156].mxu1 %vm1308_vm9, %v13341_v24 }
 0xbe1   : > { %10044 = vmatpush3.bf16.xpose.msra.mxu1 %v5700_v54  ;;  %10045 = vmatprep.mubr.msk.bf16.mxu1 %vm11341_vm8, %v14429_v44 }
 0xbe2   : > { %10040 = vmatmul.mubr.msk.bf16.vlgmr.msra.gmra.mrb[156].mxu0 %vm1308_vm9, %v13343_v58  ;;  %10055 = vmatprep.subr.bf16.mxu1 %v14429_v44 }
 0xbe3   : > { %10050 = vmatpush3.bf16.xpose.msra.mxu0 %v5748_v41  ;;  %10051 = vmatprep.mubr.msk.bf16.mxu0 %vm11341_vm8, %v14429_v44 }
 0xbe4   : > { %6718 = vrot.lane.b32.xlu1 %v13353_v50, %s14446_s20  ;;  %10061 = vmatprep.subr.bf16.mxu0 %v14429_v44 }
 0xbe8   : > { %6814 = vrot.lane.b32.xlu1 %v13379_v26, %s14446_s20  ;;  %10046 = vmatmul.mubr.msk.bf16.vlgmr.msra.gmra.mrb[160].mxu1 %vm1308_vm9, %v13349_v32 }
 0xbe9   : > { %10057 = vmatprep.mubr.msk.bf16.mxu1 %vm11341_vm8, %v14429_v44 }
 0xbea   : > { %10052 = vmatmul.mubr.msk.bf16.vlgmr.msra.gmra.mrb[160].mxu0 %vm1308_vm9, %v13353_v50 }
 0xbeb   : > { %10063 = vmatprep.mubr.msk.bf16.mxu0 %vm11341_vm8, %v14429_v44 }
 0xbff   : > { %v5793_v31 = vpop.permute.xlu0 %5792 }
 0xc00   : > { %v5798_v27 = vsel %vm1308_vm9, %v5793_v31, 0 }
 0xc01   : > { %v5843_v4 = vpop.permute.xlu1 %5842  ;;  %10056 = vmatpush3.bf16.xpose.msra.mxu1 %v5798_v27 }
 0xc02   : > { %v5848_v42 = vsel %vm1308_vm9, %v5843_v4, 0  ;;  %10067 = vmatprep.subr.bf16.mxu1 %v14429_v44 }
 0xc03   : > { %10062 = vmatpush3.bf16.xpose.msra.mxu0 %v5848_v42  ;;  %v5893_v22 = vpop.permute.xlu0 %5892 }
 0xc04   : > { %10073 = vmatprep.subr.bf16.mxu0 %v14429_v44  ;;  %v5898_v13 = vsel %vm1308_vm9, %v5893_v22, 0 }
 0xc07   : > { %v5943_v62 = vpop.permute.xlu1 %5942 }
 0xc08   : > { %10058 = vmatmul.mubr.msk.bf16.vlgmr.msra.gmra.mrb[164].mxu1 %vm1308_vm9, %v13371_v5  ;;  %v5948_v8 = vsel %vm1308_vm9, %v5943_v62, 0 }
 0xc09   : > { %10068 = vmatpush3.bf16.xpose.msra.mxu1 %v5898_v13  ;;  %10069 = vmatprep.mubr.msk.bf16.mxu1 %vm11341_vm8, %v14429_v44 }
 0xc0a   : > { %10064 = vmatmul.mubr.msk.bf16.vlgmr.msra.gmra.mrb[164].mxu0 %vm1308_vm9, %v13375_v33  ;;  %10079 = vmatprep.subr.bf16.mxu1 %v14429_v44 }
 0xc0b   : > { %10074 = vmatpush3.bf16.xpose.msra.mxu0 %v5948_v8  ;;  %10075 = vmatprep.mubr.msk.bf16.mxu0 %vm11341_vm8, %v14429_v44 }
 0xc0c   : > { %10085 = vmatprep.subr.bf16.mxu0 %v14429_v44 }
 0xc10   : > { %10070 = vmatmul.mubr.msk.bf16.vlgmr.msra.gmra.mrb[168].mxu1 %vm1308_vm9, %v13382_v36 }
 0xc11   : > { %10081 = vmatprep.mubr.msk.bf16.mxu1 %vm11341_vm8, %v14429_v44 }
 0xc12   : > { %10076 = vmatmul.mubr.msk.bf16.vlgmr.msra.gmra.mrb[168].mxu0 %vm1308_vm9, %v13393_v39 }
 0xc13   : > { %10087 = vmatprep.mubr.msk.bf16.mxu0 %vm11341_vm8, %v14429_v44 }
 0xc3a   : > { %v5993_v38 = vpop.permute.xlu0 %5992 }
 0xc3b   : > { %v5998_v10 = vsel %vm1308_vm9, %v5993_v38, 0 }
 0xc3c   : > { %v6043_v24 = vpop.permute.xlu1 %6042  ;;  %10080 = vmatpush3.bf16.xpose.msra.mxu1 %v5998_v10 }
 0xc3d   : > { %v6048_v53 = vsel %vm1308_vm9, %v6043_v24, 0  ;;  %10091 = vmatprep.subr.bf16.mxu1 %v14429_v44 }
 0xc3e   : > { %10086 = vmatpush3.bf16.xpose.msra.mxu0 %v6048_v53 }
 0xc3f   : > { %10097 = vmatprep.subr.bf16.mxu0 %v14429_v44 }
 0xc40   : > { %v6093_v58 = vpop.permute.xlu0 %6092 }
 0xc41   : > { %v6098_v50 = vsel %vm1308_vm9, %v6093_v58, 0 }
 0xc42   : > { %v6143_v32 = vpop.permute.xlu1 %6142 }
 0xc43   : > { %10082 = vmatmul.mubr.msk.bf16.vlgmr.msra.gmra.mrb[172].mxu1 %vm1308_vm9, %v13406_v40  ;;  %v6148_v5 = vsel %vm1308_vm9, %v6143_v32, 0 }
 0xc44   : > { %10092 = vmatpush3.bf16.xpose.msra.mxu1 %v6098_v50  ;;  %10093 = vmatprep.mubr.msk.bf16.mxu1 %vm11341_vm8, %v14429_v44  ;;  %v6431_v33 = vpop.permute.xlu0 %6430 }
 0xc45   : > { %10088 = vmatmul.mubr.msk.bf16.vlgmr.msra.gmra.mrb[172].mxu0 %vm1308_vm9, %v13412_v51  ;;  %10103 = vmatprep.subr.bf16.mxu1 %v14429_v44  ;;  %v6436_v36 = vsel %vm3279_vm11, %v6431_v33, 0 }
 0xc46   : > { %10098 = vmatpush3.bf16.xpose.msra.mxu0 %v6148_v5  ;;  %10099 = vmatprep.mubr.msk.bf16.mxu0 %vm11341_vm8, %v14429_v44  ;;  %v6383_v25 = vpop.permute.xlu1 %6382 }
 0xc47   : > { %10109 = vmatprep.subr.bf16.mxu0 %v14429_v44  ;;  %v6388_v26 = vsel %vm3279_vm11, %v6383_v25, 0 }
 0xc4b   : > { %10094 = vmatmul.mubr.msk.bf16.vlgmr.msra.gmra.mrb[176].mxu1 %vm1308_vm9, %v13423_v2 }
 0xc4c   : > { %10104 = vmatpush3.bf16.msra.mxu1 %v6388_v26  ;;  %10105 = vmatprep.mubr.msk.bf16.mxu1 %vm11341_vm8, %v14429_v44 }
 0xc4d   : > { %10100 = vmatmul.mubr.msk.bf16.vlgmr.msra.gmra.mrb[176].mxu0 %vm1308_vm9, %v13430_v17  ;;  %10115 = vmatprep.subr.bf16.mxu1 %v14429_v44 }
 0xc4e   : > { %10110 = vmatpush3.bf16.msra.mxu0 %v6436_v36  ;;  %10111 = vmatprep.mubr.msk.bf16.mxu0 %vm11341_vm8, %v14429_v44 }
 0xc4f   : > { %10121 = vmatprep.subr.bf16.mxu0 %v14429_v44 }
 0xc6c   : > { %v13551_v47 = vpop.f32.mrb[144].mxu0 }
 0xc6d   : > { %v10011_v14 = vpop.f32.mrb[145].mxu0  ;;  %v6190_v63 = vsel %vm2891_vm10, %v13551_v47, -inf }
 0xc6e   : > { %v5451_v39 = vpop.f32.mrb[146].mxu0 }
 0xc6f   : > { %v10012_v40 = vpop.f32.mrb[147].mxu0 }
 0xca5   : > { %v13553_v51 = vpop.f32.mrb[148].mxu0 }
 0xca6   : > { %v10017_v20 = vpop.f32.mrb[149].mxu0  ;;  %v6193_v7 = vsel %vm2891_vm10, %v13553_v51, -inf }
 0xca7   : > { %v5499_v2 = vpop.f32.mrb[150].mxu0  ;;  %6194 = vmax.xlane.f32.xlu1 %v6193_v7 }
 0xca8   : > { %v10018_v17 = vpop.f32.mrb[151].mxu0 }
 0xcab   : > { %v13557_v37 = vpop.f32.mrb[152].mxu1 }
 0xcac   : > { %v10023_v15 = vpop.f32.mrb[153].mxu1  ;;  %v6196_v29 = vsel %vm2891_vm10, %v13557_v37, -inf }
 0xcad   : > { %v13561_v43 = vpop.f32.mrb[152].mxu0  ;;  %6197 = vmax.xlane.f32.xlu0 %v6196_v29  ;;  %v5547_v0 = vpop.f32.mrb[154].mxu1 }
 0xcae   : > { %v10024_v35 = vpop.f32.mrb[155].mxu1  ;;  %v10029_v45 = vpop.f32.mrb[153].mxu0  ;;  %v6199_v31 = vsel %vm2891_vm10, %v13561_v43, -inf }
 0xcaf   : > { %v5595_v6 = vpop.f32.mrb[154].mxu0 }
 0xcb0   : > { %v10030_v11 = vpop.f32.mrb[155].mxu0 }
 0xcb1   : > { %6191 = vmax.xlane.f32.xlu0 %v6190_v63 }
 0xcb3   : > { %v13565_v54 = vpop.f32.mrb[156].mxu1 }
 0xcb4   : > { %v10035_v41 = vpop.f32.mrb[157].mxu1  ;;  %v6202_v27 = vsel %vm2891_vm10, %v13565_v54, -inf }
 0xcb5   : > { %v13571_v4 = vpop.f32.mrb[156].mxu0  ;;  %6200 = vmax.xlane.f32.xlu0 %v6199_v31  ;;  %6203 = vmax.xlane.f32.xlu1 %v6202_v27  ;;  %v5643_v42 = vpop.f32.mrb[158].mxu1 }
 0xcb6   : > { %v10036_v22 = vpop.f32.mrb[159].mxu1  ;;  %v10041_v62 = vpop.f32.mrb[157].mxu0  ;;  %v6205_v38 = vsel %vm2891_vm10, %v13571_v4, -inf }
 0xcb7   : > { %v5691_v13 = vpop.f32.mrb[158].mxu0 }
 0xcb8   : > { %v10042_v8 = vpop.f32.mrb[159].mxu0 }
 0xcb9   : > { %6206 = vmax.xlane.f32.xlu0 %v6205_v38 }
 0xcbb   : > { %v13575_v10 = vpop.f32.mrb[160].mxu1 }
 0xcbc   : > { %v10047_v24 = vpop.f32.mrb[161].mxu1  ;;  %v6208_v53 = vsel %vm2891_vm10, %v13575_v10, -inf }
 0xcbd   : > { %v13579_v58 = vpop.f32.mrb[160].mxu0  ;;  %6209 = vmax.xlane.f32.xlu1 %v6208_v53  ;;  %v5739_v32 = vpop.f32.mrb[162].mxu1 }
 0xcbe   : > { %v10048_v50 = vpop.f32.mrb[163].mxu1  ;;  %v10053_v5 = vpop.f32.mrb[161].mxu0  ;;  %v6211_v25 = vsel %vm2891_vm10, %v13579_v58, -inf }
 0xcbf   : > { %v5787_v33 = vpop.f32.mrb[162].mxu0  ;;  %6212 = vmax.xlane.f32.xlu0 %v6211_v25 }
 0xcc0   : > { %v10054_v26 = vpop.f32.mrb[163].mxu0 }
 0xcdb   : > { %v13583_v36 = vpop.f32.mrb[164].mxu1 }
 0xcdc   : > { %v10059_v14 = vpop.f32.mrb[165].mxu1  ;;  %v6214_v39 = vsel %vm2891_vm10, %v13583_v36, -inf }
 0xcdd   : > { %v13587_v40 = vpop.f32.mrb[164].mxu0  ;;  %6215 = vmax.xlane.f32.xlu1 %v6214_v39  ;;  %v5837_v20 = vpop.f32.mrb[166].mxu1 }
 0xcde   : > { %v10060_v7 = vpop.f32.mrb[167].mxu1  ;;  %v10065_v2 = vpop.f32.mrb[165].mxu0  ;;  %v6217_v17 = vsel %vm2891_vm10, %v13587_v40, -inf }
 0xcdf   : > { %v5887_v15 = vpop.f32.mrb[166].mxu0  ;;  %6218 = vmax.xlane.f32.xlu0 %v6217_v17  ;;  %v13615_v17 = vpop.permute.xlu1 %6478 }
 0xce0   : > { %v10066_v29 = vpop.f32.mrb[167].mxu0 }
 0xce3   : > { %v13591_v0 = vpop.f32.mrb[168].mxu1 }
 0xce4   : > { %v10071_v35 = vpop.f32.mrb[169].mxu1  ;;  %v6220_v45 = vsel %vm2891_vm10, %v13591_v0, -inf }
 0xce5   : > { %v13595_v6 = vpop.f32.mrb[168].mxu0  ;;  %6221 = vmax.xlane.f32.xlu1 %v6220_v45  ;;  %v5937_v11 = vpop.f32.mrb[170].mxu1 }
 0xce6   : > { %v10072_v63 = vpop.f32.mrb[171].mxu1  ;;  %v10077_v41 = vpop.f32.mrb[169].mxu0  ;;  %v6223_v31 = vsel %vm2891_vm10, %v13595_v6, -inf }
 0xce7   : > { %v5987_v27 = vpop.f32.mrb[170].mxu0  ;;  %6224 = vmax.xlane.f32.xlu0 %v6223_v31  ;;  %v13617_v35 = vpop.permute.xlu1 %6574 }
 0xce8   : > { %v10078_v42 = vpop.f32.mrb[171].mxu0  ;;  %v13619_v45 = vpop.permute.xlu0 %6526 }
 0xceb   : > { %v13621_v11 = vpop.permute.xlu1 %6670 }
 0xcec   : > { %v13623_v63 = vpop.permute.xlu0 %6622 }
 0xcef   : > { %v13627_v41 = vpop.permute.xlu1 %6718 }
 0xcf0   : > { %v13629_v31 = vpop.permute.xlu0 %6766 }
 0xcf3   : > { %v13633_v27 = vpop.permute.xlu1 %6814 }
 0xd16   : > { %v13599_v22 = vpop.f32.mrb[172].mxu1 }
 0xd17   : > { %v10083_v62 = vpop.f32.mrb[173].mxu1  ;;  %v6226_v13 = vsel %vm2891_vm10, %v13599_v22, -inf }
 0xd18   : > { %v13603_v8 = vpop.f32.mrb[172].mxu0  ;;  %6227 = vmax.xlane.f32.xlu1 %v6226_v13  ;;  %v6037_v38 = vpop.f32.mrb[174].mxu1 }
 0xd19   : > { %v10084_v24 = vpop.f32.mrb[175].mxu1  ;;  %v10089_v53 = vpop.f32.mrb[173].mxu0  ;;  %v6229_v32 = vsel %vm2891_vm10, %v13603_v8, -inf }
 0xd1a   : > { %v6087_v50 = vpop.f32.mrb[174].mxu0  ;;  %6230 = vmax.xlane.f32.xlu0 %v6229_v32 }
 0xd1b   : > { %v10090_v5 = vpop.f32.mrb[175].mxu0 }
 0xd1e   : > { %v13607_v25 = vpop.f32.mrb[176].mxu1 }
 0xd1f   : > { %v10095_v33 = vpop.f32.mrb[177].mxu1  ;;  %v6232_v26 = vsel %vm2891_vm10, %v13607_v25, -inf }
 0xd20   : > { %v13611_v14 = vpop.f32.mrb[176].mxu0  ;;  %6233 = vmax.xlane.f32.xlu1 %v6232_v26  ;;  %v6137_v39 = vpop.f32.mrb[178].mxu1 }
 0xd21   : > { %v10096_v20 = vpop.f32.mrb[179].mxu1  ;;  %v10101_v7 = vpop.f32.mrb[177].mxu0  ;;  %v6235_v2 = vsel %vm2891_vm10, %v13611_v14, -inf }
 0xd22   : > { %v6187_v15 = vpop.f32.mrb[178].mxu0  ;;  %6236 = vmax.xlane.f32.xlu0 %v6235_v2 }
 0xd23   : > { %v10102_v29 = vpop.f32.mrb[179].mxu0 }
 0xd31   : > { %6910 = vrot.lane.b32.xlu1 %v13397_v57, %s14446_s20 }
 0xd34   : > { %v6195_v62 = vpop.xlane.xlu1 %6194 }
 0xd35   : > { %v6239_v24 = vsub.f32 %v13553_v51, %v6195_v62 }
 0xd37   : > { %v6256_v5 = vmul.f32 1.442695, %v6239_v24 }
 0xd38   : > { %6862 = vrot.lane.b32.xlu0 %v13386_v55, %s14446_s20 }
 0xd3a   : > { %v6198_v42 = vpop.xlane.xlu0 %6197 }
 0xd3b   : > { %v6240_v38 = vsub.f32 %v13557_v37, %v6198_v42 }
 0xd3d   : > { %v6258_v32 = vmul.f32 1.442695, %v6240_v38 }
 0xd3e   : > { %v6192_v13 = vpop.xlane.xlu0 %6191 }
 0xd3f   : > { %v6238_v57 = vsub.f32 %v13551_v47, %v6192_v13  ;;  %10763 = vpow2.f32 %v6258_v32 }
 0xd40   : > { %10765 = vpow2.f32 %v6256_v5 }
 0xd41   : > { %v6254_v55 = vmul.f32 1.442695, %v6238_v57 }
 0xd42   : > { %v6201_v53 = vpop.xlane.xlu0 %6200  ;;  %v6204_v50 = vpop.xlane.xlu1 %6203 }
 0xd43   : > { %v6241_v33 = vsub.f32 %v13561_v43, %v6201_v53  ;;  %v6242_v39 = vsub.f32 %v13565_v54, %v6204_v50  ;;  %10767 = vpow2.f32 %v6254_v55 }
 0xd45   : > { %v6260_v20 = vmul.f32 1.442695, %v6241_v33  ;;  %v6262_v51 = vmul.f32 1.442695, %v6242_v39 }
 0xd46   : > { %v6207_v26 = vpop.xlane.xlu0 %6206 }
 0xd47   : > { %v6243_v7 = vsub.f32 %v13571_v4, %v6207_v26  ;;  %10769 = vpow2.f32 %v6260_v20 }
 0xd48   : > { %10771 = vpow2.f32 %v6262_v51 }
 0xd49   : > { %v6264_v47 = vmul.f32 1.442695, %v6243_v7  ;;  %v13643_v42 = vpop.eup %10763 }
 0xd4a   : > { %v6210_v37 = vpop.xlane.xlu1 %6209  ;;  %v13645_v62 = vpop.eup %10765  ;;  %v6292_v4 = vsel %vm2891_vm10, %v13643_v42, 0.0 }
 0xd4b   : > { %v6244_v2 = vsub.f32 %v13575_v10, %v6210_v37  ;;  %10773 = vpow2.f32 %v6264_v47  ;;  %v6289_v10 = vsel %vm2891_vm10, %v13645_v62, 0.0 }
 0xd4c   : > { %v6213_v15 = vpop.xlane.xlu0 %6212 }
 0xd4d   : > { %v6245_v29 = vsub.f32 %v13579_v58, %v6213_v15  ;;  %v6266_v43 = vmul.f32 1.442695, %v6244_v2  ;;  %v13649_v13 = vpop.eup %10767 }
 0xd4e   : > { %v6286_v38 = vsel %vm2891_vm10, %v13649_v13, 0.0 }
 0xd4f   : > { %v6268_v54 = vmul.f32 1.442695, %v6245_v29  ;;  %10775 = vpow2.f32 %v6266_v43 }
 0xd51   : > { %10777 = vpow2.f32 %v6268_v54  ;;  %v13653_v58 = vpop.eup %10769 }
 0xd52   : > { %v13657_v24 = vpop.eup %10771  ;;  %v6295_v53 = vsel %vm2891_vm10, %v13653_v58, 0.0 }
 0xd53   : > { %v6298_v57 = vsel %vm2891_vm10, %v13657_v24, 0.0 }
 0xd55   : > { %6293 = vadd.xlane.f32.xlu1 %v6292_v4  ;;  %v13661_v32 = vpop.eup %10773 }
 0xd56   : > { %v6301_v5 = vsel %vm2891_vm10, %v13661_v32, 0.0 }
 0xd57   : > { %6290 = vadd.xlane.f32.xlu0 %v6289_v10 }
 0xd59   : > { %6287 = vadd.xlane.f32.xlu1 %v6286_v38  ;;  %v13665_v50 = vpop.eup %10775 }
 0xd5a   : > { %v6304_v26 = vsel %vm2891_vm10, %v13665_v50, 0.0 }
 0xd5b   : > { %6296 = vadd.xlane.f32.xlu0 %v6295_v53  ;;  %v13669_v33 = vpop.eup %10777 }
 0xd5c   : > { %v6307_v55 = vsel %vm2891_vm10, %v13669_v33, 0.0 }
 0xd5d   : > { %6299 = vadd.xlane.f32.xlu1 %v6298_v57 }
 0xd5f   : > { %6302 = vadd.xlane.f32.xlu0 %v6301_v5 }
 0xd61   : > { %6305 = vadd.xlane.f32.xlu1 %v6304_v26 }
 0xd63   : > { %6308 = vadd.xlane.f32.xlu0 %v6307_v55 }
 0xd6a   : > { %v6216_v39 = vpop.xlane.xlu1 %6215 }
 0xd6b   : > { %v6246_v20 = vsub.f32 %v13583_v36, %v6216_v39 }
 0xd6c   : > { %v6219_v7 = vpop.xlane.xlu0 %6218 }
 0xd6d   : > { %v6270_v37 = vmul.f32 1.442695, %v6246_v20  ;;  %v6247_v51 = vsub.f32 %v13587_v40, %v6219_v7 }
 0xd6f   : > { %10779 = vpow2.f32 %v6270_v37  ;;  %v6272_v2 = vmul.f32 1.442695, %v6247_v51 }
 0xd71   : > { %10781 = vpow2.f32 %v6272_v2 }
 0xd72   : > { %v6222_v15 = vpop.xlane.xlu1 %6221 }
 0xd73   : > { %v6248_v47 = vsub.f32 %v13591_v0, %v6222_v15 }
 0xd74   : > { %v6225_v29 = vpop.xlane.xlu0 %6224 }
 0xd75   : > { %v6274_v43 = vmul.f32 1.442695, %v6248_v47  ;;  %v6249_v54 = vsub.f32 %v13595_v6, %v6225_v29 }
 0xd77   : > { %10783 = vpow2.f32 %v6274_v43  ;;  %v6276_v4 = vmul.f32 1.442695, %v6249_v54 }
 0xd79   : > { %v13679_v10 = vpop.eup %10779  ;;  %10785 = vpow2.f32 %v6276_v4 }
 0xd7a   : > { %v6310_v36 = vsel %vm2891_vm10, %v13679_v10, 0.0 }
 0xd7b   : > { %v13683_v38 = vpop.eup %10781  ;;  %6311 = vadd.xlane.f32.xlu1 %v6310_v36 }
 0xd7c   : > { %v6313_v40 = vsel %vm2891_vm10, %v13683_v38, 0.0 }
 0xd7d   : > { %6314 = vadd.xlane.f32.xlu0 %v6313_v40 }
 0xd81   : > { %v13687_v0 = vpop.eup %10783 }
 0xd82   : > { %v6316_v6 = vsel %vm2891_vm10, %v13687_v0, 0.0 }
 0xd83   : > { %v13691_v53 = vpop.eup %10785  ;;  %6317 = vadd.xlane.f32.xlu1 %v6316_v6 }
 0xd84   : > { %v6319_v57 = vsel %vm2891_vm10, %v13691_v53, 0.0 }
 0xd85   : > { %6320 = vadd.xlane.f32.xlu0 %v6319_v57 }
 0xd94   : > { %7006 = vrot.lane.b32.xlu1 %v13416_v9, %s14446_s20 }
 0xd9b   : > { %6958 = vrot.lane.b32.xlu0 %v13410_v1, %s14446_s20 }
 0xda5   : > { %v6228_v5 = vpop.xlane.xlu1 %6227 }
 0xda6   : > { %v6250_v26 = vsub.f32 %v13599_v22, %v6228_v5 }
 0xda7   : > { %v6231_v55 = vpop.xlane.xlu0 %6230 }
 0xda8   : > { %v6278_v39 = vmul.f32 1.442695, %v6250_v26  ;;  %v6251_v20 = vsub.f32 %v13603_v8, %v6231_v55 }
 0xdaa   : > { %v6280_v7 = vmul.f32 1.442695, %v6251_v20  ;;  %10787 = vpow2.f32 %v6278_v39 }
 0xdac   : > { %10789 = vpow2.f32 %v6280_v7 }
 0xdad   : > { %v6234_v37 = vpop.xlane.xlu1 %6233 }
 0xdae   : > { %v6252_v51 = vsub.f32 %v13607_v25, %v6234_v37 }
 0xdaf   : > { %v6237_v2 = vpop.xlane.xlu0 %6236 }
 0xdb0   : > { %v6282_v15 = vmul.f32 1.442695, %v6252_v51  ;;  %v6253_v9 = vsub.f32 %v13611_v14, %v6237_v2  ;;  %v6532_v51 = vsel %vm3279_vm11, %v13619_v45, 0 }
 0xdb1   : > { %v13723_v4 = vpop.permute.xlu1 %6910 }
 0xdb2   : > { %10791 = vpow2.f32 %v6282_v15  ;;  %v6284_v47 = vmul.f32 1.442695, %v6253_v9 }
 0xdb3   : > { %v13725_v36 = vpop.permute.xlu0 %6862 }
 0xdb4   : > { %10793 = vpow2.f32 %v6284_v47  ;;  %v13703_v1 = vpop.eup %10787 }
 0xdb5   : > { %v6322_v29 = vsel %vm2891_vm10, %v13703_v1, 0.0 }
 0xdb6   : > { %v13705_v22 = vpop.eup %10789 }
 0xdb7   : > { %v6325_v8 = vsel %vm2891_vm10, %v13705_v22, 0.0 }
 0xdb8   : > { %6326 = vadd.xlane.f32.xlu1 %v6325_v8 }
 0xdba   : > { %6323 = vadd.xlane.f32.xlu0 %v6322_v29 }
 0xdbc   : > { %v13711_v25 = vpop.eup %10791 }
 0xdbd   : > { %v6328_v14 = vsel %vm2891_vm10, %v13711_v25, 0.0 }
 0xdbe   : > { %v13715_v43 = vpop.eup %10793  ;;  %6329 = vadd.xlane.f32.xlu0 %v6328_v14 }
 0xdbf   : > { %v6331_v54 = vsel %vm2891_vm10, %v13715_v43, 0.0 }
 0xdc0   : > { %6332 = vadd.xlane.f32.xlu1 %v6331_v54 }
 0xdd1   : > { %7102 = vrot.lane.b32.xlu1 %v13434_v28, %s14446_s20 }
 0xdd4   : > { %7054 = vrot.lane.b32.xlu0 %v13427_v56, %s14446_s20 }
 0xde2   : > { %v6294_v40 = vpop.xlane.xlu1 %6293 }
 0xde4   : > { %v6291_v6 = vpop.xlane.xlu0 %6290 }
 0xde5   : > { %10795 = vrcp.f32 %v6291_v6 }
 0xde6   : > { %v6288_v57 = vpop.xlane.xlu1 %6287 }
 0xde7   : > { %10797 = vrcp.f32 %v6288_v57  ;;  %v6724_v57 = vsel %vm3279_vm11, %v13627_v41, 0 }
 0xde8   : > { %v6297_v5 = vpop.xlane.xlu0 %6296 }
 0xde9   : > { %10799 = vrcp.f32 %v6297_v5  ;;  %v6676_v5 = vsel %vm3279_vm11, %v13621_v11, 0  ;;  %v6820_v11 = vsel %vm3279_vm11, %v13633_v27, 0 }
 0xdea   : > { %10801 = vrcp.f32 %v6294_v40  ;;  %v6300_v28 = vpop.xlane.xlu1 %6299 }
 0xdec   : > { %v6303_v26 = vpop.xlane.xlu0 %6302 }
 0xded   : > { %10803 = vrcp.f32 %v6303_v26 }
 0xdee   : > { %10805 = vrcp.f32 %v6300_v28  ;;  %v6306_v47 = vpop.xlane.xlu1 %6305 }
 0xdef   : > { %v10796_v55 = vpop.eup %10795 }
 0xdf0   : > { %v6351_v39 = vmul.f32 %v10796_v55, %v13645_v62  ;;  %v6484_v62 = vsel %vm3279_vm11, %v13615_v17, 0  ;;  %v6628_v17 = vsel %vm3279_vm11, %v13623_v63, 0 }
 0xdf1   : > { %v10798_v20 = vpop.eup %10797 }
 0xdf2   : > { %v6350_v56 = vmul.f32 %v10798_v20, %v13649_v13  ;;  %v6367_v7 = vpack.c.bf16 %v6351_v39, %v6351_v39  ;;  %v6309_v13 = vpop.xlane.xlu0 %6308 }
 0xdf3   : > { %v10800_v37 = vpop.eup %10799  ;;  %10807 = vrcp.f32 %v6309_v13 }
 0xdf4   : > { %10112 = vmatmul.mubr.msk.bf16.vlgmr.msra.gmra.mrb[180].mxu0 %vm2891_vm10, %v6367_v7  ;;  %v6366_v2 = vpack.c.bf16 %v6350_v56, %v6350_v56  ;;  %v10802_v15 = vpop.eup %10801  ;;  %v6353_v9 = vmul.f32 %v10800_v37, %v13653_v58  ;;  %10809 = vrcp.f32 %v6306_v47 }
 0xdf5   : > { %10122 = vmatpush3.bf16.msra.mxu0 %v6532_v51  ;;  %10123 = vmatprep.mubr.msk.bf16.mxu0 %vm11341_vm8, %v14429_v44  ;;  %v6352_v45 = vmul.f32 %v10802_v15, %v13643_v42  ;;  %v6580_v42 = vsel %vm3279_vm11, %v13617_v35, 0  ;;  %v6868_v51 = vsel %vm3279_vm11, %v13725_v36, 0  ;;  %v6916_v15 = vsel %vm3279_vm11, %v13723_v4, 0 }
 0xdf6   : > { %10106 = vmatmul.mubr.msk.bf16.vlgmr.msra.gmra.mrb[180].mxu1 %vm2891_vm10, %v6366_v2  ;;  %10133 = vmatprep.subr.bf16.mxu0 %v14429_v44  ;;  %v6369_v8 = vpack.c.bf16 %v6353_v9, %v6353_v9 }
 0xdf7   : > { %10116 = vmatpush3.bf16.msra.mxu1 %v6484_v62  ;;  %10117 = vmatprep.mubr.msk.bf16.mxu1 %vm11341_vm8, %v14429_v44  ;;  %v10804_v29 = vpop.eup %10803  ;;  %v6368_v58 = vpack.c.bf16 %v6352_v45, %v6352_v45 }
 0xdf8   : > { %10127 = vmatprep.subr.bf16.mxu1 %v14429_v44  ;;  %v10806_v14 = vpop.eup %10805  ;;  %v6355_v54 = vmul.f32 %v10804_v29, %v13661_v32 }
 0xdf9   : > { %v6354_v63 = vmul.f32 %v10806_v14, %v13657_v24 }
 0xdfa   : > { %v6371_v40 = vpack.c.bf16 %v6355_v54, %v6355_v54 }
 0xdfb   : > { %v6370_v35 = vpack.c.bf16 %v6354_v63, %v6354_v63 }
 0xdfc   : > { %10124 = vmatmul.mubr.msk.bf16.vlgmr.msra.gmra.mrb[184].mxu0 %vm2891_vm10, %v6369_v8 }
 0xdfd   : > { %10134 = vmatpush3.bf16.msra.mxu0 %v6628_v17  ;;  %10135 = vmatprep.mubr.msk.bf16.mxu0 %vm11341_vm8, %v14429_v44  ;;  %v10808_v6 = vpop.eup %10807 }
 0xdfe   : > { %10118 = vmatmul.mubr.msk.bf16.vlgmr.msra.gmra.mrb[184].mxu1 %vm2891_vm10, %v6368_v58  ;;  %10145 = vmatprep.subr.bf16.mxu0 %v14429_v44  ;;  %v10810_v32 = vpop.eup %10809  ;;  %v6357_v24 = vmul.f32 %v10808_v6, %v13669_v33 }
 0xdff   : > { %10128 = vmatpush3.bf16.msra.mxu1 %v6580_v42  ;;  %10129 = vmatprep.mubr.msk.bf16.mxu1 %vm11341_vm8, %v14429_v44  ;;  %v6356_v41 = vmul.f32 %v10810_v32, %v13665_v50  ;;  %v6772_v50 = vsel %vm3279_vm11, %v13629_v31, 0 }
 0xe00   : > { %10139 = vmatprep.subr.bf16.mxu1 %v14429_v44  ;;  %v6373_v39 = vpack.c.bf16 %v6357_v24, %v6357_v24 }
 0xe01   : > { %v6372_v33 = vpack.c.bf16 %v6356_v41, %v6356_v41 }
 0xe04   : > { %10136 = vmatmul.mubr.msk.bf16.vlgmr.msra.gmra.mrb[188].mxu0 %vm2891_vm10, %v6371_v40 }
 0xe05   : > { %10146 = vmatpush3.bf16.msra.mxu0 %v6724_v57  ;;  %10147 = vmatprep.mubr.msk.bf16.mxu0 %vm11341_vm8, %v14429_v44 }
 0xe06   : > { %10130 = vmatmul.mubr.msk.bf16.vlgmr.msra.gmra.mrb[188].mxu1 %vm2891_vm10, %v6370_v35  ;;  %10157 = vmatprep.subr.bf16.mxu0 %v14429_v44 }
 0xe07   : > { %10140 = vmatpush3.bf16.msra.mxu1 %v6676_v5  ;;  %10141 = vmatprep.mubr.msk.bf16.mxu1 %vm11341_vm8, %v14429_v44 }
 0xe08   : > { %v6312_v26 = vpop.xlane.xlu1 %6311  ;;  %10151 = vmatprep.subr.bf16.mxu1 %v14429_v44 }
 0xe09   : > { %10811 = vrcp.f32 %v6312_v26 }
 0xe0a   : > { %v6315_v55 = vpop.xlane.xlu0 %6314 }
 0xe0b   : > { %10813 = vrcp.f32 %v6315_v55 }
 0xe0c   : > { %10148 = vmatmul.mubr.msk.bf16.vlgmr.msra.gmra.mrb[192].mxu0 %vm2891_vm10, %v6373_v39 }
 0xe0d   : > { %10158 = vmatpush3.bf16.msra.mxu0 %v6820_v11  ;;  %10159 = vmatprep.mubr.msk.bf16.mxu0 %vm11341_vm8, %v14429_v44 }
 0xe0e   : > { %10142 = vmatmul.mubr.msk.bf16.vlgmr.msra.gmra.mrb[192].mxu1 %vm2891_vm10, %v6372_v33  ;;  %10169 = vmatprep.subr.bf16.mxu0 %v14429_v44 }
 0xe0f   : > { %10152 = vmatpush3.bf16.msra.mxu1 %v6772_v50  ;;  %10153 = vmatprep.mubr.msk.bf16.mxu1 %vm11341_vm8, %v14429_v44 }
 0xe10   : > { %v6318_v28 = vpop.xlane.xlu1 %6317  ;;  %10163 = vmatprep.subr.bf16.mxu1 %v14429_v44 }
 0xe11   : > { %10815 = vrcp.f32 %v6318_v28 }
 0xe12   : > { %v6321_v27 = vpop.xlane.xlu0 %6320 }
 0xe13   : > { %v10812_v20 = vpop.eup %10811  ;;  %10817 = vrcp.f32 %v6321_v27 }
 0xe14   : > { %v6358_v56 = vmul.f32 %v10812_v20, %v13679_v10  ;;  %v7007_v45 = vpop.permute.xlu1 %7006 }
 0xe15   : > { %v10814_v7 = vpop.eup %10813  ;;  %v7012_v8 = vsel %vm3279_vm11, %v7007_v45, 0 }
 0xe16   : > { %v6359_v31 = vmul.f32 %v10814_v7, %v13683_v38  ;;  %v6374_v37 = vpack.c.bf16 %v6358_v56, %v6358_v56  ;;  %v6959_v62 = vpop.permute.xlu0 %6958 }
 0xe17   : > { %v6964_v4 = vsel %vm3279_vm11, %v6959_v62, 0 }
 0xe18   : > { %10154 = vmatmul.mubr.msk.bf16.vlgmr.msra.gmra.mrb[196].mxu1 %vm2891_vm10, %v6374_v37  ;;  %v6375_v2 = vpack.c.bf16 %v6359_v31, %v6359_v31 }
 0xe19   : > { %10164 = vmatpush3.bf16.msra.mxu1 %v6868_v51  ;;  %10165 = vmatprep.mubr.msk.bf16.mxu1 %vm11341_vm8, %v14429_v44 }
 0xe1a   : > { %10160 = vmatmul.mubr.msk.bf16.vlgmr.msra.gmra.mrb[196].mxu0 %vm2891_vm10, %v6375_v2  ;;  %10175 = vmatprep.subr.bf16.mxu1 %v14429_v44 }
 0xe1b   : > { %v10816_v10 = vpop.eup %10815  ;;  %10170 = vmatpush3.bf16.msra.mxu0 %v6916_v15  ;;  %10171 = vmatprep.mubr.msk.bf16.mxu0 %vm11341_vm8, %v14429_v44 }
 0xe1c   : > { %v6360_v38 = vmul.f32 %v10816_v10, %v13687_v0  ;;  %10181 = vmatprep.subr.bf16.mxu0 %v14429_v44 }
 0xe1d   : > { %v10818_v36 = vpop.eup %10817 }
 0xe1e   : > { %v6361_v9 = vmul.f32 %v10818_v36, %v13691_v53  ;;  %v6376_v13 = vpack.c.bf16 %v6360_v38, %v6360_v38 }
 0xe20   : > { %10166 = vmatmul.mubr.msk.bf16.vlgmr.msra.gmra.mrb[200].mxu1 %vm2891_vm10, %v6376_v13  ;;  %v6377_v47 = vpack.c.bf16 %v6361_v9, %v6361_v9 }
 0xe21   : > { %10176 = vmatpush3.bf16.msra.mxu1 %v6964_v4  ;;  %10177 = vmatprep.mubr.msk.bf16.mxu1 %vm11341_vm8, %v14429_v44 }
 0xe22   : > { %10172 = vmatmul.mubr.msk.bf16.vlgmr.msra.gmra.mrb[200].mxu0 %vm2891_vm10, %v6377_v47  ;;  %10187 = vmatprep.subr.bf16.mxu1 %v14429_v44 }
 0xe23   : > { %10182 = vmatpush3.bf16.msra.mxu0 %v7012_v8  ;;  %10183 = vmatprep.mubr.msk.bf16.mxu0 %vm11341_vm8, %v14429_v44 }
 0xe24   : > { %10193 = vmatprep.subr.bf16.mxu0 %v14429_v44 }
 0xe45   : > { %v6327_v0 = vpop.xlane.xlu1 %6326 }
 0xe46   : > { %10819 = vrcp.f32 %v6327_v0 }
 0xe47   : > { %v6324_v53 = vpop.xlane.xlu0 %6323 }
 0xe48   : > { %10821 = vrcp.f32 %v6324_v53 }
 0xe4b   : > { %v6330_v29 = vpop.xlane.xlu0 %6329 }
 0xe4c   : > { %10823 = vrcp.f32 %v6330_v29 }
 0xe4d   : > { %v6333_v17 = vpop.xlane.xlu1 %6332 }
 0xe4e   : > { %10825 = vrcp.f32 %v6333_v17 }
 0xe4f   : > { %v7055_v6 = vpop.permute.xlu0 %7054 }
 0xe50   : > { %v10820_v58 = vpop.eup %10819  ;;  %v7060_v5 = vsel %vm3279_vm11, %v7055_v6, 0  ;;  %v10614_v6 = vld [vmem:[%s14316_s11 + $0x8] sm:$0xff]  }
 0xe51   : > { %v6363_v14 = vmul.f32 %v10820_v58, %v13705_v22  ;;  %v7103_v54 = vpop.permute.xlu1 %7102 }
 0xe52   : > { %v10822_v42 = vpop.eup %10821  ;;  %v7108_v57 = vsel %vm3279_vm11, %v7103_v54, 0 }
 0xe53   : > { %v6362_v63 = vmul.f32 %v10822_v42, %v13703_v1  ;;  %v6379_v40 = vpack.c.bf16 %v6363_v14, %v6363_v14  ;;  %v10613_v14 = vld [vmem:[%s14316_s11] sm:$0xff]  }
 0xe55   : > { %10184 = vmatmul.mubr.msk.bf16.vlgmr.msra.gmra.mrb[204].mxu0 %vm2891_vm10, %v6379_v40  ;;  %v6378_v35 = vpack.c.bf16 %v6362_v63, %v6362_v63 }
 0xe56   : > { %v10824_v32 = vpop.eup %10823  ;;  %10194 = vmatpush3.bf16.msra.mxu0 %v7108_v57  ;;  %10195 = vmatprep.mubr.msk.bf16.mxu0 %vm11341_vm8, %v14429_v44 }
 0xe57   : > { %10178 = vmatmul.mubr.msk.bf16.vlgmr.msra.gmra.mrb[204].mxu1 %vm2891_vm10, %v6378_v35  ;;  %v6364_v1 = vmul.f32 %v10824_v32, %v13711_v25 }
 0xe58   : > { %v10826_v22 = vpop.eup %10825  ;;  %10188 = vmatpush3.bf16.msra.mxu1 %v7060_v5  ;;  %10189 = vmatprep.mubr.msk.bf16.mxu1 %vm11341_vm8, %v14429_v44 }
 0xe59   : > { %v6365_v24 = vmul.f32 %v10826_v22, %v13715_v43  ;;  %v6380_v26 = vpack.c.bf16 %v6364_v1, %v6364_v1  ;;  %10199 = vmatprep.subr.bf16.mxu1 %v10613_v14 }
 0xe5b   : > { %v6381_v41 = vpack.c.bf16 %v6365_v24, %v6365_v24 }
 0xe5d   : > { %10196 = vmatmul.mubr.msk.bf16.vlgmr.msra.gmra.mrb[208].mxu0 %vm2891_vm10, %v6381_v41 }
 0xe5f   : > { %10190 = vmatmul.mubr.msk.bf16.vlgmr.msra.gmra.mrb[208].mxu1 %vm2891_vm10, %v6380_v26 }
 0xe60   : > { %10200 = vmatpush3.bf16.msra.mxu1 %v10613_v14 }
 0xe61   : > { %10201 = vmatprep.subr.bf16.mxu1 %v10614_v6 }
 0xe64   : > { %10202 = vmatpush3.bf16.msra.mxu1 %v10614_v6 }
 0xec7   : > { %v13823_v55 = vpop.f32.mrb[180].mxu0 }
 0xec8   : > { %v10113_v39 = vpop.f32.mrb[181].mxu0 }
 0xec9   : > { %v13825_v11 = vpop.f32.mrb[180].mxu1  ;;  %v6475_v33 = vpop.f32.mrb[182].mxu0 }
 0xeca   : > { %v10107_v50 = vpop.f32.mrb[181].mxu1  ;;  %v10114_v28 = vpop.f32.mrb[183].mxu0 }
 0xecb   : > { %v6427_v27 = vpop.f32.mrb[182].mxu1 }
 0xecc   : > { %v10108_v20 = vpop.f32.mrb[183].mxu1 }
 0xecf   : > { %v13827_v56 = vpop.f32.mrb[184].mxu0 }
 0xed0   : > { %v10125_v25 = vpop.f32.mrb[185].mxu0 }
 0xed1   : > { %v13829_v43 = vpop.f32.mrb[184].mxu1  ;;  %v6571_v7 = vpop.f32.mrb[186].mxu0 }
 0xed2   : > { %v10119_v31 = vpop.f32.mrb[185].mxu1  ;;  %v10126_v37 = vpop.f32.mrb[187].mxu0 }
 0xed3   : > { %v6523_v51 = vpop.f32.mrb[186].mxu1 }
 0xed4   : > { %v10120_v2 = vpop.f32.mrb[187].mxu1 }
 0xed7   : > { %v13831_v15 = vpop.f32.mrb[188].mxu0 }
 0xed8   : > { %v10137_v10 = vpop.f32.mrb[189].mxu0 }
 0xed9   : > { %v13833_v38 = vpop.f32.mrb[188].mxu1  ;;  %v6667_v36 = vpop.f32.mrb[190].mxu0 }
 0xeda   : > { %v10131_v62 = vpop.f32.mrb[189].mxu1  ;;  %v10138_v9 = vpop.f32.mrb[191].mxu0 }
 0xedb   : > { %v6619_v13 = vpop.f32.mrb[190].mxu1 }
 0xedc   : > { %v10132_v45 = vpop.f32.mrb[191].mxu1 }
 0xedf   : > { %v13835_v4 = vpop.f32.mrb[192].mxu0 }
 0xee0   : > { %v10149_v47 = vpop.f32.mrb[193].mxu0 }
 0xee1   : > { %v13837_v8 = vpop.f32.mrb[192].mxu1  ;;  %v6763_v0 = vpop.f32.mrb[194].mxu0 }
 0xee2   : > { %v10143_v53 = vpop.f32.mrb[193].mxu1  ;;  %v10150_v29 = vpop.f32.mrb[195].mxu0 }
 0xee3   : > { %v6715_v17 = vpop.f32.mrb[194].mxu1 }
 0xee4   : > { %v10144_v58 = vpop.f32.mrb[195].mxu1 }
 0xeeb   : > { %v6808_v42 = vpop.f32.mrb[196].mxu1 }
 0xeec   : > { %v10155_v54 = vpop.f32.mrb[197].mxu1 }
 0xeed   : > { %v6811_v63 = vpop.f32.mrb[198].mxu1  ;;  %v6856_v40 = vpop.f32.mrb[196].mxu0 }
 0xeee   : > { %v10571_v57 = vpack.i.bf16 %v6856_v40, %v6808_v42  ;;  %v10156_v35 = vpop.f32.mrb[199].mxu1  ;;  %v10161_v32 = vpop.f32.mrb[197].mxu0 }
 0xeef   : > { %v6859_v5 = vpop.f32.mrb[198].mxu0 }
 0xef0   : > { %10572 = vrot.lane.b32.xlu0 %v10571_v57, %s14447_s27  ;;  %v10162_v22 = vpop.f32.mrb[199].mxu0 }
 0xef3   : > { %v6904_v1 = vpop.f32.mrb[200].mxu1 }
 0xef4   : > { %v10167_v24 = vpop.f32.mrb[201].mxu1 }
 0xef5   : > { %v6907_v41 = vpop.f32.mrb[202].mxu1  ;;  %v6952_v26 = vpop.f32.mrb[200].mxu0 }
 0xef6   : > { %v10576_v39 = vpack.i.bf16 %v6952_v26, %v6904_v1  ;;  %v10168_v33 = vpop.f32.mrb[203].mxu1  ;;  %v10173_v50 = vpop.f32.mrb[201].mxu0 }
 0xef7   : > { %v6955_v28 = vpop.f32.mrb[202].mxu0 }
 0xef8   : > { %10577 = vrot.lane.b32.xlu1 %v10576_v39, %s14447_s27  ;;  %v10174_v27 = vpop.f32.mrb[203].mxu0 }
 0xef9   : > { %v9221_v27 = vld [vmem:[#allocation16] ss:$0 sm:$0xff] }
 0xf28   : > { %v7048_v20 = vpop.f32.mrb[204].mxu0 }
 0xf29   : > { %v10185_v25 = vpop.f32.mrb[205].mxu0 }
 0xf2a   : > { %v7000_v7 = vpop.f32.mrb[204].mxu1  ;;  %v7051_v31 = vpop.f32.mrb[206].mxu0 }
 0xf2b   : > { %v10581_v37 = vpack.i.bf16 %v7048_v20, %v7000_v7  ;;  %v10179_v51 = vpop.f32.mrb[205].mxu1  ;;  %v10186_v2 = vpop.f32.mrb[207].mxu0 }
 0xf2c   : > { %v7003_v10 = vpop.f32.mrb[206].mxu1 }
 0xf2d   : > { %10582 = vrot.lane.b32.xlu0 %v10581_v37, %s14447_s27  ;;  %v10180_v36 = vpop.f32.mrb[207].mxu1 }
 0xf30   : > { %v7144_v62 = vpop.f32.mrb[208].mxu0 }
 0xf31   : > { %v10197_v9 = vpop.f32.mrb[209].mxu0 }
 0xf32   : > { %v7096_v13 = vpop.f32.mrb[208].mxu1  ;;  %v7147_v45 = vpop.f32.mrb[210].mxu0 }
 0xf33   : > { %v10586_v47 = vpack.i.bf16 %v7144_v62, %v7096_v13  ;;  %v10191_v0 = vpop.f32.mrb[209].mxu1  ;;  %v10198_v53 = vpop.f32.mrb[211].mxu0 }
 0xf34   : > { %v7099_v29 = vpop.f32.mrb[210].mxu1 }
 0xf35   : > { %10587 = vrot.lane.b32.xlu1 %v10586_v47, %s14447_s27  ;;  %v10192_v17 = vpop.f32.mrb[211].mxu1 }
 0xf62   : > { %v10573_v58 = vpop.permute.xlu0 %10572 }
 0xf63   : > { %v10575_v14 = vunpack.i.h.bf16 %v10573_v58  ;;  %v10574_v42 = vunpack.i.l.bf16 %v10573_v58 }
 0xf65   : > { %v7183_v54 = vsel %vm1308_vm9, %v13823_v55, %v10575_v14  ;;  %v7182_v63 = vsel %vm1308_vm9, %v13825_v11, %v10574_v42 }
 0xf66   : > { %v7190_v40 = vpack.c.bf16 %v7183_v54, %v7182_v63 }
 0xf68   : > { %10203 = vmatprep.mubr.msk.bf16.mxu1 %vm4853_vm12, %v7190_v40 }
 0xf6a   : > { %v10578_v6 = vpop.permute.xlu1 %10577 }
 0xf6b   : > { %v10580_v57 = vunpack.i.h.bf16 %v10578_v6  ;;  %v10579_v35 = vunpack.i.l.bf16 %v10578_v6 }
 0xf6d   : > { %v7185_v32 = vsel %vm1308_vm9, %v13827_v56, %v10580_v57  ;;  %v7184_v5 = vsel %vm1308_vm9, %v13829_v43, %v10579_v35 }
 0xf6e   : > { %v7191_v22 = vpack.c.bf16 %v7185_v32, %v7184_v5 }
 0xf70   : > { %10204 = vmatmul.mubr.msk.bf16.vlgmr.msra.gmra.mrb[212].mxu1 %vm4853_vm12, %v7191_v22 }
 0xf9f   : > { %v10583_v1 = vpop.permute.xlu0 %10582 }
 0xfa0   : > { %v10585_v55 = vunpack.i.h.bf16 %v10583_v1  ;;  %v10584_v24 = vunpack.i.l.bf16 %v10583_v1 }
 0xfa2   : > { %v7187_v11 = vsel %vm1308_vm9, %v13831_v15, %v10585_v55  ;;  %v7186_v41 = vsel %vm1308_vm9, %v13833_v38, %v10584_v24  ;;  %v10615_v24 = vld [vmem:[%s14448_s18] sm:$0xff]  }
 0xfa3   : > { %v7192_v26 = vpack.c.bf16 %v7187_v11, %v7186_v41  ;;  %v10616_v11 = vld [vmem:[%s14448_s18 + $0x8] sm:$0xff]   ;;  %10211 = vmatprep.subr.bf16.mxu0 %v10615_v24 }
 0xfa4   : > { %10212 = vmatpush3.bf16.msra.mxu0 %v10615_v24 }
 0xfa5   : > { %10207 = vmatprep.mubr.msk.bf16.mxu1 %vm4853_vm12, %v7192_v26  ;;  %10213 = vmatprep.subr.bf16.mxu0 %v10616_v11 }
 0xfa7   : > { %v10588_v39 = vpop.permute.xlu1 %10587 }
 0xfa8   : > { %v10590_v56 = vunpack.i.h.bf16 %v10588_v39  ;;  %v10589_v33 = vunpack.i.l.bf16 %v10588_v39  ;;  %10214 = vmatpush3.bf16.msra.mxu0 %v10616_v11 }
 0xfa9   : > { %10233 = vmatprep.subr.bf16.mxu0 %v14429_v44 }
 0xfaa   : > { %v7189_v43 = vsel %vm1308_vm9, %v13835_v4, %v10590_v56  ;;  %v7188_v50 = vsel %vm1308_vm9, %v13837_v8, %v10589_v33 }
 0xfab   : > { %v7193_v28 = vpack.c.bf16 %v7189_v43, %v7188_v50 }
 0xfad   : > { %10208 = vmatmul.mubr.msk.bf16.gmra.mrb[216].mxu1 %vm4853_vm12, %v7193_v28 }
0x1043   : > { %v10205_v15 = vpop.f32.mrb[212].mxu1 }
0x1044   : > { %v7263_v20 = vpop.f32.mrb[213].mxu1  ;;  %v7272_v25 = vadd.f32 %v10205_v15, %v9221_v27 }
0x1045   : > { %v7264_v38 = vadd.f32 %v9221_v27, %v7263_v20  ;;  %v10206_v7 = vpop.f32.mrb[214].mxu1 }
0x1046   : > { %v7266_v31 = vpop.f32.mrb[215].mxu1  ;;  %v7296_v4 = vadd.f32 %v7272_v25, %v5256_v49  ;;  %v7275_v2 = vadd.f32 %v10206_v7, %v9221_v27 }
0x1047   : > { %v7294_v37 = vadd.f32 %v7264_v38, %v5254_v30  ;;  %v7267_v51 = vadd.f32 %v9221_v27, %v7266_v31 }
0x1048   : > { %v7297_v62 = vadd.f32 %v7275_v2, %v5257_v16  ;;  %v7308_v21 = vsel %vm4853_vm12, %v7296_v4, 0.0 }
0x1049   : > { %v7295_v8 = vadd.f32 %v7267_v51, %v5255_v61  ;;  %v7302_v10 = vsel %vm4853_vm12, %v7294_v37, 0.0 }
0x104a   : > { %7303 = vadd.xlane.f32.xlu0 %v7302_v10  ;;  %v7311_v30 = vsel %vm4853_vm12, %v7297_v62, 0.0 }
0x104b   : > { %v7305_v36 = vsel %vm4853_vm12, %v7295_v8, 0.0 }
0x104c   : > { %7306 = vadd.xlane.f32.xlu1 %v7305_v36 }
0x104e   : > { %7309 = vadd.xlane.f32.xlu0 %v7308_v21 }
0x1052   : > { %7312 = vadd.xlane.f32.xlu0 %v7311_v30 }
0x1080   : > { %v10209_v60 = vpop.f32.mrb[216].mxu1 }
0x1081   : > { %v7288_v49 = vadd.f32 %v10209_v60, %v9221_v27  ;;  %v7279_v9 = vpop.f32.mrb[217].mxu1 }
0x1082   : > { %v7280_v18 = vadd.f32 %v9221_v27, %v7279_v9  ;;  %v10210_v61 = vpop.f32.mrb[218].mxu1 }
0x1083   : > { %v7291_v13 = vadd.f32 %v10210_v61, %v9221_v27  ;;  %v7282_v45 = vpop.f32.mrb[219].mxu1  ;;  %v7300_v48 = vadd.f32 %v7288_v49, %v5260_v3 }
0x1084   : > { %v7298_v47 = vadd.f32 %v7280_v18, %v5258_v19  ;;  %v7283_v0 = vadd.f32 %v9221_v27, %v7282_v45 }
0x1085   : > { %v7301_v29 = vadd.f32 %v7291_v13, %v5261_v34  ;;  %v7320_v58 = vsel %vm4853_vm12, %v7300_v48, 0.0 }
0x1086   : > { %v7299_v16 = vadd.f32 %v7283_v0, %v5259_v59  ;;  %v7314_v53 = vsel %vm4853_vm12, %v7298_v47, 0.0  ;;  %v9228_v0 = vld [vmem:[#allocation17] ss:$0 sm:$0xff] }
0x1087   : > { %7315 = vadd.xlane.f32.xlu1 %v7314_v53  ;;  %v7323_v46 = vsel %vm4853_vm12, %v7301_v29, 0.0 }
0x1088   : > { %v7317_v17 = vsel %vm4853_vm12, %v7299_v16, 0.0 }
0x1089   : > { %7318 = vadd.xlane.f32.xlu0 %v7317_v17 }
0x108b   : > { %7321 = vadd.xlane.f32.xlu1 %v7320_v58  ;;  %v9229_v58 = vld [vmem:[#allocation19] ss:$0 sm:$0xff] }
0x108d   : > { %7324 = vadd.xlane.f32.xlu0 %v7323_v46 }
0x10d7   : > { %v7304_v52 = vpop.xlane.xlu0 %7303 }
0x10d8   : > { %v7327_v19 = vmul.f32 0.03125, %v7304_v52 }
0x10d9   : > { %v7307_v3 = vpop.xlane.xlu1 %7306 }
0x10da   : > { %v13893_v12 = vsub.f32 %v7294_v37, %v7327_v19  ;;  %v7328_v59 = vmul.f32 0.03125, %v7307_v3 }
0x10db   : > { %v7310_v14 = vpop.xlane.xlu0 %7309 }
0x10dc   : > { %v13895_v42 = vsub.f32 %v7295_v8, %v7328_v59  ;;  %v7329_v23 = vmul.f32 0.03125, %v7310_v14  ;;  %v7343_v34 = vmul.f32 %v13893_v12, %v13893_v12 }
0x10de   : > { %v13899_v54 = vsub.f32 %v7296_v4, %v7329_v23  ;;  %v7351_v63 = vsel %vm4853_vm12, %v7343_v34, 0.0  ;;  %v7344_v40 = vmul.f32 %v13895_v42, %v13895_v42 }
0x10df   : > { %7352 = vadd.xlane.f32.xlu1 %v7351_v63  ;;  %v7313_v6 = vpop.xlane.xlu0 %7312 }
0x10e0   : > { %v7330_v57 = vmul.f32 0.03125, %v7313_v6  ;;  %v7354_v35 = vsel %vm4853_vm12, %v7344_v40, 0.0  ;;  %v7345_v32 = vmul.f32 %v13899_v54, %v13899_v54 }
0x10e1   : > { %7355 = vadd.xlane.f32.xlu0 %v7354_v35 }
0x10e2   : > { %v13907_v5 = vsub.f32 %v7297_v62, %v7330_v57  ;;  %v7357_v22 = vsel %vm4853_vm12, %v7345_v32, 0.0 }
0x10e3   : > { %7358 = vadd.xlane.f32.xlu1 %v7357_v22 }
0x10e4   : > { %v7346_v1 = vmul.f32 %v13907_v5, %v13907_v5 }
0x10e6   : > { %v7360_v55 = vsel %vm4853_vm12, %v7346_v1, 0.0 }
0x10e7   : > { %7361 = vadd.xlane.f32.xlu0 %v7360_v55 }
0x1114   : > { %v7316_v41 = vpop.xlane.xlu1 %7315 }
0x1115   : > { %v7331_v26 = vmul.f32 0.03125, %v7316_v41 }
0x1116   : > { %v7319_v39 = vpop.xlane.xlu0 %7318 }
0x1117   : > { %v13920_v56 = vsub.f32 %v7298_v47, %v7331_v26  ;;  %v7332_v33 = vmul.f32 0.03125, %v7319_v39 }
0x1118   : > { %v7322_v43 = vpop.xlane.xlu1 %7321 }
0x1119   : > { %v13922_v50 = vsub.f32 %v7299_v16, %v7332_v33  ;;  %v7333_v28 = vmul.f32 0.03125, %v7322_v43  ;;  %v7347_v27 = vmul.f32 %v13920_v56, %v13920_v56 }
0x111a   : > { %v7325_v15 = vpop.xlane.xlu0 %7324 }
0x111b   : > { %v13926_v20 = vsub.f32 %v7300_v48, %v7333_v28  ;;  %v7334_v25 = vmul.f32 0.03125, %v7325_v15  ;;  %v7363_v38 = vsel %vm4853_vm12, %v7347_v27, 0.0  ;;  %v7348_v7 = vmul.f32 %v13922_v50, %v13922_v50 }
0x111c   : > { %7364 = vadd.xlane.f32.xlu1 %v7363_v38 }
0x111d   : > { %v13931_v31 = vsub.f32 %v7301_v29, %v7334_v25  ;;  %v7366_v37 = vsel %vm4853_vm12, %v7348_v7, 0.0  ;;  %v7349_v51 = vmul.f32 %v13926_v20, %v13926_v20 }
0x111e   : > { %7367 = vadd.xlane.f32.xlu0 %v7366_v37 }
0x111f   : > { %v7369_v4 = vsel %vm4853_vm12, %v7349_v51, 0.0  ;;  %v7350_v2 = vmul.f32 %v13931_v31, %v13931_v31 }
0x1120   : > { %7370 = vadd.xlane.f32.xlu1 %v7369_v4 }
0x1121   : > { %v7372_v8 = vsel %vm4853_vm12, %v7350_v2, 0.0 }
0x1122   : > { %7373 = vadd.xlane.f32.xlu0 %v7372_v8 }
0x116c   : > { %v7353_v10 = vpop.xlane.xlu1 %7352 }
0x116d   : > { %v7375_v36 = vmul.f32 0.03125, %v7353_v10 }
0x116e   : > { %v7356_v62 = vpop.xlane.xlu0 %7355 }
0x116f   : > { %v7383_v21 = vadd.f32 1e-05, %v7375_v36  ;;  %v7376_v30 = vmul.f32 0.03125, %v7356_v62 }
0x1170   : > { %v7359_v60 = vpop.xlane.xlu1 %7358 }
0x1171   : > { %10827 = vrsqrt.f32 %v7383_v21  ;;  %v7384_v49 = vadd.f32 1e-05, %v7376_v30  ;;  %v7377_v9 = vmul.f32 0.03125, %v7359_v60 }
0x1173   : > { %10829 = vrsqrt.f32 %v7384_v49  ;;  %v7385_v18 = vadd.f32 1e-05, %v7377_v9 }
0x1174   : > { %v7362_v61 = vpop.xlane.xlu0 %7361 }
0x1175   : > { %10831 = vrsqrt.f32 %v7385_v18  ;;  %v7378_v13 = vmul.f32 0.03125, %v7362_v61 }
0x1177   : > { %v7386_v45 = vadd.f32 1e-05, %v7378_v13 }
0x1179   : > { %10833 = vrsqrt.f32 %v7386_v45 }
0x117b   : > { %v10828_v47 = vpop.eup %10827 }
0x117c   : > { %v7399_v48 = vmul.f32 %v10828_v47, %v13893_v12 }
0x117d   : > { %v10830_v16 = vpop.eup %10829 }
0x117e   : > { %v7400_v53 = vmul.f32 %v10830_v16, %v13895_v42  ;;  %v7414_v29 = vmul.f32 %v9228_v0, %v7399_v48 }
0x117f   : > { %v10832_v17 = vpop.eup %10831 }
0x1180   : > { %v7401_v46 = vmul.f32 %v10832_v17, %v13899_v54  ;;  %v7415_v52 = vmul.f32 %v9228_v0, %v7400_v53  ;;  %v7429_v19 = vadd.f32 %v9229_v58, %v7414_v29 }
0x1182   : > { %v7430_v3 = vadd.f32 %v9229_v58, %v7415_v52  ;;  %v7416_v14 = vmul.f32 %v9228_v0, %v7401_v46 }
0x1183   : > { %v10834_v59 = vpop.eup %10833 }
0x1184   : > { %v7402_v23 = vmul.f32 %v10834_v59, %v13907_v5  ;;  %v7437_v34 = vpack.c.bf16 %v7430_v3, %v7429_v19  ;;  %v7431_v12 = vadd.f32 %v9229_v58, %v7416_v14 }
0x1186   : > { %v7417_v63 = vmul.f32 %v9228_v0, %v7402_v23  ;;  %10215 = vmatprep.mubr.msk.bf16.mxu0 %vm4853_vm12, %v7437_v34 }
0x1188   : > { %v7432_v40 = vadd.f32 %v9229_v58, %v7417_v63 }
0x118a   : > { %v7438_v6 = vpack.c.bf16 %v7432_v40, %v7431_v12  ;;  %v9237_v12 = vld [vmem:[%s14450_s17] ss:$0 sm:$0xff] }
0x118c   : > { %10216 = vmatmul.mubr.msk.bf16.vlgmr.msra.gmra.mrb[212].mxu0 %vm4853_vm12, %v7438_v6 }
0x11a9   : > { %v7365_v42 = vpop.xlane.xlu1 %7364 }
0x11aa   : > { %v7379_v57 = vmul.f32 0.03125, %v7365_v42 }
0x11ab   : > { %v7368_v35 = vpop.xlane.xlu0 %7367 }
0x11ac   : > { %v7387_v54 = vadd.f32 1e-05, %v7379_v57  ;;  %v7380_v32 = vmul.f32 0.03125, %v7368_v35 }
0x11ad   : > { %v7371_v22 = vpop.xlane.xlu1 %7370 }
0x11ae   : > { %10835 = vrsqrt.f32 %v7387_v54  ;;  %v7388_v1 = vadd.f32 1e-05, %v7380_v32  ;;  %v7381_v55 = vmul.f32 0.03125, %v7371_v22 }
0x11af   : > { %v7374_v24 = vpop.xlane.xlu0 %7373 }
0x11b0   : > { %10837 = vrsqrt.f32 %v7388_v1  ;;  %v7389_v5 = vadd.f32 1e-05, %v7381_v55  ;;  %v7382_v11 = vmul.f32 0.03125, %v7374_v24 }
0x11b2   : > { %10839 = vrsqrt.f32 %v7389_v5  ;;  %v7390_v41 = vadd.f32 1e-05, %v7382_v11 }
0x11b4   : > { %10841 = vrsqrt.f32 %v7390_v41 }
0x11b8   : > { %v10836_v26 = vpop.eup %10835 }
0x11b9   : > { %v7403_v39 = vmul.f32 %v10836_v26, %v13920_v56 }
0x11ba   : > { %v10838_v33 = vpop.eup %10837 }
0x11bb   : > { %v7404_v43 = vmul.f32 %v10838_v33, %v13922_v50  ;;  %v7418_v28 = vmul.f32 %v9228_v0, %v7403_v39  ;;  %v10617_v50 = vld [vmem:[%s14449_s2] sm:$0xff]  }
0x11bc   : > { %v10840_v27 = vpop.eup %10839  ;;  %10223 = vmatprep.subr.bf16.mxu1 %v10617_v50 }
0x11bd   : > { %v7405_v15 = vmul.f32 %v10840_v27, %v13926_v20  ;;  %v7419_v25 = vmul.f32 %v9228_v0, %v7404_v43  ;;  %v7433_v37 = vadd.f32 %v9229_v58, %v7418_v28  ;;  %10224 = vmatpush3.bf16.msra.mxu1 %v10617_v50  ;;  %v9230_v20 = vld [vmem:[#allocation20] ss:$0 sm:$0xff] }
0x11be   : > { %v10842_v38 = vpop.eup %10841  ;;  %10245 = vmatprep.subr.bf16.mxu1 %v14429_v44 }
0x11bf   : > { %v7406_v7 = vmul.f32 %v10842_v38, %v13931_v31  ;;  %v7434_v51 = vadd.f32 %v9229_v58, %v7419_v25  ;;  %v7420_v4 = vmul.f32 %v9228_v0, %v7405_v15 }
0x11c1   : > { %v7439_v2 = vpack.c.bf16 %v7434_v51, %v7433_v37  ;;  %v7421_v8 = vmul.f32 %v9228_v0, %v7406_v7  ;;  %v7435_v10 = vadd.f32 %v9229_v58, %v7420_v4 }
0x11c3   : > { %10219 = vmatprep.mubr.msk.bf16.mxu0 %vm4853_vm12, %v7439_v2  ;;  %v7436_v56 = vadd.f32 %v9229_v58, %v7421_v8 }
0x11c5   : > { %v7440_v36 = vpack.c.bf16 %v7436_v56, %v7435_v10 }
0x11c7   : > { %10220 = vmatmul.mubr.msk.bf16.gmra.mrb[216].mxu0 %vm4853_vm12, %v7440_v36 }
0x11c8   : > { %10235 = vmatprep.mubr.msk.bf16.mxu0 %vm11341_vm8, %v14429_v44 }
0x125f   : > { %v10217_v31 = vpop.f32.mrb[212].mxu0 }
0x1260   : > { %v7510_v62 = vpop.f32.mrb[213].mxu0  ;;  %v13960_v60 = vadd.f32 %v10217_v31, %v9230_v20 }
0x1261   : > { %v13958_v21 = vadd.f32 %v9230_v20, %v7510_v62  ;;  %v10218_v30 = vpop.f32.mrb[214].mxu0 }
0x1262   : > { %v13962_v49 = vadd.f32 %v10218_v30, %v9230_v20  ;;  %v7513_v9 = vpop.f32.mrb[215].mxu0  ;;  %v7543_v47 = vmax.f32 %v13960_v60, 0.0 }
0x1263   : > { %v13964_v18 = vadd.f32 %v9230_v20, %v7513_v9  ;;  %v7541_v13 = vmax.f32 %v13958_v21, 0.0 }
0x1264   : > { %v7544_v61 = vmax.f32 %v13962_v49, 0.0 }
0x1265   : > { %v7542_v45 = vmax.f32 %v13964_v18, 0.0 }
0x1266   : > { %v7550_v48 = vpack.c.bf16 %v7544_v61, %v7543_v47 }
0x1267   : > { %v7549_v0 = vpack.c.bf16 %v7542_v45, %v7541_v13 }
0x1269   : > { %10225 = vmatprep.mubr.msk.bf16.mxu1 %vm1308_vm9, %v7549_v0 }
0x126a   : > { %10226 = vmatmul.mubr.msk.bf16.vlgmr.msra.gmra.mrb[220].mxu1 %vm1308_vm9, %v7550_v48 }
0x129a   : > { %v10221_v16 = vpop.f32.mrb[216].mxu0 }
0x129b   : > { %v7526_v53 = vpop.f32.mrb[217].mxu0  ;;  %v13982_v58 = vadd.f32 %v10221_v16, %v9230_v20 }
0x129c   : > { %v13980_v29 = vadd.f32 %v9230_v20, %v7526_v53  ;;  %v10222_v17 = vpop.f32.mrb[218].mxu0 }
0x129d   : > { %v13984_v46 = vadd.f32 %v10222_v17, %v9230_v20  ;;  %v7529_v52 = vpop.f32.mrb[219].mxu0  ;;  %v7547_v23 = vmax.f32 %v13982_v58, 0.0 }
0x129e   : > { %v13986_v19 = vadd.f32 %v9230_v20, %v7529_v52  ;;  %v7545_v59 = vmax.f32 %v13980_v29, 0.0 }
0x129f   : > { %v7548_v3 = vmax.f32 %v13984_v46, 0.0 }
0x12a0   : > { %v7546_v14 = vmax.f32 %v13986_v19, 0.0 }
0x12a1   : > { %v7552_v63 = vpack.c.bf16 %v7548_v3, %v7547_v23 }
0x12a2   : > { %v7551_v34 = vpack.c.bf16 %v7546_v14, %v7545_v59 }
0x12a4   : > { %10229 = vmatprep.mubr.msk.bf16.mxu1 %vm1308_vm9, %v7551_v34 }
0x12a5   : > { %10230 = vmatmul.mubr.msk.bf16.gmra.mrb[224].mxu1 %vm1308_vm9, %v7552_v63 }
0x12a6   : > { %10247 = vmatprep.mubr.msk.bf16.mxu1 %vm11341_vm8, %v14429_v44 }
0x133d   : > { %v10227_v40 = vpop.f32.mrb[220].mxu1 }
0x133e   : > { %v7614_v6 = vpop.f32.mrb[221].mxu1  ;;  %v7623_v54 = vadd.f32 %v10227_v40, %v9237_v12 }
0x133f   : > { %v7615_v42 = vadd.f32 %v9237_v12, %v7614_v6  ;;  %v10228_v57 = vpop.f32.mrb[222].mxu1 }
0x1340   : > { %v7617_v35 = vpop.f32.mrb[223].mxu1  ;;  %v14010_v55 = vpack.c.bf16 %v7623_v54, %v7623_v54  ;;  %v7626_v24 = vadd.f32 %v10228_v57, %v9237_v12 }
0x1341   : > { %v9303_v32 = vpack.c.bf16 %v7615_v42, %v7615_v42  ;;  %v7618_v22 = vadd.f32 %v9237_v12, %v7617_v35 }
0x1342   : > { %v14016_v5 = vpack.c.bf16 %v7626_v24, %v7626_v24 }
0x1343   : > { %v14007_v1 = vpack.c.bf16 %v7618_v22, %v7618_v22  ;;  %7669 = vrot.lane.b32.xlu1 %v9303_v32, %s14362_s1 }
0x1345   : > { %7717 = vrot.lane.b32.xlu0 %v14007_v1, %s14362_s1 }
0x1347   : > { %7765 = vrot.lane.b32.xlu1 %v14010_v55, %s14362_s1 }
0x134b   : > { %7813 = vrot.lane.b32.xlu1 %v14016_v5, %s14362_s1 }
0x1378   : > { %v10231_v11 = vpop.f32.mrb[224].mxu1 }
0x1379   : > { %v7630_v41 = vpop.f32.mrb[225].mxu1  ;;  %v7639_v28 = vadd.f32 %v10231_v11, %v9237_v12 }
0x137a   : > { %v7631_v26 = vadd.f32 %v9237_v12, %v7630_v41  ;;  %v10232_v39 = vpop.f32.mrb[226].mxu1 }
0x137b   : > { %v7642_v33 = vadd.f32 %v10232_v39, %v9237_v12  ;;  %v7633_v43 = vpop.f32.mrb[227].mxu1  ;;  %v14026_v38 = vpack.c.bf16 %v7639_v28, %v7639_v28 }
0x137c   : > { %v14020_v27 = vpack.c.bf16 %v7631_v26, %v7631_v26  ;;  %v7634_v15 = vadd.f32 %v9237_v12, %v7633_v43 }
0x137d   : > { %v14030_v7 = vpack.c.bf16 %v7642_v33, %v7642_v33 }
0x137e   : > { %v14022_v25 = vpack.c.bf16 %v7634_v15, %v7634_v15  ;;  %7861 = vrot.lane.b32.xlu0 %v14020_v27, %s14362_s1 }
0x1380   : > { %7909 = vrot.lane.b32.xlu1 %v14022_v25, %s14362_s1 }
0x1382   : > { %7957 = vrot.lane.b32.xlu0 %v14026_v38, %s14362_s1 }
0x1384   : > { %8005 = vrot.lane.b32.xlu1 %v14030_v7, %s14362_s1  ;;  %s14454_s1 = sld [smem:[#allocation62_spill]] }
0x1388   : > { %8149 = vrot.lane.b32.xlu1 %v9303_v32, %s14363_s6 }
0x13b5   : > { %v7670_v37 = vpop.permute.xlu1 %7669 }
0x13b6   : > { %v7675_v51 = vsel %vm1308_vm9, %v7670_v37, 0 }
0x13b7   : > { %10234 = vmatpush3.bf16.xpose.msra.mxu0 %v7675_v51  ;;  %v7718_v8 = vpop.permute.xlu0 %7717 }
0x13b8   : > { %10239 = vmatprep.subr.bf16.mxu0 %v14429_v44  ;;  %v7723_v10 = vsel %vm1308_vm9, %v7718_v8, 0 }
0x13b9   : > { %v7766_v4 = vpop.permute.xlu1 %7765 }
0x13ba   : > { %v7771_v2 = vsel %vm1308_vm9, %v7766_v4, 0 }
0x13bb   : > { %10246 = vmatpush3.bf16.xpose.msra.mxu1 %v7771_v2 }
0x13bc   : > { %10257 = vmatprep.subr.bf16.mxu1 %v14429_v44 }
0x13bd   : > { %v7814_v56 = vpop.permute.xlu1 %7813 }
0x13be   : > { %10236 = vmatmul.mubr.msk.bf16.vlgmr.msra.gmra.mrb[220].mxu0 %vm1308_vm9, %v9303_v32  ;;  %v7819_v36 = vsel %vm1308_vm9, %v7814_v56, 0 }
0x13bf   : > { %10240 = vmatpush3.bf16.xpose.msra.mxu0 %v7723_v10  ;;  %10241 = vmatprep.mubr.msk.bf16.mxu0 %vm11341_vm8, %v14429_v44 }
0x13c0   : > { %10251 = vmatprep.subr.bf16.mxu0 %v14429_v44 }
0x13c2   : > { %10248 = vmatmul.mubr.msk.bf16.vlgmr.msra.gmra.mrb[228].mxu1 %vm1308_vm9, %v14010_v55 }
0x13c3   : > { %10259 = vmatprep.mubr.msk.bf16.mxu1 %vm11341_vm8, %v14429_v44 }
0x13c6   : > { %10242 = vmatmul.mubr.msk.bf16.vlgmr.msra.gmra.mrb[224].mxu0 %vm1308_vm9, %v14007_v1 }
0x13c7   : > { %10252 = vmatpush3.bf16.xpose.msra.mxu0 %v7819_v36  ;;  %10253 = vmatprep.mubr.msk.bf16.mxu0 %vm11341_vm8, %v14429_v44 }
0x13c8   : > { %10263 = vmatprep.subr.bf16.mxu0 %v14429_v44 }
0x13ce   : > { %10254 = vmatmul.mubr.msk.bf16.vlgmr.msra.gmra.mrb[228].mxu0 %vm1308_vm9, %v14016_v5 }
0x13cf   : > { %10265 = vmatprep.mubr.msk.bf16.mxu0 %vm11341_vm8, %v14429_v44 }
0x13f0   : > { %v7862_v50 = vpop.permute.xlu0 %7861 }
0x13f1   : > { %v7867_v20 = vsel %vm1308_vm9, %v7862_v50, 0 }
0x13f2   : > { %v7910_v31 = vpop.permute.xlu1 %7909  ;;  %10258 = vmatpush3.bf16.xpose.msra.mxu1 %v7867_v20 }
0x13f3   : > { %v7915_v62 = vsel %vm1308_vm9, %v7910_v31, 0  ;;  %10269 = vmatprep.subr.bf16.mxu1 %v14429_v44 }
0x13f4   : > { %10264 = vmatpush3.bf16.xpose.msra.mxu0 %v7915_v62  ;;  %v7958_v30 = vpop.permute.xlu0 %7957 }
0x13f5   : > { %10275 = vmatprep.subr.bf16.mxu0 %v14429_v44  ;;  %v7963_v0 = vsel %vm1308_vm9, %v7958_v30, 0 }
0x13f6   : > { %v8006_v9 = vpop.permute.xlu1 %8005 }
0x13f7   : > { %v8011_v48 = vsel %vm1308_vm9, %v8006_v9, 0 }
0x13f9   : > { %10260 = vmatmul.mubr.msk.bf16.vlgmr.msra.gmra.mrb[232].mxu1 %vm1308_vm9, %v14020_v27 }
0x13fa   : > { %10270 = vmatpush3.bf16.xpose.msra.mxu1 %v7963_v0  ;;  %10271 = vmatprep.mubr.msk.bf16.mxu1 %vm11341_vm8, %v14429_v44  ;;  %v8150_v16 = vpop.permute.xlu1 %8149 }
0x13fb   : > { %10266 = vmatmul.mubr.msk.bf16.vlgmr.msra.gmra.mrb[232].mxu0 %vm1308_vm9, %v14022_v25  ;;  %10281 = vmatprep.subr.bf16.mxu1 %v14429_v44  ;;  %v8155_v53 = vsel %vm3279_vm11, %v8150_v16, 0 }
0x13fc   : > { %10276 = vmatpush3.bf16.xpose.msra.mxu0 %v8011_v48  ;;  %10277 = vmatprep.mubr.msk.bf16.mxu0 %vm11341_vm8, %v14429_v44 }
0x13fd   : > { %10287 = vmatprep.subr.bf16.mxu0 %v14429_v44 }
0x1401   : > { %10272 = vmatmul.mubr.msk.bf16.vlgmr.msra.gmra.mrb[236].mxu1 %vm1308_vm9, %v14026_v38 }
0x1402   : > { %10282 = vmatpush3.bf16.msra.mxu1 %v8155_v53  ;;  %10283 = vmatprep.mubr.msk.bf16.mxu1 %vm11341_vm8, %v14429_v44 }
0x1403   : > { %10278 = vmatmul.mubr.msk.bf16.vlgmr.msra.gmra.mrb[236].mxu0 %vm1308_vm9, %v14030_v7  ;;  %10293 = vmatprep.subr.bf16.mxu1 %v14429_v44 }
0x1404   : > { %10289 = vmatprep.mubr.msk.bf16.mxu0 %vm11341_vm8, %v14429_v44 }
0x1491   : > { %v7711_v17 = vpop.f32.mrb[220].mxu0 }
0x1492   : > { %v10237_v52 = vpop.f32.mrb[221].mxu0  ;;  %v8053_v32 = vsel %vm2891_vm10, %v7711_v17, -inf }
0x1493   : > { %v7714_v34 = vpop.f32.mrb[222].mxu0 }
0x1494   : > { %v10238_v63 = vpop.f32.mrb[223].mxu0 }
0x1495   : > { %v7807_v12 = vpop.f32.mrb[228].mxu1 }
0x1496   : > { %v10249_v40 = vpop.f32.mrb[229].mxu1  ;;  %v8059_v6 = vsel %vm2891_vm10, %v7807_v12, -inf }
0x1497   : > { %v7810_v42 = vpop.f32.mrb[230].mxu1  ;;  %8060 = vmax.xlane.f32.xlu0 %v8059_v6 }
0x1498   : > { %v10250_v57 = vpop.f32.mrb[231].mxu1 }
0x1499   : > { %v7759_v35 = vpop.f32.mrb[224].mxu0 }
0x149a   : > { %v10243_v54 = vpop.f32.mrb[225].mxu0  ;;  %v8056_v22 = vsel %vm2891_vm10, %v7759_v35, -inf }
0x149b   : > { %8054 = vmax.xlane.f32.xlu0 %v8053_v32  ;;  %8057 = vmax.xlane.f32.xlu1 %v8056_v22  ;;  %v7762_v24 = vpop.f32.mrb[226].mxu0 }
0x149c   : > { %v10244_v11 = vpop.f32.mrb[227].mxu0 }
0x14a1   : > { %v7855_v41 = vpop.f32.mrb[228].mxu0 }
0x14a2   : > { %v10255_v26 = vpop.f32.mrb[229].mxu0  ;;  %v8062_v39 = vsel %vm2891_vm10, %v7855_v41, -inf }
0x14a3   : > { %8063 = vmax.xlane.f32.xlu0 %v8062_v39  ;;  %v7858_v33 = vpop.f32.mrb[230].mxu0 }
0x14a4   : > { %v10256_v43 = vpop.f32.mrb[231].mxu0 }
0x14cc   : > { %v7903_v28 = vpop.f32.mrb[232].mxu1 }
0x14cd   : > { %v10261_v15 = vpop.f32.mrb[233].mxu1  ;;  %v8065_v37 = vsel %vm2891_vm10, %v7903_v28, -inf }
0x14ce   : > { %v7951_v51 = vpop.f32.mrb[232].mxu0  ;;  %8066 = vmax.xlane.f32.xlu1 %v8065_v37  ;;  %v7906_v4 = vpop.f32.mrb[234].mxu1 }
0x14cf   : > { %v10262_v2 = vpop.f32.mrb[235].mxu1  ;;  %v10267_v8 = vpop.f32.mrb[233].mxu0  ;;  %v8068_v10 = vsel %vm2891_vm10, %v7951_v51, -inf }
0x14d0   : > { %8069 = vmax.xlane.f32.xlu0 %v8068_v10  ;;  %v7954_v56 = vpop.f32.mrb[234].mxu0 }
0x14d1   : > { %v10268_v36 = vpop.f32.mrb[235].mxu0 }
0x14d4   : > { %v7999_v50 = vpop.f32.mrb[236].mxu1 }
0x14d5   : > { %v10273_v20 = vpop.f32.mrb[237].mxu1  ;;  %v8071_v31 = vsel %vm2891_vm10, %v7999_v50, -inf }
0x14d6   : > { %v8047_v62 = vpop.f32.mrb[236].mxu0  ;;  %8072 = vmax.xlane.f32.xlu1 %v8071_v31  ;;  %v8002_v30 = vpop.f32.mrb[238].mxu1 }
0x14d7   : > { %v10274_v9 = vpop.f32.mrb[239].mxu1  ;;  %v10279_v0 = vpop.f32.mrb[237].mxu0  ;;  %v8074_v48 = vsel %vm2891_vm10, %v8047_v62, -inf }
0x14d8   : > { %8075 = vmax.xlane.f32.xlu0 %v8074_v48  ;;  %v8050_v16 = vpop.f32.mrb[238].mxu0 }
0x14d9   : > { %v10280_v53 = vpop.f32.mrb[239].mxu0 }
0x14e7   : > { %8245 = vrot.lane.b32.xlu1 %v14010_v55, %s14363_s6 }
0x14eb   : > { %8293 = vrot.lane.b32.xlu1 %v14016_v5, %s14363_s6 }
0x14ee   : > { %8197 = vrot.lane.b32.xlu0 %v14007_v1, %s14363_s6 }
0x1524   : > { %v8061_v52 = vpop.xlane.xlu0 %8060 }
0x1525   : > { %v8079_v34 = vsub.f32 %v7807_v12, %v8061_v52 }
0x1527   : > { %v8089_v63 = vmul.f32 1.442695, %v8079_v34 }
0x1528   : > { %v8058_v40 = vpop.xlane.xlu1 %8057  ;;  %v8055_v6 = vpop.xlane.xlu0 %8054 }
0x1529   : > { %10843 = vpow2.f32 %v8089_v63  ;;  %v8078_v42 = vsub.f32 %v7759_v35, %v8058_v40  ;;  %v8077_v57 = vsub.f32 %v7711_v17, %v8055_v6 }
0x152b   : > { %v8087_v54 = vmul.f32 1.442695, %v8078_v42  ;;  %v8085_v32 = vmul.f32 1.442695, %v8077_v57 }
0x152d   : > { %10845 = vpow2.f32 %v8087_v54 }
0x152e   : > { %10847 = vpow2.f32 %v8085_v32 }
0x1530   : > { %v8064_v22 = vpop.xlane.xlu0 %8063 }
0x1531   : > { %v8080_v55 = vsub.f32 %v7855_v41, %v8064_v22 }
0x1533   : > { %v14100_v24 = vpop.eup %10843  ;;  %v8091_v5 = vmul.f32 1.442695, %v8080_v55 }
0x1534   : > { %v8107_v1 = vsel %vm2891_vm10, %v14100_v24, 0.0 }
0x1535   : > { %10849 = vpow2.f32 %v8091_v5  ;;  %8108 = vadd.xlane.f32.xlu1 %v8107_v1 }
0x1537   : > { %v10846_v12 = vpop.eup %10845 }
0x1538   : > { %v10848_v11 = vpop.eup %10847  ;;  %v8104_v26 = vsel %vm2891_vm10, %v10846_v12, 0.0 }
0x1539   : > { %8105 = vadd.xlane.f32.xlu0 %v8104_v26  ;;  %v8101_v17 = vsel %vm2891_vm10, %v10848_v11, 0.0 }
0x153a   : > { %8102 = vadd.xlane.f32.xlu1 %v8101_v17 }
0x153f   : > { %v14106_v35 = vpop.eup %10849 }
0x1540   : > { %v8110_v41 = vsel %vm2891_vm10, %v14106_v35, 0.0 }
0x1541   : > { %8111 = vadd.xlane.f32.xlu0 %v8110_v41 }
0x154b   : > { %8389 = vrot.lane.b32.xlu1 %v14022_v25, %s14363_s6 }
0x1557   : > { %8341 = vrot.lane.b32.xlu0 %v14020_v27, %s14363_s6 }
0x155b   : > { %v8067_v39 = vpop.xlane.xlu1 %8066 }
0x155c   : > { %v8081_v33 = vsub.f32 %v7903_v28, %v8067_v39 }
0x155d   : > { %v8070_v43 = vpop.xlane.xlu0 %8069 }
0x155e   : > { %v8093_v15 = vmul.f32 1.442695, %v8081_v33  ;;  %v8082_v37 = vsub.f32 %v7951_v51, %v8070_v43 }
0x1560   : > { %10851 = vpow2.f32 %v8093_v15  ;;  %v8095_v4 = vmul.f32 1.442695, %v8082_v37 }
0x1562   : > { %10853 = vpow2.f32 %v8095_v4 }
0x1563   : > { %v8073_v2 = vpop.xlane.xlu1 %8072 }
0x1564   : > { %v8083_v8 = vsub.f32 %v7999_v50, %v8073_v2 }
0x1565   : > { %v8076_v10 = vpop.xlane.xlu0 %8075 }
0x1566   : > { %v8097_v56 = vmul.f32 1.442695, %v8083_v8  ;;  %v8084_v36 = vsub.f32 %v8047_v62, %v8076_v10 }
0x1567   : > { %v8246_v48 = vpop.permute.xlu1 %8245 }
0x1568   : > { %10855 = vpow2.f32 %v8097_v56  ;;  %v8099_v20 = vmul.f32 1.442695, %v8084_v36 }
0x1569   : > { %v8198_v31 = vpop.permute.xlu0 %8197 }
0x156a   : > { %v8203_v25 = vsel %vm3279_vm11, %v8198_v31, 0  ;;  %v14115_v30 = vpop.eup %10851  ;;  %10857 = vpow2.f32 %v8099_v20 }
0x156b   : > { %10288 = vmatpush3.bf16.msra.mxu0 %v8203_v25  ;;  %v8113_v27 = vsel %vm2891_vm10, %v14115_v30, 0.0  ;;  %v8294_v16 = vpop.permute.xlu1 %8293 }
0x156c   : > { %10299 = vmatprep.subr.bf16.mxu0 %v14429_v44  ;;  %v14120_v28 = vpop.eup %10853  ;;  %v8299_v22 = vsel %vm3279_vm11, %v8294_v16, 0 }
0x156d   : > { %v8116_v62 = vsel %vm2891_vm10, %v14120_v28, 0.0 }
0x156f   : > { %8114 = vadd.xlane.f32.xlu1 %v8113_v27 }
0x1572   : > { %v14122_v51 = vpop.eup %10855 }
0x1573   : > { %v8119_v50 = vsel %vm2891_vm10, %v14122_v51, 0.0 }
0x1574   : > { %8120 = vadd.xlane.f32.xlu1 %v8119_v50  ;;  %v14128_v9 = vpop.eup %10857 }
0x1575   : > { %v8122_v0 = vsel %vm2891_vm10, %v14128_v9, 0.0 }
0x1576   : > { %8117 = vadd.xlane.f32.xlu0 %v8116_v62 }
0x157a   : > { %8123 = vadd.xlane.f32.xlu0 %v8122_v0 }
0x1585   : > { %8485 = vrot.lane.b32.xlu1 %v14030_v7, %s14363_s6 }
0x1590   : > { %8437 = vrot.lane.b32.xlu0 %v14026_v38, %s14363_s6  ;;  %v8251_v38 = vsel %vm3279_vm11, %v8246_v48, 0  ;;  %s14455_s6 = smov 32  }
0x15c2   : > { %v8109_v53 = vpop.xlane.xlu1 %8108 }
0x15c6   : > { %v8106_v52 = vpop.xlane.xlu0 %8105 }
0x15c7   : > { %v8103_v34 = vpop.xlane.xlu1 %8102  ;;  %10859 = vrcp.f32 %v8106_v52 }
0x15c8   : > { %10861 = vrcp.f32 %v8103_v34 }
0x15c9   : > { %10863 = vrcp.f32 %v8109_v53 }
0x15ce   : > { %v8112_v63 = vpop.xlane.xlu0 %8111 }
0x15cf   : > { %10865 = vrcp.f32 %v8112_v63 }
0x15d1   : > { %v10860_v40 = vpop.eup %10859 }
0x15d2   : > { %v10862_v6 = vpop.eup %10861  ;;  %v8134_v42 = vmul.f32 %v10860_v40, %v10846_v12  ;;  %v8390_v12 = vpop.permute.xlu1 %8389 }
0x15d3   : > { %v8133_v57 = vmul.f32 %v10862_v6, %v10848_v11  ;;  %v10864_v7 = vpop.eup %10863  ;;  %v8342_v11 = vpop.permute.xlu0 %8341  ;;  %v8395_v41 = vsel %vm3279_vm11, %v8390_v12, 0 }
0x15d4   : > { %v8142_v54 = vpack.c.bf16 %v8134_v42, %v8134_v42  ;;  %v8135_v5 = vmul.f32 %v10864_v7, %v14100_v24  ;;  %v8347_v39 = vsel %vm3279_vm11, %v8342_v11, 0 }
0x15d5   : > { %v8141_v32 = vpack.c.bf16 %v8133_v57, %v8133_v57 }
0x15d6   : > { %10290 = vmatmul.mubr.msk.bf16.vlgmr.msra.gmra.mrb[240].mxu0 %vm2891_vm10, %v8142_v54  ;;  %v8143_v17 = vpack.c.bf16 %v8135_v5, %v8135_v5 }
0x15d7   : > { %10284 = vmatmul.mubr.msk.bf16.vlgmr.msra.gmra.mrb[240].mxu1 %vm2891_vm10, %v8141_v32  ;;  %10300 = vmatpush3.bf16.msra.mxu0 %v8299_v22 }
0x15d8   : > { %10294 = vmatpush3.bf16.msra.mxu1 %v8251_v38  ;;  %10295 = vmatprep.mubr.msk.bf16.mxu1 %vm11341_vm8, %v14429_v44 }
0x15d9   : > { %v10866_v55 = vpop.eup %10865  ;;  %10301 = vmatprep.mubr.msk.bf16.mxu0 %vm11341_vm8, %v14429_v44  ;;  %10305 = vmatprep.subr.bf16.mxu1 %v14429_v44 }
0x15da   : > { %v8136_v1 = vmul.f32 %v10866_v55, %v14106_v35  ;;  %10311 = vmatprep.subr.bf16.mxu0 %v14429_v44 }
0x15dc   : > { %v8144_v26 = vpack.c.bf16 %v8136_v1, %v8136_v1 }
0x15de   : > { %10302 = vmatmul.mubr.msk.bf16.vlgmr.msra.gmra.mrb[244].mxu0 %vm2891_vm10, %v8144_v26 }
0x15df   : > { %10296 = vmatmul.mubr.msk.bf16.vlgmr.msra.gmra.mrb[244].mxu1 %vm2891_vm10, %v8143_v17  ;;  %10312 = vmatpush3.bf16.msra.mxu0 %v8395_v41 }
0x15e0   : > { %10306 = vmatpush3.bf16.msra.mxu1 %v8347_v39  ;;  %10307 = vmatprep.mubr.msk.bf16.mxu1 %vm11341_vm8, %v14429_v44 }
0x15e1   : > { %10317 = vmatprep.subr.bf16.mxu1 %v14429_v44  ;;  %10313 = vmatprep.mubr.msk.bf16.mxu0 %vm11341_vm8, %v14429_v44 }
0x15e2   : > { %10323 = vmatprep.subr.bf16.mxu0 %v14429_v44 }
0x15fc   : > { %v8115_v24 = vpop.xlane.xlu1 %8114 }
0x15fd   : > { %10867 = vrcp.f32 %v8115_v24 }
0x1601   : > { %v8121_v35 = vpop.xlane.xlu1 %8120 }
0x1602   : > { %10869 = vrcp.f32 %v8121_v35 }
0x1603   : > { %v8118_v33 = vpop.xlane.xlu0 %8117 }
0x1604   : > { %10871 = vrcp.f32 %v8118_v33 }
0x1605   : > { %v8486_v31 = vpop.permute.xlu1 %8485 }
0x1606   : > { %v8491_v50 = vsel %vm3279_vm11, %v8486_v31, 0 }
0x1607   : > { %v10868_v43 = vpop.eup %10867  ;;  %v8124_v15 = vpop.xlane.xlu0 %8123 }
0x1608   : > { %v8137_v37 = vmul.f32 %v10868_v43, %v14115_v30  ;;  %10873 = vrcp.f32 %v8124_v15 }
0x160a   : > { %v8145_v4 = vpack.c.bf16 %v8137_v37, %v8137_v37 }
0x160b   : > { %v8438_v2 = vpop.permute.xlu0 %8437 }
0x160c   : > { %v10870_v8 = vpop.eup %10869  ;;  %10308 = vmatmul.mubr.msk.bf16.vlgmr.msra.gmra.mrb[248].mxu1 %vm2891_vm10, %v8145_v4  ;;  %v8443_v10 = vsel %vm3279_vm11, %v8438_v2, 0 }
0x160d   : > { %10318 = vmatpush3.bf16.msra.mxu1 %v8443_v10  ;;  %10319 = vmatprep.mubr.msk.bf16.mxu1 %vm11341_vm8, %v14429_v44  ;;  %v8139_v36 = vmul.f32 %v10870_v8, %v14122_v51  ;;  %v9267_v10 = vld [vmem:[%s14452_s21] ss:$0 sm:$0xff]  ;;  %s14460_s21 = sld [smem:[#allocation63_spill]] }
0x160e   : > { %v10872_v56 = vpop.eup %10871 }
0x160f   : > { %v8138_v20 = vmul.f32 %v10872_v56, %v14120_v28  ;;  %v8147_v27 = vpack.c.bf16 %v8139_v36, %v8139_v36  ;;  %v10618_v28 = vld [vmem:[%s14451_s7] sm:$0xff]  }
0x1610   : > { %10329 = vmatprep.subr.bf16.mxu1 %v10618_v28 }
0x1611   : > { %v8146_v25 = vpack.c.bf16 %v8138_v20, %v8138_v20 }
0x1612   : > { %v10874_v30 = vpop.eup %10873 }
0x1613   : > { %10314 = vmatmul.mubr.msk.bf16.vlgmr.msra.gmra.mrb[248].mxu0 %vm2891_vm10, %v8146_v25  ;;  %v8140_v62 = vmul.f32 %v10874_v30, %v14128_v9 }
0x1614   : > { %10320 = vmatmul.mubr.msk.bf16.vlgmr.msra.gmra.mrb[252].mxu1 %vm2891_vm10, %v8147_v27  ;;  %10324 = vmatpush3.bf16.msra.mxu0 %v8491_v50 }
0x1615   : > { %10325 = vmatprep.mubr.msk.bf16.mxu0 %vm11341_vm8, %v14429_v44  ;;  %v8148_v0 = vpack.c.bf16 %v8140_v62, %v8140_v62  ;;  %10330 = vmatpush3.bf16.msra.mxu1 %v10618_v28 }
0x161b   : > { %10326 = vmatmul.mubr.msk.bf16.vlgmr.msra.gmra.mrb[252].mxu0 %vm2891_vm10, %v8148_v0 }
0x16a9   : > { %v8239_v51 = vpop.f32.mrb[240].mxu0 }
0x16aa   : > { %v8191_v48 = vpop.f32.mrb[240].mxu1  ;;  %v10291_v16 = vpop.f32.mrb[241].mxu0 }
0x16ab   : > { %v8533_v53 = vpack.c.bf16 %v8239_v51, %v8191_v48  ;;  %v10285_v52 = vpop.f32.mrb[241].mxu1  ;;  %v8242_v34 = vpop.f32.mrb[242].mxu0 }
0x16ac   : > { %v8194_v63 = vpop.f32.mrb[242].mxu1  ;;  %v10292_v9 = vpop.f32.mrb[243].mxu0 }
0x16ad   : > { %v10286_v40 = vpop.f32.mrb[243].mxu1  ;;  %10331 = vmatprep.mubr.msk.bf16.mxu1 %vm1308_vm9, %v8533_v53 }
0x16b1   : > { %v8335_v44 = vpop.f32.mrb[244].mxu0 }
0x16b2   : > { %v8287_v6 = vpop.f32.mrb[244].mxu1  ;;  %v10303_v42 = vpop.f32.mrb[245].mxu0 }
0x16b3   : > { %v8534_v57 = vpack.c.bf16 %v8335_v44, %v8287_v6  ;;  %v10297_v54 = vpop.f32.mrb[245].mxu1  ;;  %v8338_v32 = vpop.f32.mrb[246].mxu0 }
0x16b4   : > { %v8290_v7 = vpop.f32.mrb[246].mxu1  ;;  %v10304_v22 = vpop.f32.mrb[247].mxu0 }
0x16b5   : > { %v10298_v38 = vpop.f32.mrb[247].mxu1  ;;  %10332 = vmatmul.mubr.msk.bf16.vlgmr.msra.gmra.mrb[0].mxu1 %vm1308_vm9, %v8534_v57 }
0x16df   : > { %v8383_v55 = vpop.f32.mrb[248].mxu1 }
0x16e0   : > { %v10309_v5 = vpop.f32.mrb[249].mxu1 }
0x16e1   : > { %v8386_v1 = vpop.f32.mrb[250].mxu1 }
0x16e2   : > { %v10310_v12 = vpop.f32.mrb[251].mxu1 }
0x16e6   : > { %v8431_v11 = vpop.f32.mrb[248].mxu0 }
0x16e7   : > { %v8535_v26 = vpack.c.bf16 %v8431_v11, %v8383_v55  ;;  %v8479_v17 = vpop.f32.mrb[252].mxu1  ;;  %v10315_v41 = vpop.f32.mrb[249].mxu0 }
0x16e8   : > { %v10321_v39 = vpop.f32.mrb[253].mxu1  ;;  %v8434_v24 = vpop.f32.mrb[250].mxu0 }
0x16e9   : > { %v8482_v35 = vpop.f32.mrb[254].mxu1  ;;  %v10316_v33 = vpop.f32.mrb[251].mxu0  ;;  %10335 = vmatprep.mubr.msk.bf16.mxu1 %vm1308_vm9, %v8535_v26 }
0x16ea   : > { %v10322_v43 = vpop.f32.mrb[255].mxu1 }
0x16ee   : > { %v8527_v15 = vpop.f32.mrb[252].mxu0 }
0x16ef   : > { %v8536_v37 = vpack.c.bf16 %v8527_v15, %v8479_v17  ;;  %v10327_v4 = vpop.f32.mrb[253].mxu0 }
0x16f0   : > { %v8530_v2 = vpop.f32.mrb[254].mxu0 }
0x16f1   : > { %v10328_v8 = vpop.f32.mrb[255].mxu0  ;;  %10336 = vmatmul.mubr.msk.bf16.gmra.mrb[4].mxu1 %vm1308_vm9, %v8536_v37 }
0x1788   : > { %v10333_v56 = vpop.f32.mrb[0].mxu1 }
0x1789   : > { %v8607_v36 = vadd.f32 %v10333_v56, %v9267_v10  ;;  %v8598_v20 = vpop.f32.mrb[1].mxu1 }
0x178a   : > { %v8599_v31 = vadd.f32 %v9267_v10, %v8598_v20  ;;  %v10334_v25 = vpop.f32.mrb[2].mxu1 }
0x178b   : > { %v8631_v30 = vadd.f32 %v8607_v36, %v7543_v47  ;;  %v8610_v27 = vadd.f32 %v10334_v25, %v9267_v10  ;;  %v8601_v50 = vpop.f32.mrb[3].mxu1 }
0x178c   : > { %v8602_v62 = vadd.f32 %v9267_v10, %v8601_v50  ;;  %v8629_v29 = vadd.f32 %v8599_v31, %v7541_v13 }
0x178d   : > { %v8632_v0 = vadd.f32 %v8610_v27, %v7544_v61  ;;  %v8643_v28 = vsel %vm1308_vm9, %v8631_v30, 0.0 }
0x178e   : > { %8644 = vadd.xlane.f32.xlu1 %v8643_v28  ;;  %v8630_v51 = vadd.f32 %v8602_v62, %v7542_v45  ;;  %v8637_v19 = vsel %vm1308_vm9, %v8629_v29, 0.0 }
0x178f   : > { %v8646_v48 = vsel %vm1308_vm9, %v8632_v0, 0.0 }
0x1790   : > { %8647 = vadd.xlane.f32.xlu0 %v8646_v48  ;;  %v8640_v16 = vsel %vm1308_vm9, %v8630_v51, 0.0 }
0x1794   : > { %8641 = vadd.xlane.f32.xlu0 %v8640_v16 }
0x17c4   : > { %v10337_v60 = vpop.f32.mrb[4].mxu1 }
0x17c5   : > { %v8623_v47 = vadd.f32 %v10337_v60, %v9267_v10  ;;  %v8614_v53 = vpop.f32.mrb[5].mxu1 }
0x17c6   : > { %v8615_v52 = vadd.f32 %v9267_v10, %v8614_v53  ;;  %v10338_v34 = vpop.f32.mrb[6].mxu1 }
0x17c7   : > { %v8626_v63 = vadd.f32 %v10338_v34, %v9267_v10  ;;  %v8617_v49 = vpop.f32.mrb[7].mxu1  ;;  %v8635_v18 = vadd.f32 %v8623_v47, %v7547_v23  ;;  %v9273_v34 = vld [vmem:[%s14453_s19] ss:$0 sm:$0xff] }
0x17c8   : > { %v8633_v61 = vadd.f32 %v8615_v52, %v7545_v59  ;;  %v8618_v9 = vadd.f32 %v9267_v10, %v8617_v49 }
0x17c9   : > { %v8636_v44 = vadd.f32 %v8626_v63, %v7548_v3  ;;  %v8655_v59 = vsel %vm1308_vm9, %v8635_v18, 0.0 }
0x17ca   : > { %v8634_v45 = vadd.f32 %v8618_v9, %v7546_v14  ;;  %v8649_v40 = vsel %vm1308_vm9, %v8633_v61, 0.0 }
0x17cb   : > { %8650 = vadd.xlane.f32.xlu0 %v8649_v40  ;;  %v8658_v58 = vsel %vm1308_vm9, %v8636_v44, 0.0 }
0x17cc   : > { %v8652_v6 = vsel %vm1308_vm9, %v8634_v45, 0.0 }
0x17cd   : > { %8653 = vadd.xlane.f32.xlu1 %v8652_v6 }
0x17cf   : > { %8656 = vadd.xlane.f32.xlu0 %v8655_v59 }
0x17d1   : > { %8659 = vadd.xlane.f32.xlu1 %v8658_v58 }
0x17d3   : > { %8638 = vadd.xlane.f32.xlu0 %v8637_v19 }
0x181b   : > { %v8645_v14 = vpop.xlane.xlu1 %8644 }
0x181c   : > { %v8664_v23 = vmul.f32 0.0625, %v8645_v14 }
0x181d   : > { %v8648_v42 = vpop.xlane.xlu0 %8647 }
0x181e   : > { %v8672_v46 = vsub.f32 %v8631_v30, %v8664_v23  ;;  %v8665_v3 = vmul.f32 0.0625, %v8648_v42 }
0x1820   : > { %v8673_v57 = vsub.f32 %v8632_v0, %v8665_v3  ;;  %v8680_v54 = vmul.f32 %v8672_v46, %v8672_v46 }
0x1821   : > { %v8642_v32 = vpop.xlane.xlu0 %8641 }
0x1822   : > { %v8663_v7 = vmul.f32 0.0625, %v8642_v32  ;;  %v8692_v21 = vsel %vm1308_vm9, %v8680_v54, 0.0  ;;  %v8681_v13 = vmul.f32 %v8673_v57, %v8673_v57 }
0x1823   : > { %8693 = vadd.xlane.f32.xlu0 %v8692_v21 }
0x1824   : > { %v8671_v22 = vsub.f32 %v8630_v51, %v8663_v7  ;;  %v8695_v38 = vsel %vm1308_vm9, %v8681_v13, 0.0 }
0x1825   : > { %8696 = vadd.xlane.f32.xlu1 %v8695_v38 }
0x1826   : > { %v8679_v55 = vmul.f32 %v8671_v22, %v8671_v22 }
0x1828   : > { %v8689_v5 = vsel %vm1308_vm9, %v8679_v55, 0.0 }
0x1829   : > { %8690 = vadd.xlane.f32.xlu1 %v8689_v5 }
0x1858   : > { %v8651_v1 = vpop.xlane.xlu0 %8650 }
0x1859   : > { %v8666_v12 = vmul.f32 0.0625, %v8651_v1 }
0x185a   : > { %v8654_v11 = vpop.xlane.xlu1 %8653 }
0x185b   : > { %v14209_v26 = vsub.f32 %v8633_v61, %v8666_v12  ;;  %v8667_v17 = vmul.f32 0.0625, %v8654_v11  ;;  %v9274_v61 = vld [vmem:[%s14454_s1] ss:$0 sm:$0xff]  ;;  %s14457_s1 = smov 80  }
0x185c   : > { %v8657_v41 = vpop.xlane.xlu0 %8656 }
0x185d   : > { %v14211_v39 = vsub.f32 %v8634_v45, %v8667_v17  ;;  %v8668_v24 = vmul.f32 0.0625, %v8657_v41  ;;  %v8682_v35 = vmul.f32 %v14209_v26, %v14209_v26 }
0x185e   : > { %v8660_v33 = vpop.xlane.xlu1 %8659 }
0x185f   : > { %v14215_v43 = vsub.f32 %v8635_v18, %v8668_v24  ;;  %v8669_v15 = vmul.f32 0.0625, %v8660_v33  ;;  %v8698_v37 = vsel %vm1308_vm9, %v8682_v35, 0.0  ;;  %v8683_v4 = vmul.f32 %v14211_v39, %v14211_v39 }
0x1860   : > { %8699 = vadd.xlane.f32.xlu0 %v8698_v37  ;;  %v8639_v2 = vpop.xlane.xlu0 %8638 }
0x1861   : > { %v14220_v8 = vsub.f32 %v8636_v44, %v8669_v15  ;;  %v8662_v10 = vmul.f32 0.0625, %v8639_v2  ;;  %v8701_v56 = vsel %vm1308_vm9, %v8683_v4, 0.0  ;;  %v8684_v36 = vmul.f32 %v14215_v43, %v14215_v43 }
0x1862   : > { %8702 = vadd.xlane.f32.xlu1 %v8701_v56 }
0x1863   : > { %v14225_v20 = vsub.f32 %v8629_v29, %v8662_v10  ;;  %v8704_v31 = vsel %vm1308_vm9, %v8684_v36, 0.0  ;;  %v8685_v25 = vmul.f32 %v14220_v8, %v14220_v8 }
0x1864   : > { %8705 = vadd.xlane.f32.xlu0 %v8704_v31 }
0x1865   : > { %v8707_v30 = vsel %vm1308_vm9, %v8685_v25, 0.0  ;;  %v8678_v27 = vmul.f32 %v14225_v20, %v14225_v20 }
0x1866   : > { %8708 = vadd.xlane.f32.xlu1 %v8707_v30 }
0x1867   : > { %v8686_v50 = vsel %vm1308_vm9, %v8678_v27, 0.0 }
0x1868   : > { %8687 = vadd.xlane.f32.xlu0 %v8686_v50 }
0x18b0   : > { %v8694_v62 = vpop.xlane.xlu0 %8693 }
0x18b1   : > { %v8712_v0 = vmul.f32 0.0625, %v8694_v62 }
0x18b2   : > { %v8697_v28 = vpop.xlane.xlu1 %8696 }
0x18b3   : > { %v8720_v51 = vadd.f32 1e-05, %v8712_v0  ;;  %v8713_v48 = vmul.f32 0.0625, %v8697_v28 }
0x18b5   : > { %10875 = vrsqrt.f32 %v8720_v51  ;;  %v8721_v16 = vadd.f32 1e-05, %v8713_v48 }
0x18b6   : > { %v8691_v60 = vpop.xlane.xlu1 %8690 }
0x18b7   : > { %10877 = vrsqrt.f32 %v8721_v16  ;;  %v8711_v47 = vmul.f32 0.0625, %v8691_v60 }
0x18b9   : > { %v8719_v53 = vadd.f32 1e-05, %v8711_v47 }
0x18bb   : > { %10879 = vrsqrt.f32 %v8719_v53 }
0x18bf   : > { %v10876_v52 = vpop.eup %10875 }
0x18c0   : > { %v8736_v63 = vmul.f32 %v10876_v52, %v8672_v46 }
0x18c1   : > { %v10878_v49 = vpop.eup %10877 }
0x18c2   : > { %v8751_v9 = vmul.f32 %v9273_v34, %v8736_v63  ;;  %v8737_v18 = vmul.f32 %v10878_v49, %v8673_v57 }
0x18c4   : > { %v8766_v45 = vadd.f32 %v9274_v61, %v8751_v9  ;;  %v8752_v40 = vmul.f32 %v9273_v34, %v8737_v18 }
0x18c5   : > { %v10880_v44 = vpop.eup %10879 }
0x18c6   : > { %8777 = vrot.lane.b32.xlu0 %v8766_v45, %s14455_s6  ;;  %v8767_v6 = vadd.f32 %v9274_v61, %v8752_v40  ;;  %v8735_v29 = vmul.f32 %v10880_v44, %v8671_v22  ;;  %s14458_s6 = smov 96  }
0x18c8   : > { %8781 = vrot.lane.b32.xlu1 %v8767_v6, %s14456_s3  ;;  %v8750_v59 = vmul.f32 %v9273_v34, %v8735_v29  ;;  %s14459_s3 = smov 112  }
0x18ca   : > { %v8765_v58 = vadd.f32 %v9274_v61, %v8750_v59 }
0x18cc   : > { %8773 = vrot.lane.b32.xlu1 %v8765_v58, %s14447_s27  ;;  %s9276_s27 = sshll.u32 %s11490_s26, 7 }
0x18ed   : > { %v8700_v19 = vpop.xlane.xlu0 %8699 }
0x18ee   : > { %v8714_v14 = vmul.f32 0.0625, %v8700_v19 }
0x18ef   : > { %v8703_v23 = vpop.xlane.xlu1 %8702 }
0x18f0   : > { %v8722_v42 = vadd.f32 1e-05, %v8714_v14  ;;  %v8715_v46 = vmul.f32 0.0625, %v8703_v23 }
0x18f1   : > { %v8706_v3 = vpop.xlane.xlu0 %8705 }
0x18f2   : > { %10881 = vrsqrt.f32 %v8722_v42  ;;  %v8723_v57 = vadd.f32 1e-05, %v8715_v46  ;;  %v8716_v54 = vmul.f32 0.0625, %v8706_v3 }
0x18f3   : > { %v8709_v32 = vpop.xlane.xlu1 %8708 }
0x18f4   : > { %10883 = vrsqrt.f32 %v8723_v57  ;;  %v8724_v7 = vadd.f32 1e-05, %v8716_v54  ;;  %v8717_v21 = vmul.f32 0.0625, %v8709_v32 }
0x18f5   : > { %v8688_v4 = vpop.xlane.xlu0 %8687 }
0x18f6   : > { %10885 = vrsqrt.f32 %v8724_v7  ;;  %v8725_v13 = vadd.f32 1e-05, %v8717_v21  ;;  %v8710_v2 = vmul.f32 0.0625, %v8688_v4 }
0x18f8   : > { %10887 = vrsqrt.f32 %v8725_v13 }
0x18fc   : > { %v10882_v22 = vpop.eup %10881 }
0x18fd   : > { %v8738_v38 = vmul.f32 %v10882_v22, %v14209_v26 }
0x18fe   : > { %v10884_v55 = vpop.eup %10883 }
0x18ff   : > { %v8753_v5 = vmul.f32 %v9273_v34, %v8738_v38  ;;  %v8739_v1 = vmul.f32 %v10884_v55, %v14211_v39 }
0x1900   : > { %v10886_v12 = vpop.eup %10885 }
0x1901   : > { %v8768_v11 = vadd.f32 %v9274_v61, %v8753_v5  ;;  %v8754_v17 = vmul.f32 %v9273_v34, %v8739_v1  ;;  %v8740_v41 = vmul.f32 %v10886_v12, %v14215_v43  ;;  %v8718_v43 = vadd.f32 1e-05, %v8710_v2 }
0x1902   : > { %v10888_v24 = vpop.eup %10887 }
0x1903   : > { %8785 = vrot.lane.b32.xlu1 %v8768_v11, %s14446_s20  ;;  %v8769_v35 = vadd.f32 %v9274_v61, %v8754_v17  ;;  %v8755_v33 = vmul.f32 %v9273_v34, %v8740_v41  ;;  %v8741_v15 = vmul.f32 %v10888_v24, %v14220_v8  ;;  %10889 = vrsqrt.f32 %v8718_v43  ;;  %s9029_s20 = sshll.u32 %s11829_s0, 3 }
0x1904   : > { %s867_s2 = scalar_lea.vmem [#allocation22], %s9029_s20 }
0x1905   : > { %8789 = vrot.lane.b32.xlu0 %v8769_v35, %s14457_s1  ;;  %v8770_v37 = vadd.f32 %v9274_v61, %v8755_v33  ;;  %v8756_v26 = vmul.f32 %v9273_v34, %v8741_v15  ;;  %s8825_s7 = sshll.u32 %s867_s2, 4  ;;  %s14261_s1 = scalar_lea.hbm %s14460_s21, %s9276_s27  ;;  %s14263_s7 = int_to_ptr.vmem [resolvable:$true] %s8825_s7 }
0x1906   : > { %s11229_s26 = scalar_lea.vmem %s14263_s7, 128 }
0x1907   : > { %8793 = vrot.lane.b32.xlu1 %v8770_v37, %s14458_s6  ;;  %v8771_v39 = vadd.f32 %v9274_v61, %v8756_v26  ;;  %s8812_s6 = scalar_lea.sflag [#allocation4], %s11829_s0  ;;  %p11230_p2 = scmp.ne.s32.totalorder %s14263_s7, %s11229_s26 }
0x1909   : > { %8797 = vrot.lane.b32.xlu0 %v8771_v39, %s14459_s3  ;;  %p11231_p6 = pnand %p11230_p2, %p14461_p8  ;;  %s11348_s3 = smov [#allocation22]  }
0x190a   : > { %s11233_s20 = sshll.u32 %s11348_s3, 4  ;;  %s11234_s20 = int_to_ptr.vmem [resolvable:$false] %s11233_s20 }
0x190b   : > { %p11232_p4 = pneg %p11231_p6  ;;  %s11235_s5 = scalar_lea.vmem %s11234_s20, 256 }
0x190c   : > { %p11236_p11 = scmp.lt.s32.totalorder %s14263_s7, %s11234_s20  ;;  %p11237_p0 = scmp.lt.s32.totalorder %s11235_s5, %s11229_s26 }
0x190d   : > { %v10890_v10 = vpop.eup %10889 }
0x190e   : > { %v8734_v56 = vmul.f32 %v10890_v10, %v14225_v20  ;;  %p11238_p5 = por %p11237_p0, %p11236_p11 }
0x1910   : > { %v8749_v8 = vmul.f32 %v9273_v34, %v8734_v56  ;;  %p11239_p9 = pnand %p11238_p5, %p11232_p4 }
0x1912   : > { %v8764_v25 = vadd.f32 %v9274_v61, %v8749_v8 }
0x1938   : > { %v8778_v27 = vpop.permute.xlu0 %8777 }
0x193a   : > { %v8782_v36 = vpop.permute.xlu1 %8781 }
0x193e   : > { %v8774_v31 = vpop.permute.xlu1 %8773 }
0x193f   : > { %v8800_v30 = vsel %vm1308_vm9, %v8764_v25, %v8774_v31 }
0x1940   : > { %v8801_v50 = vsel %vm4853_vm12, %v8800_v30, %v8778_v27 }
0x1941   : > { %v8802_v0 = vsel %vm4862_vm13, %v8801_v50, %v8782_v36 }
0x1975   : > { %v8786_v62 = vpop.permute.xlu1 %8785 }
0x1976   : > { %v8803_v28 = vsel %vm1076_vm7, %v8802_v0, %v8786_v62 }
0x1977   : > { %v8790_v51 = vpop.permute.xlu0 %8789 }
0x1978   : > { %v8805_v20 = vsel %vm8804_vm14, %v8803_v28, %v8790_v51 }
0x1979   : > { %v8794_v48 = vpop.permute.xlu1 %8793 }
0x197a   : > { %v8807_v16 = vsel %vm8806_vm15, %v8805_v20, %v8794_v48 }
0x197b   : > { %v8798_v60 = vpop.permute.xlu0 %8797 }
0x197c   : > { %v8809_v47 = vsel %vm8808_vm0, %v8807_v16, %v8798_v60 }
0x197d   : > { %8810 = vst [vmem:[%s867_s2] sm:$0xff] %v8809_v47 }
0x197e   : > { %11242 = shalt.err (!%p11239_p9)
}
0x197f   : > { %s11243_s0 = scalar_lea.hbm %s14261_s1, 128  ;;  %s11247_s19 = scalar_lea.hbm %s14460_s21, 256 }
0x1980   : > { %p11244_p7 = scmp.ne.s32.totalorder %s14261_s1, %s11243_s0  ;;  %p11248_p13 = scmp.lt.u32.totalorder %s14261_s1, %s14460_s21 }
0x1981   : > { %p11249_p1 = scmp.lt.u32.totalorder %s11247_s19, %s11243_s0  ;;  %p11251_p2 = scmp.lt.u32.totalorder %s11243_s0, %s14261_s1 }
0x1982   : > { %p11245_p10 = pnand %p11244_p7, %p14461_p8 }
0x1983   : > { %p11250_p3 = por %p11249_p1, %p11248_p13 }
0x1984   : > { %p11246_p12 = pneg %p11245_p10 }
0x1985   : > { %p11252_p6 = por %p11251_p2, %p11250_p3 }
0x1987   : > { %p11253_p4 = pnand %p11252_p6, %p11246_p12 }
0x1989   : > { %11256 = shalt.err (!%p11253_p4)
}
0x198a   : > { %10385 = dma.vmem_to_hbm [thread:$0]  (%p14461_p8), %s14263_s7, 128, %s14261_s1, %s8812_s6  }
0x198b PF: > { %s8837_s5 = sand.u32 1, %s11307_s4   ;;  %p14462_p11 = scmp.ne.s32.totalorder %s14397_s28, 0 }
0x198c   : > { %p14463_p0 = scmp.ge.s32.totalorder %s11319_s25, 2  ;;  %s8838_s26 = scalar_lea.sflag [#allocation4], %s8837_s5 }
0x198e   : > { %p10426_p5 = pnand %p14463_p0, %p14462_p11 }
0x1990   : > { %11302 = dma.done.wait (!%p10426_p5), %s8838_s26, 128  }
0x1991   : > { %11304 = vsyncadd (!%p10426_p5), %s8838_s26, 4294967168  ;;  %p42_p9 = scmp.ge.s32.totalorder %s11756_s29, 4   ;;  %s14464_s4 = smov %s11311_s30 }
0x1992   : > { %s14465_s30 = smov %s11315_s24  ;;  %s14466_s24 = smov %s11768_s10 }
0x1993   : > { %s14467_s25 = smov %s11756_s29  ;;  %44 = sbr.rel (!%p42_p9) target bundleno = 30 (0x1e), region = 201 }
0x199a   :  { %8843 = vsyncpa [#allocation3], 1 }
0x199b   :  { %8845 = vsyncpa [#allocation3 + $0x1], 1 }
0x199c   :  { %8846 = vsyncpa [#allocation6], 1 }
0x199d   :  { %8847 = vsyncpa [#allocation9], 1 }
0x199e   :  { %8848 = vsyncpa [#allocation12], 1 }
0x199f   :  { %8849 = vsyncpa [#allocation15], 1 }
0x19a0   :  { %8850 = vsyncpa [#allocation18], 1 }
0x19a1   :  { %8851 = vsyncpa [#allocation21], 1 }
0x19a2   :  { %8852 = vsyncpa [#allocation4], 1 }
0x19a3   :  { %8854 = vsyncpa [#allocation4 + $0x1], 1 }

</bundles_post_ra>
